<compile_context>
chip_gen: v5e
topology: v5e:2x2
jax: 0.10.0
libtpu: 0.0.40
codegen_flags: <defaults>
</compile_context>

<pallas_src>
import functools

import jax
import jax.numpy as jnp
import numpy as np
from jax.experimental import pallas as pl
from jax.experimental.pallas import tpu as pltpu

_BN_INV = float(1.0 / np.sqrt(1.0 + 1e-5))  # BatchNorm1d eval affine scale (mean=0, var=1)


def gated_gcn_lspe_kernel(hp_ref, e_ref, wblk_ref, we_ref, bn_ref,
                          h_out_ref, p_out_ref, e_out_ref):
    f32 = jnp.float32
    G, N, _, D = e_out_ref.shape
    GN = G * N
    GE = G * N * N

    # ---- ONE fused node matmul: columns [A2(v) | C2 | B1 | B2 | A1 | C1], bias folded ----
    hp = hp_ref[...]                                                   # (GN, 2D+1) bf16
    proj = jnp.dot(hp, wblk_ref[...], preferred_element_type=f32)      # (GN, 6D) f32
    v_src = proj[:, 0 * D:1 * D]     # A2(cat(h,p))  (source-side message value)
    p_src = proj[:, 1 * D:2 * D]     # C2(p)         (source-side positional value)
    B1_h = proj[:, 2 * D:3 * D]
    B2_h = proj[:, 3 * D:4 * D]
    A1_h = proj[:, 4 * D:5 * D]
    C1_p = proj[:, 5 * D:6 * D]

    # ---- ONE fused edge matmul: out cols [B3(e)+bias | adj broadcast to D lanes] ----
    e_aug = e_ref[...]                                                 # (G,N,N,D+2) bf16
    eproj = jnp.dot(e_aug.reshape(GE, D + 2), we_ref[...],
                    preferred_element_type=f32).reshape(G, N, N, 2 * D)
    b3 = eproj[..., :D]
    mask = eproj[..., D:]                                              # exact 0/1 adjacency

    # ---- gate logits via structured broadcasts (no selector matmuls) ----
    # view is (G, dst=i, src=j, D): src terms broadcast over dim 1, dst over dim 2
    b1_b = jnp.broadcast_to(B1_h.reshape(G, 1, N, D), (G, N, N, D))
    b2_b = jnp.broadcast_to(B2_h.reshape(G, N, 1, D), (G, N, N, D))
    hat_eta = b3 + b1_b + b2_b                                         # (G,N,N,D)

    # ---- dense edge output first (BN eval = affine), so hat_eta-only temps die early ----
    ge = bn_ref[2:3, :]
    be = bn_ref[3:4, :]
    e_in = e_aug[..., :D].astype(f32)
    e_act = jnp.maximum(ge * (hat_eta * _BN_INV) + be, 0.0)
    e_out_ref[...] = ((e_in + e_act) * mask).astype(e_out_ref.dtype)

    # ---- masked sigmoid (exp + EUP approx reciprocal); eta is never materialized ----
    sigma_m = mask * pl.reciprocal(1.0 + jnp.exp(-hat_eta), approx=True)
    v_b = jnp.broadcast_to(v_src.reshape(G, 1, N, D), (G, N, N, D))
    p_b = jnp.broadcast_to(p_src.reshape(G, 1, N, D), (G, N, N, D))

    # one fused 96-lane sublane reduce instead of three 32-lane ones
    stacked = jnp.concatenate([sigma_m, sigma_m * v_b, sigma_m * p_b], axis=-1)
    sums = jnp.sum(stacked, axis=2).reshape(GN, 3 * D)                 # (GN, 3D)
    inv_den = 1.0 / (sums[:, :D] + 1e-6)                               # node-sized, exact

    h_new = A1_h + sums[:, D:2 * D] * inv_den
    p_new = C1_p + sums[:, 2 * D:] * inv_den

    gh = bn_ref[0:1, :]
    bh = bn_ref[1:2, :]
    h_in = hp[:, :D].astype(f32)
    p_in = hp[:, D:2 * D].astype(f32)
    h_out_ref[...] = (h_in + jnp.maximum(gh * (h_new * _BN_INV) + bh, 0.0)
                      ).astype(h_out_ref.dtype)
    p_out_ref[...] = (p_in + jnp.tanh(p_new)).astype(p_out_ref.dtype)


def gated_gcn_lspe(adj, h, p, e, params, graphs_per_step=2):
    """adj: (B,N,N) 0/1; h, p: (B,N,D); e: (B,N,N,D).  Returns (h', p', e')."""
    B, N, D = h.shape
    G = max(1, min(graphs_per_step, B))
    while B % G:                       # G must divide B
        G -= 1
    steps = B // G                     # keep grid >= 2 when possible (v7x: 2 TCs)

    bf16 = jnp.bfloat16
    f32 = jnp.float32

    # XLA-side layout plumbing (free / fused into the surrounding graph).
    hp = jnp.concatenate([h, p, jnp.ones((B, N, 1), f32)], axis=-1
                         ).reshape(B * N, 2 * D + 1).astype(bf16)       # [h | p | 1]
    e_aug = jnp.concatenate([e, adj[..., None], jnp.ones((B, N, N, 1), f32)],
                            axis=-1).astype(bf16)                       # [e | adj | 1]

    zD = jnp.zeros((D, D), f32)

    def col(w_h, w_p, b):              # one output-column group: rows [h ; p ; bias]
        return jnp.concatenate([w_h, w_p, b], axis=0)                   # (2D+1, D)

    # Node block weight, column order [A2 | C2 | B1 | B2 | A1 | C1] so every consumer
    # reads one contiguous lane slice of proj.
    wblk = jnp.concatenate([
        col(params["wa2"][:D], params["wa2"][D:], params["ba2"]),
        col(zD, params["wc2"], params["bc2"]),
        col(params["wb1"], zD, params["bb1"]),
        col(params["wb2"], zD, params["bb2"]),
        col(params["wa1"][:D], params["wa1"][D:], params["ba1"]),
        col(zD, params["wc1"], params["bc1"]),
    ], axis=1).astype(bf16)                                             # (2D+1, 6D)

    # Edge weight: input rows [e ; adj ; 1], output cols [B3(e)+bias | adj mask].
    we = jnp.concatenate([
        jnp.concatenate([params["wb3"], zD], axis=1),                   # e rows
        jnp.concatenate([jnp.zeros((1, D), f32), jnp.ones((1, D), f32)], axis=1),  # adj row
        jnp.concatenate([params["bb3"], jnp.zeros((1, D), f32)], axis=1),          # bias row
    ], axis=0).astype(bf16)                                             # (D+2, 2D)

    bn = jnp.concatenate([params["gh"], params["bh"], params["ge"], params["be"]],
                         axis=0)                                        # (4, D) f32

    def node_block(c):
        return pl.BlockSpec((G * N, c), lambda g: (g, 0))

    def edge_block(c):
        return pl.BlockSpec((G, N, N, c), lambda g: (g, 0, 0, 0))

    def shared(a):
        return pl.BlockSpec(a.shape, lambda g, nd=a.ndim: (0,) * nd)

    E = N * N
    flops = (2 * B * N * (2 * D + 1) * 6 * D          # fused node matmul
             + 2 * B * E * (D + 2) * 2 * D            # fused edge matmul
             + 24 * B * E * D)                        # edge-sized elementwise work
    transc = 2 * B * E * D + B * N * D                # exp + approx recip, tanh
    bytes_acc = (B * N * (2 * D + 1) * 2 + B * E * (D + 2) * 2          # bf16 inputs
                 + wblk.size * 2 + we.size * 2 + bn.size * 4
                 + 2 * B * N * D * 4 + B * E * D * 4)                   # f32 outputs

    h_out, p_out, e_out = pl.pallas_call(
        gated_gcn_lspe_kernel,
        grid=(steps,),
        in_specs=[node_block(2 * D + 1), edge_block(D + 2),
                  shared(wblk), shared(we), shared(bn)],
        out_specs=(node_block(D), node_block(D), edge_block(D)),
        out_shape=(
            jax.ShapeDtypeStruct((B * N, D), h.dtype),
            jax.ShapeDtypeStruct((B * N, D), p.dtype),
            jax.ShapeDtypeStruct((B, N, N, D), e.dtype),
        ),
        compiler_params=pltpu.CompilerParams(
            dimension_semantics=("parallel",),        # steps shard across TCs on v7x
            vmem_limit_bytes=32 * 1024 * 1024),
        cost_estimate=pl.CostEstimate(flops=int(flops), transcendentals=int(transc),
                                      bytes_accessed=int(bytes_acc)),
    )(hp, e_aug, wblk, we, bn)

    return h_out.reshape(B, N, D), p_out.reshape(B, N, D), e_out


def init_params(key, D):
    """Deterministic init mimicking nn.Linear default (uniform +- 1/sqrt(fan_in))."""
    ks = jax.random.split(key, 8)

    def linear(k, fan_in, fan_out):
        kw, kb = jax.random.split(k)
        bound = 1.0 / np.sqrt(fan_in)
        w = jax.random.uniform(kw, (fan_in, fan_out), jnp.float32, -bound, bound)
        b = jax.random.uniform(kb, (1, fan_out), jnp.float32, -bound, bound)
        return w, b

    wa1, ba1 = linear(ks[0], 2 * D, D)
    wa2, ba2 = linear(ks[1], 2 * D, D)
    wb1, bb1 = linear(ks[2], D, D)
    wb2, bb2 = linear(ks[3], D, D)
    wb3, bb3 = linear(ks[4], D, D)
    wc1, bc1 = linear(ks[5], D, D)
    wc2, bc2 = linear(ks[6], D, D)
    ones = jnp.ones((1, D), jnp.float32)
    zeros = jnp.zeros((1, D), jnp.float32)
    return dict(
        wa1=wa1, ba1=ba1, wa2=wa2, ba2=ba2,
        wb1=wb1, bb1=bb1, wb2=wb2, bb2=bb2, wb3=wb3, bb3=bb3,
        wc1=wc1, bc1=bc1, wc2=wc2, bc2=bc2,
        gh=ones, bh=zeros, ge=ones, be=zeros,
    )


def reference(adj, h, p, e, params):
    """Pure-JAX single-graph reference mirroring the PyTorch forward (eval mode)."""
    dot = functools.partial(jnp.dot, preferred_element_type=jnp.float32,
                            precision=jax.lax.Precision.HIGHEST)
    hp = jnp.concatenate([h, p], axis=-1)
    A1_h = dot(hp, params["wa1"]) + params["ba1"]
    v_j = dot(hp, params["wa2"]) + params["ba2"]
    B1_h = dot(h, params["wb1"]) + params["bb1"]
    B2_h = dot(h, params["wb2"]) + params["bb2"]
    C1_p = dot(p, params["wc1"]) + params["bc1"]
    C2_p = dot(p, params["wc2"]) + params["bc2"]
    B3_e = dot(e, params["wb3"]) + params["bb3"]
    hat_eta = B1_h[None, :, :] + B2_h[:, None, :] + B3_e
    sigma = jax.nn.sigmoid(hat_eta)
    adj3 = adj[:, :, None]
    sigma_m = sigma * adj3
    eta = sigma_m / (jnp.sum(sigma_m, axis=1)[:, None, :] + 1e-6)
    h_new = A1_h + jnp.sum(eta * v_j[None, :, :], axis=1)
    p_new = C1_p + jnp.sum(eta * C2_p[None, :, :], axis=1)
    h_act = jnp.maximum(params["gh"] * h_new * _BN_INV + params["bh"], 0.0)
    e_act = jnp.maximum(params["ge"][None] * hat_eta * _BN_INV + params["be"][None], 0.0)
    p_act = jnp.tanh(p_new)
    return h + h_act, p + p_act, (e + e_act) * adj3


if __name__ == "__main__":
    B, N, D = 4, 16, 32  # 4 graphs, 16 nodes each, hidden dim 32 (input_dim == output_dim)
    key = jax.random.PRNGKey(0)
    k_adj, k_h, k_p, k_e, k_par = jax.random.split(key, 5)

    adj = jax.random.bernoulli(k_adj, 0.4, (B, N, N)).astype(jnp.float32)
    h = jax.random.normal(k_h, (B, N, D), jnp.float32)
    p = jax.random.normal(k_p, (B, N, D), jnp.float32)
    e = jax.random.normal(k_e, (B, N, N, D), jnp.float32) * adj[..., None]
    params = init_params(k_par, D)

    h_out, p_out, e_out = jax.block_until_ready(gated_gcn_lspe(adj, h, p, e, params))

    # Tolerance sized for bf16 MXU operands + EUP approximate reciprocal in the sigmoid.
    for b in range(B):
        h_r, p_r, e_r = reference(adj[b], h[b], p[b], e[b], params)
        np.testing.assert_allclose(np.asarray(h_out[b]), np.asarray(h_r), rtol=3e-2, atol=3e-2)
        np.testing.assert_allclose(np.asarray(p_out[b]), np.asarray(p_r), rtol=3e-2, atol=3e-2)
        np.testing.assert_allclose(np.asarray(e_out[b]), np.asarray(e_r), rtol=3e-2, atol=3e-2)

    print("KERNEL_OK")
</pallas_src>

<mosaic_0001>
module attributes {stable_mosaic.version = 11 : i64} {
  func.func @gated_gcn_lspe_kernel(%arg0: i32, %arg1: memref<32x65xbf16, #tpu.memory_space<vmem>>, %arg2: memref<2x16x16x34xbf16, #tpu.memory_space<vmem>>, %arg3: memref<65x192xbf16, #tpu.memory_space<vmem>>, %arg4: memref<34x64xbf16, #tpu.memory_space<vmem>>, %arg5: memref<4x32xf32, #tpu.memory_space<vmem>>, %arg6: memref<32x32xf32, #tpu.memory_space<vmem>>, %arg7: memref<32x32xf32, #tpu.memory_space<vmem>>, %arg8: memref<2x16x16x32xf32, #tpu.memory_space<vmem>>) attributes {dimension_semantics = [#tpu.dimension_semantics<parallel>], iteration_bounds = array<i64: 2>, scalar_prefetch = 0 : i64, scratch_operands = 0 : i64, tpu.core_type = #tpu.core_type<tc>, window_params = [{transform_indices = @transform_0, window_bounds = array<i64: 32, 65>}, {transform_indices = @transform_1, window_bounds = array<i64: 2, 16, 16, 34>}, {pipeline_mode = #tpu.pipeline_mode<synchronous>, transform_indices = @transform_2, window_bounds = array<i64: 65, 192>}, {pipeline_mode = #tpu.pipeline_mode<synchronous>, transform_indices = @transform_3, window_bounds = array<i64: 34, 64>}, {pipeline_mode = #tpu.pipeline_mode<synchronous>, transform_indices = @transform_4, window_bounds = array<i64: 4, 32>}, {transform_indices = @transform_5, window_bounds = array<i64: 32, 32>}, {transform_indices = @transform_6, window_bounds = array<i64: 32, 32>}, {transform_indices = @transform_7, window_bounds = array<i64: 2, 16, 16, 32>}]} {
    %c0 = arith.constant 0 : index
    %c0_0 = arith.constant 0 : index
    %0 = vector.load %arg1[%c0, %c0_0] : memref<32x65xbf16, #tpu.memory_space<vmem>>, vector<32x65xbf16>
    %c0_1 = arith.constant 0 : index
    %c0_2 = arith.constant 0 : index
    %1 = vector.load %arg3[%c0_1, %c0_2] : memref<65x192xbf16, #tpu.memory_space<vmem>>, vector<65x192xbf16>
    %cst = arith.constant dense<0.000000e+00> : vector<32x192xf32>
    %2 = tpu.matmul %0, %1, %cst {dimension_numbers = #tpu.dot_dimension_numbers<[1], [0], [0], [1], [0, 0, 1, 1], [], []>} : vector<32x65xbf16>, vector<65x192xbf16>, vector<32x192xf32> -> vector<32x192xf32>
    %3 = vector.extract_strided_slice %2 {offsets = [0, 0], sizes = [32, 32], strides = [1, 1]} : vector<32x192xf32> to vector<32x32xf32>
    %4 = vector.extract_strided_slice %2 {offsets = [0, 32], sizes = [32, 32], strides = [1, 1]} : vector<32x192xf32> to vector<32x32xf32>
    %5 = vector.extract_strided_slice %2 {offsets = [0, 64], sizes = [32, 32], strides = [1, 1]} : vector<32x192xf32> to vector<32x32xf32>
    %6 = vector.extract_strided_slice %2 {offsets = [0, 96], sizes = [32, 32], strides = [1, 1]} : vector<32x192xf32> to vector<32x32xf32>
    %7 = vector.extract_strided_slice %2 {offsets = [0, 128], sizes = [32, 32], strides = [1, 1]} : vector<32x192xf32> to vector<32x32xf32>
    %8 = vector.extract_strided_slice %2 {offsets = [0, 160], sizes = [32, 32], strides = [1, 1]} : vector<32x192xf32> to vector<32x32xf32>
    %c0_3 = arith.constant 0 : index
    %c0_4 = arith.constant 0 : index
    %c0_5 = arith.constant 0 : index
    %c0_6 = arith.constant 0 : index
    %9 = vector.load %arg2[%c0_3, %c0_4, %c0_5, %c0_6] : memref<2x16x16x34xbf16, #tpu.memory_space<vmem>>, vector<2x16x16x34xbf16>
    %10 = vector.shape_cast %9 : vector<2x16x16x34xbf16> to vector<512x34xbf16>
    %c0_7 = arith.constant 0 : index
    %c0_8 = arith.constant 0 : index
    %11 = vector.load %arg4[%c0_7, %c0_8] : memref<34x64xbf16, #tpu.memory_space<vmem>>, vector<34x64xbf16>
    %cst_9 = arith.constant dense<0.000000e+00> : vector<512x64xf32>
    %12 = tpu.matmul %10, %11, %cst_9 {dimension_numbers = #tpu.dot_dimension_numbers<[1], [0], [0], [1], [0, 0, 1, 1], [], []>} : vector<512x34xbf16>, vector<34x64xbf16>, vector<512x64xf32> -> vector<512x64xf32>
    %13 = vector.shape_cast %12 : vector<512x64xf32> to vector<2x16x16x64xf32>
    %14 = vector.extract_strided_slice %13 {offsets = [0, 0, 0, 0], sizes = [2, 16, 16, 32], strides = [1, 1, 1, 1]} : vector<2x16x16x64xf32> to vector<2x16x16x32xf32>
    %15 = vector.extract_strided_slice %13 {offsets = [0, 0, 0, 32], sizes = [2, 16, 16, 32], strides = [1, 1, 1, 1]} : vector<2x16x16x64xf32> to vector<2x16x16x32xf32>
    %16 = vector.shape_cast %5 : vector<32x32xf32> to vector<2x1x16x32xf32>
    %17 = vector.shape_cast %16 : vector<2x1x16x32xf32> to vector<2x1x16x32xf32>
    %18 = vector.broadcast %17 : vector<2x1x16x32xf32> to vector<2x16x16x32xf32>
    %19 = vector.shape_cast %6 : vector<32x32xf32> to vector<2x16x1x32xf32>
    %20 = vector.shape_cast %19 : vector<2x16x1x32xf32> to vector<2x16x1x32xf32>
    %21 = vector.broadcast %20 : vector<2x16x1x32xf32> to vector<2x16x16x32xf32>
    %22 = arith.addf %14, %18 : vector<2x16x16x32xf32>
    %23 = arith.addf %22, %21 : vector<2x16x16x32xf32>
    %c2 = arith.constant 2 : index
    %c0_10 = arith.constant 0 : index
    %24 = vector.load %arg5[%c2, %c0_10] : memref<4x32xf32, #tpu.memory_space<vmem>>, vector<1x32xf32>
    %c3 = arith.constant 3 : index
    %c0_11 = arith.constant 0 : index
    %25 = vector.load %arg5[%c3, %c0_11] : memref<4x32xf32, #tpu.memory_space<vmem>>, vector<1x32xf32>
    %26 = vector.extract_strided_slice %9 {offsets = [0, 0, 0, 0], sizes = [2, 16, 16, 32], strides = [1, 1, 1, 1]} : vector<2x16x16x34xbf16> to vector<2x16x16x32xbf16>
    %27 = arith.extf %26 : vector<2x16x16x32xbf16> to vector<2x16x16x32xf32>
    %cst_12 = arith.constant 0.999994993 : f32
    %28 = vector.broadcast %cst_12 : f32 to vector<2x16x16x32xf32>
    %29 = arith.mulf %23, %28 : vector<2x16x16x32xf32>
    %30 = vector.shape_cast %24 : vector<1x32xf32> to vector<1x1x1x32xf32>
    %31 = vector.broadcast %30 : vector<1x1x1x32xf32> to vector<2x16x16x32xf32>
    %32 = arith.mulf %31, %29 : vector<2x16x16x32xf32>
    %33 = vector.shape_cast %25 : vector<1x32xf32> to vector<1x1x1x32xf32>
    %34 = vector.broadcast %33 : vector<1x1x1x32xf32> to vector<2x16x16x32xf32>
    %35 = arith.addf %32, %34 : vector<2x16x16x32xf32>
    %cst_13 = arith.constant 0.000000e+00 : f32
    %36 = vector.broadcast %cst_13 : f32 to vector<2x16x16x32xf32>
    %37 = arith.maximumf %35, %36 : vector<2x16x16x32xf32>
    %38 = arith.addf %27, %37 : vector<2x16x16x32xf32>
    %39 = arith.mulf %38, %15 : vector<2x16x16x32xf32>
    %c0_14 = arith.constant 0 : index
    %c0_15 = arith.constant 0 : index
    %c0_16 = arith.constant 0 : index
    %c0_17 = arith.constant 0 : index
    %40 = vector.load %arg8[%c0_14, %c0_15, %c0_16, %c0_17] : memref<2x16x16x32xf32, #tpu.memory_space<vmem>>, vector<2x16x16x32xf32>
    tpu.vector_store %arg8[%c0_14, %c0_15, %c0_16, %c0_17], %39 {strides = array<i32>} : memref<2x16x16x32xf32, #tpu.memory_space<vmem>>, vector<2x16x16x32xf32>,
    %cst_18 = arith.constant 0.000000e+00 : f32
    %41 = vector.broadcast %cst_18 : f32 to vector<2x16x16x32xf32>
    %42 = arith.subf %41, %23 : vector<2x16x16x32xf32>
    %43 = math.exp %42 : vector<2x16x16x32xf32>
    %cst_19 = arith.constant 1.000000e+00 : f32
    %44 = vector.broadcast %cst_19 : f32 to vector<2x16x16x32xf32>
    %45 = arith.addf %44, %43 : vector<2x16x16x32xf32>
    %46 = tpu.reciprocal %45 {approx = true} : vector<2x16x16x32xf32> -> vector<2x16x16x32xf32>
    %47 = arith.mulf %15, %46 : vector<2x16x16x32xf32>
    %48 = vector.shape_cast %3 : vector<32x32xf32> to vector<2x1x16x32xf32>
    %49 = vector.shape_cast %48 : vector<2x1x16x32xf32> to vector<2x1x16x32xf32>
    %50 = vector.broadcast %49 : vector<2x1x16x32xf32> to vector<2x16x16x32xf32>
    %51 = vector.shape_cast %4 : vector<32x32xf32> to vector<2x1x16x32xf32>
    %52 = vector.shape_cast %51 : vector<2x1x16x32xf32> to vector<2x1x16x32xf32>
    %53 = vector.broadcast %52 : vector<2x1x16x32xf32> to vector<2x16x16x32xf32>
    %54 = arith.mulf %47, %50 : vector<2x16x16x32xf32>
    %55 = arith.mulf %47, %53 : vector<2x16x16x32xf32>
    %56 = tpu.concatenate %47, %54, %55 in 3 : vector<2x16x16x32xf32>, vector<2x16x16x32xf32>, vector<2x16x16x32xf32> -> vector<2x16x16x96xf32>
    %cst_20 = arith.constant dense<0.000000e+00> : vector<2x16x96xf32>
    %57 = vector.multi_reduction <add>, %56, %cst_20 [2] : vector<2x16x16x96xf32> to vector<2x16x96xf32>
    %58 = vector.shape_cast %57 : vector<2x16x96xf32> to vector<32x96xf32>
    %59 = vector.extract_strided_slice %58 {offsets = [0, 0], sizes = [32, 32], strides = [1, 1]} : vector<32x96xf32> to vector<32x32xf32>
    %cst_21 = arith.constant 9.99999997E-7 : f32
    %60 = vector.broadcast %cst_21 : f32 to vector<32x32xf32>
    %61 = arith.addf %59, %60 : vector<32x32xf32>
    %cst_22 = arith.constant 1.000000e+00 : f32
    %62 = vector.broadcast %cst_22 : f32 to vector<32x32xf32>
    %63 = arith.divf %62, %61 : vector<32x32xf32>
    %64 = vector.extract_strided_slice %58 {offsets = [0, 32], sizes = [32, 32], strides = [1, 1]} : vector<32x96xf32> to vector<32x32xf32>
    %65 = arith.mulf %64, %63 : vector<32x32xf32>
    %66 = arith.addf %7, %65 : vector<32x32xf32>
    %67 = vector.extract_strided_slice %58 {offsets = [0, 64], sizes = [32, 32], strides = [1, 1]} : vector<32x96xf32> to vector<32x32xf32>
    %68 = arith.mulf %67, %63 : vector<32x32xf32>
    %69 = arith.addf %8, %68 : vector<32x32xf32>
    %c0_23 = arith.constant 0 : index
    %c0_24 = arith.constant 0 : index
    %70 = vector.load %arg5[%c0_23, %c0_24] : memref<4x32xf32, #tpu.memory_space<vmem>>, vector<1x32xf32>
    %c1 = arith.constant 1 : index
    %c0_25 = arith.constant 0 : index
    %71 = vector.load %arg5[%c1, %c0_25] : memref<4x32xf32, #tpu.memory_space<vmem>>, vector<1x32xf32>
    %72 = vector.extract_strided_slice %0 {offsets = [0, 0], sizes = [32, 32], strides = [1, 1]} : vector<32x65xbf16> to vector<32x32xbf16>
    %73 = arith.extf %72 : vector<32x32xbf16> to vector<32x32xf32>
    %74 = vector.extract_strided_slice %0 {offsets = [0, 32], sizes = [32, 32], strides = [1, 1]} : vector<32x65xbf16> to vector<32x32xbf16>
    %75 = arith.extf %74 : vector<32x32xbf16> to vector<32x32xf32>
    %cst_26 = arith.constant 0.999994993 : f32
    %76 = vector.broadcast %cst_26 : f32 to vector<32x32xf32>
    %77 = arith.mulf %66, %76 : vector<32x32xf32>
    %78 = vector.broadcast %70 : vector<1x32xf32> to vector<32x32xf32>
    %79 = arith.mulf %78, %77 : vector<32x32xf32>
    %80 = vector.broadcast %71 : vector<1x32xf32> to vector<32x32xf32>
    %81 = arith.addf %79, %80 : vector<32x32xf32>
    %cst_27 = arith.constant 0.000000e+00 : f32
    %82 = vector.broadcast %cst_27 : f32 to vector<32x32xf32>
    %83 = arith.maximumf %81, %82 : vector<32x32xf32>
    %84 = arith.addf %73, %83 : vector<32x32xf32>
    %c0_28 = arith.constant 0 : index
    %c0_29 = arith.constant 0 : index
    %85 = vector.load %arg6[%c0_28, %c0_29] : memref<32x32xf32, #tpu.memory_space<vmem>>, vector<32x32xf32>
    tpu.vector_store %arg6[%c0_28, %c0_29], %84 {strides = array<i32>} : memref<32x32xf32, #tpu.memory_space<vmem>>, vector<32x32xf32>,
    %86 = math.tanh %69 : vector<32x32xf32>
    %87 = arith.addf %75, %86 : vector<32x32xf32>
    %c0_30 = arith.constant 0 : index
    %c0_31 = arith.constant 0 : index
    %88 = vector.load %arg7[%c0_30, %c0_31] : memref<32x32xf32, #tpu.memory_space<vmem>>, vector<32x32xf32>
    tpu.vector_store %arg7[%c0_30, %c0_31], %87 {strides = array<i32>} : memref<32x32xf32, #tpu.memory_space<vmem>>, vector<32x32xf32>,
    return
  }
  func.func @transform_0(%arg0: i32) -> (i32, i32) {
    %c0_i32 = arith.constant 0 : i32
    %c0_i32_0 = arith.constant 0 : i32
    return %arg0, %c0_i32 : i32, i32
  }
  func.func @transform_1(%arg0: i32) -> (i32, i32, i32, i32) {
    %c0_i32 = arith.constant 0 : i32
    %c0_i32_0 = arith.constant 0 : i32
    %c0_i32_1 = arith.constant 0 : i32
    %c0_i32_2 = arith.constant 0 : i32
    return %arg0, %c0_i32, %c0_i32_0, %c0_i32_1 : i32, i32, i32, i32
  }
  func.func @transform_2(%arg0: i32) -> (i32, i32) {
    %c0_i32 = arith.constant 0 : i32
    %c0_i32_0 = arith.constant 0 : i32
    %c0_i32_1 = arith.constant 0 : i32
    return %c0_i32, %c0_i32_0 : i32, i32
  }
  func.func @transform_3(%arg0: i32) -> (i32, i32) {
    %c0_i32 = arith.constant 0 : i32
    %c0_i32_0 = arith.constant 0 : i32
    %c0_i32_1 = arith.constant 0 : i32
    return %c0_i32, %c0_i32_0 : i32, i32
  }
  func.func @transform_4(%arg0: i32) -> (i32, i32) {
    %c0_i32 = arith.constant 0 : i32
    %c0_i32_0 = arith.constant 0 : i32
    %c0_i32_1 = arith.constant 0 : i32
    return %c0_i32, %c0_i32_0 : i32, i32
  }
  func.func @transform_5(%arg0: i32) -> (i32, i32) {
    %c0_i32 = arith.constant 0 : i32
    %c0_i32_0 = arith.constant 0 : i32
    return %arg0, %c0_i32 : i32, i32
  }
  func.func @transform_6(%arg0: i32) -> (i32, i32) {
    %c0_i32 = arith.constant 0 : i32
    %c0_i32_0 = arith.constant 0 : i32
    return %arg0, %c0_i32 : i32, i32
  }
  func.func @transform_7(%arg0: i32) -> (i32, i32, i32, i32) {
    %c0_i32 = arith.constant 0 : i32
    %c0_i32_0 = arith.constant 0 : i32
    %c0_i32_1 = arith.constant 0 : i32
    %c0_i32_2 = arith.constant 0 : i32
    return %arg0, %c0_i32, %c0_i32_0, %c0_i32_1 : i32, i32, i32, i32
  }
}

</mosaic_0001>

<bundles_post_ra>
// kernel: tpu_custom_call.1
= control target key start
LH: loop header
LB: loop body
LE: loop exit
PB: predicated region body
PF: predicated region fallthrough
CT: control target
= control target key end

     0   :  { %s10382_s0 = inlined_call_operand.hbm [shape: bf16[64,65], index: 0, kind: input, shape index: {}]   ;;  %s10383_s1 = inlined_call_operand.hbm [shape: bf16[4,16,16,34], index: 1, kind: input, shape index: {}]   ;;  %s10384_s2 = inlined_call_operand.hbm [shape: bf16[65,192], index: 2, kind: input, shape index: {}]   ;;  %s10385_s3 = inlined_call_operand.hbm [shape: bf16[34,64], index: 3, kind: input, shape index: {}]   ;;  %s10386_s4 = inlined_call_operand.hbm [shape: f32[4,32], index: 4, kind: input, shape index: {}]   ;;  %s10387_s5 = inlined_call_operand.vmem [shape: f32[64,32], index: 5, kind: output, shape index: {0}]   ;;  %s10388_s6 = inlined_call_operand.vmem [shape: f32[64,32], index: 6, kind: output, shape index: {1}]   ;;  %s10389_s7 = inlined_call_operand.hbm [shape: f32[4,16,16,32], index: 7, kind: output, shape index: {2}]  }
   0x1   :  { %10615 = sst [smem:[#allocation137_spill]] %s10384_s2 }
   0x2   :  { %10616 = sst [smem:[#allocation138_spill]] %s10385_s3 }
   0x3   :  { %10617 = sst [smem:[#allocation139_spill]] %s10386_s4 }
   0x4   :  { %13 = vsyncpa [#allocation3], 0 }
   0x5   :  { %15 = vsyncpa [#allocation3 + $0x1], 0 }
   0x6   :  { %16 = vsyncpa [#allocation6], 0 }
   0x7   :  { %18 = vsyncpa [#allocation6 + $0x1], 0 }
   0x8   :  { %19 = vsyncpa [#allocation9], 0 }
   0x9   :  { %20 = vsyncpa [#allocation4], 0 }
   0xa   :  { %22 = vsyncpa [#allocation4 + $0x1], 0  ;;  %s6133_s24 = smov 0   ;;  %s6135_s25 = smov 0  }
   0xb   :  { %s6137_s26 = smov 0   ;;  %s6139_s27 = smov 0  }
   0xc LB: > { %10618 = sst [smem:[#allocation17_spill]] %s6074_s26  ;;  %s6154_s28 = sadd.s32 4294967295, %s6078_s27   ;;  %s6078_s27 = sphi %s6139_s27, %s11231_s27   ;;  %s6074_s26 = sphi %s6137_s26, %s11236_s26   ;;  %s6070_s25 = sphi %s6135_s25, %s11235_s25   ;;  %s6066_s24 = sphi %s6133_s24, %s11234_s24  }
   0xd   : > { %s5122_s29 = sadd.s32 4294967294, %s6078_s27   ;;  %p48_p0 = scmp.ne.s32.totalorder %s6070_s25, %s6066_s24 }
   0xe   : > { %p49_p1 = scmp.eq.s32.totalorder %s6154_s28, 0  ;;  %p213_p2 = scmp.eq.s32.totalorder %s6154_s28, 1 }
   0xf   : > { %p219_p3 = scmp.eq.s32.totalorder %s5122_s29, 1  ;;  %p5123_p5 = scmp.ge.s32.totalorder %s6078_s27, 1 }
  0x10   : > { %p6163_p4 = por %p49_p1, %p48_p0  ;;  %p226_p7 = scmp.lt.s32.totalorder %s6078_s27, 3 }
  0x11   : > { %p6168_p6 = por %p219_p3, %p48_p0  ;;  %s10621_s2 = sld [smem:[#allocation137_spill]] }
  0x12   : > { %p6176_p8 = pnand %p5123_p5, %p226_p7  ;;  %s6080_s13 = smov [#allocation7]  }
  0x13   : > { %s239_s14 = sshll.u32 %s6080_s13, 4  ;;  %s10624_s3 = sld [smem:[#allocation138_spill]]  ;;  %s240_s14 = int_to_ptr.vmem [resolvable:$true] %s239_s14 }
  0x14   : > { %p5440_p9 = pneg %p6176_p8  ;;  %s6081_s19 = smov 128  }
  0x15   : > { %s6082_s20 = smov 8   ;;  %s6083_s21 = smov [#allocation8]  }
  0x16   : > { %p6184_p10 = pnand %p5440_p9, %p49_p1  ;;  %s253_s22 = sshll.u32 %s6083_s21, 4  ;;  %s254_s22 = int_to_ptr.vmem [resolvable:$true] %s253_s22 }
  0x17   : > { %s237_s11 = sshll.u32 %s10621_s2, 4  ;;  %s10390_s23 = smov 64   ;;  %s238_s11 = int_to_ptr.hbm [resolvable:$true] %s237_s11 }
  0x18   : > { %5443 = dma.hbm_to_vmem [thread:$0]  (!%p6184_p10), %s238_s11, 1152, %s240_s14, [#allocation6], %s6081_s19, %s6081_s19, %s6082_s20  }
  0x19   : > { %s251_s18 = sshll.u32 %s10624_s3, 4  ;;  %s10392_s29 = smov 4   ;;  %s252_s18 = int_to_ptr.hbm [resolvable:$true] %s251_s18 }
  0x1a   : > { %5446 = dma.hbm_to_vmem [thread:$0]  (!%p6184_p10), %s252_s18, 320, %s254_s22, [#allocation9], %s10390_s23, %s10390_s23, %s10392_s29  }
  0x1b   : > { %s10625_s4 = sld [smem:[#allocation139_spill]]  ;;  %s6086_s13 = smov [#allocation10]  }
  0x1c   : > { %s268_s14 = sshll.u32 %s6086_s13, 4  ;;  %s6205_s16 = sadd.s32 1, %s6078_s27   ;;  %s269_s14 = int_to_ptr.vmem [resolvable:$true] %s268_s14 }
  0x1d   : > { %10626 = sst [smem:[#allocation18_spill]] %s6205_s16  ;;  %s32_s17 = ssub.s32 %s6078_s27, %s6205_s16 }
  0x1e   : > { %s35_s19 = sadd.s32 1, %s6074_s26  ;;  %p33_p12 = scmp.eq.s32.totalorder %s32_s17, 0 }
  0x1f   : > { %p42_p13 = scmp.ne.s32.totalorder %s6074_s26, %s6070_s25  ;;  %p43_p0 = scmp.eq.s32.totalorder %s6078_s27, 0 }
  0x20   : > { %p5464_p3 = scmp.lt.s32.totalorder %s6078_s27, 2  ;;  %s6224_s15 = sand.u32 1, %s6074_s26  }
  0x21   : > { %s266_s11 = sshll.u32 %s10625_s4, 4  ;;  %p44_p5 = por %p43_p0, %p42_p13  ;;  %s267_s11 = int_to_ptr.hbm [resolvable:$true] %s266_s11 }
  0x22   : > { %5449 = dma.hbm_to_vmem [thread:$0]  (!%p6184_p10), %s267_s11, 64, %s269_s14, [#allocation9]  }
  0x23   : > { %s6215_s18 = scalar_select %p33_p12, %s6074_s26, %s35_s19  }
  0x24   : > { %p6219_p7 = por %p213_p2, %p42_p13  ;;  %s5364_s21 = sshll.u32 %s6078_s27, 4 }
  0x25   : > { %10627 = sst [smem:[#allocation19_spill]] %s6215_s18  ;;  %s5128_s22 = sshll.u32 %s6224_s15, 4 }
  0x26   : > { %s288_s11 = scalar_lea.hbm %s10382_s0, %s5364_s21  ;;  %s283_s14 = scalar_lea.vmem [#allocation2], %s5128_s22 }
  0x27   : > { %s289_s13 = sshll.u32 %s288_s11, 4  ;;  %s291_s17 = sshll.u32 %s283_s14, 4  ;;  %s290_s13 = int_to_ptr.hbm [resolvable:$true] %s289_s13  ;;  %s292_s17 = int_to_ptr.vmem [resolvable:$true] %s291_s17 }
  0x28   : > { %p6233_p2 = pnand %p5464_p3, %p44_p5  ;;  %s301_s23 = sand.u32 1, %s6078_s27  }
  0x29   : > { %s5131_s29 = sshll.u32 %s6224_s15, 8  ;;  %s280_s2 = scalar_lea.sflag [#allocation3], %s6224_s15 }
  0x2a   : > { %s5940_s3 = sshra.s32 %s290_s13, 4  ;;  %p5944_p10 = pneg %p6233_p2  ;;  %s5941_s3 = int_to_ptr.hbm [resolvable:$true] %s5940_s3 }
  0x2b   : > { %s5942_s4 = scalar_lea.hbm %s5941_s3, 16  ;;  %s5947_s9 = scalar_lea.hbm %s10382_s0, 32 }
  0x2c   : > { %p5943_p9 = scmp.ne.s32.totalorder %s5941_s3, %s5942_s4  ;;  %p5948_p0 = scmp.lt.s32.totalorder %s5941_s3, %s10382_s0 }
  0x2d   : > { %p5949_p3 = scmp.lt.s32.totalorder %s5947_s9, %s5942_s4 }
  0x2e   : > { %p5945_p12 = pnand %p5944_p10, %p5943_p9 }
  0x2f   : > { %p5950_p5 = por %p5949_p3, %p5948_p0 }
  0x30   : > { %p5946_p13 = pneg %p5945_p12 }
  0x32   : > { %p5951_p11 = pnand %p5950_p5, %p5946_p13 }
  0x34   : > { %5954 = shalt.err (!%p5951_p11)
}
  0x35   : > { %s10630_s15 = smov 4   ;;  %s10631_s14 = smov 64  }
  0x36   : > { %5453 = dma.hbm_to_vmem [thread:$0]  (!%p6233_p2), %s290_s13, 256, %s292_s17, %s280_s2, %s10631_s14, %s10631_s14, %s10630_s15  }
  0x37   : > { %s5366_s18 = sshll.u32 %s6078_s27, 8  ;;  %s305_s26 = scalar_lea.vmem [#allocation5], %s5131_s29 }
  0x38   : > { %s314_s21 = sshll.u32 %s305_s26, 4  ;;  %s311_s10 = scalar_lea.hbm %s10383_s1, %s5366_s18  ;;  %s315_s21 = int_to_ptr.vmem [resolvable:$true] %s314_s21 }
  0x39   : > { %s312_s3 = sshll.u32 %s311_s10, 4  ;;  %s302_s4 = scalar_lea.sflag [#allocation6], %s301_s23  ;;  %s313_s3 = int_to_ptr.hbm [resolvable:$true] %s312_s3 }
  0x3a   : > { %s5970_s9 = sshra.s32 %s313_s3, 4  ;;  %s5977_s26 = scalar_lea.hbm %s10383_s1, 512  ;;  %s5971_s9 = int_to_ptr.hbm [resolvable:$true] %s5970_s9 }
  0x3b   : > { %s5972_s11 = scalar_lea.hbm %s5971_s9, 256  ;;  %p5978_p13 = scmp.lt.s32.totalorder %s5971_s9, %s10383_s1 }
  0x3c   : > { %p5973_p11 = scmp.ne.s32.totalorder %s5971_s9, %s5972_s11  ;;  %p5979_p0 = scmp.lt.s32.totalorder %s5977_s26, %s5972_s11 }
  0x3e   : > { %p5975_p9 = pnand %p5973_p11, %p5944_p10  ;;  %p5980_p3 = por %p5979_p0, %p5978_p13 }
  0x40   : > { %p5976_p12 = pneg %p5975_p9 }
  0x42   : > { %p5981_p5 = pnand %p5980_p3, %p5976_p12 }
  0x44   : > { %5984 = shalt.err (!%p5981_p5)
}
  0x45   : > { %5456 = dma.hbm_to_vmem [thread:$0]  (!%p6233_p2), %s313_s3, 4096, %s315_s21, %s302_s4, %s10631_s14, %s10631_s14, %s10630_s15  }
  0x46   : > { %326 = sbr.rel (%p6176_p8) target bundleno = 1634 (0x662), region = 40 }
  0x4b   : > { %s6277_s23 = sand.u32 1, %s6070_s25  }
  0x4c   : > { %s5136_s16 = sshll.u32 %s6277_s23, 4  ;;  %s329_s18 = scalar_lea.sflag [#allocation3], %s6277_s23 }
  0x4d   : > { %s6281_s22 = scalar_lea.vmem [#allocation2], %s5136_s16 }
  0x4e   : > { %6045 = dma.done.wait (%p6163_p4), %s329_s18, 256  }
  0x4f   : > { %6047 = vsyncadd (%p6163_p4), %s329_s18, 4294967040  ;;  %s338_s12 = sand.u32 1, %s6154_s28   ;;  %s5137_s19 = sshll.u32 %s6277_s23, 8 }
  0x50   : > { %s339_s15 = scalar_lea.sflag [#allocation6], %s338_s12  ;;  %s6289_s14 = scalar_lea.vmem [#allocation5], %s5137_s19 }
  0x51   : > { %6049 = dma.done.wait (%p6163_p4), %s339_s15, 4096  }
  0x52   : > { %6051 = vsyncadd (%p6163_p4), %s339_s15, 4294963200 }
  0x53   : > { %6053 = dma.done.wait (%p49_p1), [#allocation6], 1152  }
  0x54   : > { %6055 = vsyncadd (%p49_p1), [#allocation6], 4294966144 }
  0x55   : > { %6057 = dma.done.wait (%p49_p1), [#allocation9], 384  }
  0x56   : > { %6059 = vsyncadd (%p49_p1), [#allocation9], 4294966912  ;;  %vm495_vm0 = vcmask 1040384   ;;  %v610_v0 = vld [vmem:[#allocation8 + $0x10] sm:$0x1]  ;;  %v6087_v5 = vmov 0  }
  0x57   : > { %v432_v1 = vld [vmem:[#allocation7 + $0x40] sm:$0x11]  ;;  %v780_v2 = vunpack.c.l.b16 %v610_v0  ;;  %v497_v6 = vsel %vm495_vm0, 65535, %v6087_v5  ;;  %v5180_v10 = vld [vmem:[#allocation7 + $0x30] sm:$0xf]  ;;  %v5409_v24 = vld [vmem:[#allocation8] sm:$0xff] }
  0x58   : > { %v468_v3 = vunpack.c.l.b16 %v432_v1  ;;  %v469_v4 = vunpack.c.h.b16 %v432_v1  ;;  %v5376_v11 = vld [vmem:[#allocation7 + $0x34] sm:$0xf0]  ;;  %v5375_v15 = vld [vmem:[#allocation7 + $0x34] sm:$0xf]  ;;  %v5182_v16 = vld [vmem:[#allocation7 + $0x38] sm:$0xf0] }
  0x59   : > { %v783_v7 = vpack.c.b16 %v780_v2, %v780_v2  ;;  %v5410_v17 = vld [vmem:[#allocation8 + $0x8] sm:$0xff]  ;;  %v5172_v18 = vld [vmem:[#allocation7 + $0x20] sm:$0xf]  ;;  %v5181_v19 = vor.u32 %v5376_v11, %v5180_v10  ;;  %v5185_v20 = vor.u32 %v5375_v15, %v5182_v16  ;;  %v5374_v21 = vld [vmem:[#allocation7 + $0x24] sm:$0xf0]  ;;  %vm786_vm1 = vcmask 277504  }
  0x5a   : > { %v478_v8 = vpack.c.b16 %v468_v3, %v468_v3  ;;  %v479_v9 = vpack.c.b16 %v469_v4, %v469_v4  ;;  %v5373_v22 = vld [vmem:[#allocation7 + $0x24] sm:$0xf]  ;;  %v5174_v23 = vld [vmem:[#allocation7 + $0x28] sm:$0xf0]  ;;  %v5173_v25 = vor.u32 %v5374_v21, %v5172_v18  ;;  %v5164_v26 = vld [vmem:[#allocation7 + $0x10] sm:$0xf] }
  0x5b   : > { %v884_v12 = vsel %vm495_vm0, %v783_v7, 0  ;;  %v5177_v27 = vor.u32 %v5373_v22, %v5174_v23  ;;  %v5372_v28 = vld [vmem:[#allocation7 + $0x14] sm:$0xf0]  ;;  %v5371_v29 = vld [vmem:[#allocation7 + $0x14] sm:$0xf]  ;;  %v5389_v31 = vld [vmem:[%s6289_s14 + $0x60] sm:$0xff] }
  0x5c   : > { %v499_v13 = vand.u32 %v497_v6, %v478_v8  ;;  %v502_v14 = vand.u32 %v497_v6, %v479_v9  ;;  %5414 = vmatpush.bf16.msra.mxu2 %v884_v12  ;;  %5415 = vmatpush.bf16.msra.mxu3 %v884_v12  ;;  %v5166_v30 = vld [vmem:[#allocation7 + $0x18] sm:$0xf0]  ;;  %v5399_v32 = vld [vmem:[%s6289_s14 + $0xb0] sm:$0xff]  ;;  %v5165_v33 = vor.u32 %v5372_v28, %v5164_v26  ;;  %v5156_v34 = vld [vmem:[#allocation7] sm:$0xf]  ;;  %vm488_vm2 = vcmask 531456  }
  0x5d   : > { %v5169_v35 = vor.u32 %v5371_v29, %v5166_v30  ;;  %v5370_v36 = vld [vmem:[#allocation7 + $0x4] sm:$0xf0]  ;;  %v5369_v37 = vld [vmem:[#allocation7 + $0x4] sm:$0xf]  ;;  %v5158_v38 = vld [vmem:[#allocation7 + $0x8] sm:$0xf0] }
  0x5e   : > { %507 = vmatpush.bf16.msra.mxu0 %v499_v13  ;;  %526 = vmatpush.bf16.msra.mxu1 %v502_v14  ;;  %v5157_v39 = vor.u32 %v5370_v36, %v5156_v34  ;;  %v5161_v40 = vor.u32 %v5369_v37, %v5158_v38  ;;  %v5367_v41 = vld [vmem:[%s6281_s22] sm:$0xff]  ;;  %v5400_v42 = vld [vmem:[%s6289_s14 + $0xb8] sm:$0xff]  ;;  %v5390_v43 = vld [vmem:[%s6289_s14 + $0x68] sm:$0xff]  ;;  %s6088_s30 = smov 96   ;;  %s6089_s21 = smov 32   ;;  %vm2063_vm3 = vcmask 261120  }
  0x5f   : > { %v5368_v44 = vld [vmem:[%s6281_s22 + $0x8] sm:$0xff]  ;;  %v5391_v45 = vld [vmem:[%s6289_s14 + $0x70] sm:$0xff]  ;;  %v5401_v46 = vld [vmem:[%s6289_s14 + $0xc0] sm:$0xff]  ;;  %s6090_s10 = smov 64   ;;  %s5141_s3 = sshll.u32 %s6277_s23, 9  ;;  %vm3484_vm4 = vcmask 523264  }
  0x60   : > { %5417 = vmatpush.bf16.msra.mxu2 %v5410_v17  ;;  %5418 = vmatpush.bf16.msra.mxu3 %v5410_v17  ;;  %v5377_v47 = vld [vmem:[%s6289_s14] sm:$0xff]  ;;  %v5384_v48 = vld [vmem:[%s6289_s14 + $0x38] sm:$0xff]  ;;  %v5402_v50 = vld [vmem:[%s6289_s14 + $0xc8] sm:$0xff]  ;;  %s6621_s4 = scalar_lea.vmem [#allocation11], %s5141_s3  ;;  %vm3549_vm5 = vcmask 785408   ;;  %s5142_s9 = sshll.u32 %s6154_s28, 2 }
  0x61   : > { %v5392_v49 = vld [vmem:[%s6289_s14 + $0x78] sm:$0xff]  ;;  %v5378_v51 = vld [vmem:[%s6289_s14 + $0x8] sm:$0xff]  ;;  %v5385_v52 = vld [vmem:[%s6289_s14 + $0x40] sm:$0xff]  ;;  %s5412_s11 = sshll.u32 %s6154_s28, 9  ;;  %s4945_s29 = sshll.u32 %s6621_s4, 4  ;;  %s4946_s29 = int_to_ptr.vmem [resolvable:$true] %s4945_s29 }
  0x62   : > { %508 = vmatpush.bf16.msra.mxu0 %v5181_v19  ;;  %527 = vmatpush.bf16.msra.mxu1 %v5185_v20  ;;  %v5393_v53 = vld [vmem:[%s6289_s14 + $0x80] sm:$0xff]  ;;  %v5403_v54 = vld [vmem:[%s6289_s14 + $0xd0] sm:$0xff]  ;;  %v5386_v56 = vld [vmem:[%s6289_s14 + $0x48] sm:$0xff]  ;;  %s4944_s26 = scalar_lea.hbm %s10389_s7, %s5412_s11  ;;  %s4924_s16 = scalar_lea.sflag [#allocation4], %s6277_s23 }
  0x63   : > { %v5379_v55 = vld [vmem:[%s6289_s14 + $0x10] sm:$0xff]  ;;  %v5394_v57 = vld [vmem:[%s6289_s14 + $0x88] sm:$0xff]  ;;  %v5404_v58 = vld [vmem:[%s6289_s14 + $0xd8] sm:$0xff]  ;;  %s4947_s17 = sshll.u32 %s4944_s26, 4  ;;  %s6020_s15 = scalar_lea.hbm %s10389_s7, 1024  ;;  %s4948_s17 = int_to_ptr.hbm [resolvable:$true] %s4947_s17 }
  0x64   : > { %5420 = vmatpush.bf16.msra.mxu2 %v5409_v24  ;;  %5421 = vmatpush.bf16.msra.mxu3 %v5409_v24  ;;  %v5380_v59 = vld [vmem:[%s6289_s14 + $0x18] sm:$0xff]  ;;  %v5387_v60 = vld [vmem:[%s6289_s14 + $0x50] sm:$0xff]  ;;  %v5405_v62 = vld [vmem:[%s6289_s14 + $0xe0] sm:$0xff]  ;;  %s6014_s18 = sshra.s32 %s4948_s17, 4  ;;  %s6015_s18 = int_to_ptr.hbm [resolvable:$true] %s6014_s18 }
  0x65   : > { %v5395_v61 = vld [vmem:[%s6289_s14 + $0x90] sm:$0xff]  ;;  %v5381_v63 = vld [vmem:[%s6289_s14 + $0x20] sm:$0xff]  ;;  %v5388_v0 = vld [vmem:[%s6289_s14 + $0x58] sm:$0xff]  ;;  %p6021_p2 = scmp.lt.s32.totalorder %s6015_s18, %s10389_s7 }
  0x66   : > { %509 = vmatpush.bf16.msra.mxu0 %v5173_v25  ;;  %528 = vmatpush.bf16.msra.mxu1 %v5177_v27  ;;  %v5396_v1 = vld [vmem:[%s6289_s14 + $0x98] sm:$0xff]  ;;  %v5406_v2 = vld [vmem:[%s6289_s14 + $0xe8] sm:$0xff]  ;;  %v5397_v4 = vld [vmem:[%s6289_s14 + $0xa0] sm:$0xff] }
  0x67   : > { %5338 = vmatmul.msk.bf16.vlgmr.msra.gmra.mxu2 %vm786_vm1, %v5389_v31  ;;  %5348 = vmatmul.msk.bf16.vlgmr.msra.gmra.mxu3 %vm786_vm1, %v5399_v32  ;;  %v5382_v3 = vld [vmem:[%s6289_s14 + $0x28] sm:$0xff]  ;;  %v5407_v5 = vld [vmem:[%s6289_s14 + $0xf0] sm:$0xff] }
  0x68   : > { %v5383_v8 = vld [vmem:[%s6289_s14 + $0x30] sm:$0xff]  ;;  %v5398_v16 = vld [vmem:[%s6289_s14 + $0xa8] sm:$0xff] }
  0x6a   : > { %510 = vmatpush.bf16.msra.mxu0 %v5165_v33  ;;  %529 = vmatpush.bf16.msra.mxu1 %v5169_v35 }
  0x6e   : > { %511 = vmatpush.bf16.msra.mxu0 %v5157_v39  ;;  %530 = vmatpush.bf16.msra.mxu1 %v5161_v40 }
  0x71   : > { %5186 = vmatmul.msk.bf16.vlgmr.msra.gmra.mxu0 %vm488_vm2, %v5367_v41  ;;  %5188 = vmatmul.msk.bf16.vlgmr.msra.gmra.mxu1 %vm488_vm2, %v5367_v41 }
  0x72   : > { %891 = vmatpush.bf16.msrb.mxu0 %v884_v12  ;;  %5413 = vmatpush.bf16.msrb.mxu1 %v884_v12 }
  0x76   : > { %892 = vmatpush.bf16.msrb.mxu0 %v5410_v17  ;;  %5416 = vmatpush.bf16.msrb.mxu1 %v5410_v17  ;;  %v5408_v17 = vld [vmem:[%s6289_s14 + $0xf8] sm:$0xff] }
  0x77   : > { %5349 = vmatmul.msk.bf16.gmra.mxu3 %vm786_vm1, %v5400_v42  ;;  %5339 = vmatmul.msk.bf16.gmra.mxu2 %vm786_vm1, %v5390_v43 }
  0x7a   : > { %893 = vmatpush.bf16.msrb.mxu0 %v5409_v24  ;;  %5419 = vmatpush.bf16.msrb.mxu1 %v5409_v24 }
  0x81   : > { %5187 = vmatmul.msk.bf16.gmra.mxu0 %vm488_vm2, %v5368_v44  ;;  %5189 = vmatmul.msk.bf16.gmra.mxu1 %vm488_vm2, %v5368_v44 }
  0x87   : > { %5340 = vmatmul.msk.bf16.gmra.mxu2 %vm786_vm1, %v5391_v45  ;;  %5350 = vmatmul.msk.bf16.gmra.mxu3 %vm786_vm1, %v5401_v46 }
  0x91   : > { %5326 = vmatmul.msk.bf16.vlgmr.msrb.gmra.mxu0 %vm786_vm1, %v5377_v47  ;;  %5333 = vmatmul.msk.bf16.vlgmr.msrb.gmra.mxu1 %vm786_vm1, %v5384_v48 }
  0x97   : > { %5341 = vmatmul.msk.bf16.gmra.mxu2 %vm786_vm1, %v5392_v49  ;;  %5351 = vmatmul.msk.bf16.gmra.mxu3 %vm786_vm1, %v5402_v50 }
  0xa1   : > { %5327 = vmatmul.msk.bf16.gmra.mxu0 %vm786_vm1, %v5378_v51  ;;  %5334 = vmatmul.msk.bf16.gmra.mxu1 %vm786_vm1, %v5385_v52 }
  0xa7   : > { %5342 = vmatmul.msk.bf16.gmra.mxu2 %vm786_vm1, %v5393_v53  ;;  %5352 = vmatmul.msk.bf16.gmra.mxu3 %vm786_vm1, %v5403_v54 }
  0xb1   : > { %5328 = vmatmul.msk.bf16.gmra.mxu0 %vm786_vm1, %v5379_v55  ;;  %5335 = vmatmul.msk.bf16.gmra.mxu1 %vm786_vm1, %v5386_v56 }
  0xb7   : > { %5343 = vmatmul.msk.bf16.gmra.mxu2 %vm786_vm1, %v5394_v57  ;;  %5353 = vmatmul.msk.bf16.gmra.mxu3 %vm786_vm1, %v5404_v58 }
  0xc1   : > { %5329 = vmatmul.msk.bf16.gmra.mxu0 %vm786_vm1, %v5380_v59  ;;  %5336 = vmatmul.msk.bf16.gmra.mxu1 %vm786_vm1, %v5387_v60 }
  0xc7   : > { %5344 = vmatmul.msk.bf16.gmra.mxu2 %vm786_vm1, %v5395_v61  ;;  %5354 = vmatmul.msk.bf16.gmra.mxu3 %vm786_vm1, %v5405_v62 }
  0xd1   : > { %5330 = vmatmul.msk.bf16.gmra.mxu0 %vm786_vm1, %v5381_v63  ;;  %5337 = vmatmul.msk.bf16.gmra.mxu1 %vm786_vm1, %v5388_v0 }
  0xd7   : > { %5345 = vmatmul.msk.bf16.gmra.mxu2 %vm786_vm1, %v5396_v1  ;;  %5355 = vmatmul.msk.bf16.gmra.mxu3 %vm786_vm1, %v5406_v2 }
  0xe1   : > { %5331 = vmatmul.msk.bf16.gmra.mxu0 %vm786_vm1, %v5382_v3 }
  0xe7   : > { %5346 = vmatmul.msk.bf16.gmra.mxu2 %vm786_vm1, %v5397_v4  ;;  %5356 = vmatmul.msk.bf16.gmra.mxu3 %vm786_vm1, %v5407_v5 }
  0xea   : > { %v6367_v6 = vpop.f32.mrf.mxu2  ;;  %v6369_v7 = vpop.f32.mrf.mxu3 }
  0xeb   : > { %10632 = vst [vmem:[#allocation20_spill] sm:$0xff] %v6367_v6  ;;  %1895 = vrot.lane.b32.xlu2 %v6369_v7, %s6088_s30  ;;  %1855 = vrot.lane.b32.xlu0 %v6367_v6, %s6088_s30 }
  0xec   : > { %10633 = vst [vmem:[#allocation21_spill] sm:$0xff] %v6369_v7 }
  0xee   : > { %v6376_v9 = vpop.f32.mrf.mxu0  ;;  %v6452_v55 = vpop.f32.mrf.mxu1 }
  0xef   : > { %10634 = vst [vmem:[#allocation22_spill] sm:$0xff] %v6376_v9  ;;  %v1061_v10 = vrot.slane %v6376_v9, 3  ;;  %v1087_v12 = vperm.slane %v6376_v9, 0  ;;  %v1064_v13 = vrot.slane %v6376_v9, 6  ;;  %v1060_v14 = vrot.slane %v6376_v9, 2 }
  0xf0   : > { %v1059_v15 = vrot.slane %v6376_v9, 1  ;;  %v1063_v21 = vrot.slane %v6376_v9, 5  ;;  %v1062_v22 = vrot.slane %v6376_v9, 4  ;;  %v1065_v28 = vrot.slane %v6376_v9, 7  ;;  %10644 = vst [vmem:[#allocation32_spill] sm:$0xff] %v6452_v55 }
  0xf1   : > { %5332 = vmatmul.msk.bf16.gmra.mxu0 %vm786_vm1, %v5383_v8  ;;  %v1090_v11 = vperm.slane %v1061_v10, 0  ;;  %v1093_v18 = vperm.slane %v1064_v13, 0  ;;  %v1089_v19 = vperm.slane %v1060_v14, 0 }
  0xf2   : > { %v1088_v20 = vperm.slane %v1059_v15, 0  ;;  %v6399_v24 = vpop.f32.mrf.mxu2  ;;  %v1092_v25 = vperm.slane %v1063_v21, 0  ;;  %v1091_v26 = vperm.slane %v1062_v22, 0  ;;  %v6409_v30 = vpop.f32.mrf.mxu3  ;;  %v1094_v32 = vperm.slane %v1065_v28, 0 }
  0xf3   : > { %1201 = vrot.lane.b32.xlu1 %v1090_v11, %s6089_s21  ;;  %1119 = vrot.lane.b32.xlu0 %v6376_v9, %s6090_s10  ;;  %10636 = vst [vmem:[#allocation24_spill] sm:$0xff] %v6399_v24 }
  0xf4   : > { %1195 = vrot.lane.b32.xlu2 %v1087_v12, %s6089_s21  ;;  %10638 = vst [vmem:[#allocation26_spill] sm:$0xff] %v6409_v30 }
  0xf6   : > { %v6397_v23 = vpop.f32.mrf.mxu0  ;;  %v6462_v63 = vpop.f32.mrf.mxu1 }
  0xf7   : > { %5347 = vmatmul.msk.bf16.gmra.mxu2 %vm786_vm1, %v5398_v16  ;;  %5357 = vmatmul.msk.bf16.gmra.mxu3 %vm786_vm1, %v5408_v17  ;;  %10635 = vst [vmem:[#allocation23_spill] sm:$0xff] %v6397_v23  ;;  %v1066_v27 = vrot.slane %v6397_v23, 1  ;;  %v1069_v33 = vrot.slane %v6397_v23, 4  ;;  %v1067_v34 = vrot.slane %v6397_v23, 2  ;;  %v1072_v38 = vrot.slane %v6397_v23, 7 }
  0xf8   : > { %v1070_v39 = vrot.slane %v6397_v23, 5  ;;  %v1095_v41 = vperm.slane %v6397_v23, 0  ;;  %v1068_v44 = vrot.slane %v6397_v23, 3  ;;  %v1071_v48 = vrot.slane %v6397_v23, 6  ;;  %10646 = vst [vmem:[#allocation34_spill] sm:$0xff] %v6462_v63 }
  0xf9   : > { %v1096_v31 = vperm.slane %v1066_v27, 0  ;;  %v1099_v35 = vperm.slane %v1069_v33, 0  ;;  %v1097_v36 = vperm.slane %v1067_v34, 0  ;;  %v1102_v40 = vperm.slane %v1072_v38, 0 }
  0xfa   : > { %v1100_v42 = vperm.slane %v1070_v39, 0  ;;  %v6432_v45 = vpop.f32.mrf.mxu3  ;;  %v1098_v46 = vperm.slane %v1068_v44, 0  ;;  %v6434_v47 = vpop.f32.mrf.mxu2  ;;  %v1101_v51 = vperm.slane %v1071_v48, 0 }
  0xfb   : > { %1207 = vrot.lane.b32.xlu1 %v1093_v18, %s6089_s21  ;;  %1199 = vrot.lane.b32.xlu0 %v1089_v19, %s6089_s21  ;;  %10641 = vst [vmem:[#allocation29_spill] sm:$0xff] %v6432_v45 }
  0xfc   : > { %1197 = vrot.lane.b32.xlu2 %v1088_v20, %s6089_s21  ;;  %10642 = vst [vmem:[#allocation30_spill] sm:$0xff] %v6434_v47 }
  0xfe   : > { %v6407_v29 = vpop.f32.mrf.mxu0  ;;  %v6470_v8 = vpop.f32.mrf.mxu1 }
  0xff   : > { %10637 = vst [vmem:[#allocation25_spill] sm:$0xff] %v6407_v29  ;;  %v1103_v50 = vperm.slane %v6407_v29, 0  ;;  %v1074_v52 = vrot.slane %v6407_v29, 2  ;;  %v1075_v53 = vrot.slane %v6407_v29, 3  ;;  %v1073_v54 = vrot.slane %v6407_v29, 1 }
 0x100   : > { %v1077_v60 = vrot.slane %v6407_v29, 5  ;;  %v1078_v61 = vrot.slane %v6407_v29, 6  ;;  %v1076_v62 = vrot.slane %v6407_v29, 4  ;;  %v1079_v4 = vrot.slane %v6407_v29, 7  ;;  %10648 = vst [vmem:[#allocation36_spill] sm:$0xff] %v6470_v8 }
 0x101   : > { %v1105_v57 = vperm.slane %v1074_v52, 0  ;;  %v1106_v58 = vperm.slane %v1075_v53, 0  ;;  %v1104_v59 = vperm.slane %v1073_v54, 0 }
 0x102   : > { %v1108_v0 = vperm.slane %v1077_v60, 0  ;;  %v1109_v1 = vperm.slane %v1078_v61, 0  ;;  %v1107_v2 = vperm.slane %v1076_v62, 0  ;;  %v1110_v5 = vperm.slane %v1079_v4, 0  ;;  %v6472_v10 = vpop.f32.mrf.mxu3  ;;  %v6485_v16 = vpop.f32.mrf.mxu2 }
 0x103   : > { %1857 = vrot.lane.b32.xlu1 %v6399_v24, %s6088_s30  ;;  %1205 = vrot.lane.b32.xlu0 %v1092_v25, %s6089_s21  ;;  %10649 = vst [vmem:[#allocation37_spill] sm:$0xff] %v6472_v10 }
 0x104   : > { %1203 = vrot.lane.b32.xlu2 %v1091_v26, %s6089_s21  ;;  %10652 = vst [vmem:[#allocation40_spill] sm:$0xff] %v6485_v16 }
 0x106   : > { %v6417_v37 = vpop.f32.mrf.mxu0  ;;  %v6491_v17 = vpop.f32.mrf.mxu1 }
 0x107   : > { %10639 = vst [vmem:[#allocation27_spill] sm:$0xff] %v6417_v37  ;;  %v1080_v13 = vrot.slane %v6417_v37, 1  ;;  %v1111_v14 = vperm.slane %v6417_v37, 0  ;;  %v1082_v18 = vrot.slane %v6417_v37, 3  ;;  %v1081_v20 = vrot.slane %v6417_v37, 2 }
 0x108   : > { %10653 = vst [vmem:[#allocation41_spill] sm:$0xff] %v6491_v17  ;;  %v1083_v21 = vrot.slane %v6417_v37, 4  ;;  %v1085_v28 = vrot.slane %v6417_v37, 6  ;;  %v1086_v33 = vrot.slane %v6417_v37, 7 }
 0x109   : > { %v1112_v15 = vperm.slane %v1080_v13, 0  ;;  %v1114_v25 = vperm.slane %v1082_v18, 0  ;;  %v1113_v26 = vperm.slane %v1081_v20, 0  ;;  %v6584_v18 = vld [vmem:[#allocation10 + $0x2] ss:$0 sm:$0xff] }
 0x10a   : > { %v1115_v27 = vperm.slane %v1083_v21, 0  ;;  %v1118_v39 = vperm.slane %v1086_v33, 0  ;;  %v6521_v44 = vpop.f32.mrf.mxu3  ;;  %v568_v21 = vld [vmem:[%s6289_s14 + $0x68] sm:$0xf] }
 0x10b   : > { %1213 = vrot.lane.b32.xlu1 %v1096_v31, %s6089_s21  ;;  %1897 = vrot.lane.b32.xlu0 %v6409_v30, %s6088_s30  ;;  %10660 = vst [vmem:[#allocation48_spill] sm:$0xff] %v6521_v44  ;;  %v1383_v33 = vunpack.c.l.bf16 %v568_v21 }
 0x10c   : > { %1209 = vrot.lane.b32.xlu2 %v1094_v32, %s6089_s21  ;;  %v1084_v32 = vrot.slane %v6417_v37, 5 }
 0x10e   : > { %v6429_v43 = vpop.f32.mrf.mxu0  ;;  %v6508_v34 = vpop.f32.mrf.mxu1  ;;  %v1116_v38 = vperm.slane %v1084_v32, 0 }
 0x10f   : > { %10640 = vst [vmem:[#allocation28_spill] sm:$0xff] %v6429_v43 }
 0x110   : > { %10656 = vst [vmem:[#allocation44_spill] sm:$0xff] %v6508_v34 }
 0x112   : > { %v6541_v54 = vpop.f32.mrf.mxu3 }
 0x113   : > { %1219 = vrot.lane.b32.xlu1 %v1099_v35, %s6089_s21  ;;  %1121 = vrot.lane.b32.xlu0 %v6397_v23, %s6090_s10  ;;  %10667 = vst [vmem:[#allocation55_spill] sm:$0xff] %v6541_v54 }
 0x114   : > { %1215 = vrot.lane.b32.xlu2 %v1097_v36, %s6089_s21  ;;  %v1117_v36 = vperm.slane %v1085_v28, 0 }
 0x116   : > { %v6442_v49 = vpop.f32.mrf.mxu0 }
 0x117   : > { %10643 = vst [vmem:[#allocation31_spill] sm:$0xff] %v6442_v49 }
 0x11b   : > { %1225 = vrot.lane.b32.xlu1 %v1102_v40, %s6089_s21  ;;  %1211 = vrot.lane.b32.xlu0 %v1095_v41, %s6089_s21  ;;  %v6515_v40 = vpop.f32.mrf.mxu2 }
 0x11c   : > { %1221 = vrot.lane.b32.xlu2 %v1100_v42, %s6089_s21  ;;  %10658 = vst [vmem:[#allocation46_spill] sm:$0xff] %v6515_v40 }
 0x11e   : > { %v6454_v56 = vpop.f32.mrf.mxu0 }
 0x11f   : > { %10645 = vst [vmem:[#allocation33_spill] sm:$0xff] %v6454_v56 }
 0x123   : > { %1899 = vrot.lane.b32.xlu1 %v6432_v45, %s6088_s30  ;;  %1217 = vrot.lane.b32.xlu0 %v1098_v46, %s6089_s21  ;;  %v6523_v46 = vpop.f32.mrf.mxu1  ;;  %v6539_v53 = vpop.f32.mrf.mxu2 }
 0x124   : > { %1859 = vrot.lane.b32.xlu2 %v6434_v47, %s6088_s30  ;;  %10661 = vst [vmem:[#allocation49_spill] sm:$0xff] %v6523_v46 }
 0x125   : > { %10666 = vst [vmem:[#allocation54_spill] sm:$0xff] %v6539_v53 }
 0x126   : > { %v6464_v3 = vpop.f32.mrf.mxu0 }
 0x127   : > { %10647 = vst [vmem:[#allocation35_spill] sm:$0xff] %v6464_v3 }
 0x12b   : > { %1123 = vrot.lane.b32.xlu1 %v6407_v29, %s6090_s10  ;;  %1223 = vrot.lane.b32.xlu0 %v1101_v51, %s6089_s21  ;;  %v6559_v62 = vpop.f32.mrf.mxu2 }
 0x12c   : > { %1227 = vrot.lane.b32.xlu2 %v1103_v50, %s6089_s21  ;;  %10672 = vst [vmem:[#allocation60_spill] sm:$0xff] %v6559_v62 }
 0x12e   : > { %v6479_v11 = vpop.f32.mrf.mxu0 }
 0x12f   : > { %10650 = vst [vmem:[#allocation38_spill] sm:$0xff] %v6479_v11 }
 0x133   : > { %1231 = vrot.lane.b32.xlu1 %v1105_v57, %s6089_s21  ;;  %1229 = vrot.lane.b32.xlu0 %v1104_v59, %s6089_s21  ;;  %v6543_v57 = vpop.f32.mrf.mxu1 }
 0x134   : > { %1233 = vrot.lane.b32.xlu2 %v1106_v58, %s6089_s21  ;;  %10668 = vst [vmem:[#allocation56_spill] sm:$0xff] %v6543_v57 }
 0x136   : > { %v6498_v22 = vpop.f32.mrf.mxu0 }
 0x137   : > { %10654 = vst [vmem:[#allocation42_spill] sm:$0xff] %v6498_v22 }
 0x13b   : > { %1237 = vrot.lane.b32.xlu1 %v1108_v0, %s6089_s21  ;;  %1235 = vrot.lane.b32.xlu0 %v1107_v2, %s6089_s21  ;;  %v6561_v0 = vpop.f32.mrf.mxu3 }
 0x13c   : > { %1239 = vrot.lane.b32.xlu2 %v1109_v1, %s6089_s21  ;;  %10673 = vst [vmem:[#allocation61_spill] sm:$0xff] %v6561_v0  ;;  %v6569_v1 = vpop.f32.mrf.mxu1 }
 0x13d   : > { %10674 = vst [vmem:[#allocation62_spill] sm:$0xff] %v6569_v1 }
 0x13e   : > { %v6510_v35 = vpop.f32.mrf.mxu0 }
 0x13f   : > { %10657 = vst [vmem:[#allocation45_spill] sm:$0xff] %v6510_v35 }
 0x143   : > { %1125 = vrot.lane.b32.xlu1 %v6417_v37, %s6090_s10  ;;  %1241 = vrot.lane.b32.xlu0 %v1110_v5, %s6089_s21  ;;  %v6599_v28 = vpop.f32.mrf.mxu3 }
 0x144   : > { %1901 = vrot.lane.b32.xlu2 %v6472_v10, %s6088_s30  ;;  %10679 = vst [vmem:[#allocation67_spill] sm:$0xff] %v6599_v28 }
 0x145   : > { %v6481_v12 = vpop.permute.xlu2 %1895 }
 0x146   : > { %10651 = vst [vmem:[#allocation39_spill] sm:$0xff] %v6481_v12  ;;  %v6525_v48 = vpop.f32.mrf.mxu0 }
 0x147   : > { %10662 = vst [vmem:[#allocation50_spill] sm:$0xff] %v6525_v48 }
 0x14b   : > { %1243 = vrot.lane.b32.xlu1 %v1111_v14, %s6089_s21  ;;  %1861 = vrot.lane.b32.xlu0 %v6485_v16, %s6088_s30 }
 0x14c   : > { %1245 = vrot.lane.b32.xlu2 %v1112_v15, %s6089_s21 }
 0x14e   : > { %v6494_v19 = vpop.permute.xlu2 %1195  ;;  %v6551_v58 = vpop.f32.mrf.mxu0 }
 0x14f   : > { %10669 = vst [vmem:[#allocation57_spill] sm:$0xff] %v6551_v58 }
 0x153   : > { %1249 = vrot.lane.b32.xlu1 %v1114_v25, %s6089_s21  ;;  %1247 = vrot.lane.b32.xlu0 %v1113_v26, %s6089_s21  ;;  %v6588_v25 = vpop.f32.mrf.mxu2 }
 0x154   : > { %1251 = vrot.lane.b32.xlu2 %v1115_v27, %s6089_s21  ;;  %10678 = vst [vmem:[#allocation66_spill] sm:$0xff] %v6588_v25  ;;  %v6593_v27 = vld [vmem:[#allocation10 + $0x3] ss:$0 sm:$0xff] }
 0x156   : > { %v6504_v31 = vpop.permute.xlu2 %1197  ;;  %v6579_v14 = vpop.f32.mrf.mxu0 }
 0x157   : > { %10655 = vst [vmem:[#allocation43_spill] sm:$0xff] %v6504_v31 }
 0x158   : > { %10677 = vst [vmem:[#allocation65_spill] sm:$0xff] %v6579_v14 }
 0x15b   : > { %1255 = vrot.lane.b32.xlu1 %v1117_v36, %s6089_s21  ;;  %1253 = vrot.lane.b32.xlu0 %v1116_v38, %s6089_s21 }
 0x15c   : > { %1257 = vrot.lane.b32.xlu2 %v1118_v39, %s6089_s21 }
 0x15d   : > { %v6517_v41 = vpop.permute.xlu0 %1855 }
 0x15e   : > { %v6519_v42 = vpop.permute.xlu2 %1203  ;;  %v6609_v17 = vpop.f32.mrf.mxu0 }
 0x15f   : > { %10659 = vst [vmem:[#allocation47_spill] sm:$0xff] %v6519_v42 }
 0x160   : > { %10683 = vst [vmem:[#allocation71_spill] sm:$0xff] %v6609_v17 }
 0x163   : > { %1863 = vrot.lane.b32.xlu1 %v6515_v40, %s6088_s30  ;;  %1903 = vrot.lane.b32.xlu0 %v6521_v44, %s6088_s30 }
 0x164   : > { %1835 = vrot.lane.b32.xlu2 %v6508_v34, %s6088_s30 }
 0x165   : > { %v6533_v50 = vpop.permute.xlu1 %1201  ;;  %v6535_v51 = vpop.permute.xlu0 %1119 }
 0x166   : > { %10663 = vst [vmem:[#allocation51_spill] sm:$0xff] %v6533_v50  ;;  %v6537_v52 = vpop.permute.xlu2 %1209  ;;  %v1157_v4 = vadd.f32 %v6535_v51, %v6434_v47  ;;  %v1155_v21 = vadd.f32 %v6535_v51, %v6367_v6  ;;  %v566_v6 = vld [vmem:[%s6289_s14 + $0x60] sm:$0xf]  ;;  %v6641_v23 = vpop.f32.mrf.mxu0 }
 0x167   : > { %10664 = vst [vmem:[#allocation52_spill] sm:$0xff] %v6535_v51 }
 0x168   : > { %10665 = vst [vmem:[#allocation53_spill] sm:$0xff] %v6537_v52 }
 0x169   : > { %10689 = vst [vmem:[#allocation77_spill] sm:$0xff] %v6641_v23 }
 0x16b   : > { %1905 = vrot.lane.b32.xlu1 %v6541_v54, %s6088_s30  ;;  %1807 = vrot.lane.b32.xlu0 %v6429_v43, %s6088_s30 }
 0x16c   : > { %1865 = vrot.lane.b32.xlu2 %v6539_v53, %s6088_s30 }
 0x16d   : > { %v6553_v59 = vpop.permute.xlu1 %1207  ;;  %v6555_v60 = vpop.permute.xlu0 %1199 }
 0x16e   : > { %10670 = vst [vmem:[#allocation58_spill] sm:$0xff] %v6555_v60  ;;  %v6557_v61 = vpop.permute.xlu2 %1215 }
 0x16f   : > { %10671 = vst [vmem:[#allocation59_spill] sm:$0xff] %v6557_v61 }
 0x173   : > { %1809 = vrot.lane.b32.xlu1 %v6442_v49, %s6088_s30  ;;  %1837 = vrot.lane.b32.xlu0 %v6523_v46, %s6088_s30 }
 0x174   : > { %1907 = vrot.lane.b32.xlu2 %v6561_v0, %s6088_s30 }
 0x175   : > { %v6571_v2 = vpop.permute.xlu1 %1857  ;;  %v6575_v5 = vpop.permute.xlu0 %1205 }
 0x176   : > { %10675 = vst [vmem:[#allocation63_spill] sm:$0xff] %v6571_v2  ;;  %v6577_v13 = vpop.permute.xlu2 %1221 }
 0x177   : > { %10676 = vst [vmem:[#allocation64_spill] sm:$0xff] %v6575_v5  ;;  %v6582_v15 = vadd.f32 %v6577_v13, %v1157_v4 }
 0x179   : > { %v1447_v20 = vmul.f32 0.999995, %v6582_v15 }
 0x17b   : > { %v1512_v26 = vmul.f32 %v6584_v18, %v1447_v20  ;;  %1839 = vrot.lane.b32.xlu1 %v6543_v57, %s6088_s30  ;;  %1867 = vrot.lane.b32.xlu0 %v6559_v62, %s6088_s30  ;;  %v6607_v20 = vpop.f32.mrf.mxu1 }
 0x17c   : > { %1811 = vrot.lane.b32.xlu2 %v6454_v56, %s6088_s30  ;;  %10682 = vst [vmem:[#allocation70_spill] sm:$0xff] %v6607_v20 }
 0x17d   : > { %v6601_v32 = vpop.permute.xlu1 %1213  ;;  %v1577_v36 = vadd.f32 %v6593_v27, %v1512_v26  ;;  %v6604_v38 = vpop.permute.xlu0 %1897 }
 0x17e   : > { %10680 = vst [vmem:[#allocation68_spill] sm:$0xff] %v6601_v32  ;;  %v1860_v39 = vpop.permute.xlu2 %1859  ;;  %v6619_v26 = vpop.f32.mrf.mxu2 }
 0x17f   : > { %10681 = vst [vmem:[#allocation69_spill] sm:$0xff] %v6604_v38  ;;  %v1641_v4 = vmax.f32 %v1577_v36, 0.0 }
 0x180   : > { %10684 = vst [vmem:[#allocation72_spill] sm:$0xff] %v6619_v26 }
 0x181   : > { %v1705_v63 = vadd.f32 %v1641_v4, %v1383_v33  ;;  %v6634_v4 = vpop.f32.mrf.mxu3 }
 0x182   : > { %10687 = vst [vmem:[#allocation75_spill] sm:$0xff] %v6634_v4 }
 0x183   : > { %v2025_v8 = vmul.f32 %v1860_v39, %v1705_v63  ;;  %1869 = vrot.lane.b32.xlu1 %v6588_v25, %s6088_s30  ;;  %1909 = vrot.lane.b32.xlu0 %v6599_v28, %s6088_s30  ;;  %v6638_v47 = vpop.f32.mrf.mxu1 }
 0x184   : > { %1841 = vrot.lane.b32.xlu2 %v6569_v1, %s6088_s30  ;;  %10688 = vst [vmem:[#allocation76_spill] sm:$0xff] %v6638_v47 }
 0x185   : > { %2090 = vst.msk [vmem:[%s6621_s4 + $0xd0] sm:$0xff] %vm2063_vm3, %v2025_v8  ;;  %v6625_v63 = vpop.permute.xlu1 %1219  ;;  %v6630_v36 = vpop.permute.xlu0 %1121  ;;  %v1381_v8 = vunpack.c.l.bf16 %v566_v6 }
 0x186   : > { %10685 = vst [vmem:[#allocation73_spill] sm:$0xff] %v6625_v63  ;;  %v6628_v33 = vadd.f32 %v6625_v63, %v1155_v21  ;;  %v6632_v39 = vpop.permute.xlu2 %1227  ;;  %v6656_v30 = vpop.f32.mrf.mxu2  ;;  %v1135_v63 = vadd.f32 %v6535_v51, %v6479_v11 }
 0x187   : > { %10686 = vst [vmem:[#allocation74_spill] sm:$0xff] %v6632_v39 }
 0x188   : > { %v1445_v55 = vmul.f32 0.999995, %v6628_v33  ;;  %10691 = vst [vmem:[#allocation79_spill] sm:$0xff] %v6656_v30 }
 0x189   : > { %v6658_v7 = vpop.f32.mrf.mxu3 }
 0x18a   : > { %v1510_v29 = vmul.f32 %v6584_v18, %v1445_v55  ;;  %10692 = vst [vmem:[#allocation80_spill] sm:$0xff] %v6658_v7 }
 0x18b   : > { %1911 = vrot.lane.b32.xlu1 %v6634_v4, %s6088_s30  ;;  %1813 = vrot.lane.b32.xlu0 %v6464_v3, %s6088_s30 }
 0x18c   : > { %v1575_v21 = vadd.f32 %v6593_v27, %v1510_v29  ;;  %1871 = vrot.lane.b32.xlu2 %v6619_v26, %s6088_s30  ;;  %v6663_v29 = vpop.f32.mrf.mxu1 }
 0x18d   : > { %v6650_v37 = vpop.permute.xlu1 %1225  ;;  %v6652_v38 = vpop.permute.xlu0 %1211  ;;  %10693 = vst [vmem:[#allocation81_spill] sm:$0xff] %v6663_v29 }
 0x18e   : > { %v1639_v9 = vmax.f32 %v1575_v21, 0.0  ;;  %v6654_v55 = vpop.permute.xlu2 %1233  ;;  %v6681_v2 = vpop.f32.mrf.mxu2 }
 0x18f   : > { %10690 = vst [vmem:[#allocation78_spill] sm:$0xff] %v6654_v55  ;;  %v1151_v55 = vadd.f32 %v6535_v51, %v6663_v29 }
 0x190   : > { %v1703_v12 = vadd.f32 %v1639_v9, %v1381_v8  ;;  %v1145_v9 = vadd.f32 %v6535_v51, %v6508_v34  ;;  %v6673_v8 = vpop.f32.mrf.mxu0  ;;  %10696 = vst [vmem:[#allocation84_spill] sm:$0xff] %v6681_v2  ;;  %v1133_v34 = vadd.f32 %v6535_v51, %v6454_v56 }
 0x191   : > { %10694 = vst [vmem:[#allocation82_spill] sm:$0xff] %v6673_v8  ;;  %v1143_v24 = vadd.f32 %v6535_v51, %v6673_v8  ;;  %v6692_v3 = vpop.f32.mrf.mxu3 }
 0x192   : > { %v2023_v6 = vmul.f32 %v6517_v41, %v1703_v12  ;;  %10697 = vst [vmem:[#allocation85_spill] sm:$0xff] %v6692_v3 }
 0x193   : > { %1815 = vrot.lane.b32.xlu1 %v6479_v11, %s6088_s30  ;;  %1843 = vrot.lane.b32.xlu0 %v6607_v20, %s6088_s30  ;;  %v1311_v11 = vadd.f32 %v6557_v61, %v1151_v55  ;;  %v6705_v42 = vadd.f32 %v6553_v59, %v1143_v24 }
 0x194   : > { %2088 = vst.msk [vmem:[%s6621_s4 + $0xc0] sm:$0xff] %vm2063_vm3, %v2023_v6  ;;  %1913 = vrot.lane.b32.xlu2 %v6658_v7, %s6088_s30  ;;  %v1305_v6 = vadd.f32 %v6537_v52, %v1145_v9  ;;  %v1131_v9 = vadd.f32 %v6535_v51, %v6429_v43  ;;  %v6716_v61 = vpop.f32.mrf.mxu1  ;;  %v6748_v7 = vld [vmem:[%s6289_s14] sm:$0xff]  }
 0x195   : > { %v6675_v21 = vpop.permute.xlu1 %1899  ;;  %v6677_v12 = vpop.permute.xlu0 %1217  ;;  %10698 = vst [vmem:[#allocation86_spill] sm:$0xff] %v6716_v61 }
 0x196   : > { %v6679_v41 = vpop.permute.xlu2 %1239  ;;  %v2142_v56 = vsub.f32 0.0, %v1305_v6  ;;  %v1435_v24 = vmul.f32 0.999995, %v1305_v6  ;;  %v6725_v39 = vpop.f32.mrf.mxu2 }
 0x197   : > { %10695 = vst [vmem:[#allocation83_spill] sm:$0xff] %v6679_v41  ;;  %v1295_v41 = vadd.f32 %v6555_v60, %v1135_v63  ;;  %v1293_v63 = vadd.f32 %v6504_v31, %v1133_v34  ;;  %v6719_v60 = vadd.f32 %v6494_v19, %v1131_v9  ;;  %v2140_v31 = vsub.f32 0.0, %v6705_v42 }
 0x198   : > { %v2220_v34 = vmul.f32 1.442695, %v2142_v56  ;;  %10699 = vst [vmem:[#allocation87_spill] sm:$0xff] %v6725_v39  ;;  %v1500_v6 = vmul.f32 %v6584_v18, %v1435_v24  ;;  %v6737_v56 = vld [vmem:[%s6289_s14 + $0x38] sm:$0xff]  }
 0x199   : > { %v1423_v8 = vmul.f32 0.999995, %v1293_v63  ;;  %v1421_v9 = vmul.f32 0.999995, %v6719_v60  ;;  %10700 = vst [vmem:[#allocation88_spill] sm:$0xff] %v6737_v56  ;;  %v2130_v24 = vsub.f32 0.0, %v1293_v63  ;;  %v1357_v63 = vunpack.c.l.bf16 %v6748_v7 }
 0x19a   : > { %5518 = vpow2.f32 %v2220_v34 }
 0x19b   : > { %1845 = vrot.lane.b32.xlu1 %v6638_v47, %s6088_s30  ;;  %1873 = vrot.lane.b32.xlu0 %v6656_v30, %s6088_s30  ;;  %v1141_v47 = vadd.f32 %v6535_v51, %v6609_v17  ;;  %v2132_v30 = vsub.f32 0.0, %v1295_v41  ;;  %v1158_v17 = vadd.f32 %v6630_v36, %v6485_v16  ;;  %v1486_v34 = vmul.f32 %v6584_v18, %v1421_v9 }
 0x19c   : > { %1817 = vrot.lane.b32.xlu2 %v6498_v22, %s6088_s30  ;;  %v2148_v22 = vsub.f32 0.0, %v1311_v11  ;;  %v6761_v46 = vpop.f32.mrf.mxu1  ;;  %v2196_v14 = vmul.f32 1.442695, %v2130_v24  ;;  %v1425_v16 = vmul.f32 0.999995, %v1295_v41  ;;  %v2128_v41 = vsub.f32 0.0, %v6719_v60 }
 0x19d   : > { %v6707_v50 = vpop.permute.xlu1 %1123  ;;  %v6712_v43 = vpop.permute.xlu0 %1223  ;;  %v6722_v28 = vadd.f32 %v6575_v5, %v1141_v47  ;;  %v2200_v23 = vmul.f32 1.442695, %v2132_v30  ;;  %v2216_v5 = vmul.f32 1.442695, %v2140_v31  ;;  %v1371_v31 = vunpack.c.l.bf16 %v6737_v56  ;;  %10705 = vst [vmem:[#allocation93_spill] sm:$0xff] %v6761_v46 }
 0x19e   : > { %v6714_v55 = vpop.permute.xlu2 %1901  ;;  %v2232_v26 = vmul.f32 1.442695, %v2148_v22  ;;  %v6739_v30 = vpop.f32.mrf.mxu3  ;;  %v1488_v22 = vmul.f32 %v6584_v18, %v1423_v8  ;;  %v1149_v56 = vadd.f32 %v6535_v51, %v6607_v20  ;;  %v6795_v60 = vadd.f32 %v6535_v51, %v6515_v40 }
 0x19f   : > { %v2138_v47 = vsub.f32 0.0, %v6722_v28  ;;  %10701 = vst [vmem:[#allocation89_spill] sm:$0xff] %v6739_v30  ;;  %5520 = vpow2.f32 %v2200_v23 }
 0x1a0   : > { %5522 = vpow2.f32 %v2232_v26  ;;  %v6768_v26 = vadd.f32 %v6577_v13, %v1158_v17  ;;  %v5519_v9 = vpop.eup %5518  ;;  %v6781_v17 = vadd.f32 %v6535_v51, %v6543_v57 }
 0x1a1   : > { %5524 = vpow2.f32 %v2216_v5  ;;  %v1551_v5 = vadd.f32 %v6593_v27, %v1486_v34  ;;  %v2334_v34 = vadd.f32 1.0, %v5519_v9  ;;  %v6818_v9 = vmul.f32 0.999995, %v6705_v42 }
 0x1a3   : > { %1875 = vrot.lane.b32.xlu1 %v6681_v2, %s6088_s30  ;;  %1915 = vrot.lane.b32.xlu0 %v6692_v3, %s6088_s30  ;;  %v6744_v2 = vld [vmem:[%s6289_s14 + $0x8] sm:$0xff]   ;;  %v2154_v3 = vsub.f32 0.0, %v6582_v15  ;;  %v1565_v15 = vadd.f32 %v6593_v27, %v1500_v6  ;;  %v6791_v6 = vpop.f32.mrf.mxu2  ;;  %10713 = vst [vmem:[#allocation101_spill] sm:$0xff] %v6818_v9 }
 0x1a4   : > { %1847 = vrot.lane.b32.xlu2 %v6663_v29, %s6088_s30  ;;  %10703 = vst [vmem:[#allocation91_spill] sm:$0xff] %v6744_v2  ;;  %v1359_v8 = vunpack.c.l.bf16 %v6744_v2  ;;  %v6772_v2 = vadd.f32 %v6535_v51, %v6559_v62  ;;  %v6800_v62 = vmul.f32 %v6584_v18, %v1425_v16  ;;  %v1615_v16 = vmax.f32 %v1551_v5, 0.0 }
 0x1a5   : > { %v6741_v4 = vpop.permute.xlu1 %1231  ;;  %v6751_v52 = vpop.permute.xlu0 %1229  ;;  %v2244_v23 = vmul.f32 1.442695, %v2154_v3  ;;  %v1309_v3 = vadd.f32 %v6601_v32, %v1149_v56  ;;  %10706 = vst [vmem:[#allocation94_spill] sm:$0xff] %v6791_v6  ;;  %v1629_v56 = vmax.f32 %v1565_v15, 0.0  ;;  %v1448_v32 = vmul.f32 0.999995, %v6768_v26 }
 0x1a6   : > { %10702 = vst [vmem:[#allocation90_spill] sm:$0xff] %v6741_v4  ;;  %v6753_v29 = vpop.permute.xlu2 %1245  ;;  %v2212_v4 = vmul.f32 1.442695, %v2138_v47  ;;  %v1441_v47 = vmul.f32 0.999995, %v1311_v11  ;;  %v6785_v11 = vadd.f32 %v6535_v51, %v6761_v46  ;;  %v5521_v13 = vpop.eup %5520 }
 0x1a7   : > { %10704 = vst [vmem:[#allocation92_spill] sm:$0xff] %v6751_v52  ;;  %v1553_v52 = vadd.f32 %v6593_v27, %v1488_v22  ;;  %v5523_v24 = vpop.eup %5522  ;;  %v2192_v15 = vmul.f32 1.442695, %v2128_v41  ;;  %v1513_v42 = vmul.f32 %v6584_v18, %v1448_v32  ;;  %v2152_v32 = vsub.f32 0.0, %v6628_v33 }
 0x1a8   : > { %5526 = vpow2.f32 %v2212_v4  ;;  %10708 = vst [vmem:[#allocation96_spill] sm:$0xff] %v6800_v62  ;;  %v5525_v40 = vpop.eup %5524  ;;  %v2146_v62 = vsub.f32 0.0, %v1309_v3  ;;  %v2340_v51 = vadd.f32 1.0, %v5523_v24 }
 0x1a9   : > { %v1617_v22 = vmax.f32 %v1553_v52, 0.0  ;;  %5528 = vpow2.f32 %v2196_v14  ;;  %v1160_v52 = vadd.f32 %v6630_v36, %v6539_v53  ;;  %v6815_v14 = vld [vmem:[%s6289_s14 + $0x6c] sm:$0xff]   ;;  %v2332_v5 = vadd.f32 1.0, %v5525_v40 }
 0x1aa   : > { %5530 = vpow2.f32 %v2244_v23  ;;  %v2324_v23 = vadd.f32 1.0, %v5521_v13 }
 0x1ab   : > { %1917 = vrot.lane.b32.xlu1 %v6739_v30, %s6088_s30  ;;  %1819 = vrot.lane.b32.xlu0 %v6510_v35, %s6088_s30  ;;  %v6821_v30 = vpop.f32.mrf.mxu0  ;;  %v6828_v53 = vadd.f32 %v1617_v22, %v1359_v8  ;;  %5532 = vrcp.f32 %v2334_v34  ;;  %v1177_v34 = vadd.f32 %v6707_v50, %v6432_v45  ;;  %v6869_v41 = vpop.f32.mrf.mxu2  ;;  %v2240_v45 = vmul.f32 1.442695, %v2152_v32 }
 0x1ac   : > { %1877 = vrot.lane.b32.xlu2 %v6725_v39, %s6088_s30  ;;  %v6807_v39 = vpop.f32.mrf.mxu3  ;;  %10714 = vst [vmem:[#allocation102_spill] sm:$0xff] %v6821_v30  ;;  %v1144_v24 = vadd.f32 %v6630_v36, %v6821_v30  ;;  %5534 = vpow2.f32 %v2192_v15 }
 0x1ad   : > { %v6797_v4 = vpop.permute.xlu1 %1237  ;;  %v6802_v20 = vpop.permute.xlu0 %1235  ;;  %10711 = vst [vmem:[#allocation99_spill] sm:$0xff] %v6807_v39  ;;  %5536 = vrcp.f32 %v2324_v23 }
 0x1ae   : > { %10707 = vst [vmem:[#allocation95_spill] sm:$0xff] %v6797_v4  ;;  %v6804_v57 = vpop.permute.xlu2 %1251  ;;  %v6810_v4 = vmul.f32 %v6584_v18, %v1441_v47  ;;  %v6824_v47 = vadd.f32 %v6712_v43, %v1160_v52  ;;  %v5527_v35 = vpop.eup %5526  ;;  %5538 = vrcp.f32 %v2340_v51  ;;  %v1578_v52 = vadd.f32 %v6593_v27, %v1513_v42 }
 0x1af   : > { %10709 = vst [vmem:[#allocation97_spill] sm:$0xff] %v6802_v20  ;;  %v1431_v20 = vmul.f32 0.999995, %v6722_v28  ;;  %v6832_v13 = vpop.eup %5528  ;;  %v1439_v28 = vmul.f32 0.999995, %v1309_v3  ;;  %v2330_v3 = vadd.f32 1.0, %v5527_v35  ;;  %5540 = vrcp.f32 %v2332_v5 }
 0x1b0   : > { %10710 = vst [vmem:[#allocation98_spill] sm:$0xff] %v6804_v57  ;;  %v5531_v8 = vpop.eup %5530  ;;  %v6863_v15 = vadd.f32 %v6553_v59, %v1144_v24  ;;  %v1181_v42 = vadd.f32 %v6707_v50, %v6561_v0  ;;  %v1162_v24 = vadd.f32 %v6630_v36, %v6588_v25 }
 0x1b1   : > { %10712 = vst [vmem:[#allocation100_spill] sm:$0xff] %v6810_v4  ;;  %v6826_v4 = vadd.f32 %v1629_v56, %v1371_v31  ;;  %v6838_v31 = vadd.f32 %v1615_v16, %v1357_v63  ;;  %v6841_v40 = vmul.f32 %v6584_v18, %v1431_v20  ;;  %v2228_v56 = vmul.f32 1.442695, %v2146_v62  ;;  %v6867_v5 = vpop.eup %5532 }
 0x1b2   : > { %v1450_v63 = vmul.f32 0.999995, %v6824_v47  ;;  %v2346_v51 = vadd.f32 1.0, %v5531_v8  ;;  %v6860_v35 = vmul.f32 %v6584_v18, %v1439_v28  ;;  %10718 = vst [vmem:[#allocation106_spill] sm:$0xff] %v6863_v15  ;;  %v6877_v28 = vpop.eup %5534  ;;  %v1148_v16 = vadd.f32 %v6630_v36, %v6569_v1 }
 0x1b3   : > { %1821 = vrot.lane.b32.xlu1 %v6525_v48, %s6088_s30  ;;  %10715 = vst [vmem:[#allocation103_spill] sm:$0xff] %v6841_v40  ;;  %1849 = vrot.lane.b32.xlu0 %v6716_v61, %s6088_s30  ;;  %5542 = vpow2.f32 %v2228_v56  ;;  %v6885_v32 = vpop.eup %5536  ;;  %v2141_v25 = vsub.f32 0.0, %v6863_v15 }
 0x1b4   : > { %1919 = vrot.lane.b32.xlu2 %v6807_v39, %s6088_s30  ;;  %10717 = vst [vmem:[#allocation105_spill] sm:$0xff] %v6860_v35  ;;  %v6879_v59 = vpop.f32.mrf.mxu3  ;;  %5544 = vrcp.f32 %v2330_v3  ;;  %v1642_v3 = vmax.f32 %v1578_v52, 0.0  ;;  %v6894_v9 = vpop.eup %5538  ;;  %v6931_v48 = vadd.f32 %v6652_v38, %v1148_v16 }
 0x1b5   : > { %v6849_v22 = vpop.permute.xlu1 %1125  ;;  %v1242_v20 = vpop.permute.xlu0 %1241  ;;  %10720 = vst [vmem:[#allocation108_spill] sm:$0xff] %v6867_v5  ;;  %5546 = vrcp.f32 %v2346_v51  ;;  %v2218_v35 = vmul.f32 1.442695, %v2141_v25 }
 0x1b6   : > { %v1178_v62 = vadd.f32 %v6849_v22, %v6472_v10  ;;  %v6855_v33 = vpop.permute.xlu2 %1257  ;;  %v6865_v23 = vadd.f32 %v1242_v20, %v1177_v34  ;;  %v6871_v10 = vpop.f32.mrf.mxu1  ;;  %10723 = vst [vmem:[#allocation111_spill] sm:$0xff] %v6879_v59  ;;  %v1515_v34 = vmul.f32 %v6584_v18, %v1450_v63  ;;  %5548 = vpow2.f32 %v2240_v45 }
 0x1b7   : > { %10716 = vst [vmem:[#allocation104_spill] sm:$0xff] %v6855_v33  ;;  %v6899_v63 = vadd.f32 %v6630_v36, %v6871_v10  ;;  %v6907_v1 = vpop.eup %5540  ;;  %5550 = vpow2.f32 %v2218_v35 }
 0x1b8   : > { %10719 = vst [vmem:[#allocation107_spill] sm:$0xff] %v6865_v23  ;;  %v6875_v8 = vadd.f32 %v1242_v20, %v1178_v62  ;;  %v1467_v56 = vmul.f32 0.999995, %v6865_v23  ;;  %v6890_v20 = vadd.f32 %v6753_v29, %v1181_v42  ;;  %v588_v62 = vld [vmem:[%s6289_s14 + $0xb8] sm:$0xff]   ;;  %v6905_v42 = vld [vmem:[%s6289_s14 + $0x44] sm:$0xff]  }
 0x1b9   : > { %10721 = vst [vmem:[#allocation109_spill] sm:$0xff] %v6871_v10  ;;  %v5543_v40 = vpop.eup %5542  ;;  %v1404_v33 = vunpack.c.h.bf16 %v588_v62 }
 0x1ba   : > { %10722 = vst [vmem:[#allocation110_spill] sm:$0xff] %v6875_v8  ;;  %v1468_v0 = vmul.f32 0.999995, %v6875_v8  ;;  %v1532_v23 = vmul.f32 %v6584_v18, %v1467_v56  ;;  %v1132_v56 = vadd.f32 %v6630_v36, %v6442_v49  ;;  %v1403_v8 = vunpack.c.l.bf16 %v588_v62 }
 0x1bb   : > { %10724 = vst [vmem:[#allocation112_spill] sm:$0xff] %v6885_v32  ;;  %1851 = vrot.lane.b32.xlu1 %v6761_v46, %s6088_s30  ;;  %1879 = vrot.lane.b32.xlu0 %v6791_v6, %s6088_s30  ;;  %v1321_v46 = vadd.f32 %v6650_v37, %v6772_v2  ;;  %v6927_v2 = vpop.eup %5544  ;;  %v1307_v62 = vadd.f32 %v6652_v38, %v6781_v17  ;;  %v6945_v32 = vpop.f32.mrf.mxu2  ;;  %v2338_v30 = vadd.f32 1.0, %v5543_v40 }
 0x1bc   : > { %10725 = vst [vmem:[#allocation113_spill] sm:$0xff] %v6890_v20  ;;  %v1533_v52 = vmul.f32 %v6584_v18, %v1468_v0  ;;  %1823 = vrot.lane.b32.xlu2 %v6551_v58, %s6088_s30  ;;  %v1597_v15 = vadd.f32 %v6593_v27, %v1532_v23  ;;  %v1580_v0 = vadd.f32 %v6593_v27, %v1515_v34 }
 0x1bd   : > { %10726 = vst [vmem:[#allocation114_spill] sm:$0xff] %v6894_v9  ;;  %v6920_v45 = vpop.permute.xlu1 %1243  ;;  %v1471_v9 = vmul.f32 0.999995, %v6890_v20  ;;  %v1862_v61 = vpop.permute.xlu0 %1861  ;;  %v1322_v23 = vadd.f32 %v6650_v37, %v1162_v24  ;;  %v6940_v20 = vld [vmem:[%s6289_s14 + $0x74] sm:$0xff]   ;;  %v2158_v25 = vsub.f32 0.0, %v1321_v46  ;;  %5552 = vrcp.f32 %v2338_v30 }
 0x1be   : > { %10727 = vst [vmem:[#allocation115_spill] sm:$0xff] %v6907_v1  ;;  %v1598_v51 = vadd.f32 %v6593_v27, %v1533_v52  ;;  %v10728_v1 = vunpack.c.l.bf16 %v6815_v14  ;;  %v1836_v5 = vpop.permute.xlu2 %1835  ;;  %v1661_v34 = vmax.f32 %v1597_v15, 0.0  ;;  %v6937_v52 = vadd.f32 %v6712_v43, %v6795_v60 }
 0x1bf   : > { %10729 = vst [vmem:[#allocation116_spill] sm:$0xff] %v6927_v2  ;;  %v6942_v2 = vpop.eup %5546  ;;  %v1386_v16 = vunpack.c.l.bf16 %v6940_v20  ;;  %v1644_v24 = vmax.f32 %v1580_v0, 0.0  ;;  %v1536_v38 = vmul.f32 %v6584_v18, %v1471_v9  ;;  %v6951_v43 = vadd.f32 %v6494_v19, %v1132_v56 }
 0x1c0   : > { %v1706_v49 = vadd.f32 %v1642_v3, %v10728_v1  ;;  %v1662_v1 = vmax.f32 %v1598_v51, 0.0  ;;  %10730 = vst [vmem:[#allocation117_spill] sm:$0xff] %v6942_v2  ;;  %v1725_v37 = vadd.f32 %v1661_v34, %v1403_v8  ;;  %v5549_v15 = vpop.eup %5548  ;;  %v1438_v60 = vmul.f32 0.999995, %v6931_v48 }
 0x1c1   : > { %v1179_v51 = vadd.f32 %v6707_v50, %v6521_v44  ;;  %v1449_v9 = vmul.f32 0.999995, %v6937_v52  ;;  %v2013_v40 = vmul.f32 %v1836_v5, %v6826_v4  ;;  %v1451_v4 = vmul.f32 0.999995, %v1321_v46  ;;  %v6987_v46 = vld [vmem:[%s6289_s14 + $0xc8] sm:$0xff]  }
 0x1c2   : > { %v2026_v3 = vmul.f32 %v1862_v61, %v1706_v49  ;;  %v1726_v17 = vadd.f32 %v1662_v1, %v1404_v33  ;;  %v6953_v49 = vpop.f32.mrf.mxu3  ;;  %v2159_v61 = vsub.f32 0.0, %v1322_v23  ;;  %v2045_v8 = vmul.f32 %v6675_v21, %v1725_v37 }
 0x1c3   : > { %10731 = vst [vmem:[#allocation118_spill] sm:$0xff] %v6953_v49  ;;  %1881 = vrot.lane.b32.xlu1 %v6869_v41, %s6088_s30  ;;  %1921 = vrot.lane.b32.xlu0 %v6879_v59, %s6088_s30  ;;  %v2252_v21 = vmul.f32 1.442695, %v2158_v25  ;;  %v2144_v33 = vsub.f32 0.0, %v1307_v62  ;;  %v6971_v35 = vadd.f32 %v6920_v45, %v1179_v51  ;;  %v1180_v5 = vadd.f32 %v6849_v22, %v6541_v54  ;;  %v5551_v51 = vpop.eup %5550 }
 0x1c4   : > { %2091 = vst.msk [vmem:[%s6621_s4 + $0xd8] sm:$0xff] %vm2063_vm3, %v2026_v3  ;;  %v2046_v19 = vmul.f32 %v6714_v55, %v1726_v17  ;;  %1853 = vrot.lane.b32.xlu2 %v6871_v10, %s6088_s30  ;;  %v1708_v55 = vadd.f32 %v1644_v24, %v1386_v16  ;;  %v1601_v1 = vadd.f32 %v6593_v27, %v1536_v38  ;;  %v2254_v3 = vmul.f32 1.442695, %v2159_v61 }
 0x1c5   : > { %2110 = vst.msk [vmem:[%s6621_s4 + $0x170] sm:$0xff] %vm2063_vm3, %v2045_v8  ;;  %v6973_v56 = vpop.permute.xlu1 %1249  ;;  %v6979_v0 = vpop.permute.xlu0 %1247  ;;  %v1503_v25 = vmul.f32 %v6584_v18, %v1438_v60  ;;  %v2145_v37 = vsub.f32 0.0, %v6931_v48  ;;  %v1452_v16 = vmul.f32 0.999995, %v1322_v23  ;;  %v1514_v24 = vmul.f32 %v6584_v18, %v1449_v9 }
 0x1c6   : > { %10732 = vst [vmem:[#allocation119_spill] sm:$0xff] %v6971_v35  ;;  %v1866_v34 = vpop.permute.xlu2 %1865  ;;  %v6991_v17 = vadd.f32 %v6920_v45, %v1180_v5  ;;  %v2155_v8 = vsub.f32 0.0, %v6768_v26  ;;  %5554 = vpow2.f32 %v2252_v21  ;;  %v1437_v38 = vmul.f32 0.999995, %v1307_v62 }
 0x1c7   : > { %2111 = vst.msk [vmem:[%s6621_s4 + $0x178] sm:$0xff] %vm2063_vm3, %v2046_v19  ;;  %v2028_v30 = vmul.f32 %v1866_v34, %v1708_v55  ;;  %v2224_v61 = vmul.f32 1.442695, %v2144_v33  ;;  %v1469_v60 = vmul.f32 0.999995, %v6971_v35  ;;  %v2344_v48 = vadd.f32 1.0, %v5549_v15  ;;  %v7008_v15 = vpop.f32.mrf.mxu2 }
 0x1c8   : > { %2078 = vst.msk [vmem:[%s6621_s4 + $0x70] sm:$0xff] %vm2063_vm3, %v2013_v40  ;;  %v6996_v19 = vmul.f32 %v6584_v18, %v1451_v4  ;;  %v1407_v23 = vunpack.c.l.bf16 %v6987_v46  ;;  %v1665_v9 = vmax.f32 %v1601_v1, 0.0  ;;  %5556 = vpow2.f32 %v2254_v3  ;;  %v7006_v40 = vpop.eup %5552 }
 0x1c9   : > { %10733 = vst [vmem:[#allocation120_spill] sm:$0xff] %v6991_v17  ;;  %v2226_v45 = vmul.f32 1.442695, %v2145_v37  ;;  %v1313_v26 = vadd.f32 %v6677_v12, %v6785_v11  ;;  %v1568_v62 = vadd.f32 %v6593_v27, %v1503_v25  ;;  %v7011_v21 = vmul.f32 %v6584_v18, %v1452_v16  ;;  %v10736_v11 = vld [vmem:[#allocation65_spill] sm:$0xff] }
 0x1ca   : > { %2093 = vst.msk [vmem:[%s6621_s4 + $0xe8] sm:$0xff] %vm2063_vm3, %v2028_v30  ;;  %v1314_v33 = vadd.f32 %v6677_v12, %v6899_v63  ;;  %v1470_v55 = vmul.f32 0.999995, %v6991_v17  ;;  %v1579_v4 = vadd.f32 %v6593_v27, %v1514_v24  ;;  %v7021_v5 = vpop.f32.mrf.mxu3  ;;  %v2333_v34 = vadd.f32 1.0, %v5551_v51  ;;  %v7032_v17 = vld [vmem:[%s6289_s14 + $0xc0] sm:$0xff]  }
 0x1cb   : > { %1923 = vrot.lane.b32.xlu1 %v6953_v49, %s6088_s30  ;;  %10734 = vst [vmem:[#allocation121_spill] sm:$0xff] %v7006_v40  ;;  %1825 = vrot.lane.b32.xlu0 %v10736_v11, %s6088_s30  ;;  %5558 = vpow2.f32 %v2224_v61  ;;  %v1534_v1 = vmul.f32 %v6584_v18, %v1469_v60  ;;  %v1422_v12 = vmul.f32 0.999995, %v6951_v43  ;;  %v2246_v63 = vmul.f32 1.442695, %v2155_v8 }
 0x1cc   : > { %10735 = vst [vmem:[#allocation122_spill] sm:$0xff] %v7008_v15  ;;  %1883 = vrot.lane.b32.xlu2 %v6945_v32, %s6088_s30  ;;  %5560 = vrcp.f32 %v2344_v48  ;;  %v1729_v37 = vadd.f32 %v1665_v9, %v1407_v23  ;;  %v1385_v16 = vunpack.c.h.bf16 %v6815_v14  ;;  %v5555_v24 = vpop.eup %5554  ;;  %v1443_v54 = vmul.f32 0.999995, %v1313_v26 }
 0x1cd   : > { %10737 = vst [vmem:[#allocation123_spill] sm:$0xff] %v7021_v5  ;;  %v7024_v3 = vpop.permute.xlu1 %1255  ;;  %v7027_v25 = vpop.permute.xlu0 %1253  ;;  %5562 = vpow2.f32 %v2226_v45  ;;  %v2150_v61 = vsub.f32 0.0, %v1313_v26  ;;  %v1632_v51 = vmax.f32 %v1568_v62, 0.0  ;;  %v1444_v60 = vmul.f32 0.999995, %v1314_v33  ;;  %v10739_v26 = vld [vmem:[#allocation49_spill] sm:$0xff] }
 0x1ce   : > { %10738 = vst [vmem:[#allocation124_spill] sm:$0xff] %v7024_v3  ;;  %v1908_v30 = vpop.permute.xlu2 %1907  ;;  %v1535_v44 = vmul.f32 %v6584_v18, %v1470_v55  ;;  %v1643_v35 = vmax.f32 %v1579_v4, 0.0  ;;  %v5557_v8 = vpop.eup %5556  ;;  %5564 = vrcp.f32 %v2333_v34  ;;  %v2151_v48 = vsub.f32 0.0, %v1314_v33  ;;  %v10741_v33 = vld [vmem:[#allocation71_spill] sm:$0xff]  ;;  %v10744_v3 = vld [vmem:[#allocation53_spill] sm:$0xff] }
 0x1cf   : > { %v2049_v10 = vmul.f32 %v1908_v30, %v1729_v37  ;;  %v1599_v23 = vadd.f32 %v6593_v27, %v1534_v1  ;;  %v1487_v14 = vmul.f32 %v6584_v18, %v1422_v12  ;;  %v2350_v9 = vadd.f32 1.0, %v5555_v24 }
 0x1d0   : > { %v7037_v45 = vmul.f32 %v6584_v18, %v1437_v38  ;;  %5566 = vpow2.f32 %v2246_v63  ;;  %v1146_v62 = vadd.f32 %v6630_v36, %v10739_v26  ;;  %v7044_v4 = vmul.f32 %v6584_v18, %v1443_v54 }
 0x1d1   : > { %2114 = vst.msk [vmem:[%s6621_s4 + $0x190] sm:$0xff] %vm2063_vm3, %v2049_v10  ;;  %v5559_v55 = vpop.eup %5558  ;;  %v2236_v34 = vmul.f32 1.442695, %v2150_v61  ;;  %v1405_v1 = vunpack.c.l.bf16 %v7032_v17  ;;  %v10742_v12 = vunpack.c.l.bf16 %v6905_v42  ;;  %v2351_v10 = vadd.f32 1.0, %v5557_v8 }
 0x1d2   : > { %10740 = vst [vmem:[#allocation125_spill] sm:$0xff] %v7044_v4  ;;  %v7053_v63 = vpop.eup %5560  ;;  %v7056_v37 = vmul.f32 %v6584_v18, %v1444_v60  ;;  %v1707_v54 = vadd.f32 %v1643_v35, %v1385_v16  ;;  %v1600_v30 = vadd.f32 %v6593_v27, %v1535_v44  ;;  %v2238_v61 = vmul.f32 1.442695, %v2151_v48  ;;  %v7072_v44 = vpop.f32.mrf.mxu2  ;;  %v10747_v48 = vld [vmem:[#allocation80_spill] sm:$0xff] }
 0x1d3   : > { %1827 = vrot.lane.b32.xlu1 %v10741_v33, %s6088_s30  ;;  %v7051_v38 = vadd.f32 %v1632_v51, %v10742_v12  ;;  %10743 = vst [vmem:[#allocation126_spill] sm:$0xff] %v7053_v63  ;;  %1885 = vrot.lane.b32.xlu0 %v7008_v15, %s6088_s30  ;;  %v5563_v24 = vpop.eup %5562  ;;  %v1663_v51 = vmax.f32 %v1599_v23, 0.0  ;;  %v7064_v12 = vadd.f32 %v6593_v27, %v1487_v14  ;;  %5568 = vrcp.f32 %v2350_v9  ;;  %v7074_v16 = vpop.f32.mrf.mxu3 }
 0x1d4   : > { %1925 = vrot.lane.b32.xlu2 %v7021_v5, %s6088_s30  ;;  %v2336_v60 = vadd.f32 1.0, %v5559_v55  ;;  %v7068_v15 = vadd.f32 %v10744_v3, %v1146_v62  ;;  %v7070_v35 = vpop.eup %5564  ;;  %10746 = vst [vmem:[#allocation127_spill] sm:$0xff] %v7074_v16  ;;  %5570 = vpow2.f32 %v2236_v34  ;;  %v1184_v23 = vadd.f32 %v6849_v22, %v10747_v48  ;;  %v10749_v55 = vld [vmem:[#allocation84_spill] sm:$0xff] }
 0x1d5   : > { %v1864_v26 = vpop.permute.xlu1 %1863  ;;  %v1904_v2 = vpop.permute.xlu0 %1903  ;;  %10745 = vst [vmem:[#allocation53_spill] sm:$0xff] %v7070_v35  ;;  %v1727_v14 = vadd.f32 %v1663_v51, %v1405_v1  ;;  %5572 = vrcp.f32 %v2351_v10  ;;  %v1165_v3 = vadd.f32 %v6707_v50, %v10749_v55  ;;  %v1406_v62 = vunpack.c.h.bf16 %v7032_v17  ;;  %v10752_v51 = vld [vmem:[#allocation72_spill] sm:$0xff] }
 0x1d6   : > { %v2027_v33 = vmul.f32 %v1864_v26, %v1707_v54  ;;  %v1812_v63 = vpop.permute.xlu2 %1811  ;;  %v7079_v26 = vpop.eup %5566  ;;  %v1664_v54 = vmax.f32 %v1600_v30, 0.0  ;;  %v2337_v8 = vadd.f32 1.0, %v5563_v24  ;;  %v7087_v34 = vadd.f32 %v6979_v0, %v1184_v23  ;;  %v10753_v30 = vld [vmem:[#allocation92_spill] sm:$0xff] }
 0x1d7   : > { %v2001_v9 = vmul.f32 %v1812_v63, %v6828_v53  ;;  %10748 = vst [vmem:[#allocation128_spill] sm:$0xff] %v7079_v26  ;;  %v2047_v48 = vmul.f32 %v1904_v2, %v1727_v14  ;;  %v1436_v53 = vmul.f32 0.999995, %v7068_v15  ;;  %5574 = vrcp.f32 %v2336_v60  ;;  %v10751_v63 = vld [vmem:[#allocation75_spill] sm:$0xff] }
 0x1d8   : > { %2092 = vst.msk [vmem:[%s6621_s4 + $0xe0] sm:$0xff] %vm2063_vm3, %v2027_v33  ;;  %v2156_v1 = vsub.f32 0.0, %v6937_v52  ;;  %v1183_v10 = vadd.f32 %v6707_v50, %v10751_v63  ;;  %v1163_v33 = vadd.f32 %v6707_v50, %v10752_v51  ;;  %v2157_v17 = vsub.f32 0.0, %v6824_v47  ;;  %v10757_v47 = vld [vmem:[#allocation77_spill] sm:$0xff] }
 0x1d9   : > { %10750 = vst [vmem:[#allocation129_spill] sm:$0xff] %v7087_v34  ;;  %v7099_v24 = vadd.f32 %v10753_v30, %v1165_v3  ;;  %v1187_v2 = vadd.f32 %v6707_v50, %v6807_v39  ;;  %v1501_v52 = vmul.f32 %v6584_v18, %v1436_v53  ;;  %v7108_v60 = vpop.eup %5568  ;;  %5576 = vpow2.f32 %v2238_v61 }
 0x1da   : > { %2066 = vst.msk [vmem:[%s6621_s4 + $0x10] sm:$0xff] %vm2063_vm3, %v2001_v9  ;;  %v7111_v23 = vadd.f32 %v6979_v0, %v1183_v10  ;;  %v1728_v14 = vadd.f32 %v1664_v54, %v1406_v62  ;;  %v10758_v9 = vld [vmem:[#allocation74_spill] sm:$0xff]  ;;  %v7120_v3 = vpop.eup %5570  ;;  %5578 = vrcp.f32 %v2337_v8  ;;  %v7124_v61 = vadd.f32 %v6707_v50, %v6791_v6 }
 0x1db   : > { %10754 = vst [vmem:[#allocation92_spill] sm:$0xff] %v7099_v24  ;;  %1887 = vrot.lane.b32.xlu1 %v7072_v44, %s6088_s30  ;;  %1927 = vrot.lane.b32.xlu0 %v7074_v16, %s6088_s30  ;;  %v1474_v0 = vmul.f32 0.999995, %v7087_v34  ;;  %v1566_v10 = vadd.f32 %v6593_v27, %v1501_v52  ;;  %v7128_v39 = vpop.eup %5572  ;;  %v7130_v62 = vmul.f32 1.442695, %v2156_v1  ;;  %v7133_v54 = vadd.f32 %v6804_v57, %v1187_v2  ;;  %v7142_v1 = vld [vmem:[%s6289_s14 + $0x80] sm:$0xff]  }
 0x1dc   : > { %2112 = vst.msk [vmem:[%s6621_s4 + $0x180] sm:$0xff] %vm2063_vm3, %v2047_v48  ;;  %1829 = vrot.lane.b32.xlu2 %v10757_v47, %s6088_s30  ;;  %v7118_v48 = vadd.f32 %v10758_v9, %v1163_v33  ;;  %v7136_v55 = vmul.f32 1.442695, %v2157_v17  ;;  %v1616_v34 = vmax.f32 %v7064_v12, 0.0  ;;  %v7147_v2 = vmul.f32 0.999995, %v7099_v24  ;;  %v7157_v12 = vpop.f32.mrf.mxu3 }
 0x1dd   : > { %10755 = vst [vmem:[#allocation130_spill] sm:$0xff] %v7108_v60  ;;  %v1906_v53 = vpop.permute.xlu1 %1905  ;;  %v1808_v8 = vpop.permute.xlu0 %1807  ;;  %v1473_v17 = vmul.f32 0.999995, %v7111_v23  ;;  %v1630_v26 = vmax.f32 %v1566_v10, 0.0 }
 0x1de   : > { %10756 = vst [vmem:[#allocation131_spill] sm:$0xff] %v7111_v23  ;;  %v2048_v33 = vmul.f32 %v1906_v53, %v1728_v14  ;;  %v1842_v63 = vpop.permute.xlu2 %1841  ;;  %v1453_v6 = vmul.f32 0.999995, %v7118_v48  ;;  %v1999_v51 = vmul.f32 %v1808_v8, %v6838_v31  ;;  %v7144_v60 = vpop.eup %5574  ;;  %v10762_v14 = vld [vmem:[#allocation85_spill] sm:$0xff]  ;;  %v10765_v8 = vld [vmem:[#allocation88_spill] sm:$0xff] }
 0x1df   : > { %10759 = vst [vmem:[#allocation77_spill] sm:$0xff] %v7118_v48  ;;  %v2016_v52 = vmul.f32 %v1842_v63, %v7051_v38  ;;  %v1185_v53 = vadd.f32 %v6707_v50, %v10762_v14  ;;  %v7155_v38 = vpop.f32.mrf.mxu2  ;;  %v1539_v63 = vmul.f32 %v6584_v18, %v1474_v0  ;;  %v558_v48 = vld [vmem:[%s6289_s14 + $0x40] sm:$0xf]  ;;  %v1567_v14 = vadd.f32 %v6593_v27, %v7037_v45  ;;  %v7166_v23 = vpop.eup %5576 }
 0x1e0   : > { %10760 = vst [vmem:[#allocation74_spill] sm:$0xff] %v7128_v39  ;;  %v1518_v31 = vmul.f32 %v6584_v18, %v1453_v6  ;;  %v1372_v39 = vunpack.c.h.bf16 %v10765_v8  ;;  %v10766_v6 = vsub.f32 0.0, %v6951_v43  ;;  %v7177_v10 = vpop.eup %5578  ;;  %v10769_v45 = vunpack.c.h.bf16 %v6748_v7  ;;  %v7198_v7 = vld [vmem:[%s6289_s14 + $0xd4] sm:$0xff]  }
 0x1e1   : > { %10761 = vst [vmem:[#allocation132_spill] sm:$0xff] %v7133_v54  ;;  %v7180_v16 = vadd.f32 %v6973_v56, %v1185_v53  ;;  %v1581_v43 = vadd.f32 %v6593_v27, %v6996_v19  ;;  %v10770_v53 = vld [vmem:[#allocation82_spill] sm:$0xff]  ;;  %v1373_v40 = vunpack.c.l.bf16 %v558_v48  ;;  %v1387_v48 = vunpack.c.h.bf16 %v6940_v20  ;;  %v10775_v20 = vld [vmem:[#allocation52_spill] sm:$0xff] }
 0x1e2   : > { %2113 = vst.msk [vmem:[%s6621_s4 + $0x188] sm:$0xff] %vm2063_vm3, %v2048_v33  ;;  %v7169_v33 = vmul.f32 0.999995, %v7133_v54  ;;  %v2194_v0 = vmul.f32 1.442695, %v10766_v6  ;;  %v1583_v8 = vadd.f32 %v6593_v27, %v1518_v31  ;;  %v1680_v54 = vadd.f32 %v1616_v34, %v10769_v45  ;;  %v10771_v45 = vld [vmem:[#allocation67_spill] sm:$0xff] }
 0x1e3   : > { %10763 = vst [vmem:[#allocation133_spill] sm:$0xff] %v7155_v38  ;;  %1929 = vrot.lane.b32.xlu1 %v7157_v12, %s6088_s30  ;;  %v7190_v6 = vmul.f32 %v6584_v18, %v1473_v17  ;;  %1831 = vrot.lane.b32.xlu0 %v10770_v53, %s6088_s30  ;;  %v1694_v19 = vadd.f32 %v1630_v26, %v1372_v39  ;;  %v1645_v35 = vmax.f32 %v1581_v43, 0.0  ;;  %v1410_v57 = vunpack.c.l.bf16 %v7198_v7  ;;  %v7206_v39 = vld [vmem:[%s6289_s14 + $0x7c] sm:$0xf] }
 0x1e4   : > { %10764 = vst [vmem:[#allocation134_spill] sm:$0xff] %v7157_v12  ;;  %1889 = vrot.lane.b32.xlu2 %v7155_v38, %s6088_s30  ;;  %v1647_v12 = vmax.f32 %v1583_v8, 0.0  ;;  %v1604_v17 = vadd.f32 %v6593_v27, %v1539_v63  ;;  %5580 = vpow2.f32 %v2194_v0  ;;  %v10773_v63 = vld [vmem:[#allocation42_spill] sm:$0xff]  ;;  %v10774_v0 = vld [vmem:[#allocation45_spill] sm:$0xff] }
 0x1e5   : > { %2064 = vst.msk [vmem:[%s6621_s4] sm:$0xff] %vm2063_vm3, %v1999_v51  ;;  %v1389_v51 = vunpack.c.l.bf16 %v7142_v1  ;;  %v1810_v34 = vpop.permute.xlu1 %1809  ;;  %v1838_v53 = vpop.permute.xlu0 %1837 }
 0x1e6   : > { %2081 = vst.msk [vmem:[%s6621_s4 + $0x88] sm:$0xff] %vm2063_vm3, %v2016_v52  ;;  %v2320_v52 = vadd.f32 1.0, %v6877_v28  ;;  %v1631_v28 = vmax.f32 %v1567_v14, 0.0  ;;  %v2000_v24 = vmul.f32 %v1810_v34, %v1680_v54  ;;  %v1872_v31 = vpop.permute.xlu2 %1871  ;;  %v2014_v8 = vmul.f32 %v1838_v53, %v1694_v19 }
 0x1e7   : > { %10767 = vst [vmem:[#allocation88_spill] sm:$0xff] %v7177_v10  ;;  %v1182_v10 = vadd.f32 %v6849_v22, %v10771_v45  ;;  %v1711_v38 = vadd.f32 %v1647_v12, %v1389_v51  ;;  %v2322_v14 = vadd.f32 1.0, %v6832_v13  ;;  %v1136_v12 = vadd.f32 %v6630_v36, %v10773_v63  ;;  %v7230_v19 = vpop.f32.mrf.mxu2 }
 0x1e8   : > { %10768 = vst [vmem:[#allocation135_spill] sm:$0xff] %v7180_v16  ;;  %v1137_v51 = vadd.f32 %v10775_v20, %v10774_v0  ;;  %v1695_v43 = vadd.f32 %v1631_v28, %v1373_v40  ;;  %v1668_v53 = vmax.f32 %v1604_v17, 0.0  ;;  %5582 = vrcp.f32 %v2320_v52  ;;  %v10780_v40 = vld [vmem:[#allocation102_spill] sm:$0xff]  ;;  %v10781_v52 = vld [vmem:[#allocation47_spill] sm:$0xff] }
 0x1e9   : > { %v7209_v26 = vadd.f32 %v6753_v29, %v1182_v10  ;;  %2065 = vst.msk [vmem:[%s6621_s4 + $0x8] sm:$0xff] %vm2063_vm3, %v2000_v24  ;;  %v2031_v54 = vmul.f32 %v1872_v31, %v1711_v38  ;;  %v1139_v29 = vadd.f32 %v10775_v20, %v6551_v58  ;;  %v1388_v13 = vunpack.c.l.bf16 %v7206_v39  ;;  %v10776_v24 = vld [vmem:[#allocation58_spill] sm:$0xff]  ;;  %v10777_v10 = vld [vmem:[#allocation51_spill] sm:$0xff] }
 0x1ea   : > { %2079 = vst.msk [vmem:[%s6621_s4 + $0x78] sm:$0xff] %vm2063_vm3, %v2014_v8  ;;  %v1296_v38 = vadd.f32 %v10776_v24, %v1136_v12  ;;  %v7228_v31 = vadd.f32 %v10777_v10, %v1137_v51  ;;  %v7232_v8 = vpop.f32.mrf.mxu3  ;;  %v1582_v28 = vadd.f32 %v6593_v27, %v7011_v21  ;;  %v10782_v39 = vld [vmem:[#allocation35_spill] sm:$0xff]  ;;  %v7244_v20 = vpop.eup %5580  ;;  %v1709_v51 = vadd.f32 %v1645_v35, %v1387_v48 }
 0x1eb   : > { %10772 = vst [vmem:[#allocation136_spill] sm:$0xff] %v7209_v26  ;;  %v1472_v34 = vmul.f32 0.999995, %v7209_v26  ;;  %1833 = vrot.lane.b32.xlu1 %v10780_v40, %s6088_s30  ;;  %v1134_v12 = vadd.f32 %v6630_v36, %v10782_v39  ;;  %1891 = vrot.lane.b32.xlu0 %v7230_v19, %s6088_s30  ;;  %5584 = vrcp.f32 %v2322_v14  ;;  %v1732_v21 = vadd.f32 %v1668_v53, %v1410_v57  ;;  %v10783_v40 = vld [vmem:[#allocation43_spill] sm:$0xff] }
 0x1ec   : > { %2096 = vst.msk [vmem:[%s6621_s4 + $0x100] sm:$0xff] %vm2063_vm3, %v2031_v54  ;;  %v7240_v54 = vadd.f32 %v10781_v52, %v1139_v29  ;;  %1931 = vrot.lane.b32.xlu2 %v7232_v8, %s6088_s30  ;;  %v1426_v24 = vmul.f32 0.999995, %v1296_v38  ;;  %v2134_v27 = vsub.f32 0.0, %v7228_v31  ;;  %v7256_v48 = vld [vmem:[#allocation10 + $0x2] ss:$0 sm:$0xff] }
 0x1ed   : > { %10778 = vst [vmem:[#allocation52_spill] sm:$0xff] %v7230_v19  ;;  %v1537_v17 = vmul.f32 %v6584_v18, %v1472_v34  ;;  %v1840_v18 = vpop.permute.xlu1 %1839  ;;  %v7251_v34 = vld [vmem:[#allocation10 + $0x3] ss:$0 sm:$0xff]  ;;  %v1294_v0 = vadd.f32 %v10783_v40, %v1134_v12  ;;  %v1868_v39 = vpop.permute.xlu0 %1867  ;;  %v2133_v63 = vsub.f32 0.0, %v1296_v38  ;;  %v7260_v19 = vld [vmem:[%s6289_s14 + $0x14] sm:$0xff]   ;;  %v1646_v12 = vmax.f32 %v1582_v28, 0.0 }
 0x1ee   : > { %10779 = vst [vmem:[#allocation58_spill] sm:$0xff] %v7232_v8  ;;  %v2136_v45 = vsub.f32 0.0, %v7240_v54  ;;  %v2015_v58 = vmul.f32 %v1840_v18, %v1695_v43  ;;  %v1914_v35 = vpop.permute.xlu2 %1913  ;;  %v1491_v14 = vmul.f32 %v7256_v48, %v1426_v24  ;;  %v2204_v57 = vmul.f32 1.442695, %v2134_v27  ;;  %v5583_v43 = vpop.eup %5582  ;;  %v594_v24 = vld [vmem:[%s6289_s14 + $0xd0] sm:$0xf] }
 0x1ef   : > { %v1602_v29 = vadd.f32 %v7251_v34, %v1537_v17  ;;  %v2029_v53 = vmul.f32 %v1868_v39, %v1709_v51  ;;  %v2052_v26 = vmul.f32 %v1914_v35, %v1732_v21  ;;  %v1603_v40 = vadd.f32 %v7251_v34, %v7190_v6 }
 0x1f0   : > { %v2208_v17 = vmul.f32 1.442695, %v2136_v45  ;;  %2080 = vst.msk [vmem:[%s6621_s4 + $0x80] sm:$0xff] %vm2063_vm3, %v2015_v58  ;;  %v1408_v18 = vunpack.c.h.bf16 %v6987_v46  ;;  %v1556_v4 = vadd.f32 %v7251_v34, %v1491_v14  ;;  %v1424_v38 = vmul.f32 0.999995, %v1294_v0  ;;  %v10784_v14 = vld [vmem:[#allocation89_spill] sm:$0xff] }
 0x1f1   : > { %2094 = vst.msk [vmem:[%s6621_s4 + $0xf0] sm:$0xff] %vm2063_vm3, %v2029_v53  ;;  %v1666_v39 = vmax.f32 %v1602_v29, 0.0  ;;  %v1362_v51 = vunpack.c.l.bf16 %v7260_v19  ;;  %5586 = vpow2.f32 %v2204_v57  ;;  %v2131_v45 = vsub.f32 0.0, %v1294_v0  ;;  %v5585_v27 = vpop.eup %5584  ;;  %v10786_v57 = vld [vmem:[#allocation100_spill] sm:$0xff] }
 0x1f2   : > { %2117 = vst.msk [vmem:[%s6621_s4 + $0x1a8] sm:$0xff] %vm2063_vm3, %v2052_v26  ;;  %v1620_v6 = vmax.f32 %v1556_v4, 0.0  ;;  %v2202_v58 = vmul.f32 1.442695, %v2133_v63  ;;  %5588 = vpow2.f32 %v2208_v17  ;;  %v1489_v46 = vmul.f32 %v7256_v48, %v1424_v38  ;;  %v10785_v4 = vld [vmem:[#allocation112_spill] sm:$0xff] }
 0x1f3   : > { %v7277_v28 = vmul.f32 %v7256_v48, %v7169_v33  ;;  %2512 = vrot.lane.b32.xlu1 %v5583_v43, %s6089_s21  ;;  %v1409_v21 = vunpack.c.l.bf16 %v594_v24  ;;  %v1667_v29 = vmax.f32 %v1603_v40, 0.0  ;;  %v2198_v35 = vmul.f32 1.442695, %v2131_v45  ;;  %2516 = vrot.lane.b32.xlu0 %v5585_v27, %s6089_s21  ;;  %v7291_v33 = vld [vmem:[%s6289_s14 + $0x50] sm:$0xff]  }
 0x1f4   : > { %v7282_v0 = vadd.f32 %v6849_v22, %v10784_v14  ;;  %v7285_v26 = vmul.f32 0.999995, %v7180_v16  ;;  %2520 = vrot.lane.b32.xlu2 %v10785_v4, %s6089_s21  ;;  %v1710_v63 = vadd.f32 %v1646_v12, %v1388_v13  ;;  %v1571_v53 = vadd.f32 %v7251_v34, %v10786_v57  ;;  %v10788_v12 = vld [vmem:[#allocation91_spill] sm:$0xff] }
 0x1f5   : > { %v1870_v17 = vpop.permute.xlu1 %1869  ;;  %v1730_v40 = vadd.f32 %v1666_v39, %v1408_v18  ;;  %v1684_v43 = vadd.f32 %v1620_v6, %v1362_v51  ;;  %v1554_v24 = vadd.f32 %v7251_v34, %v1489_v46  ;;  %5590 = vpow2.f32 %v2198_v35  ;;  %v1910_v27 = vpop.permute.xlu0 %1909 }
 0x1f6   : > { %v10787_v38 = vsub.f32 0.0, %v7068_v15  ;;  %v2030_v4 = vmul.f32 %v1870_v17, %v1710_v63  ;;  %v1818_v13 = vpop.permute.xlu2 %1817  ;;  %5592 = vpow2.f32 %v2202_v58  ;;  %v1360_v14 = vunpack.c.h.bf16 %v10788_v12  ;;  %v10789_v63 = vld [vmem:[#allocation87_spill] sm:$0xff] }
 0x1f7   : > { %v5587_v16 = vpop.eup %5586  ;;  %v2050_v57 = vmul.f32 %v1910_v27, %v1730_v40  ;;  %v2004_v18 = vmul.f32 %v1818_v13, %v1684_v43  ;;  %v1731_v39 = vadd.f32 %v1667_v29, %v1409_v21  ;;  %v1377_v51 = vunpack.c.l.bf16 %v7291_v33  ;;  %v10790_v29 = vld [vmem:[#allocation50_spill] sm:$0xff] }
 0x1f8   : > { %v7298_v45 = vmul.f32 1.442695, %v10787_v38  ;;  %v5589_v6 = vpop.eup %5588  ;;  %2095 = vst.msk [vmem:[%s6621_s4 + $0xf8] sm:$0xff] %vm2063_vm3, %v2030_v4  ;;  %v2326_v15 = vadd.f32 1.0, %v5587_v16  ;;  %v1635_v46 = vmax.f32 %v1571_v53, 0.0  ;;  %v2321_v35 = vadd.f32 1.0, %v7244_v20 }
 0x1f9   : > { %v1166_v58 = vadd.f32 %v6849_v22, %v10789_v63  ;;  %2115 = vst.msk [vmem:[%s6621_s4 + $0x198] sm:$0xff] %vm2063_vm3, %v2050_v57  ;;  %v2328_v17 = vadd.f32 1.0, %v5589_v6  ;;  %v1618_v38 = vmax.f32 %v1554_v24, 0.0  ;;  %v1140_v21 = vadd.f32 %v6630_v36, %v10736_v11  ;;  %v10791_v16 = vld [vmem:[#allocation96_spill] sm:$0xff]  ;;  %v10792_v20 = vld [vmem:[#allocation105_spill] sm:$0xff] }
 0x1fa   : > { %v1138_v40 = vadd.f32 %v6630_v36, %v10790_v29  ;;  %2069 = vst.msk [vmem:[%s6621_s4 + $0x28] sm:$0xff] %vm2063_vm3, %v2004_v18  ;;  %5594 = vrcp.f32 %v2326_v15  ;;  %v1555_v53 = vadd.f32 %v7251_v34, %v10791_v16  ;;  %v1569_v43 = vadd.f32 %v7251_v34, %v10792_v20  ;;  %v546_v24 = vld [vmem:[%s6289_s14 + $0x10] sm:$0xf]  ;;  %v10793_v57 = vld [vmem:[#allocation76_spill] sm:$0xff] }
 0x1fb   : > { %v7320_v4 = vadd.f32 %v10753_v30, %v1166_v58  ;;  %v5591_v27 = vpop.eup %5590  ;;  %5596 = vrcp.f32 %v2328_v17  ;;  %v7324_v13 = vadd.f32 %v10781_v52, %v1140_v21  ;;  %v1150_v18 = vadd.f32 %v6630_v36, %v10793_v57  ;;  %v10794_v15 = vld [vmem:[#allocation116_spill] sm:$0xff] }
 0x1fc   : > { %v7327_v12 = vadd.f32 %v10777_v10, %v1138_v40  ;;  %v5593_v6 = vpop.eup %5592  ;;  %2532 = vrot.lane.b32.xlu2 %v10794_v15, %s6089_s21  ;;  %v1699_v16 = vadd.f32 %v1635_v46, %v1377_v51  ;;  %v2323_v20 = vadd.f32 1.0, %v5591_v27  ;;  %5598 = vrcp.f32 %v2321_v35  ;;  %v10795_v21 = vld [vmem:[#allocation68_spill] sm:$0xff] }
 0x1fd   : > { %v1456_v30 = vmul.f32 0.999995, %v7320_v4  ;;  %v1912_v58 = vpop.permute.xlu1 %1911  ;;  %v1682_v17 = vadd.f32 %v1618_v38, %v1360_v14  ;;  %v2137_v52 = vsub.f32 0.0, %v7324_v13  ;;  %v7337_v40 = vadd.f32 %v10795_v21, %v1150_v18  ;;  %v1814_v57 = vpop.permute.xlu0 %1813  ;;  %v7344_v21 = vld [vmem:[%s6289_s14 + $0x8c] sm:$0xff]  }
 0x1fe   : > { %v2135_v10 = vsub.f32 0.0, %v7327_v12  ;;  %v2051_v63 = vmul.f32 %v1912_v58, %v1731_v39  ;;  %v1848_v11 = vpop.permute.xlu2 %1847  ;;  %v1361_v15 = vunpack.c.l.bf16 %v546_v24  ;;  %v1619_v51 = vmax.f32 %v1555_v53, 0.0 }
 0x1ff   : > { %v1521_v46 = vmul.f32 %v7256_v48, %v1456_v30  ;;  %v2002_v35 = vmul.f32 %v1814_v57, %v1682_v17  ;;  %v2019_v27 = vmul.f32 %v1848_v11, %v1699_v16  ;;  %v2210_v29 = vmul.f32 1.442695, %v2137_v52  ;;  %v10796_v16 = vld [vmem:[#allocation79_spill] sm:$0xff] }
 0x200   : > { %v2206_v14 = vmul.f32 1.442695, %v2135_v10  ;;  %v5595_v38 = vpop.eup %5594  ;;  %2116 = vst.msk [vmem:[%s6621_s4 + $0x1a0] sm:$0xff] %vm2063_vm3, %v2051_v63  ;;  %5600 = vrcp.f32 %v2323_v20  ;;  %v1375_v18 = vunpack.c.h.bf16 %v6905_v42  ;;  %v1440_v24 = vmul.f32 0.999995, %v7337_v40 }
 0x201   : > { %v1586_v39 = vadd.f32 %v7251_v34, %v1521_v46  ;;  %v5597_v53 = vpop.eup %5596  ;;  %2524 = vrot.lane.b32.xlu1 %v5595_v38, %s6089_s21  ;;  %2067 = vst.msk [vmem:[%s6621_s4 + $0x18] sm:$0xff] %vm2063_vm3, %v2002_v35  ;;  %v1633_v11 = vmax.f32 %v1569_v43, 0.0  ;;  %v1392_v57 = vunpack.c.l.bf16 %v7344_v21  ;;  %5602 = vpow2.f32 %v2210_v29 }
 0x202   : > { %v1164_v63 = vadd.f32 %v6849_v22, %v10796_v16  ;;  %v5599_v42 = vpop.eup %5598  ;;  %2528 = vrot.lane.b32.xlu0 %v5597_v53, %s6089_s21  ;;  %2084 = vst.msk [vmem:[%s6621_s4 + $0xa0] sm:$0xff] %vm2063_vm3, %v2019_v27  ;;  %5604 = vpow2.f32 %v2206_v14  ;;  %v2325_v30 = vadd.f32 1.0, %v5593_v6  ;;  %v1505_v58 = vmul.f32 %v7256_v48, %v1440_v24 }
 0x203   : > { %v1650_v20 = vmax.f32 %v1586_v39, 0.0  ;;  %v1520_v43 = vmul.f32 %v7256_v48, %v7147_v2  ;;  %v7362_v29 = vadd.f32 %v6973_v56, %v7282_v0  ;;  %v1142_v52 = vadd.f32 %v6630_v36, %v10757_v47  ;;  %v561_v2 = vld [vmem:[%s6289_s14 + $0x4c] sm:$0xf]  ;;  %v10797_v39 = vld [vmem:[#allocation64_spill] sm:$0xff] }
 0x204   : > { %v7365_v17 = vadd.f32 %v10758_v9, %v1164_v63  ;;  %v1540_v10 = vmul.f32 %v7256_v48, %v7285_v26  ;;  %5606 = vpow2.f32 %v7298_v45  ;;  %2514 = vrot.lane.b32.xlu2 %v5599_v42, %s6089_s21  ;;  %v1683_v6 = vadd.f32 %v1619_v51, %v1361_v15  ;;  %v7380_v51 = vld [vmem:[%s6289_s14 + $0xe0] sm:$0xff]  }
 0x205   : > { %v1570_v46 = vadd.f32 %v7251_v34, %v1505_v58  ;;  %v1816_v56 = vpop.permute.xlu1 %1815  ;;  %v1697_v0 = vadd.f32 %v1633_v11, %v1375_v18  ;;  %v1714_v35 = vadd.f32 %v1650_v20, %v1392_v57  ;;  %v1607_v27 = vadd.f32 %v7251_v34, %v7277_v28  ;;  %v1844_v38 = vpop.permute.xlu0 %1843 }
 0x206   : > { %v1454_v9 = vmul.f32 0.999995, %v7365_v17  ;;  %v5601_v14 = vpop.eup %5600  ;;  %v2003_v26 = vmul.f32 %v1816_v56, %v1683_v6  ;;  %v1878_v45 = vpop.permute.xlu2 %1877  ;;  %5608 = vrcp.f32 %v2325_v30  ;;  %v2147_v15 = vsub.f32 0.0, %v7337_v40 }
 0x207   : > { %v7383_v24 = vadd.f32 %v10797_v39, %v1142_v52  ;;  %v5603_v18 = vpop.eup %5602  ;;  %v2017_v53 = vmul.f32 %v1844_v38, %v1697_v0  ;;  %v2034_v11 = vmul.f32 %v1878_v45, %v1714_v35  ;;  %v1376_v57 = vunpack.c.l.bf16 %v561_v2 }
 0x208   : > { %v1519_v63 = vmul.f32 %v7256_v48, %v1454_v9  ;;  %v5605_v28 = vpop.eup %5604  ;;  %2068 = vst.msk [vmem:[%s6621_s4 + $0x20] sm:$0xff] %vm2063_vm3, %v2003_v26  ;;  %v2329_v42 = vadd.f32 1.0, %v5603_v18  ;;  %v1634_v20 = vmax.f32 %v1570_v46, 0.0  ;;  %v1390_v30 = vunpack.c.h.bf16 %v7142_v1  ;;  %v10798_v1 = vld [vmem:[#allocation108_spill] sm:$0xff]  ;;  %v576_v26 = vld [vmem:[%s6289_s14 + $0x88] sm:$0xf] }
 0x209   : > { %v2139_v40 = vsub.f32 0.0, %v7383_v24  ;;  %2518 = vrot.lane.b32.xlu1 %v5601_v14, %s6089_s21  ;;  %2082 = vst.msk [vmem:[%s6621_s4 + $0x90] sm:$0xff] %vm2063_vm3, %v2017_v53  ;;  %v2327_v58 = vadd.f32 1.0, %v5605_v28  ;;  %v1413_v6 = vunpack.c.l.bf16 %v7380_v51  ;;  %v1671_v2 = vmax.f32 %v1607_v27, 0.0 }
 0x20a   : > { %v1584_v52 = vadd.f32 %v7251_v34, %v1519_v63  ;;  %v5607_v56 = vpop.eup %5606  ;;  %v7397_v0 = vadd.f32 %v6707_v50, %v7072_v44  ;;  %2540 = vrot.lane.b32.xlu0 %v10798_v1, %s6089_s21  ;;  %2099 = vst.msk [vmem:[%s6621_s4 + $0x118] sm:$0xff] %vm2063_vm3, %v2034_v11  ;;  %5610 = vrcp.f32 %v2329_v42  ;;  %v2230_v46 = vmul.f32 1.442695, %v2147_v15 }
 0x20b   : > { %v2214_v35 = vmul.f32 1.442695, %v2139_v40  ;;  %v1476_v9 = vmul.f32 0.999995, %v7362_v29  ;;  %5612 = vrcp.f32 %v2327_v58  ;;  %v1585_v27 = vadd.f32 %v7251_v34, %v1520_v43  ;;  %v7410_v58 = vld [vmem:[%s6289_s14 + $0x20] sm:$0xff]  }
 0x20c   : > { %v1648_v14 = vmax.f32 %v1584_v52, 0.0  ;;  %v5609_v38 = vpop.eup %5608  ;;  %v1698_v45 = vadd.f32 %v1634_v20, %v1376_v57  ;;  %v1605_v39 = vadd.f32 %v7251_v34, %v1540_v10  ;;  %v1429_v18 = vmul.f32 0.999995, %v7240_v54 }
 0x20d   : > { %5614 = vpow2.f32 %v2214_v35  ;;  %v1846_v53 = vpop.permute.xlu1 %1845  ;;  %v1735_v11 = vadd.f32 %v1671_v2, %v1413_v6  ;;  %v2335_v63 = vadd.f32 1.0, %v5607_v56  ;;  %v1874_v42 = vpop.permute.xlu0 %1873  ;;  %v1391_v43 = vunpack.c.l.bf16 %v576_v26 }
 0x20e   : > { %5616 = vpow2.f32 %v7130_v62  ;;  %v1712_v15 = vadd.f32 %v1648_v14, %v1390_v30  ;;  %v2018_v28 = vmul.f32 %v1846_v53, %v1698_v45  ;;  %v1920_v40 = vpop.permute.xlu2 %1919  ;;  %v1494_v57 = vmul.f32 %v7256_v48, %v1429_v18  ;;  %v10800_v14 = vld [vmem:[#allocation86_spill] sm:$0xff] }
 0x20f   : > { %5618 = vpow2.f32 %v2230_v46  ;;  %v2055_v20 = vmul.f32 %v1920_v40, %v1735_v11  ;;  %v1649_v54 = vmax.f32 %v1585_v27, 0.0  ;;  %v1427_v62 = vmul.f32 0.999995, %v7228_v31  ;;  %v10799_v46 = vld [vmem:[#allocation90_spill] sm:$0xff]  ;;  %v10801_v11 = vld [vmem:[#allocation59_spill] sm:$0xff] }
 0x210   : > { %v2032_v10 = vmul.f32 %v1874_v42, %v1712_v15  ;;  %v5611_v52 = vpop.eup %5610  ;;  %v1541_v30 = vmul.f32 %v7256_v48, %v1476_v9  ;;  %2083 = vst.msk [vmem:[%s6621_s4 + $0x98] sm:$0xff] %vm2063_vm3, %v2018_v28  ;;  %v1411_v6 = vunpack.c.h.bf16 %v7198_v7  ;;  %v1669_v2 = vmax.f32 %v1605_v39, 0.0  ;;  %v10802_v40 = vld [vmem:[#allocation78_spill] sm:$0xff] }
 0x211   : > { %v1559_v56 = vadd.f32 %v7251_v34, %v1494_v57  ;;  %v5613_v1 = vpop.eup %5612  ;;  %v7421_v35 = vadd.f32 %v10799_v46, %v7124_v61  ;;  %2530 = vrot.lane.b32.xlu1 %v5611_v52, %s6089_s21  ;;  %v1365_v31 = vunpack.c.l.bf16 %v7410_v58  ;;  %v1492_v9 = vmul.f32 %v7256_v48, %v1427_v62  ;;  %2120 = vst.msk [vmem:[%s6621_s4 + $0x1c0] sm:$0xff] %vm2063_vm3, %v2055_v20  ;;  %v597_v62 = vld [vmem:[%s6289_s14 + $0xdc] sm:$0xf] }
 0x212   : > { %2097 = vst.msk [vmem:[%s6621_s4 + $0x108] sm:$0xff] %vm2063_vm3, %v2032_v10  ;;  %v1152_v26 = vadd.f32 %v6630_v36, %v10800_v14  ;;  %2526 = vrot.lane.b32.xlu2 %v5613_v1, %s6089_s21  ;;  %2522 = vrot.lane.b32.xlu0 %v5609_v38, %s6089_s21  ;;  %5620 = vrcp.f32 %v2335_v63  ;;  %v1428_v27 = vmul.f32 0.999995, %v7327_v12  ;;  %v1169_v45 = vadd.f32 %v6707_v50, %v6945_v32 }
 0x213   : > { %v5615_v7 = vpop.eup %5614  ;;  %v1623_v61 = vmax.f32 %v1559_v56, 0.0  ;;  %v1190_v18 = vadd.f32 %v6849_v22, %v7021_v5  ;;  %v1713_v15 = vadd.f32 %v1649_v54, %v1391_v43  ;;  %v1733_v63 = vadd.f32 %v1669_v2, %v1411_v6  ;;  %v7453_v54 = vld [vmem:[%s6289_s14 + $0x58] sm:$0xff]  }
 0x214   : > { %v7437_v39 = vpop.eup %5616  ;;  %v2331_v53 = vadd.f32 1.0, %v5615_v7  ;;  %v7442_v38 = vadd.f32 %v10801_v11, %v1152_v26  ;;  %v1606_v42 = vadd.f32 %v7251_v34, %v1541_v30  ;;  %v1574_v12 = vadd.f32 %v7251_v34, %v7056_v37 }
 0x215   : > { %v5619_v28 = vpop.eup %5618  ;;  %v7448_v57 = vadd.f32 %v10802_v40, %v1169_v45  ;;  %v1876_v10 = vpop.permute.xlu1 %1875  ;;  %v1687_v20 = vadd.f32 %v1623_v61, %v1365_v31  ;;  %v1557_v43 = vadd.f32 %v7251_v34, %v1492_v9  ;;  %v7457_v6 = vadd.f32 %v7027_v25, %v1190_v18 }
 0x216   : > { %5622 = vrcp.f32 %v2331_v53  ;;  %v1442_v52 = vmul.f32 0.999995, %v7442_v38  ;;  %v2033_v30 = vmul.f32 %v1876_v10, %v1713_v15  ;;  %v1916_v37 = vpop.permute.xlu0 %1915  ;;  %v1824_v2 = vpop.permute.xlu2 %1823  ;;  %v1493_v56 = vmul.f32 %v7256_v48, %v1428_v27 }
 0x217   : > { %v1459_v1 = vmul.f32 0.999995, %v7448_v57  ;;  %v1457_v31 = vmul.f32 0.999995, %v7421_v35  ;;  %v2053_v26 = vmul.f32 %v1916_v37, %v1733_v63  ;;  %v2007_v7 = vmul.f32 %v1824_v2, %v1687_v20  ;;  %v10803_v37 = vld [vmem:[#allocation24_spill] sm:$0xff] }
 0x218   : > { %v2339_v9 = vadd.f32 1.0, %v5619_v28  ;;  %v5621_v61 = vpop.eup %5620  ;;  %2098 = vst.msk [vmem:[%s6621_s4 + $0x110] sm:$0xff] %vm2063_vm3, %v2033_v30  ;;  %v1412_v45 = vunpack.c.l.bf16 %v597_v62  ;;  %v1670_v18 = vmax.f32 %v1606_v42, 0.0  ;;  %v1380_v53 = vunpack.c.h.bf16 %v7453_v54  ;;  %v549_v62 = vld [vmem:[%s6289_s14 + $0x1c] sm:$0xf] }
 0x219   : > { %v1638_v15 = vmax.f32 %v1574_v12, 0.0  ;;  %2542 = vrot.lane.b32.xlu1 %v5621_v61, %s6089_s21  ;;  %2118 = vst.msk [vmem:[%s6621_s4 + $0x1b0] sm:$0xff] %vm2063_vm3, %v2053_v26  ;;  %v1363_v27 = vunpack.c.h.bf16 %v7260_v19  ;;  %v1621_v11 = vmax.f32 %v1557_v43, 0.0  ;;  %v1507_v63 = vmul.f32 %v7256_v48, %v1442_v52  ;;  %v7495_v26 = vld [vmem:[%s6289_s14 + $0x98] sm:$0xff]  }
 0x21a   : > { %v1524_v28 = vmul.f32 %v7256_v48, %v1459_v1  ;;  %5624 = vpow2.f32 %v7136_v55  ;;  %v7474_v42 = vadd.f32 %v6707_v50, %v7232_v8  ;;  %v1480_v12 = vmul.f32 0.999995, %v7457_v6  ;;  %2544 = vrot.lane.b32.xlu2 %v7144_v60, %s6089_s21  ;;  %2072 = vst.msk [vmem:[%s6621_s4 + $0x40] sm:$0xff] %vm2063_vm3, %v2007_v7  ;;  %v7529_v8 = vpop.f32.mrf.mxu3 }
 0x21b   : > { %v1558_v19 = vadd.f32 %v7251_v34, %v1493_v56  ;;  %v7483_v20 = vadd.f32 1.0, %v7120_v3  ;;  %v1189_v55 = vadd.f32 %v6707_v50, %v6953_v49  ;;  %5626 = vrcp.f32 %v2339_v9 }
 0x21c   : > { %v5623_v10 = vpop.eup %5622  ;;  %v2149_v43 = vsub.f32 0.0, %v7442_v38  ;;  %v1522_v52 = vmul.f32 %v7256_v48, %v1457_v31  ;;  %v1734_v60 = vadd.f32 %v1670_v18, %v1412_v45  ;;  %v1702_v30 = vadd.f32 %v1638_v15, %v1380_v53 }
 0x21d   : > { %2534 = vrot.lane.b32.xlu0 %v5623_v10, %s6089_s21  ;;  %v1156_v2 = vadd.f32 %v6630_v36, %v10803_v37  ;;  %v1918_v56 = vpop.permute.xlu1 %1917  ;;  %v1685_v1 = vadd.f32 %v1621_v11, %v1363_v27  ;;  %v1572_v3 = vadd.f32 %v7251_v34, %v1507_v63  ;;  %v1589_v7 = vadd.f32 %v7251_v34, %v1524_v28  ;;  %v10804_v11 = vld [vmem:[#allocation73_spill] sm:$0xff]  ;;  %v7504_v28 = vpop.f32.mrf.mxu2 }
 0x21e   : > { %v1168_v38 = vadd.f32 %v6849_v22, %v6869_v41  ;;  %v1545_v31 = vmul.f32 %v7256_v48, %v1480_v12  ;;  %v2054_v9 = vmul.f32 %v1918_v56, %v1734_v60  ;;  %v1820_v61 = vpop.permute.xlu0 %1819  ;;  %v1854_v45 = vpop.permute.xlu2 %1853  ;;  %v1364_v18 = vunpack.c.l.bf16 %v549_v62  ;;  %v567_v56 = vld [vmem:[%s6289_s14 + $0x64] sm:$0xf] }
 0x21f   : > { %v1622_v36 = vmax.f32 %v1558_v19, 0.0  ;;  %v2005_v53 = vmul.f32 %v1820_v61, %v1685_v1  ;;  %v2022_v15 = vmul.f32 %v1854_v45, %v1702_v30  ;;  %v2234_v27 = vmul.f32 1.442695, %v2149_v43  ;;  %v10806_v45 = vld [vmem:[#allocation98_spill] sm:$0xff] }
 0x220   : > { %v1316_v63 = vadd.f32 %v10804_v11, %v1156_v2  ;;  %v7502_v10 = vpop.eup %5624  ;;  %2119 = vst.msk [vmem:[%s6621_s4 + $0x1b8] sm:$0xff] %vm2063_vm3, %v2054_v9  ;;  %v1378_v12 = vunpack.c.h.bf16 %v7291_v33  ;;  %v1395_v60 = vunpack.c.l.bf16 %v7495_v26  ;;  %v7512_v62 = vadd.f32 %v10799_v46, %v1168_v38  ;;  %v10805_v38 = vld [vmem:[#allocation125_spill] sm:$0xff] }
 0x221   : > { %v1188_v19 = vadd.f32 %v6849_v22, %v6879_v59  ;;  %v5627_v43 = vpop.eup %5626  ;;  %1893 = vrot.lane.b32.xlu1 %v7504_v28, %s6088_s30  ;;  %2070 = vst.msk [vmem:[%s6621_s4 + $0x30] sm:$0xff] %vm2063_vm3, %v2005_v53  ;;  %v1636_v30 = vmax.f32 %v1572_v3, 0.0  ;;  %v1653_v2 = vmax.f32 %v1589_v7, 0.0  ;;  %v2343_v33 = vadd.f32 1.0, %v7166_v23 }
 0x222   : > { %v1446_v1 = vmul.f32 0.999995, %v1316_v63  ;;  %v2153_v9 = vsub.f32 0.0, %v1316_v63  ;;  %2550 = vrot.lane.b32.xlu2 %v5627_v43, %s6089_s21  ;;  %2087 = vst.msk [vmem:[%s6621_s4 + $0xb8] sm:$0xff] %vm2063_vm3, %v2022_v15  ;;  %v1686_v46 = vadd.f32 %v1622_v36, %v1364_v18  ;;  %v1573_v61 = vadd.f32 %v7251_v34, %v10805_v38 }
 0x223   : > { %v7527_v11 = vadd.f32 %v10806_v45, %v1188_v19  ;;  %5628 = vpow2.f32 %v2234_v27  ;;  %v1587_v3 = vadd.f32 %v7251_v34, %v1522_v52  ;;  %v1610_v18 = vadd.f32 %v7251_v34, %v1545_v31  ;;  %v7539_v27 = vld [vmem:[%s6289_s14 + $0xec] sm:$0xff]  }
 0x224   : > { %v1511_v7 = vmul.f32 %v7256_v48, %v1446_v1  ;;  %v2242_v23 = vmul.f32 1.442695, %v2153_v9  ;;  %v1382_v36 = vunpack.c.l.bf16 %v567_v56  ;;  %v1458_v53 = vmul.f32 0.999995, %v7512_v62 }
 0x225   : > { %1933 = vrot.lane.b32.xlu0 %v7529_v8, %s6088_s30  ;;  %v1478_v15 = vmul.f32 0.999995, %v7527_v11  ;;  %v1822_v63 = vpop.permute.xlu1 %1821  ;;  %v1700_v19 = vadd.f32 %v1636_v30, %v1378_v12  ;;  %v1717_v43 = vadd.f32 %v1653_v2, %v1395_v60  ;;  %v1432_v1 = vmul.f32 0.999995, %v7383_v24 }
 0x226   : > { %v1576_v52 = vadd.f32 %v7251_v34, %v1511_v7  ;;  %v7544_v9 = vadd.f32 %v7027_v25, %v1189_v55  ;;  %v2006_v38 = vmul.f32 %v1822_v63, %v1686_v46  ;;  %v1850_v31 = vpop.permute.xlu0 %1849  ;;  %v1884_v56 = vpop.permute.xlu2 %1883  ;;  %v1379_v45 = vunpack.c.l.bf16 %v7453_v54  ;;  %v10807_v46 = vld [vmem:[#allocation115_spill] sm:$0xff]  ;;  %v10809_v63 = vld [vmem:[#allocation133_spill] sm:$0xff] }
 0x227   : > { %5630 = vpow2.f32 %v2242_v23  ;;  %v2020_v49 = vmul.f32 %v1850_v31, %v1700_v19  ;;  %v2037_v59 = vmul.f32 %v1884_v56, %v1717_v43  ;;  %v1393_v12 = vunpack.c.h.bf16 %v7344_v21  ;;  %v10814_v56 = vld [vmem:[#allocation97_spill] sm:$0xff] }
 0x228   : > { %v1640_v60 = vmax.f32 %v1576_v52, 0.0  ;;  %2071 = vst.msk [vmem:[%s6621_s4 + $0x38] sm:$0xff] %vm2063_vm3, %v2006_v38  ;;  %v1637_v30 = vmax.f32 %v1573_v61, 0.0  ;;  %v1416_v24 = vunpack.c.l.bf16 %v7539_v27  ;;  %v1523_v25 = vmul.f32 %v7256_v48, %v1458_v53  ;;  %v10813_v52 = vld [vmem:[#allocation88_spill] sm:$0xff]  ;;  %v579_v38 = vld [vmem:[%s6289_s14 + $0x94] sm:$0xf] }
 0x229   : > { %v1543_v55 = vmul.f32 %v7256_v48, %v1478_v15  ;;  %v5629_v2 = vpop.eup %5628  ;;  %2536 = vrot.lane.b32.xlu1 %v10807_v46, %s6089_s21  ;;  %2085 = vst.msk [vmem:[%s6621_s4 + $0xa8] sm:$0xff] %vm2063_vm3, %v2020_v49  ;;  %v1651_v54 = vmax.f32 %v1587_v3, 0.0  ;;  %v1674_v7 = vmax.f32 %v1610_v18, 0.0  ;;  %v1497_v23 = vmul.f32 %v7256_v48, %v1432_v1  ;;  %v10808_v15 = vld [vmem:[#allocation53_spill] sm:$0xff]  ;;  %v10810_v3 = vld [vmem:[#allocation92_spill] sm:$0xff] }
 0x22a   : > { %v1704_v21 = vadd.f32 %v1640_v60, %v1382_v36  ;;  %5632 = vrcp.f32 %v7483_v20  ;;  %v2164_v61 = vsub.f32 0.0, %v7421_v35  ;;  %v1479_v53 = vmul.f32 0.999995, %v7544_v9  ;;  %2538 = vrot.lane.b32.xlu2 %v10808_v15, %s6089_s21  ;;  %2102 = vst.msk [vmem:[%s6621_s4 + $0x130] sm:$0xff] %vm2063_vm3, %v2037_v59  ;;  %v10811_v36 = vld [vmem:[#allocation104_spill] sm:$0xff]  ;;  %v10812_v20 = vld [vmem:[#allocation63_spill] sm:$0xff] }
 0x22b   : > { %v1172_v49 = vadd.f32 %v6849_v22, %v10809_v63  ;;  %5634 = vrcp.f32 %v2343_v33  ;;  %v2162_v18 = vsub.f32 0.0, %v10810_v3  ;;  %v7570_v19 = vadd.f32 %v10811_v36, %v7474_v42 }
 0x22c   : > { %v2024_v35 = vmul.f32 %v10812_v20, %v1704_v21  ;;  %v1701_v1 = vadd.f32 %v1637_v30, %v1379_v45  ;;  %v1588_v59 = vadd.f32 %v7251_v34, %v1523_v25  ;;  %v1608_v31 = vadd.f32 %v7251_v34, %v1543_v55 }
 0x22d   : > { %v5631_v43 = vpop.eup %5630  ;;  %2546 = vrot.lane.b32.xlu0 %v10813_v52, %s6089_s21  ;;  %v7579_v33 = vadd.f32 %v10814_v56, %v1172_v49  ;;  %v1852_v60 = vpop.permute.xlu1 %1851  ;;  %v1715_v46 = vadd.f32 %v1651_v54, %v1393_v12  ;;  %v1738_v42 = vadd.f32 %v1674_v7, %v1416_v24  ;;  %v1562_v21 = vadd.f32 %v7251_v34, %v1497_v23  ;;  %v7588_v54 = vld [vmem:[%s6289_s14 + $0x2c] sm:$0xff]  }
 0x22e   : > { %2089 = vst.msk [vmem:[%s6621_s4 + $0xc8] sm:$0xff] %vm2063_vm3, %v2024_v35  ;;  %v1430_v15 = vmul.f32 0.999995, %v7324_v13  ;;  %v1544_v45 = vmul.f32 %v7256_v48, %v1479_v53  ;;  %v2021_v30 = vmul.f32 %v1852_v60, %v1701_v1  ;;  %v1880_v25 = vpop.permute.xlu0 %1879  ;;  %v1926_v3 = vpop.permute.xlu2 %1925  ;;  %v2341_v55 = vadd.f32 1.0, %v5629_v2  ;;  %v10815_v2 = vld [vmem:[#allocation121_spill] sm:$0xff] }
 0x22f   : > { %v1462_v49 = vmul.f32 0.999995, %v7579_v33  ;;  %v2035_v20 = vmul.f32 %v1880_v25, %v1715_v46  ;;  %v2058_v52 = vmul.f32 %v1926_v3, %v1738_v42  ;;  %v2345_v12 = vadd.f32 1.0, %v5631_v43  ;;  %v10816_v46 = vld [vmem:[#allocation122_spill] sm:$0xff] }
 0x230   : > { %v1394_v24 = vunpack.c.l.bf16 %v579_v38  ;;  %v5633_v7 = vpop.eup %5632  ;;  %2086 = vst.msk [vmem:[%s6621_s4 + $0xb0] sm:$0xff] %vm2063_vm3, %v2021_v30  ;;  %v1652_v13 = vmax.f32 %v1588_v59, 0.0  ;;  %v1414_v23 = vunpack.c.h.bf16 %v7380_v51  ;;  %v1672_v53 = vmax.f32 %v1608_v31, 0.0  ;;  %v10817_v51 = vld [vmem:[#allocation52_spill] sm:$0xff]  ;;  %v10818_v30 = vld [vmem:[#allocation127_spill] sm:$0xff] }
 0x231   : > { %v1368_v35 = vunpack.c.l.bf16 %v7588_v54  ;;  %v7594_v1 = vpop.eup %5634  ;;  %2548 = vrot.lane.b32.xlu1 %v10815_v2, %s6089_s21  ;;  %2100 = vst.msk [vmem:[%s6621_s4 + $0x120] sm:$0xff] %vm2063_vm3, %v2035_v20  ;;  %v1626_v43 = vmax.f32 %v1562_v21, 0.0  ;;  %v1495_v38 = vmul.f32 %v7256_v48, %v1430_v15  ;;  %v1527_v60 = vmul.f32 %v7256_v48, %v1462_v49  ;;  %v10819_v49 = vld [vmem:[#allocation114_spill] sm:$0xff] }
 0x232   : > { %v1170_v59 = vadd.f32 %v6849_v22, %v10816_v46  ;;  %v2264_v42 = vmul.f32 1.442695, %v2164_v61  ;;  %v7606_v31 = vadd.f32 %v6707_v50, %v10817_v51  ;;  %v1191_v25 = vadd.f32 %v6707_v50, %v10818_v30  ;;  %2556 = vrot.lane.b32.xlu2 %v5633_v7, %s6089_s21  ;;  %2123 = vst.msk [vmem:[%s6621_s4 + $0x1d8] sm:$0xff] %vm2063_vm3, %v2058_v52 }
 0x233   : > { %5636 = vrcp.f32 %v2341_v55  ;;  %v2260_v21 = vmul.f32 1.442695, %v2162_v18  ;;  %v7615_v15 = vadd.f32 %v10814_v56, %v7397_v0  ;;  %v1483_v3 = vmul.f32 0.999995, %v7570_v19  ;;  %v600_v18 = vld [vmem:[%s6289_s14 + $0xe8] sm:$0xf] }
 0x234   : > { %5638 = vrcp.f32 %v2345_v12  ;;  %v7618_v61 = vadd.f32 %v10802_v40, %v1170_v59  ;;  %v1716_v20 = vadd.f32 %v1652_v13, %v1394_v24  ;;  %v1736_v2 = vadd.f32 %v1672_v53, %v1414_v23  ;;  %v10820_v59 = vld [vmem:[#allocation124_spill] sm:$0xff]  ;;  %v10821_v53 = vld [vmem:[#allocation77_spill] sm:$0xff] }
 0x235   : > { %2552 = vrot.lane.b32.xlu0 %v10819_v49, %s6089_s21  ;;  %v1609_v7 = vadd.f32 %v7251_v34, %v1544_v45  ;;  %v1882_v52 = vpop.permute.xlu1 %1881  ;;  %v1690_v55 = vadd.f32 %v1626_v43, %v1368_v35  ;;  %v1560_v0 = vadd.f32 %v7251_v34, %v1495_v38  ;;  %v1592_v56 = vadd.f32 %v7251_v34, %v1527_v60 }
 0x236   : > { %v1460_v40 = vmul.f32 0.999995, %v7618_v61  ;;  %v2348_v12 = vadd.f32 1.0, %v7437_v39  ;;  %5640 = vpow2.f32 %v2264_v42  ;;  %v7630_v49 = vadd.f32 %v10820_v59, %v1191_v25  ;;  %v1922_v45 = vpop.permute.xlu0 %1921  ;;  %v1830_v13 = vpop.permute.xlu2 %1829 }
 0x237   : > { %v2036_v24 = vmul.f32 %v1882_v52, %v1716_v20  ;;  %v1461_v23 = vmul.f32 0.999995, %v7615_v15  ;;  %v2160_v35 = vsub.f32 0.0, %v10821_v53  ;;  %v2056_v43 = vmul.f32 %v1922_v45, %v1736_v2  ;;  %v7639_v20 = vld [vmem:[%s6289_s14 + $0xa4] sm:$0xff]  }
 0x238   : > { %v2010_v38 = vmul.f32 %v1830_v13, %v1690_v55  ;;  %v1548_v30 = vmul.f32 %v7256_v48, %v1483_v3  ;;  %v1415_v39 = vunpack.c.l.bf16 %v600_v18  ;;  %v1673_v42 = vmax.f32 %v1609_v7, 0.0  ;;  %v10822_v18 = vld [vmem:[#allocation134_spill] sm:$0xff] }
 0x239   : > { %v5637_v60 = vpop.eup %5636  ;;  %2101 = vst.msk [vmem:[%s6621_s4 + $0x128] sm:$0xff] %vm2063_vm3, %v2036_v24  ;;  %v1366_v25 = vunpack.c.h.bf16 %v7410_v58  ;;  %v1624_v53 = vmax.f32 %v1560_v0, 0.0  ;;  %v1398_v2 = vunpack.c.l.bf16 %v7639_v20  ;;  %v1656_v55 = vmax.f32 %v1592_v56, 0.0 }
 0x23a   : > { %v5639_v52 = vpop.eup %5638  ;;  %2554 = vrot.lane.b32.xlu1 %v5637_v60, %s6089_s21  ;;  %2121 = vst.msk [vmem:[%s6621_s4 + $0x1c8] sm:$0xff] %vm2063_vm3, %v2056_v43  ;;  %v1525_v3 = vmul.f32 %v7256_v48, %v1460_v40  ;;  %v2349_v24 = vadd.f32 1.0, %v7502_v10  ;;  %5642 = vpow2.f32 %v2260_v21  ;;  %v1192_v7 = vadd.f32 %v6849_v22, %v10822_v18  ;;  %v10823_v43 = vld [vmem:[#allocation103_spill] sm:$0xff] }
 0x23b   : > { %v1481_v58 = vmul.f32 0.999995, %v7630_v49  ;;  %2562 = vrot.lane.b32.xlu2 %v5639_v52, %s6089_s21  ;;  %2075 = vst.msk [vmem:[%s6621_s4 + $0x58] sm:$0xff] %vm2063_vm3, %v2010_v38  ;;  %5644 = vrcp.f32 %v2348_v12  ;;  %v1526_v0 = vmul.f32 %v7256_v48, %v1461_v23  ;;  %v2168_v56 = vsub.f32 0.0, %v7615_v15  ;;  %v552_v15 = vld [vmem:[%s6289_s14 + $0x28] sm:$0xf] }
 0x23c   : > { %v2256_v45 = vmul.f32 1.442695, %v2160_v35  ;;  %v7655_v40 = vpop.eup %5640  ;;  %v7658_v10 = vadd.f32 %v10820_v59, %v1192_v7  ;;  %v2161_v21 = vsub.f32 0.0, %v7365_v17  ;;  %v1737_v13 = vadd.f32 %v1673_v42, %v1415_v39  ;;  %v10824_v39 = vld [vmem:[#allocation128_spill] sm:$0xff] }
 0x23d   : > { %2558 = vrot.lane.b32.xlu0 %v7594_v1, %s6089_s21  ;;  %v1561_v12 = vadd.f32 %v7251_v34, %v10823_v43  ;;  %v1924_v38 = vpop.permute.xlu1 %1923  ;;  %v1688_v23 = vadd.f32 %v1624_v53, %v1366_v25  ;;  %v1720_v60 = vadd.f32 %v1656_v55, %v1398_v2  ;;  %v1590_v35 = vadd.f32 %v7251_v34, %v1525_v3  ;;  %v7672_v43 = vld [vmem:[%s6289_s14 + $0xf8] sm:$0xff]  }
 0x23e   : > { %v1613_v59 = vadd.f32 %v7251_v34, %v1548_v30  ;;  %v1546_v52 = vmul.f32 %v7256_v48, %v1481_v58  ;;  %v2165_v17 = vsub.f32 0.0, %v7512_v62  ;;  %v2057_v7 = vmul.f32 %v1924_v38, %v1737_v13  ;;  %v1826_v18 = vpop.permute.xlu0 %1825  ;;  %v1890_v1 = vpop.permute.xlu2 %1889  ;;  %v10825_v38 = vld [vmem:[#allocation126_spill] sm:$0xff] }
 0x23f   : > { %v2347_v42 = vadd.f32 1.0, %v10824_v39  ;;  %5646 = vpow2.f32 %v2256_v45  ;;  %v2163_v25 = vsub.f32 0.0, %v7320_v4  ;;  %v2008_v53 = vmul.f32 %v1826_v18, %v1688_v23  ;;  %v10826_v23 = vld [vmem:[#allocation21_spill] sm:$0xff] }
 0x240   : > { %v2040_v2 = vmul.f32 %v1890_v1, %v1720_v60  ;;  %v5643_v55 = vpop.eup %5642  ;;  %v2258_v3 = vmul.f32 1.442695, %v2161_v21  ;;  %2122 = vst.msk [vmem:[%s6621_s4 + $0x1d0] sm:$0xff] %vm2063_vm3, %v2057_v7  ;;  %v1367_v30 = vunpack.c.l.bf16 %v552_v15  ;;  %v1625_v62 = vmax.f32 %v1561_v12, 0.0  ;;  %v10827_v60 = vld [vmem:[#allocation106_spill] sm:$0xff]  ;;  %v10828_v15 = vld [vmem:[#allocation95_spill] sm:$0xff] }
 0x241   : > { %v1396_v58 = vunpack.c.h.bf16 %v7495_v26  ;;  %v5645_v13 = vpop.eup %5644  ;;  %2073 = vst.msk [vmem:[%s6621_s4 + $0x48] sm:$0xff] %vm2063_vm3, %v2008_v53  ;;  %v1654_v45 = vmax.f32 %v1590_v35, 0.0  ;;  %v1419_v4 = vunpack.c.l.bf16 %v7672_v43  ;;  %v1677_v18 = vmax.f32 %v1613_v59, 0.0  ;;  %v10829_v7 = vld [vmem:[#allocation83_spill] sm:$0xff]  ;;  %v10830_v53 = vld [vmem:[#allocation117_spill] sm:$0xff] }
 0x242   : > { %2560 = vrot.lane.b32.xlu1 %v10825_v38, %s6089_s21  ;;  %v1175_v21 = vadd.f32 %v6707_v50, %v10826_v23  ;;  %v1434_v1 = vmul.f32 0.999995, %v10827_v60  ;;  %v7688_v12 = vadd.f32 %v10828_v15, %v7606_v31  ;;  %v2266_v26 = vmul.f32 1.442695, %v2165_v17  ;;  %2105 = vst.msk [vmem:[%s6621_s4 + $0x148] sm:$0xff] %vm2063_vm3, %v2040_v2 }
 0x243   : > { %2568 = vrot.lane.b32.xlu2 %v5645_v13, %s6089_s21  ;;  %5648 = vrcp.f32 %v2347_v42  ;;  %v2272_v35 = vmul.f32 1.442695, %v2168_v56  ;;  %v1482_v59 = vmul.f32 0.999995, %v7658_v10  ;;  %v2262_v50 = vmul.f32 1.442695, %v2163_v25 }
 0x244   : > { %5650 = vrcp.f32 %v2349_v24  ;;  %v7695_v39 = vadd.f32 %v10829_v7, %v1175_v21  ;;  %v1689_v31 = vadd.f32 %v1625_v62, %v1367_v30  ;;  %v1591_v17 = vadd.f32 %v7251_v34, %v1526_v0  ;;  %v582_v42 = vld [vmem:[%s6289_s14 + $0xa0] sm:$0xf] }
 0x245   : > { %5652 = vpow2.f32 %v2258_v3  ;;  %2564 = vrot.lane.b32.xlu0 %v10830_v53, %s6089_s21  ;;  %v5647_v13 = vpop.eup %5646  ;;  %v1828_v38 = vpop.permute.xlu1 %1827  ;;  %v1718_v60 = vadd.f32 %v1654_v45, %v1396_v58  ;;  %v1741_v2 = vadd.f32 %v1677_v18, %v1419_v4  ;;  %v1611_v24 = vadd.f32 %v7251_v34, %v1546_v52  ;;  %v7705_v58 = vld [vmem:[#allocation10 + $0x2] ss:$0 sm:$0xff] }
 0x246   : > { %v1465_v56 = vmul.f32 0.999995, %v7695_v39  ;;  %v2354_v21 = vadd.f32 1.0, %v5643_v55  ;;  %v2166_v25 = vsub.f32 0.0, %v7448_v57  ;;  %5654 = vpow2.f32 %v2266_v26  ;;  %v1886_v53 = vpop.permute.xlu0 %1885  ;;  %v1932_v30 = vpop.permute.xlu2 %1931  ;;  %v10831_v26 = vld [vmem:[#allocation101_spill] sm:$0xff] }
 0x247   : > { %v2009_v3 = vmul.f32 %v1828_v38, %v1689_v31  ;;  %v1547_v0 = vmul.f32 %v7256_v48, %v1482_v59  ;;  %v2038_v62 = vmul.f32 %v1886_v53, %v1718_v60  ;;  %v2061_v5 = vmul.f32 %v1932_v30, %v1741_v2  ;;  %v7716_v31 = vld [vmem:[#allocation10 + $0x3] ss:$0 sm:$0xff]  ;;  %v10832_v60 = vld [vmem:[#allocation74_spill] sm:$0xff] }
 0x248   : > { %v1530_v45 = vmul.f32 %v7705_v58, %v1465_v56  ;;  %5656 = vpow2.f32 %v2262_v50  ;;  %v2352_v34 = vadd.f32 1.0, %v5647_v13  ;;  %v1397_v57 = vunpack.c.l.bf16 %v582_v42  ;;  %v603_v30 = vld [vmem:[%s6289_s14 + $0xf4] sm:$0xf] }
 0x249   : > { %v5649_v4 = vpop.eup %5648  ;;  %2074 = vst.msk [vmem:[%s6621_s4 + $0x50] sm:$0xff] %vm2063_vm3, %v2009_v3  ;;  %v1655_v52 = vmax.f32 %v1591_v17, 0.0  ;;  %v1417_v48 = vunpack.c.h.bf16 %v7539_v27  ;;  %v1675_v18 = vmax.f32 %v1611_v24, 0.0  ;;  %v1498_v59 = vmul.f32 %v7705_v58, %v10831_v26  ;;  %v7725_v27 = vld [vmem:[%s6289_s14 + $0xb0] sm:$0xff]  }
 0x24a   : > { %v5651_v55 = vpop.eup %5650  ;;  %2566 = vrot.lane.b32.xlu1 %v5649_v4, %s6089_s21  ;;  %2103 = vst.msk [vmem:[%s6621_s4 + $0x138] sm:$0xff] %vm2063_vm3, %v2038_v62  ;;  %v1595_v50 = vadd.f32 %v7716_v31, %v1530_v45  ;;  %v1499_v38 = vmul.f32 %v7705_v58, %v1434_v1  ;;  %5658 = vrcp.f32 %v2354_v21  ;;  %v2268_v17 = vmul.f32 1.442695, %v2166_v25 }
 0x24b   : > { %v5653_v13 = vpop.eup %5652  ;;  %2574 = vrot.lane.b32.xlu2 %v10832_v60, %s6089_s21  ;;  %2126 = vst.msk [vmem:[%s6621_s4 + $0x1f0] sm:$0xff] %vm2063_vm3, %v2061_v5  ;;  %v1463_v2 = vmul.f32 0.999995, %v7688_v12  ;;  %5660 = vpow2.f32 %v2272_v35  ;;  %v1401_v42 = vunpack.c.l.bf16 %v7725_v27  ;;  %v2167_v1 = vsub.f32 0.0, %v7618_v61 }
 0x24c   : > { %v1659_v24 = vmax.f32 %v1595_v50, 0.0  ;;  %v5655_v56 = vpop.eup %5654  ;;  %v1719_v21 = vadd.f32 %v1655_v52, %v1397_v57  ;;  %v1612_v25 = vadd.f32 %v7716_v31, %v1547_v0  ;;  %v1174_v3 = vadd.f32 %v6849_v22, %v7504_v28 }
 0x24d   : > { %2570 = vrot.lane.b32.xlu0 %v5651_v55, %s6089_s21  ;;  %5662 = vrcp.f32 %v2352_v34  ;;  %v1888_v5 = vpop.permute.xlu1 %1887  ;;  %v1739_v53 = vadd.f32 %v1675_v18, %v1417_v48  ;;  %v1563_v35 = vadd.f32 %v7716_v31, %v1498_v59  ;;  %v2353_v61 = vadd.f32 1.0, %v5653_v13  ;;  %v10833_v48 = vld [vmem:[#allocation39_spill] sm:$0xff] }
 0x24e   : > { %v1723_v62 = vadd.f32 %v1659_v24, %v1401_v42  ;;  %v5657_v45 = vpop.eup %5656  ;;  %5664 = vpow2.f32 %v2268_v17  ;;  %v2039_v4 = vmul.f32 %v1888_v5, %v1719_v21  ;;  %v1928_v55 = vpop.permute.xlu0 %1927  ;;  %v7739_v0 = vadd.f32 %v10828_v15, %v1174_v3  ;;  %v10834_v15 = vld [vmem:[#allocation130_spill] sm:$0xff] }
 0x24f   : > { %v7736_v26 = vpop.permute.xlu2 %2520  ;;  %v2169_v34 = vsub.f32 0.0, %v7579_v33  ;;  %v2059_v57 = vmul.f32 %v1928_v55, %v1739_v53  ;;  %v2357_v52 = vadd.f32 1.0, %v5655_v56  ;;  %v2270_v59 = vmul.f32 1.442695, %v2167_v1  ;;  %v10835_v55 = vld [vmem:[#allocation107_spill] sm:$0xff] }
 0x250   : > { %v2043_v18 = vmul.f32 %v10833_v48, %v1723_v62  ;;  %v5659_v50 = vpop.eup %5658  ;;  %2104 = vst.msk [vmem:[%s6621_s4 + $0x140] sm:$0xff] %vm2063_vm3, %v2039_v4  ;;  %v1418_v17 = vunpack.c.l.bf16 %v603_v30  ;;  %v1676_v60 = vmax.f32 %v1612_v25, 0.0  ;;  %v2171_v42 = vsub.f32 0.0, %v7739_v0  ;;  %v555_v62 = vld [vmem:[%s6289_s14 + $0x34] sm:$0xf] }
 0x251   : > { %v5661_v24 = vpop.eup %5660  ;;  %v1528_v13 = vmul.f32 %v7705_v58, %v1463_v2  ;;  %2124 = vst.msk [vmem:[%s6621_s4 + $0x1e0] sm:$0xff] %vm2063_vm3, %v2059_v57  ;;  %v2355_v33 = vadd.f32 1.0, %v5657_v45  ;;  %v1369_v56 = vunpack.c.h.bf16 %v7588_v54  ;;  %v1627_v21 = vmax.f32 %v1563_v35, 0.0  ;;  %v10836_v48 = vld [vmem:[#allocation26_spill] sm:$0xff] }
 0x252   : > { %2572 = vrot.lane.b32.xlu1 %v10834_v15, %s6089_s21  ;;  %5666 = vrcp.f32 %v2353_v61  ;;  %v2278_v1 = vmul.f32 1.442695, %v2171_v42  ;;  %2108 = vst.msk [vmem:[%s6621_s4 + $0x160] sm:$0xff] %vm2063_vm3, %v2043_v18  ;;  %v2274_v3 = vmul.f32 1.442695, %v2169_v34  ;;  %v2170_v5 = vsub.f32 0.0, %v7688_v12 }
 0x253   : > { %2580 = vrot.lane.b32.xlu2 %v5659_v50, %s6089_s21  ;;  %v5663_v25 = vpop.eup %5662  ;;  %5668 = vrcp.f32 %v2357_v52  ;;  %v1740_v53 = vadd.f32 %v1676_v60, %v1418_v17  ;;  %v1564_v54 = vadd.f32 %v7716_v31, %v1499_v38  ;;  %v1691_v35 = vadd.f32 %v1627_v21, %v1369_v56 }
 0x254   : > { %v5665_v2 = vpop.eup %5664  ;;  %5670 = vpow2.f32 %v2270_v59  ;;  %v1593_v45 = vadd.f32 %v7716_v31, %v1528_v13  ;;  %v2356_v4 = vadd.f32 1.0, %v7655_v40  ;;  %v2174_v61 = vsub.f32 0.0, %v10835_v55 }
 0x255   : > { %2576 = vrot.lane.b32.xlu0 %v5663_v25, %s6089_s21  ;;  %5672 = vrcp.f32 %v2355_v33  ;;  %v1930_v30 = vpop.permute.xlu1 %1929  ;;  %v2360_v57 = vadd.f32 1.0, %v5661_v24  ;;  %v1176_v38 = vadd.f32 %v6849_v22, %v10836_v48  ;;  %v2276_v50 = vmul.f32 1.442695, %v2170_v5 }
 0x256   : > { %v2060_v34 = vmul.f32 %v1930_v30, %v1740_v53  ;;  %v1832_v12 = vpop.permute.xlu0 %1831  ;;  %5674 = vpow2.f32 %v2278_v1  ;;  %v1370_v17 = vunpack.c.l.bf16 %v555_v62  ;;  %v1628_v40 = vmax.f32 %v1564_v54, 0.0  ;;  %v10838_v62 = vld [vmem:[#allocation120_spill] sm:$0xff] }
 0x257   : > { %5676 = vpow2.f32 %v2274_v3  ;;  %v2011_v52 = vmul.f32 %v1832_v12, %v1691_v35  ;;  %v7766_v59 = vpop.permute.xlu2 %2532  ;;  %v2172_v60 = vsub.f32 0.0, %v7695_v39  ;;  %v2358_v24 = vadd.f32 1.0, %v5665_v2  ;;  %v10837_v3 = vld [vmem:[#allocation110_spill] sm:$0xff] }
 0x258   : > { %v5667_v18 = vpop.eup %5666  ;;  %2125 = vst.msk [vmem:[%s6621_s4 + $0x1e8] sm:$0xff] %vm2063_vm3, %v2060_v34  ;;  %v1399_v13 = vunpack.c.h.bf16 %v7639_v20  ;;  %v1657_v15 = vmax.f32 %v1593_v45, 0.0  ;;  %v1336_v33 = vadd.f32 %v10829_v7, %v1176_v38  ;;  %5678 = vrcp.f32 %v2356_v4 }
 0x259   : > { %v5669_v42 = vpop.eup %5668  ;;  %2076 = vst.msk [vmem:[%s6621_s4 + $0x60] sm:$0xff] %vm2063_vm3, %v2011_v52  ;;  %v2284_v21 = vmul.f32 1.442695, %v2174_v61  ;;  %5680 = vrcp.f32 %v2360_v57  ;;  %v2175_v5 = vsub.f32 0.0, %v10837_v3  ;;  %v1692_v2 = vadd.f32 %v1628_v40, %v1370_v17 }
 0x25a   : > { %2578 = vrot.lane.b32.xlu1 %v5667_v18, %s6089_s21  ;;  %v5671_v56 = vpop.eup %5670  ;;  %v1466_v25 = vmul.f32 0.999995, %v1336_v33  ;;  %5682 = vpow2.f32 %v2276_v50  ;;  %v2280_v53 = vmul.f32 1.442695, %v2172_v60  ;;  %v1721_v54 = vadd.f32 %v1657_v15, %v1399_v13 }
 0x25b   : > { %2586 = vrot.lane.b32.xlu2 %v5669_v42, %s6089_s21  ;;  %v5673_v1 = vpop.eup %5672  ;;  %5684 = vrcp.f32 %v2358_v24  ;;  %v2173_v35 = vsub.f32 0.0, %v1336_v33  ;;  %v2177_v45 = vsub.f32 0.0, %v10838_v62  ;;  %v2359_v61 = vadd.f32 1.0, %v5671_v56  ;;  %v10839_v56 = vld [vmem:[#allocation119_spill] sm:$0xff] }
 0x25c   : > { %v5675_v39 = vpop.eup %5674  ;;  %v1531_v30 = vmul.f32 %v7705_v58, %v1466_v25  ;;  %5686 = vpow2.f32 %v2284_v21  ;;  %v1402_v57 = vunpack.c.h.bf16 %v7725_v27  ;;  %v2286_v13 = vmul.f32 1.442695, %v2175_v5 }
 0x25d   : > { %2582 = vrot.lane.b32.xlu0 %v5673_v1, %s6089_s21  ;;  %v5677_v20 = vpop.eup %5676  ;;  %v1834_v7 = vpop.permute.xlu1 %1833  ;;  %v2363_v12 = vadd.f32 1.0, %v5675_v39  ;;  %5688 = vpow2.f32 %v2280_v53  ;;  %v2282_v40 = vmul.f32 1.442695, %v2173_v35  ;;  %v2290_v42 = vmul.f32 1.442695, %v2177_v45  ;;  %v10840_v1 = vld [vmem:[#allocation69_spill] sm:$0xff] }
 0x25e   : > { %v2012_v4 = vmul.f32 %v1834_v7, %v1692_v2  ;;  %v1892_v55 = vpop.permute.xlu0 %1891  ;;  %v1596_v52 = vadd.f32 %v7716_v31, %v1531_v30  ;;  %v5679_v38 = vpop.eup %5678  ;;  %v2361_v18 = vadd.f32 1.0, %v5677_v20  ;;  %5690 = vrcp.f32 %v2359_v61  ;;  %v10841_v2 = vld [vmem:[#allocation131_spill] sm:$0xff]  ;;  %v10842_v20 = vld [vmem:[#allocation113_spill] sm:$0xff] }
 0x25f   : > { %v2041_v34 = vmul.f32 %v1892_v55, %v1721_v54  ;;  %v5681_v50 = vpop.eup %5680  ;;  %v7787_v24 = vpop.permute.xlu2 %2514  ;;  %5692 = vrcp.f32 %v2363_v12  ;;  %v2176_v21 = vsub.f32 0.0, %v10839_v56  ;;  %v2180_v53 = vsub.f32 0.0, %v10841_v2 }
 0x260   : > { %2077 = vst.msk [vmem:[%s6621_s4 + $0x68] sm:$0xff] %vm2063_vm3, %v2012_v4  ;;  %v1660_v17 = vmax.f32 %v1596_v52, 0.0  ;;  %v5683_v60 = vpop.eup %5682  ;;  %5694 = vrcp.f32 %v2361_v18  ;;  %v2178_v7 = vsub.f32 0.0, %v10842_v20  ;;  %v10843_v18 = vld [vmem:[#allocation136_spill] sm:$0xff] }
 0x261   : > { %2106 = vst.msk [vmem:[%s6621_s4 + $0x150] sm:$0xff] %vm2063_vm3, %v2041_v34  ;;  %v5685_v27 = vpop.eup %5684  ;;  %5696 = vpow2.f32 %v2282_v40  ;;  %v2362_v3 = vadd.f32 1.0, %v5683_v60  ;;  %v2288_v30 = vmul.f32 1.442695, %v2176_v21  ;;  %v2296_v55 = vmul.f32 1.442695, %v2180_v53 }
 0x262   : > { %2584 = vrot.lane.b32.xlu1 %v5679_v38, %s6089_s21  ;;  %v1724_v15 = vadd.f32 %v1660_v17, %v1402_v57  ;;  %v5687_v33 = vpop.eup %5686  ;;  %5698 = vpow2.f32 %v2290_v42  ;;  %v2292_v12 = vmul.f32 1.442695, %v2178_v7  ;;  %v2183_v17 = vsub.f32 0.0, %v7362_v29  ;;  %v10844_v42 = vld [vmem:[#allocation129_spill] sm:$0xff]  ;;  %v10845_v7 = vld [vmem:[#allocation135_spill] sm:$0xff] }
 0x263   : > { %2592 = vrot.lane.b32.xlu2 %v5681_v50, %s6089_s21  ;;  %v5689_v39 = vpop.eup %5688  ;;  %5700 = vpow2.f32 %v2286_v13  ;;  %v2366_v5 = vadd.f32 1.0, %v5687_v33  ;;  %v2179_v50 = vsub.f32 0.0, %v10843_v18 }
 0x264   : > { %v2044_v25 = vmul.f32 %v10840_v1, %v1724_v15  ;;  %v5691_v54 = vpop.eup %5690  ;;  %v2364_v45 = vadd.f32 1.0, %v5689_v39  ;;  %5702 = vrcp.f32 %v2362_v3  ;;  %v2302_v1 = vmul.f32 1.442695, %v2183_v17 }
 0x265   : > { %2588 = vrot.lane.b32.xlu0 %v5685_v27, %s6089_s21  ;;  %v5693_v35 = vpop.eup %5692  ;;  %v7797_v62 = vpop.permute.xlu1 %2512  ;;  %5704 = vrcp.f32 %v2366_v5  ;;  %v2181_v27 = vsub.f32 0.0, %v10844_v42  ;;  %v2294_v56 = vmul.f32 1.442695, %v2179_v50  ;;  %v2182_v5 = vsub.f32 0.0, %v10845_v7 }
 0x266   : > { %2109 = vst.msk [vmem:[%s6621_s4 + $0x168] sm:$0xff] %vm2063_vm3, %v2044_v25  ;;  %v5695_v4 = vpop.eup %5694  ;;  %v7800_v61 = vpop.permute.xlu0 %2516  ;;  %5706 = vpow2.f32 %v2288_v30  ;;  %v2186_v30 = vsub.f32 0.0, %v7544_v9 }
 0x267   : > { %v5697_v34 = vpop.eup %5696  ;;  %5708 = vrcp.f32 %v2364_v45  ;;  %v2298_v29 = vmul.f32 1.442695, %v2181_v27 }
 0x268   : > { %v5699_v57 = vpop.eup %5698  ;;  %5710 = vpow2.f32 %v2296_v55  ;;  %v2365_v40 = vadd.f32 1.0, %v5697_v34  ;;  %v2308_v18 = vmul.f32 1.442695, %v2186_v30 }
 0x269   : > { %v5701_v38 = vpop.eup %5700  ;;  %5712 = vpow2.f32 %v2292_v12  ;;  %v2369_v60 = vadd.f32 1.0, %v5699_v57  ;;  %v2300_v57 = vmul.f32 1.442695, %v2182_v5 }
 0x26a   : > { %2590 = vrot.lane.b32.xlu1 %v5691_v54, %s6089_s21  ;;  %v5703_v13 = vpop.eup %5702  ;;  %v2367_v15 = vadd.f32 1.0, %v5701_v38  ;;  %5714 = vrcp.f32 %v2365_v40 }
 0x26b   : > { %2598 = vrot.lane.b32.xlu2 %v5693_v35, %s6089_s21  ;;  %v5705_v33 = vpop.eup %5704  ;;  %5716 = vrcp.f32 %v2369_v60  ;;  %v10846_v35 = vld [vmem:[#allocation132_spill] sm:$0xff] }
 0x26c   : > { %v7803_v52 = vpop.permute.xlu2 %2526  ;;  %v5707_v21 = vpop.eup %5706  ;;  %5718 = vrcp.f32 %v2367_v15  ;;  %v2184_v45 = vsub.f32 0.0, %v10846_v35  ;;  %v2185_v15 = vsub.f32 0.0, %v7527_v11  ;;  %v1464_v11 = vmul.f32 0.999995, %v7739_v0 }
 0x26d   : > { %2594 = vrot.lane.b32.xlu0 %v5695_v4, %s6089_s21  ;;  %v5709_v25 = vpop.eup %5708  ;;  %5720 = vpow2.f32 %v2294_v56  ;;  %v2368_v54 = vadd.f32 1.0, %v5707_v21 }
 0x26e   : > { %v5711_v3 = vpop.eup %5710  ;;  %5722 = vpow2.f32 %v2302_v1  ;;  %v2304_v17 = vmul.f32 1.442695, %v2184_v45  ;;  %v2306_v7 = vmul.f32 1.442695, %v2185_v15  ;;  %v1529_v0 = vmul.f32 %v7705_v58, %v1464_v11 }
 0x26f   : > { %v5713_v20 = vpop.eup %5712  ;;  %5724 = vpow2.f32 %v2298_v29  ;;  %v2372_v4 = vadd.f32 1.0, %v5711_v3  ;;  %v2187_v29 = vsub.f32 0.0, %v7457_v6 }
 0x270   : > { %v5715_v55 = vpop.eup %5714  ;;  %v2370_v34 = vadd.f32 1.0, %v5713_v20  ;;  %5726 = vrcp.f32 %v2368_v54 }
 0x271   : > { %v5717_v12 = vpop.eup %5716  ;;  %5728 = vrcp.f32 %v2372_v4  ;;  %v2310_v6 = vmul.f32 1.442695, %v2187_v29 }
 0x272   : > { %2596 = vrot.lane.b32.xlu1 %v5703_v13, %s6089_s21  ;;  %v5719_v38 = vpop.eup %5718  ;;  %5730 = vrcp.f32 %v2370_v34  ;;  %v1194_v13 = vadd.f32 %v6849_v22, %v7529_v8 }
 0x273   : > { %2604 = vrot.lane.b32.xlu2 %v5705_v33, %s6089_s21  ;;  %v7810_v39 = vpop.permute.xlu1 %2524  ;;  %v5721_v50 = vpop.eup %5720  ;;  %5732 = vpow2.f32 %v2300_v57  ;;  %v2189_v33 = vsub.f32 0.0, %v7658_v10 }
 0x274   : > { %v7813_v2 = vpop.permute.xlu2 %2544  ;;  %v7815_v53 = vpop.permute.xlu0 %2528  ;;  %5734 = vpow2.f32 %v2308_v18  ;;  %v2371_v56 = vadd.f32 1.0, %v5721_v50  ;;  %v1354_v20 = vadd.f32 %v10811_v36, %v1194_v13  ;;  %v2190_v18 = vsub.f32 0.0, %v7570_v19 }
 0x275   : > { %2600 = vrot.lane.b32.xlu0 %v5709_v25, %s6089_s21  ;;  %v5723_v9 = vpop.eup %5722  ;;  %5736 = vpow2.f32 %v2304_v17  ;;  %v2314_v5 = vmul.f32 1.442695, %v2189_v33  ;;  %v585_v33 = vld [vmem:[%s6289_s14 + $0xac] sm:$0xf] }
 0x276   : > { %v5725_v27 = vpop.eup %5724  ;;  %v2375_v21 = vadd.f32 1.0, %v5723_v9  ;;  %5738 = vrcp.f32 %v2371_v56  ;;  %v1484_v4 = vmul.f32 0.999995, %v1354_v20  ;;  %v2191_v19 = vsub.f32 0.0, %v1354_v20 }
 0x277   : > { %v5727_v1 = vpop.eup %5726  ;;  %v2373_v25 = vadd.f32 1.0, %v5725_v27 }
 0x278   : > { %v5729_v3 = vpop.eup %5728  ;;  %5740 = vrcp.f32 %v2375_v21  ;;  %v1549_v17 = vmul.f32 %v7705_v58, %v1484_v4  ;;  %v2316_v21 = vmul.f32 1.442695, %v2190_v18 }
 0x279   : > { %v5731_v22 = vpop.eup %5730  ;;  %5742 = vrcp.f32 %v2373_v25 }
 0x27a   : > { %2602 = vrot.lane.b32.xlu1 %v5715_v55, %s6089_s21  ;;  %v5733_v10 = vpop.eup %5732  ;;  %v2188_v55 = vsub.f32 0.0, %v7630_v49  ;;  %5744 = vpow2.f32 %v2306_v7  ;;  %v1594_v49 = vadd.f32 %v7716_v31, %v1529_v0  ;;  %v1400_v7 = vunpack.c.l.bf16 %v585_v33 }
 0x27b   : > { %2610 = vrot.lane.b32.xlu2 %v5717_v12, %s6089_s21  ;;  %v7822_v40 = vpop.permute.xlu1 %2518  ;;  %v5735_v30 = vpop.eup %5734  ;;  %v2374_v34 = vadd.f32 1.0, %v5733_v10  ;;  %5746 = vpow2.f32 %v2314_v5  ;;  %v2318_v10 = vmul.f32 1.442695, %v2191_v19 }
 0x27c   : > { %v7825_v60 = vpop.permute.xlu2 %2550  ;;  %v7827_v42 = vpop.permute.xlu0 %2540  ;;  %v2378_v12 = vadd.f32 1.0, %v5735_v30  ;;  %5748 = vpow2.f32 %v2310_v6  ;;  %v2312_v9 = vmul.f32 1.442695, %v2188_v55  ;;  %v1420_v6 = vunpack.c.h.bf16 %v7672_v43 }
 0x27d   : > { %2606 = vrot.lane.b32.xlu0 %v5719_v38, %s6089_s21  ;;  %v5737_v45 = vpop.eup %5736  ;;  %5750 = vrcp.f32 %v2374_v34 }
 0x27e   : > { %v5739_v57 = vpop.eup %5738  ;;  %v2376_v38 = vadd.f32 1.0, %v5737_v45  ;;  %5752 = vrcp.f32 %v2378_v12 }
 0x27f   : > { %v5741_v50 = vpop.eup %5740 }
 0x280   : > { %v5743_v27 = vpop.eup %5742  ;;  %5754 = vrcp.f32 %v2376_v38 }
 0x281   : > { %v5745_v13 = vpop.eup %5744  ;;  %5756 = vpow2.f32 %v2312_v9 }
 0x282   : > { %2608 = vrot.lane.b32.xlu1 %v5727_v1, %s6089_s21  ;;  %v5747_v56 = vpop.eup %5746  ;;  %v1614_v1 = vadd.f32 %v7716_v31, %v1549_v17  ;;  %v2377_v29 = vadd.f32 1.0, %v5745_v13  ;;  %5758 = vpow2.f32 %v2316_v21 }
 0x283   : > { %2616 = vrot.lane.b32.xlu2 %v5729_v3, %s6089_s21  ;;  %v7838_v54 = vpop.permute.xlu1 %2530  ;;  %v5749_v25 = vpop.eup %5748  ;;  %v2381_v5 = vadd.f32 1.0, %v5747_v56 }
 0x284   : > { %v7841_v36 = vpop.permute.xlu0 %2522  ;;  %v7843_v35 = vpop.permute.xlu2 %2538  ;;  %v2379_v20 = vadd.f32 1.0, %v5749_v25  ;;  %v1678_v45 = vmax.f32 %v1614_v1, 0.0  ;;  %5760 = vrcp.f32 %v2377_v29  ;;  %v10847_v25 = vld [vmem:[#allocation22_spill] sm:$0xff] }
 0x285   : > { %2612 = vrot.lane.b32.xlu0 %v5731_v22, %s6089_s21  ;;  %v1658_v22 = vmax.f32 %v1594_v49, 0.0  ;;  %v5751_v11 = vpop.eup %5750  ;;  %5762 = vrcp.f32 %v2381_v5 }
 0x286   : > { %v5753_v30 = vpop.eup %5752  ;;  %5764 = vpow2.f32 %v2318_v10  ;;  %v10848_v10 = vld [vmem:[#allocation27_spill] sm:$0xff] }
 0x287   : > { %v5755_v4 = vpop.eup %5754  ;;  %v1722_v31 = vadd.f32 %v1658_v22, %v1400_v7  ;;  %5766 = vrcp.f32 %v2379_v20  ;;  %v10849_v20 = vld [vmem:[#allocation23_spill] sm:$0xff] }
 0x288   : > { %v5757_v55 = vpop.eup %5756 }
 0x289   : > { %v5759_v43 = vpop.eup %5758  ;;  %v2380_v38 = vadd.f32 1.0, %v5757_v55  ;;  %v10851_v55 = vld [vmem:[#allocation25_spill] sm:$0xff] }
 0x28a   : > { %2614 = vrot.lane.b32.xlu1 %v5739_v57, %s6089_s21  ;;  %v1742_v57 = vadd.f32 %v1678_v45, %v1420_v6  ;;  %v5761_v17 = vpop.eup %5760 }
 0x28b   : > { %2622 = vrot.lane.b32.xlu2 %v5741_v50, %s6089_s21  ;;  %v7852_v15 = vpop.permute.xlu1 %2542  ;;  %v5763_v9 = vpop.eup %5762  ;;  %5768 = vrcp.f32 %v2380_v38 }
 0x28c   : > { %v7856_v58 = vpop.permute.xlu2 %2556  ;;  %v5765_v49 = vpop.eup %5764 }
 0x28d   : > { %2618 = vrot.lane.b32.xlu0 %v5743_v27, %s6089_s21  ;;  %v2382_v27 = vadd.f32 1.0, %v5759_v43  ;;  %v5767_v13 = vpop.eup %5766  ;;  %v2383_v19 = vadd.f32 1.0, %v5765_v49 }
 0x28f   : > { %v7859_v3 = vpop.permute.xlu0 %2534  ;;  %5770 = vrcp.f32 %v2382_v27 }
 0x290   : > { %5772 = vrcp.f32 %v2383_v19  ;;  %v10858_v19 = vld [vmem:[#allocation57_spill] sm:$0xff] }
 0x291   : > { %v5769_v1 = vpop.eup %5768 }
 0x292   : > { %2620 = vrot.lane.b32.xlu1 %v5751_v11, %s6089_s21 }
 0x293   : > { %2628 = vrot.lane.b32.xlu2 %v5753_v30, %s6089_s21  ;;  %v1894_v34 = vpop.permute.xlu1 %1893 }
 0x294   : > { %v2042_v0 = vmul.f32 %v1894_v34, %v1722_v31  ;;  %v10852_v34 = vld [vmem:[#allocation28_spill] sm:$0xff] }
 0x295   : > { %2624 = vrot.lane.b32.xlu0 %v5755_v4, %s6089_s21  ;;  %v7865_v12 = vpop.permute.xlu2 %2562  ;;  %v5771_v29 = vpop.eup %5770  ;;  %v10850_v4 = vld [vmem:[#allocation33_spill] sm:$0xff] }
 0x296   : > { %2107 = vst.msk [vmem:[%s6621_s4 + $0x158] sm:$0xff] %vm2063_vm3, %v2042_v0  ;;  %v5773_v11 = vpop.eup %5772  ;;  %v7897_v31 = vmul.f32 %v7800_v61, %v10850_v4  ;;  %v7903_v0 = vmul.f32 %v7797_v62, %v10852_v34  ;;  %v10853_v61 = vld [vmem:[#allocation31_spill] sm:$0xff] }
 0x297   : > { %v1934_v18 = vpop.permute.xlu0 %1933 }
 0x298   : > { %v2062_v50 = vmul.f32 %v1934_v18, %v1742_v57  ;;  %v7917_v18 = vmul.f32 %v7787_v24, %v10853_v61  ;;  %v10862_v61 = vld [vmem:[#allocation65_spill] sm:$0xff] }
 0x29a   : > { %2127 = vst.msk [vmem:[%s6621_s4 + $0x1f8] sm:$0xff] %vm2063_vm3, %v2062_v50  ;;  %2626 = vrot.lane.b32.xlu1 %v5761_v17, %s6089_s21  ;;  %v10854_v50 = vld [vmem:[#allocation42_spill] sm:$0xff]  ;;  %v10856_v17 = vld [vmem:[#allocation35_spill] sm:$0xff] }
 0x29b   : > { %2634 = vrot.lane.b32.xlu2 %v5763_v9, %s6089_s21  ;;  %v2537_v33 = vpop.permute.xlu1 %2536  ;;  %v7921_v62 = vmul.f32 %v7841_v36, %v10854_v50  ;;  %v7927_v9 = vmul.f32 %v7822_v40, %v10856_v17  ;;  %v10857_v36 = vld [vmem:[#allocation38_spill] sm:$0xff]  ;;  %v7945_v40 = vmul.f32 %v7815_v53, %v10858_v19  ;;  %v7975_v50 = vmul.f32 %v7838_v54, %v10862_v61  ;;  %v10864_v19 = vld [vmem:[#allocation44_spill] sm:$0xff] }
 0x29c   : > { %v10860_v53 = vld [vmem:[#allocation50_spill] sm:$0xff]  ;;  %v7993_v54 = vmul.f32 %v7827_v42, %v10864_v19 }
 0x29d   : > { %2630 = vrot.lane.b32.xlu0 %v5767_v13, %s6089_s21  ;;  %v7874_v56 = vpop.permute.xlu2 %2568  ;;  %10855 = vst [vmem:[#allocation51_spill] sm:$0xff] %v7921_v62  ;;  %v7941_v13 = vmul.f32 %v7736_v26, %v10857_v36  ;;  %v7965_v34 = vmul.f32 %v7803_v52, %v10860_v53  ;;  %v10868_v42 = vld [vmem:[#allocation102_spill] sm:$0xff] }
 0x29e   : > { %10865 = vst [vmem:[#allocation43_spill] sm:$0xff] %v7993_v54  ;;  %v8012_v19 = vmul.f32 %v7843_v35, %v10868_v42 }
 0x29f   : > { %v2547_v21 = vpop.permute.xlu0 %2546 }
 0x2a0   : > { %10869 = vst [vmem:[#allocation100_spill] sm:$0xff] %v8012_v19 }
 0x2a2   : > { %2632 = vrot.lane.b32.xlu1 %v5769_v1, %s6089_s21  ;;  %v10859_v1 = vld [vmem:[#allocation45_spill] sm:$0xff] }
 0x2a3   : > { %2768 = vrot.lane.b32.xlu2 %v10847_v25, %s6089_s21  ;;  %v7879_v7 = vpop.permute.xlu1 %2548 }
 0x2a5   : > { %2636 = vrot.lane.b32.xlu0 %v5771_v29, %s6089_s21  ;;  %v7882_v22 = vpop.permute.xlu2 %2574  ;;  %v7951_v29 = vmul.f32 %v7810_v39, %v10859_v1  ;;  %v7969_v39 = vmul.f32 %v7859_v3, %v10757_v47  ;;  %v10863_v47 = vld [vmem:[#allocation71_spill] sm:$0xff]  ;;  %v10866_v1 = vld [vmem:[#allocation82_spill] sm:$0xff] }
 0x2a6   : > { %v7989_v3 = vmul.f32 %v7766_v59, %v10863_v47  ;;  %v7998_v53 = vmul.f32 %v2537_v33, %v10866_v1  ;;  %v10872_v33 = vld [vmem:[#allocation49_spill] sm:$0xff] }
 0x2a7   : > { %v2553_v5 = vpop.permute.xlu0 %2552  ;;  %10861 = vst [vmem:[#allocation47_spill] sm:$0xff] %v7969_v39  ;;  %v8021_v1 = vmul.f32 %v7852_v15, %v10872_v33  ;;  %v10878_v15 = vld [vmem:[#allocation70_spill] sm:$0xff] }
 0x2a8   : > { %10867 = vst [vmem:[#allocation112_spill] sm:$0xff] %v7998_v53  ;;  %v8044_v33 = vmul.f32 %v7879_v7, %v10878_v15 }
 0x2a9   : > { %10873 = vst [vmem:[#allocation96_spill] sm:$0xff] %v8021_v1 }
 0x2aa   : > { %2638 = vrot.lane.b32.xlu1 %v5773_v11, %s6089_s21  ;;  %10879 = vst [vmem:[#allocation68_spill] sm:$0xff] %v8044_v33 }
 0x2ab   : > { %2774 = vrot.lane.b32.xlu2 %v10848_v10, %s6089_s21  ;;  %v10870_v10 = vld [vmem:[#allocation62_spill] sm:$0xff] }
 0x2ac   : > { %v7887_v30 = vpop.permute.xlu1 %2554 }
 0x2ad   : > { %2770 = vrot.lane.b32.xlu0 %v10849_v20, %s6089_s21  ;;  %v7891_v6 = vpop.permute.xlu2 %2580  ;;  %v8068_v15 = vmul.f32 %v7887_v30, %v10800_v14  ;;  %v10889_v30 = vld [vmem:[#allocation20_spill] sm:$0xff] }
 0x2af   : > { %v7893_v45 = vpop.permute.xlu0 %2558  ;;  %10884 = vst [vmem:[#allocation108_spill] sm:$0xff] %v8068_v15 }
 0x2b2   : > { %2772 = vrot.lane.b32.xlu1 %v10851_v55, %s6089_s21  ;;  %v8015_v55 = vmul.f32 %v2547_v21, %v10870_v10  ;;  %v10874_v21 = vld [vmem:[#allocation56_spill] sm:$0xff] }
 0x2b3   : > { %2976 = vrot.lane.b32.xlu2 %v7897_v31, %s6088_s30  ;;  %v8035_v10 = vmul.f32 %v7813_v2, %v10874_v21 }
 0x2b4   : > { %v7907_v57 = vpop.permute.xlu1 %2560  ;;  %10871 = vst [vmem:[#allocation91_spill] sm:$0xff] %v8015_v55 }
 0x2b5   : > { %2972 = vrot.lane.b32.xlu0 %v7903_v0, %s6088_s30  ;;  %v7911_v43 = vpop.permute.xlu2 %2586  ;;  %10875 = vst [vmem:[#allocation105_spill] sm:$0xff] %v8035_v10 }
 0x2b7   : > { %v7913_v38 = vpop.permute.xlu0 %2564 }
 0x2ba   : > { %2974 = vrot.lane.b32.xlu1 %v7917_v18, %s6088_s30 }
 0x2bb   : > { %2982 = vrot.lane.b32.xlu2 %v7921_v62, %s6088_s30 }
 0x2bc   : > { %v7931_v27 = vpop.permute.xlu1 %2566 }
 0x2bd   : > { %2978 = vrot.lane.b32.xlu0 %v7927_v9, %s6088_s30  ;;  %v7935_v24 = vpop.permute.xlu2 %2592 }
 0x2bf   : > { %v7937_v49 = vpop.permute.xlu0 %2570 }
 0x2c2   : > { %2980 = vrot.lane.b32.xlu1 %v7941_v13, %s6088_s30 }
 0x2c3   : > { %2988 = vrot.lane.b32.xlu2 %v7945_v40, %s6088_s30 }
 0x2c4   : > { %v7955_v11 = vpop.permute.xlu1 %2572 }
 0x2c5   : > { %2984 = vrot.lane.b32.xlu0 %v7951_v29, %s6088_s30  ;;  %v7959_v26 = vpop.permute.xlu2 %2598 }
 0x2c7   : > { %v7961_v4 = vpop.permute.xlu0 %2576 }
 0x2ca   : > { %2986 = vrot.lane.b32.xlu1 %v7965_v34, %s6088_s30 }
 0x2cb   : > { %2994 = vrot.lane.b32.xlu2 %v7969_v39, %s6088_s30 }
 0x2cc   : > { %v7979_v17 = vpop.permute.xlu1 %2578 }
 0x2cd   : > { %2990 = vrot.lane.b32.xlu0 %v7975_v50, %s6088_s30  ;;  %v7983_v52 = vpop.permute.xlu2 %2604 }
 0x2cf   : > { %v7985_v36 = vpop.permute.xlu0 %2582 }
 0x2d2   : > { %2992 = vrot.lane.b32.xlu1 %v7989_v3, %s6088_s30 }
 0x2d3   : > { %3000 = vrot.lane.b32.xlu2 %v7993_v54, %s6088_s30 }
 0x2d4   : > { %v8002_v61 = vpop.permute.xlu1 %2584 }
 0x2d5   : > { %2996 = vrot.lane.b32.xlu0 %v7998_v53, %s6088_s30  ;;  %v8006_v59 = vpop.permute.xlu2 %2610  ;;  %v10876_v53 = vld [vmem:[#allocation81_spill] sm:$0xff] }
 0x2d6   : > { %v8038_v39 = vmul.f32 %v2553_v5, %v10876_v53  ;;  %v10880_v5 = vld [vmem:[#allocation76_spill] sm:$0xff] }
 0x2d7   : > { %v8008_v47 = vpop.permute.xlu0 %2588  ;;  %v8058_v53 = vmul.f32 %v7825_v60, %v10880_v5 }
 0x2d8   : > { %10877 = vst [vmem:[#allocation116_spill] sm:$0xff] %v8038_v39 }
 0x2d9   : > { %10881 = vst [vmem:[#allocation79_spill] sm:$0xff] %v8058_v53 }
 0x2da   : > { %2998 = vrot.lane.b32.xlu1 %v8012_v19, %s6088_s30 }
 0x2db   : > { %3006 = vrot.lane.b32.xlu2 %v8015_v55, %s6088_s30 }
 0x2dc   : > { %v8025_v54 = vpop.permute.xlu1 %2590 }
 0x2dd   : > { %3002 = vrot.lane.b32.xlu0 %v8021_v1, %s6088_s30  ;;  %v8029_v35 = vpop.permute.xlu2 %2616  ;;  %v10882_v1 = vld [vmem:[#allocation109_spill] sm:$0xff] }
 0x2de   : > { %v8062_v7 = vmul.f32 %v7893_v45, %v10882_v1  ;;  %v10885_v45 = vld [vmem:[#allocation93_spill] sm:$0xff] }
 0x2df   : > { %v8031_v42 = vpop.permute.xlu0 %2594  ;;  %v8082_v1 = vmul.f32 %v7856_v58, %v10885_v45 }
 0x2e0   : > { %10883 = vst [vmem:[#allocation64_spill] sm:$0xff] %v8062_v7 }
 0x2e1   : > { %10886 = vst [vmem:[#allocation90_spill] sm:$0xff] %v8082_v1 }
 0x2e2   : > { %3004 = vrot.lane.b32.xlu1 %v8035_v10, %s6088_s30 }
 0x2e3   : > { %3012 = vrot.lane.b32.xlu2 %v8038_v39, %s6088_s30 }
 0x2e4   : > { %v8048_v55 = vpop.permute.xlu1 %2596 }
 0x2e5   : > { %3008 = vrot.lane.b32.xlu0 %v8044_v33, %s6088_s30  ;;  %v8052_v2 = vpop.permute.xlu2 %2622  ;;  %v10887_v33 = vld [vmem:[#allocation30_spill] sm:$0xff] }
 0x2e6   : > { %v8086_v14 = vmul.f32 %v7913_v38, %v10887_v33  ;;  %v8106_v38 = vmul.f32 %v7865_v12, %v10803_v37  ;;  %v10892_v33 = vld [vmem:[#allocation54_spill] sm:$0xff] }
 0x2e7   : > { %v8054_v21 = vpop.permute.xlu0 %2600 }
 0x2e8   : > { %10888 = vst [vmem:[#allocation86_spill] sm:$0xff] %v8086_v14 }
 0x2e9   : > { %10891 = vst [vmem:[#allocation78_spill] sm:$0xff] %v8106_v38 }
 0x2ea   : > { %3010 = vrot.lane.b32.xlu1 %v8058_v53, %s6088_s30 }
 0x2eb   : > { %3018 = vrot.lane.b32.xlu2 %v8062_v7, %s6088_s30  ;;  %v8092_v7 = vmul.f32 %v7907_v57, %v10889_v30  ;;  %v8110_v57 = vmul.f32 %v7937_v49, %v10892_v33  ;;  %v10894_v30 = vld [vmem:[#allocation40_spill] sm:$0xff]  ;;  %v10897_v49 = vld [vmem:[#allocation46_spill] sm:$0xff] }
 0x2ec   : > { %v8072_v39 = vpop.permute.xlu1 %2602  ;;  %v8130_v33 = vmul.f32 %v7874_v56, %v10897_v49 }
 0x2ed   : > { %3014 = vrot.lane.b32.xlu0 %v8068_v15, %s6088_s30  ;;  %v8076_v60 = vpop.permute.xlu2 %2628  ;;  %10890 = vst [vmem:[#allocation59_spill] sm:$0xff] %v8092_v7 }
 0x2ee   : > { %10893 = vst [vmem:[#allocation24_spill] sm:$0xff] %v8110_v57 }
 0x2ef   : > { %v8078_v5 = vpop.permute.xlu0 %2606  ;;  %10898 = vst [vmem:[#allocation98_spill] sm:$0xff] %v8130_v33 }
 0x2f2   : > { %3016 = vrot.lane.b32.xlu1 %v8082_v1, %s6088_s30 }
 0x2f3   : > { %3024 = vrot.lane.b32.xlu2 %v8086_v14, %s6088_s30  ;;  %v8116_v14 = vmul.f32 %v7931_v27, %v10894_v30  ;;  %v10900_v30 = vld [vmem:[#allocation60_spill] sm:$0xff] }
 0x2f4   : > { %v8096_v15 = vpop.permute.xlu1 %2608 }
 0x2f5   : > { %3020 = vrot.lane.b32.xlu0 %v8092_v7, %s6088_s30  ;;  %v8100_v58 = vpop.permute.xlu2 %2634  ;;  %10895 = vst [vmem:[#allocation73_spill] sm:$0xff] %v8116_v14 }
 0x2f7   : > { %v8102_v45 = vpop.permute.xlu0 %2612 }
 0x2fa   : > { %3022 = vrot.lane.b32.xlu1 %v8106_v38, %s6088_s30  ;;  %v10899_v38 = vld [vmem:[#allocation72_spill] sm:$0xff] }
 0x2fb   : > { %3030 = vrot.lane.b32.xlu2 %v8110_v57, %s6088_s30  ;;  %v8134_v27 = vmul.f32 %v7961_v4, %v10899_v38  ;;  %v8140_v57 = vmul.f32 %v7955_v11, %v10900_v30  ;;  %v10902_v4 = vld [vmem:[#allocation66_spill] sm:$0xff]  ;;  %v8164_v30 = vmul.f32 %v7979_v17, %v10796_v16  ;;  %v8182_v16 = vmul.f32 %v8008_v47, %v6945_v32 }
 0x2fc   : > { %v8120_v7 = vpop.permute.xlu1 %2614  ;;  %v8154_v38 = vmul.f32 %v7882_v22, %v10902_v4  ;;  %v10908_v17 = vld [vmem:[#allocation94_spill] sm:$0xff]  ;;  %v8202_v32 = vmul.f32 %v7911_v43, %v6869_v41  ;;  %v8212_v47 = vmul.f32 %v8025_v54, %v10816_v46  ;;  %v8230_v46 = vmul.f32 %v8054_v21, %v10826_v23  ;;  %v10916_v21 = vld [vmem:[#allocation37_spill] sm:$0xff] }
 0x2fd   : > { %3026 = vrot.lane.b32.xlu0 %v8116_v14, %s6088_s30  ;;  %v8124_v37 = vpop.permute.xlu2 %2768  ;;  %v10904_v14 = vld [vmem:[#allocation87_spill] sm:$0xff]  ;;  %v8236_v54 = vmul.f32 %v8048_v55, %v10817_v51  ;;  %v8250_v23 = vmul.f32 %v7959_v26, %v7504_v28  ;;  %v8254_v51 = vmul.f32 %v8078_v5, %v10916_v21  ;;  %v8260_v55 = vmul.f32 %v8072_v39, %v10836_v48  ;;  %v10920_v5 = vld [vmem:[#allocation29_spill] sm:$0xff]  ;;  %v10923_v39 = vld [vmem:[#allocation48_spill] sm:$0xff] }
 0x2fe   : > { %10896 = vst [vmem:[#allocation125_spill] sm:$0xff] %v8124_v37  ;;  %v8158_v11 = vmul.f32 %v7985_v36, %v10904_v14  ;;  %v10907_v36 = vld [vmem:[#allocation84_spill] sm:$0xff]  ;;  %v8274_v21 = vmul.f32 %v7983_v52, %v10920_v5 }
 0x2ff   : > { %v8126_v12 = vpop.permute.xlu0 %2618  ;;  %10903 = vst [vmem:[#allocation53_spill] sm:$0xff] %v8154_v38  ;;  %v8178_v14 = vmul.f32 %v7891_v6, %v10907_v36 }
 0x300   : > { %10905 = vst [vmem:[#allocation133_spill] sm:$0xff] %v8158_v11 }
 0x301   : > { %10910 = vst [vmem:[#allocation63_spill] sm:$0xff] %v8202_v32 }
 0x302   : > { %3028 = vrot.lane.b32.xlu1 %v8130_v33, %s6088_s30  ;;  %10912 = vst [vmem:[#allocation97_spill] sm:$0xff] %v8236_v54 }
 0x303   : > { %3036 = vrot.lane.b32.xlu2 %v8134_v27, %s6088_s30  ;;  %10915 = vst [vmem:[#allocation52_spill] sm:$0xff] %v8250_v23 }
 0x304   : > { %v8144_v37 = vpop.permute.xlu1 %2620  ;;  %10921 = vst [vmem:[#allocation103_spill] sm:$0xff] %v8274_v21 }
 0x305   : > { %3032 = vrot.lane.b32.xlu0 %v8140_v57, %s6088_s30  ;;  %v8148_v56 = vpop.permute.xlu2 %2774 }
 0x306   : > { %10901 = vst [vmem:[#allocation115_spill] sm:$0xff] %v8148_v56 }
 0x307   : > { %v8150_v49 = vpop.permute.xlu0 %2624 }
 0x30a   : > { %3034 = vrot.lane.b32.xlu1 %v8154_v38, %s6088_s30 }
 0x30b   : > { %3042 = vrot.lane.b32.xlu2 %v8158_v11, %s6088_s30  ;;  %v8188_v11 = vmul.f32 %v8002_v61, %v10908_v17  ;;  %v8206_v61 = vmul.f32 %v8031_v42, %v10809_v63  ;;  %v8226_v63 = vmul.f32 %v7935_v24, %v7072_v44 }
 0x30c   : > { %v8168_v56 = vpop.permute.xlu1 %2626 }
 0x30d   : > { %3038 = vrot.lane.b32.xlu0 %v8164_v30, %s6088_s30  ;;  %v8172_v22 = vpop.permute.xlu2 %2976  ;;  %10911 = vst [vmem:[#allocation88_spill] sm:$0xff] %v8226_v63 }
 0x30e   : > { %10906 = vst [vmem:[#allocation92_spill] sm:$0xff] %v8172_v22 }
 0x30f   : > { %v8174_v4 = vpop.permute.xlu0 %2630 }
 0x312   : > { %3040 = vrot.lane.b32.xlu1 %v8178_v14, %s6088_s30 }
 0x313   : > { %3048 = vrot.lane.b32.xlu2 %v8182_v16, %s6088_s30 }
 0x314   : > { %v8192_v22 = vpop.permute.xlu1 %2632 }
 0x315   : > { %3044 = vrot.lane.b32.xlu0 %v8188_v11, %s6088_s30  ;;  %v8196_v6 = vpop.permute.xlu2 %2982 }
 0x316   : > { %10909 = vst [vmem:[#allocation104_spill] sm:$0xff] %v8196_v6 }
 0x317   : > { %v8198_v36 = vpop.permute.xlu0 %2636 }
 0x31a   : > { %3046 = vrot.lane.b32.xlu1 %v8202_v32, %s6088_s30 }
 0x31b   : > { %3054 = vrot.lane.b32.xlu2 %v8206_v61, %s6088_s30 }
 0x31c   : > { %v8216_v17 = vpop.permute.xlu1 %2638 }
 0x31d   : > { %3050 = vrot.lane.b32.xlu0 %v8212_v47, %s6088_s30  ;;  %v8220_v41 = vpop.permute.xlu2 %2988 }
 0x31f   : > { %v8222_v43 = vpop.permute.xlu0 %2770 }
 0x322   : > { %3052 = vrot.lane.b32.xlu1 %v8226_v63, %s6088_s30 }
 0x323   : > { %3060 = vrot.lane.b32.xlu2 %v8230_v46, %s6088_s30 }
 0x324   : > { %v8240_v42 = vpop.permute.xlu1 %2772 }
 0x325   : > { %10913 = vst [vmem:[#allocation121_spill] sm:$0xff] %v8240_v42  ;;  %3056 = vrot.lane.b32.xlu0 %v8236_v54, %s6088_s30  ;;  %v8244_v44 = vpop.permute.xlu2 %2994  ;;  %v10922_v42 = vld [vmem:[#allocation61_spill] sm:$0xff] }
 0x326   : > { %v8278_v48 = vmul.f32 %v8102_v45, %v10922_v42  ;;  %v10927_v45 = vld [vmem:[#allocation55_spill] sm:$0xff] }
 0x327   : > { %v8246_v24 = vpop.permute.xlu0 %2972  ;;  %v8298_v42 = vmul.f32 %v8006_v59, %v10927_v45 }
 0x328   : > { %10914 = vst [vmem:[#allocation122_spill] sm:$0xff] %v8246_v24 }
 0x329   : > { %10928 = vst [vmem:[#allocation106_spill] sm:$0xff] %v8298_v42 }
 0x32a   : > { %3058 = vrot.lane.b32.xlu1 %v8250_v23, %s6088_s30 }
 0x32b   : > { %3066 = vrot.lane.b32.xlu2 %v8254_v51, %s6088_s30 }
 0x32c   : > { %v8264_v6 = vpop.permute.xlu1 %2974 }
 0x32d   : > { %10917 = vst [vmem:[#allocation114_spill] sm:$0xff] %v8264_v6  ;;  %3062 = vrot.lane.b32.xlu0 %v8260_v55, %s6088_s30  ;;  %v8268_v28 = vpop.permute.xlu2 %3000  ;;  %v8284_v6 = vmul.f32 %v8096_v15, %v10923_v39  ;;  %v10930_v39 = vld [vmem:[#allocation67_spill] sm:$0xff] }
 0x32e   : > { %10918 = vst [vmem:[#allocation124_spill] sm:$0xff] %v8268_v28 }
 0x32f   : > { %v8270_v26 = vpop.permute.xlu0 %2978 }
 0x330   : > { %10919 = vst [vmem:[#allocation77_spill] sm:$0xff] %v8270_v26  ;;  %v10929_v26 = vld [vmem:[#allocation80_spill] sm:$0xff] }
 0x331   : > { %v8302_v15 = vmul.f32 %v8126_v12, %v10929_v26  ;;  %v10934_v12 = vld [vmem:[#allocation75_spill] sm:$0xff] }
 0x332   : > { %3064 = vrot.lane.b32.xlu1 %v8274_v21, %s6088_s30  ;;  %v8322_v26 = vmul.f32 %v8029_v35, %v10934_v12 }
 0x333   : > { %3072 = vrot.lane.b32.xlu2 %v8278_v48, %s6088_s30 }
 0x334   : > { %v8288_v28 = vpop.permute.xlu1 %2980  ;;  %10935 = vst [vmem:[#allocation101_spill] sm:$0xff] %v8322_v26 }
 0x335   : > { %10924 = vst [vmem:[#allocation128_spill] sm:$0xff] %v8288_v28  ;;  %3068 = vrot.lane.b32.xlu0 %v8284_v6, %s6088_s30  ;;  %v8292_v52 = vpop.permute.xlu2 %3006  ;;  %v8308_v28 = vmul.f32 %v8120_v7, %v10930_v39  ;;  %v10937_v39 = vld [vmem:[#allocation85_spill] sm:$0xff] }
 0x336   : > { %10925 = vst [vmem:[#allocation126_spill] sm:$0xff] %v8292_v52 }
 0x337   : > { %v8294_v5 = vpop.permute.xlu0 %2984 }
 0x338   : > { %10926 = vst [vmem:[#allocation21_spill] sm:$0xff] %v8294_v5  ;;  %v10936_v5 = vld [vmem:[#allocation99_spill] sm:$0xff] }
 0x339   : > { %v8326_v7 = vmul.f32 %v8150_v49, %v10936_v5  ;;  %v10941_v49 = vld [vmem:[#allocation89_spill] sm:$0xff] }
 0x33a   : > { %3070 = vrot.lane.b32.xlu1 %v8298_v42, %s6088_s30  ;;  %v8346_v5 = vmul.f32 %v8052_v2, %v10941_v49 }
 0x33b   : > { %3078 = vrot.lane.b32.xlu2 %v8302_v15, %s6088_s30 }
 0x33c   : > { %v8312_v52 = vpop.permute.xlu1 %2986  ;;  %10942 = vst [vmem:[#allocation107_spill] sm:$0xff] %v8346_v5 }
 0x33d   : > { %10931 = vst [vmem:[#allocation95_spill] sm:$0xff] %v8312_v52  ;;  %3074 = vrot.lane.b32.xlu0 %v8308_v28, %s6088_s30  ;;  %v8316_v59 = vpop.permute.xlu2 %3012  ;;  %v8332_v52 = vmul.f32 %v8144_v37, %v10937_v39  ;;  %v10944_v39 = vld [vmem:[#allocation111_spill] sm:$0xff] }
 0x33e   : > { %10932 = vst [vmem:[#allocation83_spill] sm:$0xff] %v8316_v59 }
 0x33f   : > { %v8318_v45 = vpop.permute.xlu0 %2990 }
 0x340   : > { %10933 = vst [vmem:[#allocation117_spill] sm:$0xff] %v8318_v45  ;;  %v10943_v45 = vld [vmem:[#allocation123_spill] sm:$0xff] }
 0x341   : > { %v8350_v37 = vmul.f32 %v8174_v4, %v10943_v45  ;;  %v10948_v4 = vld [vmem:[#allocation118_spill] sm:$0xff] }
 0x342   : > { %3076 = vrot.lane.b32.xlu1 %v8322_v26, %s6088_s30  ;;  %v8370_v45 = vmul.f32 %v8076_v60, %v10948_v4 }
 0x343   : > { %3084 = vrot.lane.b32.xlu2 %v8326_v7, %s6088_s30 }
 0x344   : > { %v8336_v59 = vpop.permute.xlu1 %2992  ;;  %10949 = vst [vmem:[#allocation119_spill] sm:$0xff] %v8370_v45 }
 0x345   : > { %10938 = vst [vmem:[#allocation74_spill] sm:$0xff] %v8336_v59  ;;  %3080 = vrot.lane.b32.xlu0 %v8332_v52, %s6088_s30  ;;  %v8340_v35 = vpop.permute.xlu2 %3018  ;;  %v8356_v59 = vmul.f32 %v8168_v56, %v10944_v39  ;;  %v10951_v39 = vld [vmem:[#allocation127_spill] sm:$0xff] }
 0x346   : > { %10939 = vst [vmem:[#allocation39_spill] sm:$0xff] %v8340_v35 }
 0x347   : > { %v8342_v12 = vpop.permute.xlu0 %2996 }
 0x348   : > { %10940 = vst [vmem:[#allocation130_spill] sm:$0xff] %v8342_v12  ;;  %v10950_v12 = vld [vmem:[#allocation58_spill] sm:$0xff] }
 0x349   : > { %v8374_v56 = vmul.f32 %v8198_v36, %v10950_v12  ;;  %v10955_v36 = vld [vmem:[#allocation134_spill] sm:$0xff] }
 0x34a   : > { %3082 = vrot.lane.b32.xlu1 %v8346_v5, %s6088_s30  ;;  %v8394_v12 = vmul.f32 %v8100_v58, %v10955_v36  ;;  %v2844_v36 = vmul.f32 %v7903_v0, %v10847_v25 }
 0x34b   : > { %3090 = vrot.lane.b32.xlu2 %v8350_v37, %s6088_s30 }
 0x34c   : > { %v8360_v35 = vpop.permute.xlu1 %2998  ;;  %10956 = vst [vmem:[#allocation136_spill] sm:$0xff] %v8394_v12 }
 0x34d   : > { %10945 = vst [vmem:[#allocation26_spill] sm:$0xff] %v8360_v35  ;;  %3086 = vrot.lane.b32.xlu0 %v8356_v59, %s6088_s30  ;;  %v8364_v2 = vpop.permute.xlu2 %3024  ;;  %v8380_v35 = vmul.f32 %v8192_v22, %v10951_v39  ;;  %v2845_v22 = vmul.f32 %v7917_v18, %v10849_v20  ;;  %v8402_v39 = vmul.f32 %v8216_v17, %v7529_v8 }
 0x34e   : > { %10946 = vst [vmem:[#allocation110_spill] sm:$0xff] %v8364_v2  ;;  %v2846_v8 = vmul.f32 %v7897_v31, %v10847_v25 }
 0x34f   : > { %v8366_v49 = vpop.permute.xlu0 %3002  ;;  %10957 = vst [vmem:[#allocation129_spill] sm:$0xff] %v8402_v39 }
 0x350   : > { %10947 = vst [vmem:[#allocation120_spill] sm:$0xff] %v8366_v49  ;;  %v2860_v49 = vmul.f32 %v8035_v10, %v10847_v25  ;;  %v2863_v10 = vmul.f32 %v8058_v53, %v10849_v20  ;;  %v2866_v53 = vmul.f32 %v8082_v1, %v10847_v25  ;;  %v10990_v1 = vld [vmem:[#allocation78_spill] sm:$0xff] }
 0x352   : > { %3088 = vrot.lane.b32.xlu1 %v8370_v45, %s6088_s30 }
 0x353   : > { %3096 = vrot.lane.b32.xlu2 %v8374_v56, %s6088_s30 }
 0x354   : > { %v8384_v2 = vpop.permute.xlu1 %3004 }
 0x355   : > { %10952 = vst [vmem:[#allocation69_spill] sm:$0xff] %v8384_v2  ;;  %3092 = vrot.lane.b32.xlu0 %v8380_v35, %s6088_s30  ;;  %v8388_v60 = vpop.permute.xlu2 %3030 }
 0x356   : > { %10953 = vst [vmem:[#allocation131_spill] sm:$0xff] %v8388_v60  ;;  %v2848_v60 = vmul.f32 %v7941_v13, %v10847_v25 }
 0x357   : > { %v8390_v4 = vpop.permute.xlu0 %3008 }
 0x358   : > { %10954 = vst [vmem:[#allocation113_spill] sm:$0xff] %v8390_v4 }
 0x35a   : > { %3094 = vrot.lane.b32.xlu1 %v8394_v12, %s6088_s30 }
 0x35b   : > { %3230 = vrot.lane.b32.xlu2 %v2845_v22, %s6089_s21 }
 0x35c   : > { %v8405_v2 = vpop.permute.xlu1 %3010 }
 0x35d   : > { %10958 = vst [vmem:[#allocation135_spill] sm:$0xff] %v8405_v2  ;;  %3098 = vrot.lane.b32.xlu0 %v8402_v39, %s6088_s30  ;;  %v8409_v4 = vpop.permute.xlu2 %3036  ;;  %v2851_v2 = vmul.f32 %v7965_v34, %v10849_v20 }
 0x35e   : > { %10959 = vst [vmem:[#allocation132_spill] sm:$0xff] %v8409_v4  ;;  %v2847_v4 = vmul.f32 %v7927_v9, %v10849_v20 }
 0x35f   : > { %v8411_v58 = vpop.permute.xlu0 %3014 }
 0x360   : > { %10960 = vst [vmem:[#allocation22_spill] sm:$0xff] %v8411_v58 }
 0x362   : > { %3228 = vrot.lane.b32.xlu1 %v2844_v36, %s6089_s21  ;;  %v2849_v36 = vmul.f32 %v7921_v62, %v10849_v20 }
 0x363   : > { %3236 = vrot.lane.b32.xlu2 %v2848_v60, %s6089_s21 }
 0x364   : > { %v8421_v17 = vpop.permute.xlu1 %3016 }
 0x365   : > { %10961 = vst [vmem:[#allocation23_spill] sm:$0xff] %v8421_v17  ;;  %3232 = vrot.lane.b32.xlu0 %v2846_v8, %s6089_s21  ;;  %v8424_v22 = vpop.permute.xlu2 %3042  ;;  %v2854_v17 = vmul.f32 %v7989_v3, %v10847_v25 }
 0x366   : > { %10962 = vst [vmem:[#allocation33_spill] sm:$0xff] %v8424_v22 }
 0x367   : > { %v8426_v58 = vpop.permute.xlu0 %3020 }
 0x368   : > { %10963 = vst [vmem:[#allocation28_spill] sm:$0xff] %v8426_v58  ;;  %v2850_v58 = vmul.f32 %v7951_v29, %v10847_v25 }
 0x36a   : > { %3234 = vrot.lane.b32.xlu1 %v2847_v4, %s6089_s21  ;;  %v2852_v4 = vmul.f32 %v7945_v40, %v10847_v25 }
 0x36b   : > { %3242 = vrot.lane.b32.xlu2 %v2851_v2, %s6089_s21 }
 0x36c   : > { %v8436_v60 = vpop.permute.xlu1 %3022 }
 0x36d   : > { %10964 = vst [vmem:[#allocation31_spill] sm:$0xff] %v8436_v60  ;;  %3238 = vrot.lane.b32.xlu0 %v2849_v36, %s6089_s21  ;;  %v8439_v8 = vpop.permute.xlu2 %3048 }
 0x36e   : > { %10965 = vst [vmem:[#allocation42_spill] sm:$0xff] %v8439_v8  ;;  %v2857_v8 = vmul.f32 %v8012_v19, %v10849_v20 }
 0x36f   : > { %v8441_v22 = vpop.permute.xlu0 %3026 }
 0x370   : > { %10966 = vst [vmem:[#allocation35_spill] sm:$0xff] %v8441_v22  ;;  %v2853_v22 = vmul.f32 %v7975_v50, %v10849_v20 }
 0x372   : > { %3240 = vrot.lane.b32.xlu1 %v2850_v58, %s6089_s21  ;;  %v10970_v58 = vld [vmem:[#allocation47_spill] sm:$0xff] }
 0x373   : > { %3248 = vrot.lane.b32.xlu2 %v2854_v17, %s6089_s21  ;;  %v2855_v60 = vmul.f32 %v10970_v58, %v10849_v20 }
 0x374   : > { %v8451_v2 = vpop.permute.xlu1 %3028 }
 0x375   : > { %10967 = vst [vmem:[#allocation38_spill] sm:$0xff] %v8451_v2  ;;  %3244 = vrot.lane.b32.xlu0 %v2852_v4, %s6089_s21  ;;  %v8454_v36 = vpop.permute.xlu2 %3054 }
 0x376   : > { %10968 = vst [vmem:[#allocation57_spill] sm:$0xff] %v8454_v36  ;;  %v10974_v36 = vld [vmem:[#allocation112_spill] sm:$0xff] }
 0x377   : > { %v8456_v62 = vpop.permute.xlu0 %3032  ;;  %v2856_v2 = vmul.f32 %v10974_v36, %v10847_v25 }
 0x378   : > { %10969 = vst [vmem:[#allocation45_spill] sm:$0xff] %v8456_v62 }
 0x37a   : > { %3246 = vrot.lane.b32.xlu1 %v2853_v22, %s6089_s21  ;;  %v10975_v22 = vld [vmem:[#allocation43_spill] sm:$0xff] }
 0x37b   : > { %3254 = vrot.lane.b32.xlu2 %v2857_v8, %s6089_s21  ;;  %v2858_v19 = vmul.f32 %v10975_v22, %v10847_v25 }
 0x37c   : > { %v8466_v17 = vpop.permute.xlu1 %3034 }
 0x37d   : > { %10971 = vst [vmem:[#allocation50_spill] sm:$0xff] %v8466_v17  ;;  %3250 = vrot.lane.b32.xlu0 %v2855_v60, %s6089_s21  ;;  %v8469_v4 = vpop.permute.xlu2 %3060 }
 0x37e   : > { %10972 = vst [vmem:[#allocation65_spill] sm:$0xff] %v8469_v4  ;;  %v10979_v4 = vld [vmem:[#allocation96_spill] sm:$0xff] }
 0x37f   : > { %v8471_v62 = vpop.permute.xlu0 %3038  ;;  %v2859_v17 = vmul.f32 %v10979_v4, %v10849_v20 }
 0x380   : > { %10973 = vst [vmem:[#allocation71_spill] sm:$0xff] %v8471_v62 }
 0x382   : > { %3252 = vrot.lane.b32.xlu1 %v2856_v2, %s6089_s21  ;;  %v10980_v2 = vld [vmem:[#allocation91_spill] sm:$0xff] }
 0x383   : > { %3260 = vrot.lane.b32.xlu2 %v2860_v49, %s6089_s21  ;;  %v2861_v24 = vmul.f32 %v10980_v2, %v10849_v20 }
 0x384   : > { %v8481_v8 = vpop.permute.xlu1 %3040 }
 0x385   : > { %10976 = vst [vmem:[#allocation44_spill] sm:$0xff] %v8481_v8  ;;  %3256 = vrot.lane.b32.xlu0 %v2858_v19, %s6089_s21  ;;  %v8484_v60 = vpop.permute.xlu2 %3066 }
 0x386   : > { %10977 = vst [vmem:[#allocation82_spill] sm:$0xff] %v8484_v60  ;;  %v10984_v60 = vld [vmem:[#allocation68_spill] sm:$0xff] }
 0x387   : > { %v8486_v62 = vpop.permute.xlu0 %3044  ;;  %v2862_v8 = vmul.f32 %v10984_v60, %v10847_v25  ;;  %v2869_v60 = vmul.f32 %v10990_v1, %v10849_v20  ;;  %v2872_v1 = vmul.f32 %v8130_v33, %v10847_v25  ;;  %v2875_v33 = vmul.f32 %v8154_v38, %v10849_v20 }
 0x388   : > { %10978 = vst [vmem:[#allocation102_spill] sm:$0xff] %v8486_v62 }
 0x38a   : > { %3258 = vrot.lane.b32.xlu1 %v2859_v17, %s6089_s21  ;;  %v10985_v17 = vld [vmem:[#allocation116_spill] sm:$0xff] }
 0x38b   : > { %3266 = vrot.lane.b32.xlu2 %v2863_v10, %s6089_s21  ;;  %v2864_v4 = vmul.f32 %v10985_v17, %v10847_v25 }
 0x38c   : > { %v8496_v49 = vpop.permute.xlu1 %3046 }
 0x38d   : > { %10981 = vst [vmem:[#allocation62_spill] sm:$0xff] %v8496_v49  ;;  %3262 = vrot.lane.b32.xlu0 %v2861_v24, %s6089_s21  ;;  %v8499_v19 = vpop.permute.xlu2 %3072 }
 0x38e   : > { %10982 = vst [vmem:[#allocation49_spill] sm:$0xff] %v8499_v19 }
 0x38f   : > { %v8501_v62 = vpop.permute.xlu0 %3050 }
 0x390   : > { %10983 = vst [vmem:[#allocation56_spill] sm:$0xff] %v8501_v62  ;;  %v10989_v62 = vld [vmem:[#allocation108_spill] sm:$0xff] }
 0x391   : > { %v2865_v49 = vmul.f32 %v10989_v62, %v10849_v20 }
 0x392   : > { %3264 = vrot.lane.b32.xlu1 %v2862_v8, %s6089_s21  ;;  %v10991_v8 = vld [vmem:[#allocation64_spill] sm:$0xff] }
 0x393   : > { %3272 = vrot.lane.b32.xlu2 %v2866_v53, %s6089_s21  ;;  %v2867_v36 = vmul.f32 %v10991_v8, %v10849_v20 }
 0x394   : > { %v8511_v10 = vpop.permute.xlu1 %3052 }
 0x395   : > { %10986 = vst [vmem:[#allocation81_spill] sm:$0xff] %v8511_v10  ;;  %3268 = vrot.lane.b32.xlu0 %v2864_v4, %s6089_s21  ;;  %v8514_v24 = vpop.permute.xlu2 %3078 }
 0x396   : > { %10987 = vst [vmem:[#allocation70_spill] sm:$0xff] %v8514_v24  ;;  %v10995_v24 = vld [vmem:[#allocation59_spill] sm:$0xff] }
 0x397   : > { %v8516_v19 = vpop.permute.xlu0 %3056  ;;  %v2868_v10 = vmul.f32 %v10995_v24, %v10847_v25 }
 0x398   : > { %10988 = vst [vmem:[#allocation76_spill] sm:$0xff] %v8516_v19 }
 0x39a   : > { %3270 = vrot.lane.b32.xlu1 %v2865_v49, %s6089_s21  ;;  %v10996_v49 = vld [vmem:[#allocation86_spill] sm:$0xff] }
 0x39b   : > { %3278 = vrot.lane.b32.xlu2 %v2869_v60, %s6089_s21  ;;  %v2870_v62 = vmul.f32 %v10996_v49, %v10847_v25 }
 0x39c   : > { %v8526_v53 = vpop.permute.xlu1 %3058 }
 0x39d   : > { %10992 = vst [vmem:[#allocation109_spill] sm:$0xff] %v8526_v53  ;;  %3274 = vrot.lane.b32.xlu0 %v2867_v36, %s6089_s21  ;;  %v8529_v4 = vpop.permute.xlu2 %3084 }
 0x39e   : > { %10993 = vst [vmem:[#allocation93_spill] sm:$0xff] %v8529_v4 }
 0x39f   : > { %v8531_v19 = vpop.permute.xlu0 %3062 }
 0x3a0   : > { %10994 = vst [vmem:[#allocation30_spill] sm:$0xff] %v8531_v19  ;;  %v11000_v19 = vld [vmem:[#allocation73_spill] sm:$0xff] }
 0x3a1   : > { %v2871_v53 = vmul.f32 %v11000_v19, %v10849_v20 }
 0x3a2   : > { %3276 = vrot.lane.b32.xlu1 %v2868_v10, %s6089_s21  ;;  %v11001_v10 = vld [vmem:[#allocation24_spill] sm:$0xff] }
 0x3a3   : > { %3284 = vrot.lane.b32.xlu2 %v2872_v1, %s6089_s21  ;;  %v2873_v24 = vmul.f32 %v11001_v10, %v10849_v20 }
 0x3a4   : > { %v8541_v60 = vpop.permute.xlu1 %3064 }
 0x3a5   : > { %10997 = vst [vmem:[#allocation20_spill] sm:$0xff] %v8541_v60  ;;  %3280 = vrot.lane.b32.xlu0 %v2870_v62, %s6089_s21  ;;  %v8544_v36 = vpop.permute.xlu2 %3090  ;;  %v11005_v60 = vld [vmem:[#allocation25_spill] sm:$0xff] }
 0x3a6   : > { %10998 = vst [vmem:[#allocation54_spill] sm:$0xff] %v8544_v36  ;;  %v2874_v36 = vmul.f32 %v8140_v57, %v10847_v25  ;;  %v2878_v38 = vmul.f32 %v8178_v14, %v11005_v60  ;;  %v2876_v20 = vmul.f32 %v8134_v27, %v11005_v60 }
 0x3a7   : > { %v8546_v4 = vpop.permute.xlu0 %3068 }
 0x3a8   : > { %10999 = vst [vmem:[#allocation40_spill] sm:$0xff] %v8546_v4 }
 0x3aa   : > { %3282 = vrot.lane.b32.xlu1 %v2871_v53, %s6089_s21 }
 0x3ab   : > { %3290 = vrot.lane.b32.xlu2 %v2875_v33, %s6089_s21 }
 0x3ac   : > { %v8556_v1 = vpop.permute.xlu1 %3070 }
 0x3ad   : > { %11002 = vst [vmem:[#allocation46_spill] sm:$0xff] %v8556_v1  ;;  %3286 = vrot.lane.b32.xlu0 %v2873_v24, %s6089_s21  ;;  %v8559_v62 = vpop.permute.xlu2 %3096 }
 0x3ae   : > { %11003 = vst [vmem:[#allocation72_spill] sm:$0xff] %v8559_v62 }
 0x3af   : > { %v8561_v4 = vpop.permute.xlu0 %3074 }
 0x3b0   : > { %11004 = vst [vmem:[#allocation60_spill] sm:$0xff] %v8561_v4  ;;  %v11008_v4 = vld [vmem:[#allocation27_spill] sm:$0xff] }
 0x3b1   : > { %v2877_v25 = vmul.f32 %v8164_v30, %v11008_v4  ;;  %v2881_v62 = vmul.f32 %v8202_v32, %v11008_v4  ;;  %v2880_v32 = vmul.f32 %v8188_v11, %v11005_v60 }
 0x3b2   : > { %3288 = vrot.lane.b32.xlu1 %v2874_v36, %s6089_s21  ;;  %v11009_v36 = vld [vmem:[#allocation133_spill] sm:$0xff] }
 0x3b3   : > { %3296 = vrot.lane.b32.xlu2 %v2878_v38, %s6089_s21  ;;  %v2879_v1 = vmul.f32 %v11009_v36, %v11008_v4 }
 0x3b4   : > { %v8571_v33 = vpop.permute.xlu1 %3076 }
 0x3b5   : > { %11006 = vst [vmem:[#allocation66_spill] sm:$0xff] %v8571_v33  ;;  %3292 = vrot.lane.b32.xlu0 %v2876_v20, %s6089_s21  ;;  %v8574_v24 = vpop.permute.xlu2 %3230  ;;  %v2887_v33 = vmul.f32 %v8250_v23, %v11008_v4  ;;  %v8613_v23 = vmul.f32 %v8206_v61, %v11008_v4 }
 0x3b7   : > { %v8576_v53 = vpop.permute.xlu0 %3080 }
 0x3b8   : > { %11007 = vst [vmem:[#allocation87_spill] sm:$0xff] %v8576_v53  ;;  %v2884_v53 = vmul.f32 %v8226_v63, %v11005_v60  ;;  %v8633_v63 = vmul.f32 %v8260_v55, %v11008_v4 }
 0x3ba   : > { %3294 = vrot.lane.b32.xlu1 %v2877_v25, %s6089_s21  ;;  %v8597_v25 = vmul.f32 %v8274_v21, %v11005_v60  ;;  %v8617_v21 = vmul.f32 %v8322_v26, %v11005_v60  ;;  %v8637_v26 = vmul.f32 %v8254_v51, %v11008_v4 }
 0x3bb   : > { %3302 = vrot.lane.b32.xlu2 %v2881_v62, %s6089_s21  ;;  %v8603_v62 = vmul.f32 %v8298_v42, %v11008_v4  ;;  %v8621_v42 = vmul.f32 %v8236_v54, %v11005_v60  ;;  %v8645_v54 = vmul.f32 %v8284_v6, %v11005_v60 }
 0x3bc   : > { %v8586_v38 = vpop.permute.xlu1 %3082  ;;  %11014 = vst [vmem:[#allocation61_spill] sm:$0xff] %v8617_v21  ;;  %v8641_v21 = vmul.f32 %v8370_v45, %v11005_v60 }
 0x3bd   : > { %11010 = vst [vmem:[#allocation84_spill] sm:$0xff] %v8586_v38  ;;  %3298 = vrot.lane.b32.xlu0 %v2879_v1, %s6089_s21  ;;  %v8589_v20 = vpop.permute.xlu2 %3236  ;;  %v2882_v38 = vmul.f32 %v8182_v16, %v11005_v60 }
 0x3be   : > { %11011 = vst [vmem:[#allocation94_spill] sm:$0xff] %v8589_v20  ;;  %v2883_v20 = vmul.f32 %v8212_v47, %v11008_v4 }
 0x3bf   : > { %11012 = vst [vmem:[#allocation37_spill] sm:$0xff] %v8603_v62  ;;  %v8605_v1 = vpop.permute.xlu0 %3086  ;;  %v8629_v62 = vmul.f32 %v8346_v5, %v11008_v4  ;;  %v8649_v5 = vmul.f32 %v8394_v12, %v11008_v4  ;;  %v8675_v12 = vmul.f32 %v8326_v7, %v11005_v60 }
 0x3c0   : > { %11013 = vst [vmem:[#allocation29_spill] sm:$0xff] %v8605_v1  ;;  %v8625_v1 = vmul.f32 %v8230_v46, %v11005_v60 }
 0x3c1   : > { %11015 = vst [vmem:[#allocation48_spill] sm:$0xff] %v8629_v62  ;;  %v8654_v62 = vmul.f32 %v8278_v48, %v11005_v60 }
 0x3c2   : > { %11016 = vst [vmem:[#allocation55_spill] sm:$0xff] %v8637_v26  ;;  %3300 = vrot.lane.b32.xlu1 %v2880_v32, %s6089_s21  ;;  %v8658_v26 = vmul.f32 %v8308_v28, %v11008_v4  ;;  %v8671_v32 = vmul.f32 %v8332_v52, %v11005_v60 }
 0x3c3   : > { %11017 = vst [vmem:[#allocation80_spill] sm:$0xff] %v8641_v21  ;;  %v11021_v21 = vld [vmem:[#allocation125_spill] sm:$0xff]  ;;  %3308 = vrot.lane.b32.xlu2 %v2884_v53, %s6089_s21  ;;  %v8687_v53 = vmul.f32 %v8350_v37, %v11008_v4 }
 0x3c4   : > { %11018 = vst [vmem:[#allocation67_spill] sm:$0xff] %v8645_v54  ;;  %v2782_v45 = vmul.f32 %v11021_v21, %v7897_v31  ;;  %v2788_v54 = vmul.f32 %v11021_v21, %v7945_v40  ;;  %v2780_v31 = vmul.f32 %v11021_v21, %v7903_v0  ;;  %v8683_v40 = vmul.f32 %v8356_v59, %v11008_v4 }
 0x3c5   : > { %11019 = vst [vmem:[#allocation75_spill] sm:$0xff] %v8649_v5  ;;  %v8667_v5 = vmul.f32 %v8302_v15, %v11008_v4  ;;  %3304 = vrot.lane.b32.xlu0 %v2882_v38, %s6089_s21  ;;  %v8696_v0 = vpop.permute.xlu2 %3242  ;;  %v2791_v38 = vmul.f32 %v8222_v43, %v10970_v58  ;;  %v2790_v58 = vmul.f32 %v11021_v21, %v7989_v3 }
 0x3c6   : > { %11020 = vst [vmem:[#allocation99_spill] sm:$0xff] %v8658_v26  ;;  %v8679_v26 = vpop.permute.xlu1 %3088 }
 0x3c7   : > { %11022 = vst [vmem:[#allocation85_spill] sm:$0xff] %v8667_v5  ;;  %v11028_v5 = vld [vmem:[#allocation92_spill] sm:$0xff] }
 0x3c8   : > { %11023 = vst [vmem:[#allocation89_spill] sm:$0xff] %v8671_v32  ;;  %v8691_v32 = vsel %vm2063_vm3, %v11028_v5, %v2782_v45  ;;  %v2786_v5 = vmul.f32 %v11021_v21, %v7951_v29  ;;  %v8712_v45 = vmul.f32 %v8402_v39, %v11008_v4  ;;  %v2797_v29 = vmul.f32 %v8222_v43, %v10980_v2  ;;  %v11035_v2 = vld [vmem:[#allocation122_spill] sm:$0xff]  ;;  %v11039_v39 = vld [vmem:[#allocation124_spill] sm:$0xff] }
 0x3c9   : > { %11024 = vst [vmem:[#allocation123_spill] sm:$0xff] %v8675_v12  ;;  %v2794_v12 = vmul.f32 %v11021_v21, %v10975_v22  ;;  %v8716_v22 = vsel %vm2063_vm3, %v8220_v41, %v2788_v54  ;;  %v2787_v4 = vmul.f32 %v8222_v43, %v7965_v34  ;;  %v2789_v41 = vmul.f32 %v8222_v43, %v7975_v50  ;;  %v11036_v34 = vld [vmem:[#allocation114_spill] sm:$0xff] }
 0x3ca   : > { %11025 = vst [vmem:[#allocation111_spill] sm:$0xff] %v8679_v26  ;;  %v8700_v26 = vmul.f32 %v8380_v35, %v11005_v60  ;;  %v8734_v54 = vsel %vm2063_vm3, %v8244_v44, %v2791_v38  ;;  %v2803_v50 = vmul.f32 %v8222_v43, %v10991_v8  ;;  %v11037_v44 = vld [vmem:[#allocation100_spill] sm:$0xff]  ;;  %3306 = vrot.lane.b32.xlu1 %v2883_v20, %s6089_s21  ;;  %v11043_v20 = vld [vmem:[#allocation126_spill] sm:$0xff] }
 0x3cb   : > { %11026 = vst [vmem:[#allocation118_spill] sm:$0xff] %v8683_v40  ;;  %v8704_v40 = vmul.f32 %v8374_v56, %v11005_v60  ;;  %v2781_v60 = vmul.f32 %v8222_v43, %v7917_v18  ;;  %v2800_v18 = vmul.f32 %v11021_v21, %v10985_v17  ;;  %v2793_v38 = vmul.f32 %v8222_v43, %v11037_v44  ;;  %v11038_v17 = vld [vmem:[#allocation77_spill] sm:$0xff]  ;;  %v11042_v8 = vld [vmem:[#allocation128_spill] sm:$0xff] }
 0x3cc   : > { %11027 = vst [vmem:[#allocation58_spill] sm:$0xff] %v8687_v53  ;;  %v2784_v53 = vmul.f32 %v11021_v21, %v7941_v13  ;;  %v2783_v13 = vmul.f32 %v8222_v43, %v7927_v9  ;;  %v11034_v9 = vld [vmem:[#allocation112_spill] sm:$0xff]  ;;  %3314 = vrot.lane.b32.xlu2 %v2887_v33, %s6089_s21  ;;  %v11045_v44 = vld [vmem:[#allocation105_spill] sm:$0xff]  ;;  %v11049_v33 = vld [vmem:[#allocation95_spill] sm:$0xff] }
 0x3cd   : > { %11029 = vst [vmem:[#allocation127_spill] sm:$0xff] %v8700_v26  ;;  %v3421_v26 = vsel %vm2063_vm3, %v11036_v34, %v2781_v60  ;;  %v2806_v60 = vmul.f32 %v11021_v21, %v10996_v49  ;;  %3310 = vrot.lane.b32.xlu0 %v8613_v23, %s6089_s21  ;;  %v11059_v23 = vld [vmem:[#allocation39_spill] sm:$0xff] }
 0x3ce   : > { %11030 = vst [vmem:[#allocation134_spill] sm:$0xff] %v8704_v40  ;;  %v8722_v40 = vpop.permute.xlu0 %3092  ;;  %v8753_v3 = vsel %vm2063_vm3, %v11038_v17, %v2783_v13  ;;  %v8766_v34 = vsel %vm2063_vm3, %v11042_v8, %v2784_v53  ;;  %v8770_v13 = vsel %vm2063_vm3, %v11043_v20, %v2797_v29  ;;  %v8784_v53 = vsel %vm2063_vm3, %v11049_v33, %v2787_v4  ;;  %v11050_v8 = vld [vmem:[#allocation79_spill] sm:$0xff]  ;;  %v11056_v4 = vld [vmem:[#allocation108_spill] sm:$0xff] }
 0x3cf   : > { %11031 = vst [vmem:[#allocation47_spill] sm:$0xff] %v8712_v45  ;;  %v3420_v45 = vsel %vm2063_vm3, %v11035_v2, %v2780_v31  ;;  %v11041_v31 = vld [vmem:[#allocation96_spill] sm:$0xff]  ;;  %v2809_v29 = vmul.f32 %v8222_v43, %v11001_v10  ;;  %v2799_v20 = vmul.f32 %v8222_v43, %v11050_v8  ;;  %v2801_v33 = vmul.f32 %v8222_v43, %v11056_v4  ;;  %v11057_v10 = vld [vmem:[#allocation121_spill] sm:$0xff]  ;;  %v11058_v8 = vld [vmem:[#allocation74_spill] sm:$0xff] }
 0x3d0   : > { %11032 = vst [vmem:[#allocation43_spill] sm:$0xff] %v8722_v40  ;;  %v2792_v40 = vmul.f32 %v11021_v21, %v11034_v9  ;;  %v8757_v9 = vsel %vm2063_vm3, %v11039_v39, %v2794_v12  ;;  %v2795_v2 = vmul.f32 %v8222_v43, %v11041_v31  ;;  %v2796_v12 = vmul.f32 %v11021_v21, %v11045_v44  ;;  %v11046_v39 = vld [vmem:[#allocation68_spill] sm:$0xff]  ;;  %v8776_v31 = vpop.permute.xlu1 %3094  ;;  %v8792_v44 = vpop.permute.xlu2 %3248  ;;  %v11064_v4 = vld [vmem:[#allocation130_spill] sm:$0xff] }
 0x3d1   : > { %11033 = vst [vmem:[#allocation91_spill] sm:$0xff] %v8734_v54  ;;  %v2798_v17 = vmul.f32 %v11021_v21, %v11046_v39  ;;  %v11052_v39 = vld [vmem:[#allocation117_spill] sm:$0xff]  ;;  %v8808_v54 = vsel %vm2063_vm3, %v11058_v8, %v2790_v58  ;;  %v11067_v8 = vld [vmem:[#allocation115_spill] sm:$0xff] }
 0x3d2   : > { %11040 = vst [vmem:[#allocation116_spill] sm:$0xff] %v8757_v9  ;;  %v11048_v9 = vld [vmem:[#allocation21_spill] sm:$0xff]  ;;  %3312 = vrot.lane.b32.xlu1 %v8621_v42, %s6089_s21 }
 0x3d3   : > { %11044 = vst [vmem:[#allocation64_spill] sm:$0xff] %v8770_v13  ;;  %v8780_v49 = vsel %vm2063_vm3, %v11048_v9, %v2786_v5  ;;  %v11054_v5 = vld [vmem:[#allocation83_spill] sm:$0xff]  ;;  %v2812_v13 = vmul.f32 %v11057_v10, %v8134_v27  ;;  %v11066_v27 = vld [vmem:[#allocation26_spill] sm:$0xff] }
 0x3d4   : > { %11047 = vst [vmem:[#allocation86_spill] sm:$0xff] %v8776_v31  ;;  %v8796_v31 = vsel %vm2063_vm3, %v11052_v39, %v2789_v41  ;;  %v8800_v9 = vsel %vm2063_vm3, %v11054_v5, %v2800_v18  ;;  %v11061_v41 = vld [vmem:[#allocation90_spill] sm:$0xff]  ;;  %v8826_v58 = vsel %vm2063_vm3, %v11066_v27, %v2793_v38  ;;  %v11071_v38 = vld [vmem:[#allocation69_spill] sm:$0xff]  ;;  %3320 = vrot.lane.b32.xlu2 %v8597_v25, %s6089_s21 }
 0x3d5   : > { %11051 = vst [vmem:[#allocation73_spill] sm:$0xff] %v8792_v44  ;;  %v8812_v44 = vsel %vm2063_vm3, %v11059_v23, %v2803_v50  ;;  %v2802_v39 = vmul.f32 %v11021_v21, %v11061_v41  ;;  %v2815_v50 = vmul.f32 %v11067_v8, %v11009_v36  ;;  %v11068_v23 = vld [vmem:[#allocation120_spill] sm:$0xff]  ;;  %v8844_v27 = vsel %vm2063_vm3, %v11071_v38, %v2796_v12  ;;  %v11072_v36 = vld [vmem:[#allocation131_spill] sm:$0xff] }
 0x3d6   : > { %11053 = vst [vmem:[#allocation24_spill] sm:$0xff] %v8796_v31  ;;  %v11062_v31 = vld [vmem:[#allocation59_spill] sm:$0xff]  ;;  %v8818_v5 = vpop.permute.xlu0 %3098  ;;  %v8832_v41 = vsel %vm2063_vm3, %v11068_v23, %v2795_v2  ;;  %v2818_v2 = vmul.f32 %v11057_v10, %v8182_v16  ;;  %v11073_v23 = vld [vmem:[#allocation98_spill] sm:$0xff]  ;;  %v2810_v12 = vmul.f32 %v11021_v21, %v8140_v57  ;;  %v11076_v38 = vld [vmem:[#allocation132_spill] sm:$0xff]  ;;  %v2824_v25 = vmul.f32 %v11057_v10, %v8230_v46 }
 0x3d7   : > { %11055 = vst [vmem:[#allocation25_spill] sm:$0xff] %v8800_v9  ;;  %v2804_v18 = vmul.f32 %v11021_v21, %v11062_v31  ;;  %v8822_v9 = vsel %vm2063_vm3, %v11064_v4, %v2792_v40  ;;  %v2807_v4 = vmul.f32 %v8222_v43, %v11000_v19  ;;  %v11075_v16 = vld [vmem:[#allocation135_spill] sm:$0xff]  ;;  %v8872_v42 = vsel %vm2063_vm3, %v11076_v38, %v2812_v13  ;;  %v11081_v38 = vld [vmem:[#allocation28_spill] sm:$0xff] }
 0x3d8   : > { %11060 = vst [vmem:[#allocation27_spill] sm:$0xff] %v8812_v44  ;;  %v11069_v44 = vld [vmem:[#allocation110_spill] sm:$0xff]  ;;  %3316 = vrot.lane.b32.xlu0 %v8625_v1, %s6089_s21  ;;  %v11082_v1 = vld [vmem:[#allocation33_spill] sm:$0xff] }
 0x3d9   : > { %11063 = vst [vmem:[#allocation133_spill] sm:$0xff] %v8818_v5  ;;  %v8836_v31 = vsel %vm2063_vm3, %v11069_v44, %v2806_v60  ;;  %v11070_v5 = vld [vmem:[#allocation78_spill] sm:$0xff]  ;;  %v2808_v60 = vmul.f32 %v11021_v21, %v11073_v23  ;;  %v11074_v44 = vld [vmem:[#allocation113_spill] sm:$0xff]  ;;  %v3229_v21 = vpop.permute.xlu1 %3228  ;;  %v8901_v46 = vsel %vm2063_vm3, %v11081_v38, %v2804_v18  ;;  %v2827_v18 = vmul.f32 %v11067_v8, %v8254_v51  ;;  %v11088_v38 = vld [vmem:[#allocation35_spill] sm:$0xff] }
 0x3da   : > { %11065 = vst [vmem:[#allocation125_spill] sm:$0xff] %v8822_v9  ;;  %v2805_v40 = vmul.f32 %v8222_v43, %v11070_v5  ;;  %v8848_v9 = vsel %vm2063_vm3, %v11072_v36, %v2809_v29  ;;  %v8858_v19 = vsel %vm2063_vm3, %v11074_v44, %v2798_v17  ;;  %v3486_v29 = vsel %vm3484_vm4, %v3421_v26, %v8574_v24  ;;  %v11078_v36 = vld [vmem:[#allocation53_spill] sm:$0xff]  ;;  %v11079_v23 = vld [vmem:[#allocation22_spill] sm:$0xff] }
 0x3db   : > { %v8868_v5 = vsel %vm2063_vm3, %v11075_v16, %v2799_v20  ;;  %11077 = vst [vmem:[#allocation92_spill] sm:$0xff] %v8872_v42  ;;  %v2821_v17 = vmul.f32 %v11067_v8, %v8206_v61  ;;  %v2811_v57 = vmul.f32 %v8222_v43, %v11078_v36  ;;  %v8880_v26 = vsel %vm2063_vm3, %v11079_v23, %v2801_v33  ;;  %v8889_v61 = vpop.permute.xlu2 %3254  ;;  %v11080_v20 = vld [vmem:[#allocation23_spill] sm:$0xff] }
 0x3dc   : > { %v2813_v24 = vmul.f32 %v11067_v8, %v8164_v30  ;;  %v3485_v13 = vsel %vm3484_vm4, %v3420_v45, %v3229_v21  ;;  %v8893_v44 = vsel %vm2063_vm3, %v11080_v20, %v2802_v39  ;;  %v2814_v33 = vmul.f32 %v11057_v10, %v8178_v14  ;;  %v11084_v23 = vld [vmem:[#allocation31_spill] sm:$0xff]  ;;  %3318 = vrot.lane.b32.xlu1 %v8633_v63, %s6089_s21 }
 0x3dd   : > { %v3551_v16 = vsel %vm3549_vm5, %v3486_v29, 0.0  ;;  %v3550_v30 = vsel %vm3549_vm5, %v3485_v13, 0.0  ;;  %v8905_v45 = vsel %vm2063_vm3, %v11082_v1, %v2815_v50  ;;  %v2816_v36 = vmul.f32 %v11057_v10, %v8188_v11  ;;  %v11085_v29 = vld [vmem:[#allocation42_spill] sm:$0xff]  ;;  %v11087_v20 = vld [vmem:[#allocation63_spill] sm:$0xff] }
 0x3de   : > { %11083 = vst [vmem:[#allocation112_spill] sm:$0xff] %v8905_v45  ;;  %v3552_v39 = vadd.f32 %v3551_v16, %v3550_v30  ;;  %v3233_v21 = vpop.permute.xlu0 %3232  ;;  %v8911_v14 = vsel %vm2063_vm3, %v11084_v23, %v2805_v40  ;;  %v8915_v13 = vsel %vm2063_vm3, %v11085_v29, %v2818_v2  ;;  %v2817_v50 = vmul.f32 %v11067_v8, %v11087_v20  ;;  %v11089_v30 = vld [vmem:[#allocation38_spill] sm:$0xff]  ;;  %v11090_v23 = vld [vmem:[#allocation57_spill] sm:$0xff]  ;;  %v11092_v29 = vld [vmem:[#allocation88_spill] sm:$0xff] }
 0x3df   : > { %11086 = vst [vmem:[#allocation122_spill] sm:$0xff] %v8915_v13  ;;  %v8923_v1 = vsel %vm2063_vm3, %v11088_v38, %v2807_v4  ;;  %v2819_v11 = vmul.f32 %v11067_v8, %v8212_v47  ;;  %v2830_v40 = vmul.f32 %v11057_v10, %v8278_v48  ;;  %v8931_v2 = vsel %vm2063_vm3, %v11089_v30, %v2808_v60  ;;  %v11093_v4 = vld [vmem:[#allocation97_spill] sm:$0xff]  ;;  %v11108_v42 = vld [vmem:[#allocation103_spill] sm:$0xff] }
 0x3e0   : > { %v3553_v16 = vrot.slane %v3552_v39, 4  ;;  %v8935_v51 = vsel %vm2063_vm3, %v11090_v23, %v2821_v17  ;;  %v2820_v20 = vmul.f32 %v11057_v10, %v11092_v29  ;;  %v8941_v38 = vmul.f32 %v11057_v10, %v11093_v4  ;;  %v11094_v47 = vld [vmem:[#allocation45_spill] sm:$0xff]  ;;  %v11096_v23 = vld [vmem:[#allocation51_spill] sm:$0xff] }
 0x3e1   : > { %11091 = vst [vmem:[#allocation114_spill] sm:$0xff] %v8935_v51  ;;  %v8947_v48 = vsel %vm2063_vm3, %v11094_v47, %v2810_v12  ;;  %v3487_v30 = vsel %vm3484_vm4, %v8691_v32, %v3233_v21  ;;  %v11095_v17 = vld [vmem:[#allocation37_spill] sm:$0xff]  ;;  %v2785_v29 = vmul.f32 %v8222_v43, %v11096_v23  ;;  %v11097_v51 = vld [vmem:[#allocation50_spill] sm:$0xff]  ;;  %v2833_v12 = vmul.f32 %v11067_v8, %v8302_v15  ;;  %v3235_v21 = vpop.permute.xlu1 %3234 }
 0x3e2   : > { %v3554_v60 = vadd.f32 %v3553_v16, %v3552_v39  ;;  %3326 = vrot.lane.b32.xlu2 %v11095_v17, %s6089_s21  ;;  %v8957_v4 = vsel %vm2063_vm3, %v11097_v51, %v2811_v57  ;;  %v11098_v13 = vld [vmem:[#allocation65_spill] sm:$0xff]  ;;  %v11100_v39 = vld [vmem:[#allocation52_spill] sm:$0xff]  ;;  %v11101_v16 = vld [vmem:[#allocation71_spill] sm:$0xff]  ;;  %v2825_v43 = vmul.f32 %v11067_v8, %v8260_v55  ;;  %v2836_v15 = vmul.f32 %v11057_v10, %v8326_v7 }
 0x3e3   : > { %v8961_v63 = vsel %vm2063_vm3, %v11098_v13, %v2824_v25  ;;  %v2823_v32 = vmul.f32 %v11067_v8, %v11100_v39  ;;  %v8969_v47 = vsel %vm2063_vm3, %v11101_v16, %v2813_v24  ;;  %v11103_v51 = vld [vmem:[#allocation55_spill] sm:$0xff]  ;;  %v3488_v25 = vsel %vm3484_vm4, %v8753_v3, %v3235_v21  ;;  %v8977_v13 = vpop.permute.xlu2 %3260  ;;  %v11104_v17 = vld [vmem:[#allocation94_spill] sm:$0xff]  ;;  %v11105_v39 = vld [vmem:[#allocation44_spill] sm:$0xff] }
 0x3e4   : > { %11099 = vst [vmem:[#allocation100_spill] sm:$0xff] %v8961_v63  ;;  %v3555_v57 = vrot.slane %v3554_v60, 2  ;;  %3322 = vrot.lane.b32.xlu0 %v11103_v51, %s6089_s21  ;;  %v3489_v24 = vsel %vm3484_vm4, %v8766_v34, %v11104_v17  ;;  %v3559_v23 = vsel %vm3549_vm5, %v3487_v30, 0.0  ;;  %v3560_v55 = vsel %vm3549_vm5, %v3488_v25, 0.0  ;;  %v11106_v21 = vld [vmem:[#allocation104_spill] sm:$0xff] }
 0x3e5   : > { %11102 = vst [vmem:[#allocation77_spill] sm:$0xff] %v8969_v47  ;;  %v8988_v16 = vsel %vm2063_vm3, %v11105_v39, %v2814_v33  ;;  %v3561_v63 = vadd.f32 %v3560_v55, %v3559_v23  ;;  %v3425_v45 = vsel %vm2063_vm3, %v11106_v21, %v2785_v29  ;;  %v11107_v47 = vld [vmem:[#allocation82_spill] sm:$0xff]  ;;  %v2826_v34 = vmul.f32 %v11057_v10, %v11108_v42  ;;  %v11115_v21 = vld [vmem:[#allocation56_spill] sm:$0xff] }
 0x3e6   : > { %v3556_v51 = vadd.f32 %v3555_v57, %v3554_v60  ;;  %v3239_v3 = vpop.permute.xlu0 %3238  ;;  %v8994_v7 = vsel %vm2063_vm3, %v11107_v47, %v2827_v18  ;;  %v9000_v30 = vmul.f32 %v11057_v10, %v8284_v6  ;;  %v3568_v60 = vsel %vm3549_vm5, %v3489_v24, 0.0  ;;  %v11109_v29 = vld [vmem:[#allocation102_spill] sm:$0xff] }
 0x3e7   : > { %v3490_v33 = vsel %vm3484_vm4, %v3425_v45, %v3239_v3  ;;  %v3562_v25 = vrot.slane %v3561_v63, 4  ;;  %v9007_v23 = vsel %vm2063_vm3, %v11109_v29, %v2816_v36  ;;  %v11110_v18 = vld [vmem:[#allocation62_spill] sm:$0xff]  ;;  %v2839_v6 = vmul.f32 %v11067_v8, %v8350_v37  ;;  %v11111_v45 = vld [vmem:[#allocation67_spill] sm:$0xff] }
 0x3e8   : > { %v3557_v57 = vrot.slane %v3556_v51, 1  ;;  %v3569_v17 = vsel %vm3549_vm5, %v3490_v33, 0.0  ;;  %v9011_v47 = vsel %vm2063_vm3, %v11110_v18, %v2817_v50  ;;  %3324 = vrot.lane.b32.xlu1 %v11111_v45, %s6089_s21  ;;  %v11112_v24 = vld [vmem:[#allocation106_spill] sm:$0xff]  ;;  %v3492_v39 = vsel %vm3484_vm4, %v8784_v53, %v8696_v0  ;;  %v11114_v50 = vld [vmem:[#allocation61_spill] sm:$0xff] }
 0x3e9   : > { %v3570_v42 = vadd.f32 %v3569_v17, %v3568_v60  ;;  %v2829_v55 = vmul.f32 %v11067_v8, %v11112_v24  ;;  %v3563_v3 = vadd.f32 %v3562_v25, %v3561_v63  ;;  %v9028_v37 = vsel %vm2063_vm3, %v11115_v21, %v2819_v11  ;;  %v11116_v33 = vld [vmem:[#allocation49_spill] sm:$0xff]  ;;  %v3241_v0 = vpop.permute.xlu1 %3240  ;;  %v11118_v45 = vld [vmem:[#allocation70_spill] sm:$0xff] }
 0x3ea   : > { %v9022_v36 = vadd.f32 %v3557_v57, %v3556_v51  ;;  %3332 = vrot.lane.b32.xlu2 %v11114_v50, %s6089_s21  ;;  %v9032_v60 = vsel %vm2063_vm3, %v11116_v33, %v2830_v40  ;;  %v9036_v17 = vmul.f32 %v11067_v8, %v8308_v28  ;;  %v2842_v53 = vmul.f32 %v11057_v10, %v8374_v56  ;;  %v11117_v57 = vld [vmem:[#allocation81_spill] sm:$0xff] }
 0x3eb   : > { %v3571_v29 = vrot.slane %v3570_v42, 4  ;;  %v3564_v51 = vrot.slane %v3563_v3, 2  ;;  %v3491_v11 = vsel %vm3484_vm4, %v8780_v49, %v3241_v0  ;;  %v9047_v40 = vpop.permute.xlu2 %3266  ;;  %v9051_v28 = vsel %vm2063_vm3, %v11117_v57, %v2820_v20  ;;  %v11119_v50 = vld [vmem:[#allocation101_spill] sm:$0xff]  ;;  %v11120_v0 = vld [vmem:[#allocation76_spill] sm:$0xff] }
 0x3ec   : > { %11113 = vst [vmem:[#allocation124_spill] sm:$0xff] %v9022_v36  ;;  %v9041_v63 = vadd.f32 1e-06, %v9022_v36  ;;  %3328 = vrot.lane.b32.xlu0 %v8654_v62, %s6089_s21  ;;  %v3578_v25 = vsel %vm3549_vm5, %v3492_v39, 0.0  ;;  %v3577_v56 = vsel %vm3549_vm5, %v3491_v11, 0.0  ;;  %v9057_v24 = vsel %vm2063_vm3, %v11118_v45, %v2833_v12  ;;  %v11121_v39 = vld [vmem:[#allocation109_spill] sm:$0xff] }
 0x3ed   : > { %v3572_v18 = vadd.f32 %v3571_v29, %v3570_v42  ;;  %v9061_v62 = vmul.f32 %v11057_v10, %v11119_v50  ;;  %v3565_v49 = vadd.f32 %v3564_v51, %v3563_v3  ;;  %v3579_v21 = vadd.f32 %v3578_v25, %v3577_v56  ;;  %v11122_v11 = vld [vmem:[#allocation107_spill] sm:$0xff]  ;;  %v11123_v25 = vld [vmem:[#allocation30_spill] sm:$0xff]  ;;  %v11124_v56 = vld [vmem:[#allocation93_spill] sm:$0xff] }
 0x3ee   : > { %v3245_v33 = vpop.permute.xlu0 %3244  ;;  %v9066_v20 = vsel %vm2063_vm3, %v11120_v0, %v8941_v38  ;;  %v9070_v42 = vsel %vm2063_vm3, %v11121_v39, %v2823_v32  ;;  %v9074_v12 = vmul.f32 %v11057_v10, %v8332_v52  ;;  %v9078_v57 = vmul.f32 %v11067_v8, %v11122_v11  ;;  %v11125_v50 = vld [vmem:[#allocation99_spill] sm:$0xff]  ;;  %v11126_v0 = vld [vmem:[#allocation136_spill] sm:$0xff]  ;;  %v11138_v36 = vld [vmem:[#allocation46_spill] sm:$0xff] }
 0x3ef   : > { %v3573_v29 = vrot.slane %v3572_v18, 2  ;;  %5774 = vrcp.f32 %v9041_v63  ;;  %v3566_v3 = vrot.slane %v3565_v49, 1  ;;  %v3580_v51 = vrot.slane %v3579_v21, 4 }
 0x3f0   : > { %v9083_v38 = vsel %vm2063_vm3, %v11123_v25, %v2825_v43  ;;  %v9087_v32 = vsel %vm2063_vm3, %v11124_v56, %v2836_v15  ;;  %v9091_v52 = vmul.f32 %v11067_v8, %v8356_v59  ;;  %3330 = vrot.lane.b32.xlu1 %v11125_v50, %s6089_s21  ;;  %v9097_v39 = vmul.f32 %v11067_v8, %v11126_v0  ;;  %v11129_v15 = vld [vmem:[#allocation48_spill] sm:$0xff]  ;;  %v11133_v50 = vld [vmem:[#allocation119_spill] sm:$0xff] }
 0x3f1   : > { %v3574_v45 = vadd.f32 %v3573_v29, %v3572_v18  ;;  %v9099_v11 = vadd.f32 %v3566_v3, %v3565_v49  ;;  %v3581_v43 = vadd.f32 %v3580_v51, %v3579_v21  ;;  %v3493_v25 = vsel %vm3484_vm4, %v8716_v22, %v3245_v33  ;;  %v11130_v56 = vld [vmem:[#allocation20_spill] sm:$0xff]  ;;  %v11131_v18 = vld [vmem:[#allocation54_spill] sm:$0xff]  ;;  %v3247_v22 = vpop.permute.xlu1 %3246  ;;  %v11134_v21 = vld [vmem:[#allocation73_spill] sm:$0xff] }
 0x3f2   : > { %11127 = vst [vmem:[#allocation96_spill] sm:$0xff] %v9097_v39  ;;  %3338 = vrot.lane.b32.xlu2 %v11129_v15, %s6089_s21  ;;  %v9107_v59 = vsel %vm2063_vm3, %v11130_v56, %v2826_v34  ;;  %v9111_v29 = vsel %vm2063_vm3, %v11131_v18, %v2839_v6  ;;  %v9115_v0 = vmul.f32 %v11057_v10, %v11133_v50  ;;  %v11135_v6 = vld [vmem:[#allocation85_spill] sm:$0xff]  ;;  %v11136_v51 = vld [vmem:[#allocation24_spill] sm:$0xff]  ;;  %v3586_v50 = vsel %vm3549_vm5, %v3493_v25, 0.0 }
 0x3f3   : > { %11128 = vst [vmem:[#allocation128_spill] sm:$0xff] %v9099_v11  ;;  %v9119_v49 = vmul.f32 %v11057_v10, %v8380_v35  ;;  %v3495_v33 = vsel %vm3484_vm4, %v8808_v54, %v11134_v21  ;;  %v9125_v34 = vadd.f32 1e-06, %v9099_v11  ;;  %v3582_v3 = vrot.slane %v3581_v43, 2  ;;  %v3273_v56 = vpop.permute.xlu2 %3272  ;;  %v11137_v18 = vld [vmem:[#allocation40_spill] sm:$0xff] }
 0x3f4   : > { %11132 = vst [vmem:[#allocation126_spill] sm:$0xff] %v9111_v29  ;;  %3334 = vrot.lane.b32.xlu0 %v11135_v6, %s6089_s21  ;;  %v3494_v15 = vsel %vm3484_vm4, %v11136_v51, %v3247_v22  ;;  %v9134_v35 = vsel %vm2063_vm3, %v11137_v18, %v9000_v30  ;;  %v3575_v10 = vrot.slane %v3574_v45, 1  ;;  %v9142_v11 = vsel %vm2063_vm3, %v11138_v36, %v2829_v55  ;;  %v11139_v6 = vld [vmem:[#allocation72_spill] sm:$0xff] }
 0x3f5   : > { %v3587_v54 = vsel %vm3549_vm5, %v3494_v15, 0.0  ;;  %v9138_v21 = vpop.eup %5774  ;;  %v9146_v22 = vsel %vm2063_vm3, %v11139_v6, %v2842_v53  ;;  %v3583_v51 = vadd.f32 %v3582_v3, %v3581_v43  ;;  %v3595_v30 = vsel %vm3549_vm5, %v3495_v33, 0.0  ;;  %v11140_v15 = vld [vmem:[#allocation91_spill] sm:$0xff]  ;;  %v11141_v3 = vld [vmem:[#allocation129_spill] sm:$0xff] }
 0x3f6   : > { %v3588_v39 = vadd.f32 %v3587_v54, %v3586_v50  ;;  %v3251_v29 = vpop.permute.xlu0 %3250  ;;  %v3498_v25 = vsel %vm3484_vm4, %v8826_v58, %v8889_v61  ;;  %5776 = vrcp.f32 %v9125_v34  ;;  %v3501_v55 = vsel %vm3484_vm4, %v8844_v27, %v8977_v13  ;;  %v11144_v61 = vld [vmem:[#allocation89_spill] sm:$0xff]  ;;  %v11145_v54 = vld [vmem:[#allocation60_spill] sm:$0xff] }
 0x3f7   : > { %v3496_v18 = vsel %vm3484_vm4, %v11140_v15, %v3251_v29  ;;  %v3584_v36 = vrot.slane %v3583_v51, 1  ;;  %v9161_v33 = vmul.f32 %v11067_v8, %v11141_v3  ;;  %v9163_v50 = vadd.f32 %v3575_v10, %v3574_v45  ;;  %v11147_v45 = vld [vmem:[#allocation80_spill] sm:$0xff] }
 0x3f8   : > { %v3589_v53 = vrot.slane %v3588_v39, 4  ;;  %v3596_v43 = vsel %vm3549_vm5, %v3496_v18, 0.0  ;;  %3336 = vrot.lane.b32.xlu1 %v11144_v61, %s6089_s21  ;;  %v3871_v29 = vmul.f32 %v9138_v21, %v9041_v63  ;;  %v9172_v27 = vsel %vm2063_vm3, %v11145_v54, %v9036_v17 }
 0x3f9   : > { %11142 = vst [vmem:[#allocation105_spill] sm:$0xff] %v9161_v33  ;;  %v3597_v58 = vadd.f32 %v3596_v43, %v3595_v30  ;;  %v3605_v13 = vsel %vm3549_vm5, %v3498_v25, 0.0  ;;  %v9175_v6 = vadd.f32 %v3584_v36, %v3583_v51  ;;  %v9180_v10 = vsel %vm3549_vm5, %v3501_v55, 0.0  ;;  %v3253_v18 = vpop.permute.xlu1 %3252  ;;  %v11148_v51 = vld [vmem:[#allocation123_spill] sm:$0xff]  ;;  %v11149_v36 = vld [vmem:[#allocation125_spill] sm:$0xff] }
 0x3fa   : > { %11143 = vst [vmem:[#allocation68_spill] sm:$0xff] %v9163_v50  ;;  %v3590_v8 = vadd.f32 %v3589_v53, %v3588_v39  ;;  %3344 = vrot.lane.b32.xlu2 %v11147_v45, %s6089_s21  ;;  %v3504_v30 = vsel %vm3484_vm4, %v8868_v5, %v9047_v40  ;;  %v3872_v43 = vsub.f32 1.0, %v3871_v29  ;;  %v3507_v39 = vsel %vm3484_vm4, %v8893_v44, %v3273_v56 }
 0x3fb   : > { %11146 = vst [vmem:[#allocation21_spill] sm:$0xff] %v9175_v6  ;;  %v3598_v15 = vrot.slane %v3597_v58, 4  ;;  %v9186_v17 = vadd.f32 1e-06, %v9175_v6  ;;  %v3497_v55 = vsel %vm3484_vm4, %v11149_v36, %v3253_v18  ;;  %v3279_v53 = vpop.permute.xlu2 %3278  ;;  %v9197_v5 = vadd.f32 1e-06, %v9163_v50 }
 0x3fc   : > { %v3591_v25 = vrot.slane %v3590_v8, 2  ;;  %3340 = vrot.lane.b32.xlu0 %v11148_v51, %s6089_s21  ;;  %v9194_v3 = vpop.eup %5776  ;;  %v3604_v61 = vsel %vm3549_vm5, %v3497_v55, 0.0  ;;  %v3873_v29 = vmul.f32 %v9138_v21, %v3872_v43  ;;  %vm3876_vm6 = vweird.f32 %v9138_v21  ;;  %v11152_v50 = vld [vmem:[#allocation116_spill] sm:$0xff]  ;;  %v11153_v6 = vld [vmem:[#allocation75_spill] sm:$0xff] }
 0x3fd   : > { %v3599_v40 = vadd.f32 %v3598_v15, %v3597_v58  ;;  %v3606_v45 = vadd.f32 %v3605_v13, %v3604_v61  ;;  %v3879_v56 = vand.u32 2147483647, %v9041_v63  ;;  %5778 = vrcp.f32 %v9186_v17  ;;  %v11150_v61 = vld [vmem:[#allocation118_spill] sm:$0xff] }
 0x3fe   : > { %v3592_v54 = vadd.f32 %v3591_v25, %v3590_v8  ;;  %v3257_v44 = vpop.permute.xlu0 %3256  ;;  %v3510_v51 = vsel %vm3484_vm4, %v8911_v14, %v3279_v53  ;;  %v3881_v36 = vand.u32 2147483648, %v9041_v63  ;;  %v3874_v55 = vadd.f32 %v9138_v21, %v3873_v29 }
 0x3ff   : > { %v3600_v18 = vrot.slane %v3599_v40, 2  ;;  %v3607_v15 = vrot.slane %v3606_v45, 4  ;;  %v3886_v13 = vmul.f32 %v9194_v3, %v9125_v34  ;;  %v9211_v8 = vsel %vm3549_vm5, %v3504_v30, 0.0 }
 0x400   : > { %v3593_v58 = vrot.slane %v3592_v54, 1  ;;  %v9214_v25 = vsel %vm3549_vm5, %v3507_v39, 0.0  ;;  %3342 = vrot.lane.b32.xlu1 %v11150_v61, %s6089_s21  ;;  %vm3875_vm7 = vweird.f32 %v9041_v63  ;;  %v3499_v29 = vsel %vm3484_vm4, %v11152_v50, %v3257_v44 }
 0x401   : > { %v3601_v43 = vadd.f32 %v3600_v18, %v3599_v40  ;;  %v3608_v53 = vadd.f32 %v3607_v15, %v3606_v45  ;;  %v3887_v30 = vsub.f32 1.0, %v3886_v13  ;;  %5780 = vrcp.f32 %v9197_v5  ;;  %v3259_v40 = vpop.permute.xlu1 %3258  ;;  %vm9231_vm8 = vmor %vm3875_vm7, %vm3876_vm6 }
 0x402   : > { %v9219_v14 = vadd.f32 %v3593_v58, %v3592_v54  ;;  %3350 = vrot.lane.b32.xlu2 %v11153_v6, %s6089_s21  ;;  %v9227_v39 = vsel %vm3549_vm5, %v3510_v51, 0.0  ;;  %vm9235_vm9 = vcmp.eq.f32.partialorder %v3879_v56, 8.507059e+37  ;;  %v3882_v50 = vor.u32 1.1754944e-38, %v3881_v36  ;;  %v11158_v6 = vld [vmem:[#allocation58_spill] sm:$0xff] }
 0x403   : > { %v3609_v45 = vrot.slane %v3608_v53, 2  ;;  %v3500_v44 = vsel %vm3484_vm4, %v8832_v41, %v3259_v40  ;;  %v3878_v18 = vsel %vm9231_vm8, %v9138_v21, %v3874_v55  ;;  %v3888_v51 = vmul.f32 %v9194_v3, %v3887_v30  ;;  %v9247_v58 = vpop.eup %5778  ;;  %v11159_v21 = vld [vmem:[#allocation64_spill] sm:$0xff] }
 0x404   : > { %11151 = vst [vmem:[#allocation95_spill] sm:$0xff] %v9219_v14  ;;  %3346 = vrot.lane.b32.xlu0 %v11158_v6, %s6089_s21  ;;  %v9250_v56 = vadd.f32 1e-06, %v9219_v14  ;;  %v3602_v15 = vrot.slane %v3601_v43, 1  ;;  %v3613_v36 = vsel %vm3549_vm5, %v3499_v29, 0.0  ;;  %v3614_v13 = vsel %vm3549_vm5, %v3500_v44, 0.0 }
 0x405   : > { %v3610_v61 = vadd.f32 %v3609_v45, %v3608_v53  ;;  %v3615_v6 = vadd.f32 %v3614_v13, %v3613_v36  ;;  %vm3890_vm10 = vweird.f32 %v9125_v34  ;;  %v3896_v41 = vand.u32 2147483648, %v9125_v34 }
 0x406   : > { %v3263_v33 = vpop.permute.xlu0 %3262  ;;  %v9260_v30 = vsel %vm9235_vm9, %v3882_v50, %v3878_v18  ;;  %v3889_v40 = vadd.f32 %v9194_v3, %v3888_v51  ;;  %vm3891_vm11 = vweird.f32 %v9194_v3  ;;  %v3916_v45 = vmul.f32 %v9247_v58, %v9186_v17  ;;  %v9273_v50 = vpop.permute.xlu2 %3284  ;;  %v11162_v18 = vld [vmem:[#allocation127_spill] sm:$0xff] }
 0x407   : > { %v3502_v55 = vsel %vm3484_vm4, %v11159_v21, %v3263_v33  ;;  %11160 = vst [vmem:[#allocation79_spill] sm:$0xff] %v9260_v30  ;;  %v3611_v29 = vrot.slane %v3610_v61, 1  ;;  %v3616_v63 = vrot.slane %v3615_v6, 4  ;;  %v9267_v44 = vpop.eup %5780  ;;  %5782 = vrcp.f32 %v9250_v56  ;;  %vm9286_vm12 = vmor %vm3890_vm10, %vm3891_vm11 }
 0x408   : > { %v3623_v53 = vsel %vm3549_vm5, %v3502_v55, 0.0  ;;  %v9270_v33 = vadd.f32 %v3602_v15, %v3601_v43  ;;  %3348 = vrot.lane.b32.xlu1 %v11162_v18, %s6089_s21  ;;  %v3894_v51 = vand.u32 2147483647, %v9125_v34  ;;  %v3917_v15 = vsub.f32 1.0, %v3916_v45 }
 0x409   : > { %v3624_v54 = vadd.f32 %v3623_v53, %v9180_v10  ;;  %v9278_v36 = vadd.f32 %v3611_v29, %v3610_v61  ;;  %v3617_v13 = vadd.f32 %v3616_v63, %v3615_v6  ;;  %v3897_v10 = vor.u32 1.1754944e-38, %v3896_v41  ;;  %v3265_v55 = vpop.permute.xlu1 %3264  ;;  %v11166_v53 = vld [vmem:[#allocation134_spill] sm:$0xff] }
 0x40a   : > { %11161 = vst [vmem:[#allocation117_spill] sm:$0xff] %v9270_v33  ;;  %4382 = vrot.lane.b32.xlu2 %v9260_v30, %s6089_s21  ;;  %v3893_v61 = vsel %vm9286_vm12, %v9194_v3, %v3889_v40  ;;  %v3924_v6 = vand.u32 2147483647, %v9186_v17  ;;  %v3926_v29 = vand.u32 2147483648, %v9186_v17  ;;  %v3503_v34 = vsel %vm3484_vm4, %v8858_v19, %v3265_v55 }
 0x40b   : > { %11163 = vst [vmem:[#allocation83_spill] sm:$0xff] %v9278_v36  ;;  %v3625_v21 = vrot.slane %v3624_v54, 4  ;;  %v3618_v63 = vrot.slane %v3617_v13, 2  ;;  %v3918_v41 = vmul.f32 %v9247_v58, %v3917_v15  ;;  %v3901_v45 = vmul.f32 %v9267_v44, %v9197_v5 }
 0x40c   : > { %3352 = vrot.lane.b32.xlu0 %v11166_v53, %s6089_s21  ;;  %v9303_v18 = vadd.f32 1e-06, %v9278_v36  ;;  %v3631_v40 = vsel %vm3549_vm5, %v3503_v34, 0.0  ;;  %vm3921_vm13 = vweird.f32 %v9247_v58  ;;  %vm3895_vm14 = vcmp.eq.f32.partialorder %v3894_v51, 8.507059e+37 }
 0x40d   : > { %v3626_v3 = vadd.f32 %v3625_v21, %v3624_v54  ;;  %v3619_v43 = vadd.f32 %v3618_v63, %v3617_v13  ;;  %v3633_v30 = vadd.f32 %v9211_v8, %v3631_v40  ;;  %vm3920_vm15 = vweird.f32 %v9186_v17  ;;  %v9309_v19 = vpop.eup %5782  ;;  %v11167_v17 = vld [vmem:[#allocation47_spill] sm:$0xff] }
 0x40e   : > { %v3269_v53 = vpop.permute.xlu0 %3268  ;;  %v9312_v15 = vadd.f32 1e-06, %v9270_v33  ;;  %v9314_v36 = vsel %vm3895_vm14, %v3897_v10, %v3893_v61  ;;  %v3919_v54 = vadd.f32 %v9247_v58, %v3918_v41  ;;  %vm3922_vm0 = vmor %vm3920_vm15, %vm3921_vm13  ;;  %vm3925_vm1 = vcmp.eq.f32.partialorder %v3924_v6, 8.507059e+37  ;;  %v11168_v33 = vld [vmem:[#allocation25_spill] sm:$0xff] }
 0x40f   : > { %v3627_v55 = vrot.slane %v3626_v3, 2  ;;  %v3634_v21 = vrot.slane %v3633_v30, 4  ;;  %v3927_v13 = vor.u32 1.1754944e-38, %v3926_v29  ;;  %v3902_v63 = vsub.f32 1.0, %v3901_v45  ;;  %v3291_v29 = vpop.permute.xlu2 %3290 }
 0x410   : > { %5784 = vrcp.f32 %v9303_v18  ;;  %v3620_v8 = vrot.slane %v3619_v43, 1  ;;  %3354 = vrot.lane.b32.xlu1 %v11167_v17, %s6089_s21  ;;  %v3923_v34 = vsel %vm3922_vm0, %v9247_v58, %v3919_v54  ;;  %v3505_v10 = vsel %vm3484_vm4, %v11168_v33, %v3269_v53 }
 0x411   : > { %v3628_v51 = vadd.f32 %v3627_v55, %v3626_v3  ;;  %v3635_v40 = vadd.f32 %v3634_v21, %v3633_v30  ;;  %v9323_v61 = vsel %vm3925_vm1, %v3927_v13, %v3923_v34  ;;  %v3903_v41 = vmul.f32 %v9267_v44, %v3902_v63  ;;  %v3271_v45 = vpop.permute.xlu1 %3270 }
 0x412   : > { %4388 = vrot.lane.b32.xlu2 %v9323_v61, %s6089_s21  ;;  %vm3906_vm2 = vweird.f32 %v9267_v44  ;;  %v3909_v3 = vand.u32 2147483647, %v9197_v5  ;;  %v3911_v58 = vand.u32 2147483648, %v9197_v5  ;;  %v3506_v33 = vsel %vm3484_vm4, %v8880_v26, %v3271_v45 }
 0x413   : > { %v3629_v6 = vrot.slane %v3628_v51, 1  ;;  %v3636_v30 = vrot.slane %v3635_v40, 2  ;;  %v3904_v53 = vadd.f32 %v9267_v44, %v3903_v41  ;;  %v3931_v55 = vmul.f32 %v9309_v19, %v9250_v56 }
 0x414   : > { %4384 = vrot.lane.b32.xlu0 %v9314_v36, %s6089_s21  ;;  %v9338_v54 = vadd.f32 %v3620_v8, %v3619_v43  ;;  %v3640_v21 = vsel %vm3549_vm5, %v3505_v10, 0.0  ;;  %v3641_v13 = vsel %vm3549_vm5, %v3506_v33, 0.0  ;;  %vm3905_vm6 = vweird.f32 %v9197_v5  ;;  %v11170_v10 = vld [vmem:[#allocation27_spill] sm:$0xff] }
 0x415   : > { %5786 = vrcp.f32 %v9312_v15  ;;  %v9344_v63 = vadd.f32 %v3629_v6, %v3628_v51  ;;  %v3513_v26 = vsel %vm3484_vm4, %v8931_v2, %v9273_v50  ;;  %v3642_v17 = vadd.f32 %v3641_v13, %v3640_v21  ;;  %vm3907_vm7 = vmor %vm3905_vm6, %vm3906_vm2 }
 0x416   : > { %11169 = vst [vmem:[#allocation108_spill] sm:$0xff] %v9338_v54  ;;  %v3275_v34 = vpop.permute.xlu0 %3274  ;;  %v9351_v43 = vpop.eup %5784  ;;  %v3637_v8 = vadd.f32 %v3636_v30, %v3635_v40  ;;  %v3908_v5 = vsel %vm3907_vm7, %v9267_v44, %v3904_v53  ;;  %v3912_v45 = vor.u32 1.1754944e-38, %v3911_v58  ;;  %vm3910_vm8 = vcmp.eq.f32.partialorder %v3909_v3, 8.507059e+37 }
 0x417   : > { %v3508_v41 = vsel %vm3484_vm4, %v11170_v10, %v3275_v34  ;;  %v3643_v51 = vrot.slane %v3642_v17, 4  ;;  %v3932_v33 = vsub.f32 1.0, %v3931_v55  ;;  %v9358_v2 = vadd.f32 1e-06, %v9338_v54  ;;  %v11171_v54 = vld [vmem:[#allocation66_spill] sm:$0xff] }
 0x418   : > { %v3650_v6 = vsel %vm3549_vm5, %v3508_v41, 0.0  ;;  %v3516_v50 = vsel %vm3484_vm4, %v8957_v4, %v3291_v29  ;;  %v9363_v40 = vsel %vm3910_vm8, %v3912_v45, %v3908_v5  ;;  %v9366_v30 = vadd.f32 1e-06, %v9344_v63  ;;  %v9380_v41 = vpop.permute.xlu2 %3296 }
 0x419   : > { %v3651_v21 = vadd.f32 %v3650_v6, %v9214_v25  ;;  %v3644_v44 = vadd.f32 %v3643_v51, %v3642_v17  ;;  %4386 = vrot.lane.b32.xlu1 %v9363_v40, %s6089_s21  ;;  %v3933_v3 = vmul.f32 %v9309_v19, %v3932_v33  ;;  %vm3936_vm9 = vweird.f32 %v9309_v19  ;;  %v3277_v25 = vpop.permute.xlu1 %3276 }
 0x41a   : > { %v3638_v58 = vrot.slane %v3637_v8, 1  ;;  %v3939_v55 = vand.u32 2147483647, %v9250_v56  ;;  %v3941_v4 = vand.u32 2147483648, %v9250_v56  ;;  %vm3935_vm10 = vweird.f32 %v9250_v56 }
 0x41b   : > { %v3652_v53 = vrot.slane %v3651_v21, 4  ;;  %v9374_v29 = vpop.eup %5786  ;;  %v3645_v13 = vrot.slane %v3644_v44, 2  ;;  %v3934_v34 = vadd.f32 %v9309_v19, %v3933_v3  ;;  %v3509_v17 = vsel %vm3484_vm4, %v8901_v46, %v3277_v25  ;;  %vm3937_vm11 = vmor %vm3935_vm10, %vm3936_vm9  ;;  %v11174_v25 = vld [vmem:[#allocation87_spill] sm:$0xff] }
 0x41c   : > { %v3942_v5 = vor.u32 1.1754944e-38, %v3941_v4  ;;  %v3658_v45 = vsel %vm3549_vm5, %v3509_v17, 0.0  ;;  %v3961_v51 = vmul.f32 %v9351_v43, %v9303_v18  ;;  %vm3940_vm12 = vcmp.eq.f32.partialorder %v3939_v55, 8.507059e+37 }
 0x41d   : > { %v3653_v10 = vadd.f32 %v3652_v53, %v3651_v21  ;;  %v3646_v6 = vadd.f32 %v3645_v13, %v3644_v44  ;;  %v3938_v33 = vsel %vm3937_vm11, %v9309_v19, %v3934_v34  ;;  %v3660_v3 = vadd.f32 %v9227_v39, %v3658_v45 }
 0x41e   : > { %v3281_v56 = vpop.permute.xlu0 %3280  ;;  %v9390_v46 = vsel %vm2063_vm3, %v11171_v54, %v9061_v62  ;;  %v9392_v21 = vadd.f32 %v3638_v58, %v3637_v8  ;;  %v9394_v4 = vsel %vm3940_vm12, %v3942_v5, %v3938_v33  ;;  %v9399_v44 = vsel %vm2063_vm3, %v11174_v25, %v9074_v12 }
 0x41f   : > { %v3654_v53 = vrot.slane %v3653_v10, 2  ;;  %11173 = vst [vmem:[#allocation74_spill] sm:$0xff] %v9394_v4  ;;  %v3676_v19 = vsel %vm3549_vm5, %v3513_v26, 0.0  ;;  %v3647_v55 = vrot.slane %v3646_v6, 1  ;;  %4390 = vrot.lane.b32.xlu0 %v9394_v4, %s6089_s21  ;;  %v3661_v39 = vrot.slane %v3660_v3, 4 }
 0x420   : > { %11172 = vst [vmem:[#allocation121_spill] sm:$0xff] %v9392_v21  ;;  %5788 = vrcp.f32 %v9358_v2  ;;  %v9406_v62 = vsel %vm3549_vm5, %v3516_v50, 0.0  ;;  %v3962_v8 = vsub.f32 1.0, %v3961_v51  ;;  %v3969_v12 = vand.u32 2147483647, %v9303_v18 }
 0x421   : > { %v3655_v54 = vadd.f32 %v3654_v53, %v3653_v10  ;;  %5790 = vrcp.f32 %v9366_v30  ;;  %v3662_v58 = vadd.f32 %v3661_v39, %v3660_v3  ;;  %v3971_v13 = vand.u32 2147483648, %v9303_v18  ;;  %v3283_v17 = vpop.permute.xlu1 %3282 }
 0x422   : > { %v9412_v26 = vadd.f32 1e-06, %v9392_v21  ;;  %v3963_v34 = vmul.f32 %v9351_v43, %v3962_v8  ;;  %vm3966_vm13 = vweird.f32 %v9351_v43  ;;  %v3946_v50 = vmul.f32 %v9374_v29, %v9312_v15 }
 0x423   : > { %v9418_v10 = vadd.f32 %v3647_v55, %v3646_v6  ;;  %v3663_v5 = vrot.slane %v3662_v58, 2  ;;  %v3511_v45 = vsel %vm3484_vm4, %v8836_v31, %v3281_v56  ;;  %vm3965_vm14 = vweird.f32 %v9303_v18  ;;  %v9432_v31 = vpop.permute.xlu2 %3302 }
 0x424   : > { %v3656_v51 = vrot.slane %v3655_v54, 1  ;;  %v3964_v33 = vadd.f32 %v9351_v43, %v3963_v34  ;;  %vm9424_vm15 = vcmp.eq.f32.partialorder %v3969_v12, 8.507059e+37  ;;  %v3947_v53 = vsub.f32 1.0, %v3946_v50  ;;  %vm3967_vm0 = vmor %vm3965_vm14, %vm3966_vm13 }
 0x425   : > { %v3664_v25 = vadd.f32 %v3663_v5, %v3662_v58  ;;  %v3972_v39 = vor.u32 1.1754944e-38, %v3971_v13  ;;  %vm3951_vm1 = vweird.f32 %v9374_v29  ;;  %v3956_v6 = vand.u32 2147483648, %v9312_v15 }
 0x426   : > { %v3287_v55 = vpop.permute.xlu0 %3286  ;;  %v9430_v8 = vpop.eup %5788  ;;  %v3968_v18 = vsel %vm3967_vm0, %v9351_v43, %v3964_v33  ;;  %v3948_v56 = vmul.f32 %v9374_v29, %v3947_v53  ;;  %v3954_v12 = vand.u32 2147483647, %v9312_v15  ;;  %v3512_v58 = vsel %vm3484_vm4, %v8923_v1, %v3283_v17 }
 0x427   : > { %v9439_v34 = vpop.eup %5790  ;;  %v3665_v13 = vrot.slane %v3664_v25, 1  ;;  %v3667_v50 = vsel %vm3549_vm5, %v3511_v45, 0.0  ;;  %v9444_v5 = vsel %vm9424_vm15, %v3972_v39, %v3968_v18  ;;  %vm3950_vm2 = vweird.f32 %v9312_v15 }
 0x428   : > { %11177 = vst [vmem:[#allocation39_spill] sm:$0xff] %v9444_v5  ;;  %v9448_v43 = vadd.f32 1e-06, %v9418_v10  ;;  %4394 = vrot.lane.b32.xlu2 %v9444_v5, %s6089_s21  ;;  %v3949_v33 = vadd.f32 %v9374_v29, %v3948_v56  ;;  %v3668_v1 = vsel %vm3549_vm5, %v3512_v58, 0.0  ;;  %v3514_v17 = vsel %vm3484_vm4, %v8848_v9, %v3287_v55  ;;  %vm3952_vm6 = vmor %vm3950_vm2, %vm3951_vm1 }
 0x429   : > { %v9456_v45 = vadd.f32 %v3656_v51, %v3655_v54  ;;  %v3957_v3 = vor.u32 1.1754944e-38, %v3956_v6  ;;  %v3669_v15 = vadd.f32 %v3668_v1, %v3667_v50  ;;  %v3677_v53 = vsel %vm3549_vm5, %v3514_v17, 0.0  ;;  %v3289_v58 = vpop.permute.xlu1 %3288 }
 0x42a   : > { %v3953_v39 = vsel %vm3952_vm6, %v9374_v29, %v3949_v33  ;;  %vm3955_vm7 = vcmp.eq.f32.partialorder %v3954_v12, 8.507059e+37  ;;  %v3678_v18 = vadd.f32 %v3677_v53, %v3676_v19  ;;  %v3976_v56 = vmul.f32 %v9430_v8, %v9358_v2 }
 0x42b   : > { %11178 = vst [vmem:[#allocation90_spill] sm:$0xff] %v9456_v45  ;;  %5792 = vrcp.f32 %v9412_v26  ;;  %v9465_v9 = vadd.f32 %v3665_v13, %v3664_v25  ;;  %v9467_v54 = vsel %vm3955_vm7, %v3957_v3, %v3953_v39  ;;  %v3670_v51 = vrot.slane %v3669_v15, 4  ;;  %v3309_v53 = vpop.permute.xlu2 %3308 }
 0x42c   : > { %11179 = vst [vmem:[#allocation59_spill] sm:$0xff] %v9467_v54  ;;  %5794 = vrcp.f32 %v9448_v43  ;;  %v3519_v6 = vsel %vm3484_vm4, %v8988_v16, %v9380_v41  ;;  %4392 = vrot.lane.b32.xlu1 %v9467_v54, %s6089_s21  ;;  %v3679_v29 = vrot.slane %v3678_v18, 4  ;;  %v3977_v19 = vsub.f32 1.0, %v3976_v56 }
 0x42d   : > { %v9476_v55 = vadd.f32 1e-06, %v9456_v45  ;;  %v3671_v12 = vadd.f32 %v3670_v51, %v3669_v15  ;;  %v3986_v25 = vand.u32 2147483648, %v9358_v2  ;;  %v3991_v13 = vmul.f32 %v9439_v34, %v9366_v30 }
 0x42e   : > { %v3293_v50 = vpop.permute.xlu0 %3292  ;;  %v3680_v33 = vadd.f32 %v3679_v29, %v3678_v18  ;;  %v3978_v1 = vmul.f32 %v9430_v8, %v3977_v19  ;;  %vm3981_vm8 = vweird.f32 %v9430_v8  ;;  %v3984_v16 = vand.u32 2147483647, %v9358_v2 }
 0x42f   : > { %v9485_v41 = vadd.f32 1e-06, %v9465_v9  ;;  %v3672_v17 = vrot.slane %v3671_v12, 2  ;;  %vm3980_vm9 = vweird.f32 %v9358_v2  ;;  %v3992_v3 = vsub.f32 1.0, %v3991_v13 }
 0x430   : > { %v3681_v15 = vrot.slane %v3680_v33, 2  ;;  %v3979_v39 = vadd.f32 %v9430_v8, %v3978_v1  ;;  %v3987_v56 = vor.u32 1.1754944e-38, %v3986_v25  ;;  %v4001_v18 = vand.u32 2147483648, %v9366_v30  ;;  %vm3982_vm10 = vmor %vm3980_vm9, %vm3981_vm8 }
 0x431   : > { %v9490_v51 = vpop.eup %5792  ;;  %v3993_v29 = vmul.f32 %v9439_v34, %v3992_v3  ;;  %vm3996_vm11 = vweird.f32 %v9439_v34  ;;  %v3999_v19 = vand.u32 2147483647, %v9366_v30  ;;  %v3515_v2 = vsel %vm3484_vm4, %v8947_v48, %v3289_v58  ;;  %v3295_v1 = vpop.permute.xlu1 %3294 }
 0x432   : > { %v9497_v13 = vpop.eup %5794  ;;  %v3673_v5 = vadd.f32 %v3672_v17, %v3671_v12  ;;  %v3682_v54 = vadd.f32 %v3681_v15, %v3680_v33  ;;  %v3983_v25 = vsel %vm3982_vm10, %v9430_v8, %v3979_v39  ;;  %vm3985_vm12 = vcmp.eq.f32.partialorder %v3984_v16, 8.507059e+37  ;;  %v11181_v33 = vld [vmem:[#allocation92_spill] sm:$0xff] }
 0x433   : > { %v9500_v4 = vsel %vm3985_vm12, %v3987_v56, %v3983_v25  ;;  %v3994_v45 = vadd.f32 %v9439_v34, %v3993_v29  ;;  %vm3995_vm13 = vweird.f32 %v9366_v30  ;;  %v3685_v3 = vsel %vm3549_vm5, %v3515_v2, 0.0 }
 0x434   : > { %11180 = vst [vmem:[#allocation130_spill] sm:$0xff] %v9500_v4  ;;  %5796 = vrcp.f32 %v9476_v55  ;;  %v3703_v48 = vsel %vm3549_vm5, %v3519_v6, 0.0  ;;  %4396 = vrot.lane.b32.xlu0 %v9500_v4, %s6089_s21  ;;  %vm3997_vm14 = vmor %vm3995_vm13, %vm3996_vm11  ;;  %v4002_v8 = vor.u32 1.1754944e-38, %v4001_v18  ;;  %v3687_v58 = vadd.f32 %v9406_v62, %v3685_v3 }
 0x435   : > { %v3998_v12 = vsel %vm3997_vm14, %v9439_v34, %v3994_v45  ;;  %vm4000_vm15 = vcmp.eq.f32.partialorder %v3999_v19, 8.507059e+37  ;;  %v3517_v30 = vsel %vm3484_vm4, %v11181_v33, %v3293_v50  ;;  %v4006_v16 = vmul.f32 %v9490_v51, %v9412_v26  ;;  %v11182_v19 = vld [vmem:[#allocation77_spill] sm:$0xff] }
 0x436   : > { %v3299_v17 = vpop.permute.xlu0 %3298  ;;  %v3674_v6 = vrot.slane %v3673_v5, 1  ;;  %v3683_v15 = vrot.slane %v3682_v54, 1  ;;  %v9517_v39 = vsel %vm4000_vm15, %v4002_v8, %v3998_v12  ;;  %v3688_v56 = vrot.slane %v3687_v58, 4 }
 0x437   : > { %5798 = vrcp.f32 %v9485_v41  ;;  %v3522_v62 = vsel %vm3484_vm4, %v9011_v47, %v9432_v31  ;;  %v3525_v34 = vsel %vm3484_vm4, %v9051_v28, %v3309_v53  ;;  %4398 = vrot.lane.b32.xlu1 %v9517_v39, %s6089_s21  ;;  %v4007_v45 = vsub.f32 1.0, %v4006_v16 }
 0x438   : > { %v3689_v50 = vadd.f32 %v3688_v56, %v3687_v58  ;;  %v3694_v18 = vsel %vm3549_vm5, %v3517_v30, 0.0  ;;  %v4016_v29 = vand.u32 2147483648, %v9412_v26  ;;  %v3518_v2 = vsel %vm3484_vm4, %v11182_v19, %v3295_v1  ;;  %v3315_v58 = vpop.permute.xlu2 %3314  ;;  %v11183_v30 = vld [vmem:[#allocation112_spill] sm:$0xff] }
 0x439   : > { %v4008_v25 = vmul.f32 %v9490_v51, %v4007_v45  ;;  %vm4011_vm0 = vweird.f32 %v9490_v51  ;;  %v4014_v47 = vand.u32 2147483647, %v9412_v26  ;;  %v3695_v28 = vsel %vm3549_vm5, %v3518_v2, 0.0  ;;  %v3301_v33 = vpop.permute.xlu1 %3300 }
 0x43a   : > { %v9535_v31 = vpop.eup %5796  ;;  %v9537_v53 = vadd.f32 %v3674_v6, %v3673_v5  ;;  %v9539_v3 = vadd.f32 %v3683_v15, %v3682_v54  ;;  %v3690_v8 = vrot.slane %v3689_v50, 2  ;;  %v3696_v12 = vadd.f32 %v3695_v28, %v3694_v18 }
 0x43b   : > { %v4009_v1 = vadd.f32 %v9490_v51, %v4008_v25  ;;  %vm4010_vm1 = vweird.f32 %v9412_v26  ;;  %v3520_v16 = vsel %vm3484_vm4, %v11183_v30, %v3299_v17  ;;  %v4021_v56 = vmul.f32 %v9497_v13, %v9448_v43 }
 0x43c   : > { %v3691_v45 = vadd.f32 %v3690_v8, %v3689_v50  ;;  %vm4012_vm2 = vmor %vm4010_vm1, %vm4011_vm0  ;;  %v4017_v5 = vor.u32 1.1754944e-38, %v4016_v29  ;;  %v3697_v54 = vrot.slane %v3696_v12, 4  ;;  %v3704_v6 = vsel %vm3549_vm5, %v3520_v16, 0.0 }
 0x43d   : > { %v9550_v15 = vpop.eup %5798  ;;  %v4013_v18 = vsel %vm4012_vm2, %v9490_v51, %v4009_v1  ;;  %vm4015_vm6 = vcmp.eq.f32.partialorder %v4014_v47, 8.507059e+37  ;;  %v3705_v26 = vadd.f32 %v3704_v6, %v3703_v48  ;;  %v4022_v19 = vsub.f32 1.0, %v4021_v56 }
 0x43e   : > { %v3305_v2 = vpop.permute.xlu0 %3304  ;;  %v3692_v17 = vrot.slane %v3691_v45, 1  ;;  %v9553_v25 = vsel %vm4015_vm6, %v4017_v5, %v4013_v18  ;;  %v3698_v28 = vadd.f32 %v3697_v54, %v3696_v12  ;;  %vm4026_vm7 = vweird.f32 %v9497_v13 }
 0x43f   : > { %4400 = vrot.lane.b32.xlu2 %v9553_v25, %s6089_s21  ;;  %v3706_v50 = vrot.slane %v3705_v26, 4  ;;  %v4023_v29 = vmul.f32 %v9497_v13, %v4022_v19  ;;  %v4029_v8 = vand.u32 2147483647, %v9448_v43  ;;  %v4031_v51 = vand.u32 2147483648, %v9448_v43 }
 0x440   : > { %v3713_v48 = vsel %vm3549_vm5, %v3522_v62, 0.0  ;;  %v9563_v47 = vadd.f32 1e-06, %v9537_v53  ;;  %v9566_v1 = vsel %vm3549_vm5, %v3525_v34, 0.0  ;;  %v4036_v12 = vmul.f32 %v9535_v31, %v9476_v55 }
 0x441   : > { %v3699_v30 = vrot.slane %v3698_v28, 2  ;;  %v3707_v16 = vadd.f32 %v3706_v50, %v3705_v26  ;;  %v4024_v56 = vadd.f32 %v9497_v13, %v4023_v29  ;;  %vm4025_vm8 = vweird.f32 %v9448_v43  ;;  %v3307_v6 = vpop.permute.xlu1 %3306  ;;  %v3321_v43 = vpop.permute.xlu2 %3320 }
 0x442   : > { %v9572_v5 = vadd.f32 %v3692_v17, %v3691_v45  ;;  %v3528_v62 = vsel %vm3484_vm4, %v9070_v42, %v3315_v58  ;;  %vm4027_vm9 = vmor %vm4025_vm8, %vm4026_vm7  ;;  %v4032_v54 = vor.u32 1.1754944e-38, %v4031_v51  ;;  %v4037_v34 = vsub.f32 1.0, %v4036_v12 }
 0x443   : > { %v9579_v18 = vadd.f32 1e-06, %v9539_v3  ;;  %v4028_v26 = vsel %vm4027_vm9, %v9497_v13, %v4024_v56  ;;  %vm4030_vm10 = vcmp.eq.f32.partialorder %v4029_v8, 8.507059e+37  ;;  %v4046_v19 = vand.u32 2147483648, %v9476_v55 }
 0x444   : > { %11184 = vst [vmem:[#allocation26_spill] sm:$0xff] %v9572_v5  ;;  %v9583_v45 = vsel %vm4030_vm10, %v4032_v54, %v4028_v26  ;;  %v4038_v17 = vmul.f32 %v9535_v31, %v4037_v34  ;;  %vm4041_vm11 = vweird.f32 %v9535_v31  ;;  %v4044_v42 = vand.u32 2147483647, %v9476_v55  ;;  %v11185_v54 = vld [vmem:[#allocation122_spill] sm:$0xff] }
 0x445   : > { %5800 = vrcp.f32 %v9563_v47  ;;  %v3700_v58 = vadd.f32 %v3699_v30, %v3698_v28  ;;  %v3708_v50 = vrot.slane %v3707_v16, 2  ;;  %4402 = vrot.lane.b32.xlu0 %v9583_v45, %s6089_s21  ;;  %v3521_v13 = vsel %vm3484_vm4, %v9007_v23, %v3301_v33 }
 0x446   : > { %v3311_v29 = vpop.permute.xlu0 %3310  ;;  %v9594_v8 = vadd.f32 1e-06, %v9572_v5  ;;  %v4039_v51 = vadd.f32 %v9535_v31, %v4038_v17  ;;  %vm4040_vm12 = vweird.f32 %v9476_v55  ;;  %v3712_v12 = vsel %vm3549_vm5, %v3521_v13, 0.0 }
 0x447   : > { %v9600_v56 = vsel %vm3549_vm5, %v3528_v62, 0.0  ;;  %vm4042_vm13 = vmor %vm4040_vm12, %vm4041_vm11  ;;  %v4047_v28 = vor.u32 1.1754944e-38, %v4046_v19  ;;  %v3714_v30 = vadd.f32 %v3713_v48, %v3712_v12  ;;  %v3523_v34 = vsel %vm3484_vm4, %v11185_v54, %v3305_v2  ;;  %v11186_v12 = vld [vmem:[#allocation114_spill] sm:$0xff] }
 0x448   : > { %5802 = vrcp.f32 %v9579_v18  ;;  %v4043_v23 = vsel %vm4042_vm13, %v9535_v31, %v4039_v51  ;;  %vm4045_vm14 = vcmp.eq.f32.partialorder %v4044_v42, 8.507059e+37  ;;  %v4051_v33 = vmul.f32 %v9550_v15, %v9485_v41 }
 0x449   : > { %v3701_v55 = vrot.slane %v3700_v58, 1  ;;  %v3709_v26 = vadd.f32 %v3708_v50, %v3707_v16  ;;  %v9608_v17 = vsel %vm4045_vm14, %v4047_v28, %v4043_v23  ;;  %v3715_v62 = vrot.slane %v3714_v30, 4  ;;  %v9618_v19 = vpop.permute.xlu1 %3312 }
 0x44a   : > { %5804 = vrcp.f32 %v9594_v8  ;;  %v9613_v48 = vsel %vm3484_vm4, %v9107_v59, %v3321_v43  ;;  %4404 = vrot.lane.b32.xlu1 %v9608_v17, %s6089_s21  ;;  %v3721_v31 = vsel %vm3549_vm5, %v3523_v34, 0.0  ;;  %v4052_v2 = vsub.f32 1.0, %v4051_v33 }
 0x44b   : > { %v5801_v42 = vpop.eup %5800  ;;  %v3716_v13 = vadd.f32 %v3715_v62, %v3714_v30  ;;  %vm4056_vm15 = vweird.f32 %v9550_v15  ;;  %v4061_v16 = vand.u32 2147483648, %v9485_v41  ;;  %v3524_v50 = vsel %vm3484_vm4, %v9028_v37, %v3307_v6  ;;  %v3327_v62 = vpop.permute.xlu2 %3326 }
 0x44c   : > { %v4053_v59 = vmul.f32 %v9550_v15, %v4052_v2  ;;  %v4059_v43 = vand.u32 2147483647, %v9485_v41  ;;  %v3722_v51 = vsel %vm3549_vm5, %v3524_v50, 0.0  ;;  %v3526_v28 = vsel %vm3484_vm4, %v11186_v12, %v3311_v29 }
 0x44d   : > { %v9629_v54 = vadd.f32 %v3701_v55, %v3700_v58  ;;  %v3710_v34 = vrot.slane %v3709_v26, 1  ;;  %v3717_v30 = vrot.slane %v3716_v13, 2  ;;  %v3723_v23 = vadd.f32 %v3722_v51, %v3721_v31 }
 0x44e   : > { %v9631_v33 = vpop.eup %5802  ;;  %v4054_v5 = vadd.f32 %v9550_v15, %v4053_v59  ;;  %vm4055_vm0 = vweird.f32 %v9485_v41  ;;  %v3731_v37 = vsel %vm3549_vm5, %v3526_v28, 0.0  ;;  %v4066_v6 = vmul.f32 %v5801_v42, %v9563_v47  ;;  %v3317_v31 = vpop.permute.xlu0 %3316 }
 0x44f   : > { %11187 = vst [vmem:[#allocation115_spill] sm:$0xff] %v9629_v54  ;;  %v3718_v2 = vadd.f32 %v3717_v30, %v3716_v13  ;;  %vm4057_vm1 = vmor %vm4055_vm0, %vm4056_vm15  ;;  %v4062_v58 = vor.u32 1.1754944e-38, %v4061_v16  ;;  %v3724_v29 = vrot.slane %v3723_v23, 4  ;;  %v3732_v55 = vadd.f32 %v3731_v37, %v9566_v1 }
 0x450   : > { %v9640_v50 = vpop.eup %5804  ;;  %v4058_v51 = vsel %vm4057_vm1, %v9550_v15, %v4054_v5  ;;  %vm4060_vm2 = vcmp.eq.f32.partialorder %v4059_v43, 8.507059e+37  ;;  %v4067_v59 = vsub.f32 1.0, %v4066_v6  ;;  %vm4071_vm6 = vweird.f32 %v5801_v42 }
 0x451   : > { %v3719_v41 = vrot.slane %v3718_v2, 1  ;;  %v9643_v12 = vsel %vm4060_vm2, %v4062_v58, %v4058_v51  ;;  %v3725_v28 = vadd.f32 %v3724_v29, %v3723_v23  ;;  %v3733_v13 = vrot.slane %v3732_v55, 4  ;;  %v3319_v15 = vpop.permute.xlu1 %3318 }
 0x452   : > { %11188 = vst [vmem:[#allocation120_spill] sm:$0xff] %v9643_v12  ;;  %4406 = vrot.lane.b32.xlu2 %v9643_v12, %s6089_s21  ;;  %v4068_v16 = vmul.f32 %v5801_v42, %v4067_v59  ;;  %v4074_v30 = vand.u32 2147483647, %v9563_v47  ;;  %v4076_v1 = vand.u32 2147483648, %v9563_v47  ;;  %v4081_v37 = vmul.f32 %v9631_v33, %v9579_v18 }
 0x453   : > { %v9652_v5 = vadd.f32 1e-06, %v9629_v54  ;;  %v9654_v43 = vadd.f32 %v3710_v34, %v3709_v26  ;;  %v3734_v6 = vadd.f32 %v3733_v13, %v3732_v55  ;;  %vm4070_vm7 = vweird.f32 %v9563_v47 }
 0x454   : > { %v9657_v23 = vadd.f32 %v3719_v41, %v3718_v2  ;;  %v3726_v58 = vrot.slane %v3725_v28, 2  ;;  %v4069_v29 = vadd.f32 %v5801_v42, %v4068_v16  ;;  %v4082_v51 = vsub.f32 1.0, %v4081_v37  ;;  %vm4072_vm8 = vmor %vm4070_vm7, %vm4071_vm6 }
 0x455   : > { %v3735_v59 = vrot.slane %v3734_v6, 2  ;;  %vm4075_vm9 = vcmp.eq.f32.partialorder %v4074_v30, 8.507059e+37  ;;  %v4077_v4 = vor.u32 1.1754944e-38, %v4076_v1  ;;  %vm4086_vm10 = vweird.f32 %v9631_v33  ;;  %v11189_v1 = vld [vmem:[#allocation84_spill] sm:$0xff] }
 0x456   : > { %v4073_v12 = vsel %vm4072_vm8, %v5801_v42, %v4069_v29  ;;  %v4083_v54 = vmul.f32 %v9631_v33, %v4082_v51  ;;  %v4089_v26 = vand.u32 2147483647, %v9579_v18  ;;  %v4091_v34 = vand.u32 2147483648, %v9579_v18  ;;  %v9675_v42 = vpop.permute.xlu2 %3332 }
 0x457   : > { %5806 = vrcp.f32 %v9652_v5  ;;  %v9666_v47 = vadd.f32 1e-06, %v9654_v43  ;;  %v3534_v2 = vsel %vm3484_vm4, %v9142_v11, %v3327_v62  ;;  %v9670_v55 = vsel %vm4075_vm9, %v4077_v4, %v4073_v12  ;;  %v3323_v12 = vpop.permute.xlu0 %3322 }
 0x458   : > { %v9673_v41 = vadd.f32 1e-06, %v9657_v23  ;;  %4408 = vrot.lane.b32.xlu0 %v9670_v55, %s6089_s21  ;;  %v4084_v13 = vadd.f32 %v9631_v33, %v4083_v54  ;;  %vm4085_vm11 = vweird.f32 %v9579_v18  ;;  %v3527_v16 = vsel %vm3484_vm4, %v9066_v20, %v9618_v19  ;;  %v11190_v20 = vld [vmem:[#allocation111_spill] sm:$0xff] }
 0x459   : > { %v3727_v30 = vadd.f32 %v3726_v58, %v3725_v28  ;;  %v3736_v11 = vadd.f32 %v3735_v59, %v3734_v6  ;;  %vm4087_vm12 = vmor %vm4085_vm11, %vm4086_vm10  ;;  %v4092_v4 = vor.u32 1.1754944e-38, %v4091_v34  ;;  %v3739_v62 = vsel %vm3549_vm5, %v3527_v16, 0.0 }
 0x45a   : > { %v3475_v37 = vsel %vm2063_vm3, %v11189_v1, %v9078_v57  ;;  %v4088_v54 = vsel %vm4087_vm12, %v9631_v33, %v4084_v13  ;;  %vm4090_vm13 = vcmp.eq.f32.partialorder %v4089_v26, 8.507059e+37  ;;  %v3741_v18 = vadd.f32 %v9600_v56, %v3739_v62  ;;  %v9692_v29 = vpop.permute.xlu1 %3324  ;;  %v11191_v56 = vld [vmem:[#allocation100_spill] sm:$0xff] }
 0x45b   : > { %v9697_v19 = vsel %vm2063_vm3, %v11190_v20, %v9115_v0  ;;  %v3757_v28 = vsel %vm3549_vm5, %v9613_v48, 0.0  ;;  %v9702_v6 = vsel %vm3549_vm5, %v3534_v2, 0.0  ;;  %v9704_v58 = vsel %vm4090_vm13, %v4092_v4, %v4088_v54 }
 0x45c   : > { %5808 = vrcp.f32 %v9666_v47  ;;  %4410 = vrot.lane.b32.xlu1 %v9704_v58, %s6089_s21  ;;  %v3742_v57 = vrot.slane %v3741_v18, 4  ;;  %v3529_v33 = vsel %vm3484_vm4, %v11191_v56, %v3317_v31  ;;  %v4096_v0 = vmul.f32 %v9640_v50, %v9594_v8 }
 0x45d   : > { %v9713_v51 = vpop.eup %5806  ;;  %5810 = vrcp.f32 %v9673_v41  ;;  %v3728_v48 = vrot.slane %v3727_v30, 1  ;;  %v3737_v59 = vrot.slane %v3736_v11, 1  ;;  %v4104_v26 = vand.u32 2147483647, %v9594_v8 }
 0x45e   : > { %v3743_v34 = vadd.f32 %v3742_v57, %v3741_v18  ;;  %v4097_v2 = vsub.f32 1.0, %v4096_v0  ;;  %v3530_v13 = vsel %vm3484_vm4, %v9083_v38, %v3319_v15  ;;  %v3532_v16 = vsel %vm3484_vm4, %v8994_v7, %v3323_v12  ;;  %v3339_v56 = vpop.permute.xlu2 %3338 }
 0x45f   : > { %v3748_v31 = vsel %vm3549_vm5, %v3529_v33, 0.0  ;;  %vm4101_vm14 = vweird.f32 %v9640_v50  ;;  %v4106_v4 = vand.u32 2147483648, %v9594_v8  ;;  %v3749_v62 = vsel %vm3549_vm5, %v3530_v13, 0.0 }
 0x460   : > { %v3744_v1 = vrot.slane %v3743_v34, 2  ;;  %v4098_v54 = vmul.f32 %v9640_v50, %v4097_v2  ;;  %v3750_v20 = vadd.f32 %v3749_v62, %v3748_v31  ;;  %v3758_v18 = vsel %vm3549_vm5, %v3532_v16, 0.0 }
 0x461   : > { %v9727_v57 = vadd.f32 %v3728_v48, %v3727_v30  ;;  %v9729_v38 = vadd.f32 %v3737_v59, %v3736_v11  ;;  %v3759_v15 = vadd.f32 %v3758_v18, %v3757_v28  ;;  %v4111_v7 = vmul.f32 %v9713_v51, %v9652_v5  ;;  %v3329_v48 = vpop.permute.xlu0 %3328 }
 0x462   : > { %v9733_v12 = vpop.eup %5808  ;;  %v4099_v33 = vadd.f32 %v9640_v50, %v4098_v54  ;;  %vm4100_vm15 = vweird.f32 %v9594_v8  ;;  %vm4105_vm0 = vcmp.eq.f32.partialorder %v4104_v26, 8.507059e+37  ;;  %v3751_v0 = vrot.slane %v3750_v20, 4  ;;  %v9741_v59 = vpop.permute.xlu1 %3330 }
 0x463   : > { %v9737_v2 = vpop.eup %5810  ;;  %v3745_v13 = vadd.f32 %v3744_v1, %v3743_v34  ;;  %vm4102_vm1 = vmor %vm4100_vm15, %vm4101_vm14  ;;  %v4107_v30 = vor.u32 1.1754944e-38, %v4106_v4  ;;  %v3760_v11 = vrot.slane %v3759_v15, 4  ;;  %v4112_v28 = vsub.f32 1.0, %v4111_v7 }
 0x464   : > { %v4103_v16 = vsel %vm4102_vm1, %v9640_v50, %v4099_v33  ;;  %v3752_v31 = vadd.f32 %v3751_v0, %v3750_v20  ;;  %vm4116_vm2 = vweird.f32 %v9713_v51  ;;  %v4121_v8 = vand.u32 2147483648, %v9652_v5 }
 0x465   : > { %v9746_v26 = vsel %vm4105_vm0, %v4107_v30, %v4103_v16  ;;  %v3761_v62 = vadd.f32 %v3760_v11, %v3759_v15  ;;  %v4113_v34 = vmul.f32 %v9713_v51, %v4112_v28  ;;  %v4119_v1 = vand.u32 2147483647, %v9652_v5 }
 0x466   : > { %v9751_v4 = vadd.f32 1e-06, %v9727_v57  ;;  %v3537_v54 = vsel %vm3484_vm4, %v9390_v46, %v9675_v42  ;;  %v3540_v50 = vsel %vm3484_vm4, %v3475_v37, %v3339_v56  ;;  %4412 = vrot.lane.b32.xlu2 %v9746_v26, %s6089_s21  ;;  %v4126_v20 = vmul.f32 %v9733_v12, %v9666_v47 }
 0x467   : > { %v9762_v18 = vadd.f32 1e-06, %v9729_v38  ;;  %v3746_v15 = vrot.slane %v3745_v13, 1  ;;  %v4114_v7 = vadd.f32 %v9713_v51, %v4113_v34  ;;  %vm4115_vm6 = vweird.f32 %v9652_v5 }
 0x468   : > { %v3753_v33 = vrot.slane %v3752_v31, 2  ;;  %v3762_v0 = vrot.slane %v3761_v62, 2  ;;  %vm4117_vm7 = vmor %vm4115_vm6, %vm4116_vm2  ;;  %v4122_v46 = vor.u32 1.1754944e-38, %v4121_v8  ;;  %v4127_v42 = vsub.f32 1.0, %v4126_v20 }
 0x469   : > { %v4118_v37 = vsel %vm4117_vm7, %v9713_v51, %v4114_v7  ;;  %vm4120_vm8 = vcmp.eq.f32.partialorder %v4119_v1, 8.507059e+37  ;;  %v4136_v56 = vand.u32 2147483648, %v9666_v47  ;;  %v3533_v30 = vsel %vm3484_vm4, %v9134_v35, %v9692_v29  ;;  %v3335_v7 = vpop.permute.xlu0 %3334 }
 0x46a   : > { %v9773_v11 = vsel %vm4120_vm8, %v4122_v46, %v4118_v37  ;;  %v4128_v5 = vmul.f32 %v9733_v12, %v4127_v42  ;;  %vm4131_vm9 = vweird.f32 %v9733_v12  ;;  %v4134_v28 = vand.u32 2147483647, %v9666_v47 }
 0x46b   : > { %5812 = vrcp.f32 %v9751_v4  ;;  %v9779_v16 = vadd.f32 %v3746_v15, %v3745_v13  ;;  %4414 = vrot.lane.b32.xlu0 %v9773_v11, %s6089_s21  ;;  %vm4130_vm10 = vweird.f32 %v9666_v47  ;;  %v3766_v51 = vsel %vm3549_vm5, %v3533_v30, 0.0  ;;  %v9793_v47 = vpop.permute.xlu1 %3336 }
 0x46c   : > { %v3754_v35 = vadd.f32 %v3753_v33, %v3752_v31  ;;  %v3763_v29 = vadd.f32 %v3762_v0, %v3761_v62  ;;  %v4129_v8 = vadd.f32 %v9733_v12, %v4128_v5  ;;  %v3768_v34 = vadd.f32 %v9702_v6, %v3766_v51  ;;  %vm4132_vm11 = vmor %vm4130_vm10, %vm4131_vm9 }
 0x46d   : > { %v3784_v1 = vsel %vm3549_vm5, %v3537_v54, 0.0  ;;  %v9789_v20 = vsel %vm3549_vm5, %v3540_v50, 0.0  ;;  %v4137_v13 = vor.u32 1.1754944e-38, %v4136_v56  ;;  %v4141_v15 = vmul.f32 %v9737_v2, %v9673_v41 }
 0x46e   : > { %5814 = vrcp.f32 %v9762_v18  ;;  %v4133_v31 = vsel %vm4132_vm11, %v9733_v12, %v4129_v8  ;;  %vm4135_vm12 = vcmp.eq.f32.partialorder %v4134_v28, 8.507059e+37  ;;  %v3769_v62 = vrot.slane %v3768_v34, 4 }
 0x46f   : > { %v9798_v6 = vadd.f32 1e-06, %v9779_v16  ;;  %v9800_v54 = vsel %vm4135_vm12, %v4137_v13, %v4133_v31  ;;  %v3535_v50 = vsel %vm3484_vm4, %v9032_v60, %v3329_v48  ;;  %v4142_v33 = vsub.f32 1.0, %v4141_v15 }
 0x470   : > { %v3755_v0 = vrot.slane %v3754_v35, 1  ;;  %v3764_v46 = vrot.slane %v3763_v29, 1  ;;  %4416 = vrot.lane.b32.xlu1 %v9800_v54, %s6089_s21  ;;  %v3770_v42 = vadd.f32 %v3769_v62, %v3768_v34  ;;  %vm4146_vm13 = vweird.f32 %v9737_v2 }
 0x471   : > { %v5813_v12 = vpop.eup %5812  ;;  %v4143_v37 = vmul.f32 %v9737_v2, %v4142_v33  ;;  %v4149_v56 = vand.u32 2147483647, %v9673_v41  ;;  %v4151_v30 = vand.u32 2147483648, %v9673_v41  ;;  %v3536_v60 = vsel %vm3484_vm4, %v9172_v27, %v9741_v59 }
 0x472   : > { %v3771_v48 = vrot.slane %v3770_v42, 2  ;;  %v3775_v5 = vsel %vm3549_vm5, %v3535_v50, 0.0  ;;  %v3776_v28 = vsel %vm3549_vm5, %v3536_v60, 0.0  ;;  %v3538_v51 = vsel %vm3484_vm4, %v9057_v24, %v3335_v7  ;;  %v3345_v24 = vpop.permute.xlu2 %3344 }
 0x473   : > { %v4144_v8 = vadd.f32 %v9737_v2, %v4143_v37  ;;  %vm4145_vm14 = vweird.f32 %v9673_v41  ;;  %v3777_v34 = vadd.f32 %v3776_v28, %v3775_v5  ;;  %v3785_v13 = vsel %vm3549_vm5, %v3538_v51, 0.0 }
 0x474   : > { %v5815_v15 = vpop.eup %5814  ;;  %v9820_v31 = vadd.f32 %v3755_v0, %v3754_v35  ;;  %vm4147_vm15 = vmor %vm4145_vm14, %vm4146_vm13  ;;  %v4152_v27 = vor.u32 1.1754944e-38, %v4151_v30  ;;  %v3786_v59 = vadd.f32 %v3785_v13, %v3784_v1  ;;  %v4156_v62 = vmul.f32 %v5813_v12, %v9751_v4  ;;  %v3343_v30 = vpop.permute.xlu1 %3342 }
 0x475   : > { %v9825_v50 = vadd.f32 %v3764_v46, %v3763_v29  ;;  %v4148_v7 = vsel %vm4147_vm15, %v9737_v2, %v4144_v8  ;;  %vm4150_vm0 = vcmp.eq.f32.partialorder %v4149_v56, 8.507059e+37  ;;  %v3778_v41 = vrot.slane %v3777_v34, 4  ;;  %v3341_v46 = vpop.permute.xlu0 %3340 }
 0x476   : > { %v3772_v33 = vadd.f32 %v3771_v48, %v3770_v42  ;;  %v9828_v37 = vsel %vm4150_vm0, %v4152_v27, %v4148_v7  ;;  %v3787_v60 = vrot.slane %v3786_v59, 4  ;;  %v4157_v35 = vsub.f32 1.0, %v4156_v62 }
 0x477   : > { %11192 = vst [vmem:[#allocation110_spill] sm:$0xff] %v9825_v50  ;;  %5816 = vrcp.f32 %v9798_v6  ;;  %4418 = vrot.lane.b32.xlu2 %v9828_v37, %s6089_s21  ;;  %v3779_v1 = vadd.f32 %v3778_v41, %v3777_v34  ;;  %v4166_v0 = vand.u32 2147483648, %v9751_v4  ;;  %v4171_v29 = vmul.f32 %v5815_v15, %v9762_v18 }
 0x478   : > { %v9836_v2 = vadd.f32 1e-06, %v9820_v31  ;;  %v4158_v42 = vmul.f32 %v5813_v12, %v4157_v35  ;;  %vm4161_vm1 = vweird.f32 %v5813_v12  ;;  %v4164_v56 = vand.u32 2147483647, %v9751_v4 }
 0x479   : > { %v9840_v48 = vadd.f32 1e-06, %v9825_v50  ;;  %v3788_v5 = vadd.f32 %v3787_v60, %v3786_v59  ;;  %vm4160_vm2 = vweird.f32 %v9751_v4  ;;  %v4172_v28 = vsub.f32 1.0, %v4171_v29 }
 0x47a   : > { %v3773_v51 = vrot.slane %v3772_v33, 1  ;;  %v3780_v8 = vrot.slane %v3779_v1, 2  ;;  %v4159_v34 = vadd.f32 %v5813_v12, %v4158_v42  ;;  %v4167_v13 = vor.u32 1.1754944e-38, %v4166_v0  ;;  %vm4162_vm6 = vmor %vm4160_vm2, %vm4161_vm1 }
 0x47b   : > { %v4173_v27 = vmul.f32 %v5815_v15, %v4172_v28  ;;  %vm4176_vm7 = vweird.f32 %v5815_v15  ;;  %v4179_v62 = vand.u32 2147483647, %v9762_v18  ;;  %v4181_v7 = vand.u32 2147483648, %v9762_v18 }
 0x47c   : > { %5818 = vrcp.f32 %v9836_v2  ;;  %v4163_v41 = vsel %vm4162_vm6, %v5813_v12, %v4159_v34  ;;  %vm4165_vm8 = vcmp.eq.f32.partialorder %v4164_v56, 8.507059e+37  ;;  %v3539_v4 = vsel %vm3484_vm4, %v9399_v44, %v9793_v47  ;;  %v9860_v47 = vpop.permute.xlu2 %3350 }
 0x47d   : > { %v5817_v59 = vpop.eup %5816  ;;  %v3789_v60 = vrot.slane %v3788_v5, 2  ;;  %v9849_v35 = vsel %vm4165_vm8, %v4167_v13, %v4163_v41  ;;  %v4174_v0 = vadd.f32 %v5815_v15, %v4173_v27  ;;  %vm4175_vm9 = vweird.f32 %v9762_v18  ;;  %v11194_v13 = vld [vmem:[#allocation43_spill] sm:$0xff] }
 0x47e   : > { %v9852_v29 = vadd.f32 %v3773_v51, %v3772_v33  ;;  %v3781_v42 = vadd.f32 %v3780_v8, %v3779_v1  ;;  %4420 = vrot.lane.b32.xlu0 %v9849_v35, %s6089_s21  ;;  %vm4177_vm10 = vmor %vm4175_vm9, %vm4176_vm7  ;;  %v4182_v12 = vor.u32 1.1754944e-38, %v4181_v7  ;;  %v3793_v56 = vsel %vm3549_vm5, %v3539_v4, 0.0  ;;  %v11193_v33 = vld [vmem:[#allocation29_spill] sm:$0xff] }
 0x47f   : > { %v3543_v44 = vsel %vm3484_vm4, %v9697_v19, %v3345_v24  ;;  %v4178_v28 = vsel %vm4177_vm10, %v5815_v15, %v4174_v0  ;;  %vm4180_vm11 = vcmp.eq.f32.partialorder %v4179_v62, 8.507059e+37  ;;  %v3795_v18 = vadd.f32 %v9789_v20, %v3793_v56  ;;  %v9879_v24 = vpop.permute.xlu1 %3348 }
 0x480   : > { %v3477_v1 = vsel %vm2063_vm3, %v11193_v33, %v9091_v52  ;;  %v9866_v51 = vsel %vm4180_vm11, %v4182_v12, %v4178_v28  ;;  %v3541_v8 = vsel %vm3484_vm4, %v9087_v32, %v3341_v46  ;;  %v4186_v34 = vmul.f32 %v5817_v59, %v9798_v6  ;;  %v3347_v52 = vpop.permute.xlu0 %3346  ;;  %v11195_v33 = vld [vmem:[#allocation126_spill] sm:$0xff] }
 0x481   : > { %v9874_v19 = vsel %vm2063_vm3, %v11194_v13, %v9119_v49  ;;  %5820 = vrcp.f32 %v9840_v48  ;;  %v3790_v15 = vadd.f32 %v3789_v60, %v3788_v5  ;;  %4422 = vrot.lane.b32.xlu1 %v9866_v51, %s6089_s21  ;;  %v3796_v20 = vrot.slane %v3795_v18, 4 }
 0x482   : > { %v9881_v27 = vpop.eup %5818  ;;  %v3811_v32 = vsel %vm3549_vm5, %v3543_v44, 0.0  ;;  %v9885_v46 = vadd.f32 1e-06, %v9852_v29  ;;  %v3782_v62 = vrot.slane %v3781_v42, 1  ;;  %v4187_v49 = vsub.f32 1.0, %v4186_v34 }
 0x483   : > { %v3797_v7 = vadd.f32 %v3796_v20, %v3795_v18  ;;  %v3802_v41 = vsel %vm3549_vm5, %v3541_v8, 0.0  ;;  %v4196_v5 = vand.u32 2147483648, %v9798_v6  ;;  %v3542_v4 = vsel %vm3484_vm4, %v3477_v1, %v3343_v30 }
 0x484   : > { %v4188_v60 = vmul.f32 %v5817_v59, %v4187_v49  ;;  %vm4191_vm12 = vweird.f32 %v5817_v59  ;;  %v4194_v0 = vand.u32 2147483647, %v9798_v6  ;;  %v3803_v12 = vsel %vm3549_vm5, %v3542_v4, 0.0 }
 0x485   : > { %v3791_v56 = vrot.slane %v3790_v15, 1  ;;  %v3798_v44 = vrot.slane %v3797_v7, 2  ;;  %v3804_v28 = vadd.f32 %v3803_v12, %v3802_v41  ;;  %v3544_v13 = vsel %vm3484_vm4, %v11195_v33, %v3347_v52 }
 0x486   : > { %v4189_v34 = vadd.f32 %v5817_v59, %v4188_v60  ;;  %vm4190_vm13 = vweird.f32 %v9798_v6  ;;  %v3812_v18 = vsel %vm3549_vm5, %v3544_v13, 0.0  ;;  %v4201_v30 = vmul.f32 %v9881_v27, %v9836_v2  ;;  %v9905_v6 = vpop.permute.xlu2 %4382 }
 0x487   : > { %v9898_v1 = vpop.eup %5820  ;;  %v9900_v8 = vadd.f32 %v3782_v62, %v3781_v42  ;;  %vm4192_vm14 = vmor %vm4190_vm13, %vm4191_vm12  ;;  %v4197_v20 = vor.u32 1.1754944e-38, %v4196_v5  ;;  %v3805_v49 = vrot.slane %v3804_v28, 4  ;;  %v9902_v4 = vadd.f32 %v3812_v18, %v3811_v32  ;;  %v11196_v62 = vld [vmem:[#allocation96_spill] sm:$0xff]  ;;  %v11197_v5 = vld [vmem:[#allocation86_spill] sm:$0xff]  ;;  %v3355_v18 = vpop.permute.xlu1 %3354 }
 0x488   : > { %5822 = vrcp.f32 %v9885_v46  ;;  %v4193_v52 = vsel %vm4192_vm14, %v5817_v59, %v4189_v34  ;;  %vm4195_vm15 = vcmp.eq.f32.partialorder %v4194_v0, 8.507059e+37  ;;  %v4202_v41 = vsub.f32 1.0, %v4201_v30  ;;  %v3353_v34 = vpop.permute.xlu0 %3352 }
 0x489   : > { %v3799_v60 = vadd.f32 %v3798_v44, %v3797_v7  ;;  %v9907_v12 = vsel %vm4195_vm15, %v4197_v20, %v4193_v52  ;;  %v3806_v33 = vadd.f32 %v3805_v49, %v3804_v28  ;;  %v4211_v13 = vand.u32 2147483648, %v9836_v2 }
 0x48a   : > { %4424 = vrot.lane.b32.xlu2 %v9907_v12, %s6089_s21  ;;  %v4203_v42 = vmul.f32 %v9881_v27, %v4202_v41  ;;  %vm4206_vm0 = vweird.f32 %v9881_v27  ;;  %v4209_v32 = vand.u32 2147483647, %v9836_v2  ;;  %v4216_v59 = vmul.f32 %v9898_v1, %v9840_v48 }
 0x48b   : > { %v3481_v7 = vsel %vm2063_vm3, %v11197_v5, %v11196_v62  ;;  %v9921_v0 = vadd.f32 1e-06, %v9900_v8  ;;  %v9923_v44 = vadd.f32 %v3791_v56, %v3790_v15  ;;  %v3807_v28 = vrot.slane %v3806_v33, 2 }
 0x48c   : > { %v3546_v30 = vsel %vm3484_vm4, %v3481_v7, %v9860_v47  ;;  %v4204_v20 = vadd.f32 %v9881_v27, %v4203_v42  ;;  %vm4205_vm1 = vweird.f32 %v9836_v2  ;;  %v4217_v49 = vsub.f32 1.0, %v4216_v59 }
 0x48d   : > { %11198 = vst [vmem:[#allocation78_spill] sm:$0xff] %v9923_v44  ;;  %v3800_v52 = vrot.slane %v3799_v60, 1  ;;  %vm4207_vm2 = vmor %vm4205_vm1, %vm4206_vm0  ;;  %v4212_v41 = vor.u32 1.1754944e-38, %v4211_v13  ;;  %v4224_v62 = vand.u32 2147483647, %v9840_v48  ;;  %v4226_v5 = vand.u32 2147483648, %v9840_v48 }
 0x48e   : > { %v5823_v15 = vpop.eup %5822  ;;  %v4208_v56 = vsel %vm4207_vm2, %v9881_v27, %v4204_v20  ;;  %vm4210_vm6 = vcmp.eq.f32.partialorder %v4209_v32, 8.507059e+37  ;;  %v4218_v50 = vmul.f32 %v9898_v1, %v4217_v49  ;;  %vm4221_vm7 = vweird.f32 %v9898_v1  ;;  %v4389_v20 = vpop.permute.xlu2 %4388  ;;  %v11200_v49 = vld [vmem:[#allocation133_spill] sm:$0xff] }
 0x48f   : > { %5824 = vrcp.f32 %v9921_v0  ;;  %v9936_v2 = vadd.f32 1e-06, %v9923_v44  ;;  %v3808_v47 = vadd.f32 %v3807_v28, %v3806_v33  ;;  %v9938_v42 = vsel %vm4210_vm6, %v4212_v41, %v4208_v56 }
 0x490   : > { %v3821_v13 = vsel %vm3549_vm5, %v3546_v30, 0.0  ;;  %4426 = vrot.lane.b32.xlu0 %v9938_v42, %s6089_s21  ;;  %v4219_v27 = vadd.f32 %v9898_v1, %v4218_v50  ;;  %vm4220_vm8 = vweird.f32 %v9840_v48  ;;  %v3545_v32 = vsel %vm3484_vm4, %v9874_v19, %v9879_v24  ;;  %v4385_v56 = vpop.permute.xlu0 %4384 }
 0x491   : > { %v9948_v59 = vadd.f32 %v3800_v52, %v3799_v60  ;;  %vm4222_vm9 = vmor %vm4220_vm8, %vm4221_vm7  ;;  %vm4225_vm10 = vcmp.eq.f32.partialorder %v4224_v62, 8.507059e+37  ;;  %v4227_v33 = vor.u32 1.1754944e-38, %v4226_v5  ;;  %v3820_v7 = vsel %vm3549_vm5, %v3545_v32, 0.0  ;;  %v11199_v60 = vld [vmem:[#allocation105_spill] sm:$0xff] }
 0x492   : > { %v4223_v28 = vsel %vm4222_vm9, %v9898_v1, %v4219_v27  ;;  %v9952_v30 = vadd.f32 %v3821_v13, %v3820_v7  ;;  %v3547_v50 = vsel %vm3484_vm4, %v9146_v22, %v3353_v34  ;;  %v4231_v48 = vmul.f32 %v5823_v15, %v9885_v46  ;;  %v4387_v13 = vpop.permute.xlu1 %4386 }
 0x493   : > { %5826 = vrcp.f32 %v9936_v2  ;;  %v3809_v19 = vrot.slane %v3808_v47, 1  ;;  %v9958_v24 = vsel %vm4225_vm10, %v4227_v33, %v4223_v28  ;;  %v3483_v52 = vsel %vm2063_vm3, %v11200_v49, %v11199_v60 }
 0x494   : > { %4428 = vrot.lane.b32.xlu1 %v9958_v24, %s6089_s21  ;;  %v4232_v1 = vsub.f32 1.0, %v4231_v48  ;;  %v9966_v62 = vadd.f32 1e-06, %v9948_v59  ;;  %v3829_v22 = vsel %vm3549_vm5, %v3547_v50, 0.0  ;;  %v4241_v34 = vand.u32 2147483648, %v9885_v46  ;;  %v11201_v50 = vld [vmem:[#allocation128_spill] sm:$0xff] }
 0x495   : > { %v5825_v41 = vpop.eup %5824  ;;  %v3548_v5 = vsel %vm3484_vm4, %v3483_v52, %v3355_v18  ;;  %vm4236_vm11 = vweird.f32 %v5823_v15  ;;  %v4239_v32 = vand.u32 2147483647, %v9885_v46  ;;  %v9973_v7 = vadd.f32 %v3809_v19, %v3808_v47  ;;  %v11202_v52 = vld [vmem:[#allocation124_spill] sm:$0xff] }
 0x496   : > { %v4233_v27 = vmul.f32 %v5823_v15, %v4232_v1  ;;  %v3830_v33 = vsel %vm3549_vm5, %v3548_v5, 0.0  ;;  %vm4235_vm12 = vweird.f32 %v9885_v46  ;;  %v4479_v60 = vmul.f32 %v4385_v56, %v11201_v50  ;;  %v9986_v46 = vpop.permute.xlu2 %4394 }
 0x497   : > { %v9975_v28 = vadd.f32 %v3830_v33, %v3829_v22  ;;  %v4246_v49 = vmul.f32 %v5825_v41, %v9921_v0  ;;  %v4478_v1 = vmul.f32 %v9905_v6, %v11202_v52  ;;  %5828 = vrcp.f32 %v9966_v62  ;;  %vm4237_vm4 = vmor %vm4235_vm12, %vm4236_vm11  ;;  %11203 = vst [vmem:[#allocation69_spill] sm:$0xff] %v9986_v46  ;;  %v11204_v33 = vld [vmem:[#allocation21_spill] sm:$0xff] }
 0x498   : > { %v4234_v48 = vadd.f32 %v5823_v15, %v4233_v27  ;;  %v4242_v44 = vor.u32 1.1754944e-38, %v4241_v34  ;;  %vm4543_vm5 = vcmask 1041409   ;;  %vm4240_vm13 = vcmp.eq.f32.partialorder %v4239_v32, 8.507059e+37  ;;  %v4391_v46 = vpop.permute.xlu0 %4390 }
 0x499   : > { %v5827_v18 = vpop.eup %5826  ;;  %v4542_v19 = vrot.slane %v4479_v60, 7  ;;  %v4247_v22 = vsub.f32 1.0, %v4246_v49  ;;  %v9984_v5 = vadd.f32 1e-06, %v9973_v7  ;;  %v4254_v27 = vand.u32 2147483647, %v9921_v0 }
 0x49a   : > { %v4238_v47 = vsel %vm4237_vm4, %v5823_v15, %v4234_v48  ;;  %v4256_v6 = vand.u32 2147483648, %v9921_v0  ;;  %vm4251_vm14 = vweird.f32 %v5825_v41  ;;  %v4261_v32 = vmul.f32 %v5827_v18, %v9936_v2 }
 0x49b   : > { %v9988_v56 = vsel %vm4240_vm13, %v4242_v44, %v4238_v47  ;;  %v4544_v34 = vsel %vm4543_vm5, %v4542_v19, %v4478_v1  ;;  %v4248_v15 = vmul.f32 %v5825_v41, %v4247_v22  ;;  %v4481_v48 = vmul.f32 %v4389_v20, %v11204_v33 }
 0x49c   : > { %4430 = vrot.lane.b32.xlu2 %v9988_v56, %s6089_s21  ;;  %vm4250_vm15 = vweird.f32 %v9921_v0  ;;  %v4262_v44 = vsub.f32 1.0, %v4261_v32  ;;  %5830 = vrcp.f32 %v9984_v5  ;;  %vm4255_vm1 = vcmp.eq.f32.partialorder %v4254_v27, 8.507059e+37  ;;  %v11205_v27 = vld [vmem:[#allocation68_spill] sm:$0xff] }
 0x49d   : > { %v4249_v60 = vadd.f32 %v5825_v41, %v4248_v15  ;;  %v5829_v49 = vpop.eup %5828  ;;  %vm4252_vm0 = vmor %vm4250_vm15, %vm4251_vm14  ;;  %v4257_v47 = vor.u32 1.1754944e-38, %v4256_v6  ;;  %v4271_v52 = vand.u32 2147483648, %v9936_v2  ;;  %vm4266_vm2 = vweird.f32 %v5827_v18 }
 0x49e   : > { %v4393_v50 = vpop.permute.xlu1 %4392  ;;  %v4263_v19 = vmul.f32 %v5827_v18, %v4262_v44  ;;  %v4269_v22 = vand.u32 2147483647, %v9936_v2  ;;  %v4548_v15 = vrot.slane %v4481_v48, 5  ;;  %vm4265_vm6 = vweird.f32 %v9936_v2  ;;  %v4401_v33 = vpop.permute.xlu2 %4400 }
 0x49f   : > { %v4253_v1 = vsel %vm4252_vm0, %v5825_v41, %v4249_v60  ;;  %v4480_v6 = vmul.f32 %v4387_v13, %v11205_v27  ;;  %vm4267_vm7 = vmor %vm4265_vm6, %vm4266_vm2  ;;  %v4272_v32 = vor.u32 1.1754944e-38, %v4271_v52  ;;  %vm4546_vm8 = vcmask 1042434  }
 0x4a0   : > { %v10001_v20 = vsel %vm4255_vm1, %v4257_v47, %v4253_v1  ;;  %v4264_v0 = vadd.f32 %v5827_v18, %v4263_v19  ;;  %v4482_v41 = vmul.f32 %v4391_v46, %v9219_v14  ;;  %v4276_v60 = vmul.f32 %v5829_v49, %v9966_v62 }
 0x4a1   : > { %4432 = vrot.lane.b32.xlu0 %v10001_v20, %s6089_s21  ;;  %vm4270_vm9 = vcmp.eq.f32.partialorder %v4269_v22, 8.507059e+37  ;;  %v4545_v47 = vrot.slane %v4480_v6, 6  ;;  %vm4549_vm10 = vcmask 1043459   ;;  %vm4552_vm11 = vcmask 1044484   ;;  %v11206_v6 = vld [vmem:[#allocation117_spill] sm:$0xff] }
 0x4a2   : > { %v4268_v44 = vsel %vm4267_vm7, %v5827_v18, %v4264_v0  ;;  %v5831_v48 = vpop.eup %5830  ;;  %v4551_v19 = vrot.slane %v4482_v41, 4  ;;  %v4277_v2 = vsub.f32 1.0, %v4276_v60  ;;  %v4487_v13 = vmul.f32 %v4401_v33, %v9392_v21 }
 0x4a3   : > { %v10009_v1 = vsel %vm4270_vm9, %v4272_v32, %v4268_v44  ;;  %v4547_v52 = vsel %vm4546_vm8, %v4545_v47, %v4544_v34  ;;  %v4284_v46 = vand.u32 2147483647, %v9966_v62  ;;  %v4286_v18 = vand.u32 2147483648, %v9966_v62 }
 0x4a4   : > { %4434 = vrot.lane.b32.xlu1 %v10009_v1, %s6089_s21  ;;  %v4550_v22 = vsel %vm4549_vm10, %v4548_v15, %v4547_v52  ;;  %v4278_v0 = vmul.f32 %v5829_v49, %v4277_v2  ;;  %vm4281_vm12 = vweird.f32 %v5829_v49  ;;  %v4483_v32 = vmul.f32 %v4393_v50, %v11206_v6 }
 0x4a5   : > { %v4553_v41 = vsel %vm4552_vm11, %v4551_v19, %v4550_v22  ;;  %vm4555_vm4 = vcmask 1045509   ;;  %v4291_v60 = vmul.f32 %v5831_v48, %v9984_v5  ;;  %vm4280_vm13 = vweird.f32 %v9966_v62 }
 0x4a6   : > { %v4279_v44 = vadd.f32 %v5829_v49, %v4278_v0  ;;  %v4554_v33 = vrot.slane %v4483_v32, 3  ;;  %v4563_v47 = vrot.slane %v4487_v13, 7  ;;  %vm4282_vm14 = vmor %vm4280_vm13, %vm4281_vm12  ;;  %vm4285_vm15 = vcmp.eq.f32.partialorder %v4284_v46, 8.507059e+37  ;;  %v11207_v0 = vld [vmem:[#allocation79_spill] sm:$0xff] }
 0x4a7   : > { %v4287_v21 = vor.u32 1.1754944e-38, %v4286_v18  ;;  %v4292_v14 = vsub.f32 1.0, %v4291_v60  ;;  %v4301_v50 = vand.u32 2147483648, %v9984_v5  ;;  %vm4296_vm0 = vweird.f32 %v5831_v48  ;;  %v10036_v18 = vpop.permute.xlu0 %4396 }
 0x4a8   : > { %v4283_v15 = vsel %vm4282_vm14, %v5829_v49, %v4279_v44  ;;  %v10023_v2 = vsel %vm4555_vm4, %v4554_v33, %v4553_v41  ;;  %v4299_v62 = vand.u32 2147483647, %v9984_v5  ;;  %vm4295_vm1 = vweird.f32 %v9984_v5 }
 0x4a9   : > { %v4399_v34 = vpop.permute.xlu1 %4398  ;;  %v10027_v52 = vsel %vm4285_vm15, %v4287_v21, %v4283_v15  ;;  %v4293_v22 = vmul.f32 %v5831_v48, %v4292_v14  ;;  %vm4297_vm2 = vmor %vm4295_vm1, %vm4296_vm0  ;;  %v4302_v46 = vor.u32 1.1754944e-38, %v4301_v50  ;;  %v3814_v50 = vrot.slane %v9902_v4, 4 }
 0x4aa   : > { %v4486_v19 = vmul.f32 %v4399_v34, %v9344_v63  ;;  %4436 = vrot.lane.b32.xlu2 %v10027_v52, %s6089_s21  ;;  %vm4300_vm6 = vcmp.eq.f32.partialorder %v4299_v62, 8.507059e+37  ;;  %vm4558_vm7 = vcmask 1046534  }
 0x4ab   : > { %v4294_v49 = vadd.f32 %v5831_v48, %v4293_v22 }
 0x4ac   : > { %v4564_v13 = vsel %vm4543_vm5, %v4563_v47, %v4486_v19  ;;  %4623 = vrot.lane.b32.xlu1 %v9314_v36, %s6090_s10  ;;  %v4407_v32 = vpop.permute.xlu2 %4406  ;;  %v3823_v19 = vrot.slane %v9952_v30, 4 }
 0x4ad   : > { %v4298_v21 = vsel %vm4297_vm2, %v5831_v48, %v4294_v49  ;;  %v4490_v41 = vmul.f32 %v4407_v32, %v9465_v9  ;;  %v3832_v49 = vrot.slane %v9975_v28, 4 }
 0x4ae   : > { %v10038_v14 = vsel %vm4300_vm6, %v4302_v46, %v4298_v21  ;;  %v3824_v22 = vadd.f32 %v3823_v19, %v9952_v30  ;;  %v11212_v19 = vld [vmem:[#allocation39_spill] sm:$0xff] }
 0x4af   : > { %4438 = vrot.lane.b32.xlu0 %v10038_v14, %s6089_s21  ;;  %v4569_v47 = vrot.slane %v4490_v41, 4 }
 0x4b0   : > { %v3825_v46 = vrot.slane %v3824_v22, 2 }
 0x4b2   : > { %4625 = vrot.lane.b32.xlu2 %v9363_v40, %s6090_s10  ;;  %v11208_v40 = vld [vmem:[#allocation90_spill] sm:$0xff] }
 0x4b4   : > { %4621 = vrot.lane.b32.xlu1 %v11207_v0, %s6090_s10 }
 0x4b7   : > { %v4403_v36 = vpop.permute.xlu0 %4402  ;;  %4639 = vrot.lane.b32.xlu0 %v9553_v25, %s6090_s10 }
 0x4b8   : > { %v4488_v5 = vmul.f32 %v4403_v36, %v9418_v10  ;;  %v3833_v36 = vadd.f32 %v3832_v49, %v9975_v28 }
 0x4ba   : > { %v4565_v48 = vrot.slane %v4488_v5, 6  ;;  %4627 = vrot.lane.b32.xlu2 %v9323_v61, %s6090_s10  ;;  %v11209_v61 = vld [vmem:[#allocation74_spill] sm:$0xff]  ;;  %v3826_v5 = vadd.f32 %v3825_v46, %v3824_v22  ;;  %v3834_v41 = vrot.slane %v3833_v36, 2 }
 0x4bc   : > { %v4566_v60 = vsel %vm4546_vm8, %v4565_v48, %v4564_v13  ;;  %v4405_v44 = vpop.permute.xlu1 %4404  ;;  %4655 = vrot.lane.b32.xlu1 %v9800_v54, %s6090_s10  ;;  %v3815_v54 = vadd.f32 %v3814_v50, %v9902_v4 }
 0x4bd   : > { %v4489_v33 = vmul.f32 %v4405_v44, %v11208_v40  ;;  %v11211_v44 = vld [vmem:[#allocation120_spill] sm:$0xff] }
 0x4be   : > { %v3816_v13 = vrot.slane %v3815_v54, 2 }
 0x4bf   : > { %v4567_v34 = vrot.slane %v4489_v33, 5  ;;  %4641 = vrot.lane.b32.xlu0 %v9583_v45, %s6090_s10 }
 0x4c0   : > { %v10088_v33 = vpop.permute.xlu2 %4412 }
 0x4c1   : > { %v4568_v15 = vsel %vm4549_vm10, %v4567_v34, %v4566_v60  ;;  %v3827_v60 = vrot.slane %v3826_v5, 1  ;;  %v3835_v34 = vadd.f32 %v3834_v41, %v3833_v36 }
 0x4c2   : > { %v4570_v25 = vsel %vm4552_vm11, %v4569_v47, %v4568_v15  ;;  %4629 = vrot.lane.b32.xlu2 %v11209_v61, %s6090_s10 }
 0x4c3   : > { %v10092_v47 = vadd.f32 %v3827_v60, %v3826_v5  ;;  %v3836_v15 = vrot.slane %v3835_v34, 1 }
 0x4c4   : > { %4643 = vrot.lane.b32.xlu1 %v9608_v17, %s6090_s10  ;;  %v11210_v17 = vld [vmem:[#allocation59_spill] sm:$0xff] }
 0x4c5   : > { %v10107_v50 = vadd.f32 %v3836_v15, %v3835_v34 }
 0x4c7   : > { %4637 = vrot.lane.b32.xlu0 %v9517_v39, %s6090_s10  ;;  %v3817_v39 = vadd.f32 %v3816_v13, %v3815_v54 }
 0x4c9   : > { %v3818_v48 = vrot.slane %v3817_v39, 1 }
 0x4ca   : > { %v4409_v45 = vpop.permute.xlu0 %4408  ;;  %4657 = vrot.lane.b32.xlu2 %v9828_v37, %s6090_s10 }
 0x4cb   : > { %v4491_v62 = vmul.f32 %v4409_v45, %v9537_v53  ;;  %v10090_v28 = vadd.f32 %v3818_v48, %v3817_v39 }
 0x4cc   : > { %4631 = vrot.lane.b32.xlu1 %v11210_v17, %s6090_s10 }
 0x4cd   : > { %v4571_v21 = vrot.slane %v4491_v62, 3 }
 0x4ce   : > { %v4411_v4 = vpop.permute.xlu1 %4410 }
 0x4cf   : > { %v4572_v30 = vsel %vm4555_vm4, %v4571_v21, %v4570_v25  ;;  %v4492_v0 = vmul.f32 %v4411_v4, %v9539_v3  ;;  %4671 = vrot.lane.b32.xlu0 %v10001_v20, %s6090_s10  ;;  %v10097_v20 = vadd.f32 1e-06, %v10090_v28  ;;  %v10100_v25 = vadd.f32 1e-06, %v10092_v47 }
 0x4d1   : > { %v4573_v32 = vrot.slane %v4492_v0, 2  ;;  %5832 = vrcp.f32 %v10097_v20  ;;  %vm4310_vm13 = vweird.f32 %v10097_v20  ;;  %vm4325_vm15 = vweird.f32 %v10100_v25 }
 0x4d2   : > { %4645 = vrot.lane.b32.xlu2 %v11211_v44, %s6090_s10  ;;  %5834 = vrcp.f32 %v10100_v25 }
 0x4d3   : > { %v10082_v37 = vsel %vm4558_vm7, %v4573_v32, %v4572_v30  ;;  %v11214_v30 = vld [vmem:[#allocation130_spill] sm:$0xff] }
 0x4d4   : > { %4659 = vrot.lane.b32.xlu1 %v9849_v35, %s6090_s10  ;;  %v4419_v35 = vpop.permute.xlu2 %4418 }
 0x4d7   : > { %4653 = vrot.lane.b32.xlu0 %v9773_v11, %s6090_s10  ;;  %v4496_v11 = vmul.f32 %v4419_v35, %v9657_v23  ;;  %v5833_v13 = vpop.eup %5832 }
 0x4d8   : > { %v5835_v46 = vpop.eup %5834  ;;  %v4306_v4 = vmul.f32 %v5833_v13, %v10097_v20  ;;  %vm4311_vm9 = vweird.f32 %v5833_v13 }
 0x4d9   : > { %v4579_v49 = vrot.slane %v4496_v11, 6  ;;  %vm4326_vm12 = vweird.f32 %v5835_v46  ;;  %vm4312_vm14 = vmor %vm4310_vm13, %vm4311_vm9 }
 0x4da   : > { %4673 = vrot.lane.b32.xlu2 %v10009_v1, %s6090_s10  ;;  %v10115_v1 = vadd.f32 1e-06, %v10107_v50  ;;  %v4307_v0 = vsub.f32 1.0, %v4306_v4  ;;  %vm4327_vm0 = vmor %vm4325_vm15, %vm4326_vm12 }
 0x4dc   : > { %4647 = vrot.lane.b32.xlu1 %v9670_v55, %s6090_s10  ;;  %v11213_v55 = vld [vmem:[#allocation115_spill] sm:$0xff]  ;;  %5836 = vrcp.f32 %v10115_v1  ;;  %v4308_v48 = vmul.f32 %v5833_v13, %v4307_v0  ;;  %vm4340_vm9 = vweird.f32 %v10115_v1 }
 0x4dd   : > { %v4415_v61 = vpop.permute.xlu0 %4414 }
 0x4de   : > { %v4494_v45 = vmul.f32 %v4415_v61, %v11213_v55  ;;  %v4309_v35 = vadd.f32 %v5833_v13, %v4308_v48 }
 0x4df   : > { %4633 = vrot.lane.b32.xlu0 %v11212_v19, %s6090_s10 }
 0x4e2   : > { %v4417_v54 = vpop.permute.xlu1 %4416  ;;  %4661 = vrot.lane.b32.xlu2 %v9866_v51, %s6090_s10  ;;  %v4321_v51 = vmul.f32 %v5835_v46, %v10100_v25  ;;  %v5837_v39 = vpop.eup %5836 }
 0x4e3   : > { %v4495_v22 = vmul.f32 %v4417_v54, %v9654_v43  ;;  %v4336_v41 = vmul.f32 %v5837_v39, %v10115_v1  ;;  %vm4341_vm6 = vweird.f32 %v5837_v39 }
 0x4e4   : > { %4675 = vrot.lane.b32.xlu1 %v10027_v52, %s6090_s10  ;;  %v4322_v52 = vsub.f32 1.0, %v4321_v51  ;;  %v4425_v36 = vpop.permute.xlu2 %4424  ;;  %vm4342_vm12 = vmor %vm4340_vm9, %vm4341_vm6 }
 0x4e5   : > { %v4577_v62 = vrot.slane %v4495_v22, 7  ;;  %v4499_v60 = vmul.f32 %v4425_v36, %v9779_v16  ;;  %v4337_v11 = vsub.f32 1.0, %v4336_v41  ;;  %v4314_v22 = vand.u32 2147483647, %v10097_v20 }
 0x4e7   : > { %v4578_v21 = vsel %vm4543_vm5, %v4577_v62, %v4494_v45  ;;  %4669 = vrot.lane.b32.xlu0 %v9988_v56, %s6090_s10  ;;  %v4323_v56 = vmul.f32 %v5835_v46, %v4322_v52  ;;  %v4585_v54 = vrot.slane %v4499_v60, 3  ;;  %v4329_v62 = vand.u32 2147483647, %v10100_v25 }
 0x4e8   : > { %v4580_v17 = vsel %vm4546_vm8, %v4579_v49, %v4578_v21  ;;  %v4338_v49 = vmul.f32 %v5837_v39, %v4337_v11  ;;  %vm4315_vm1 = vcmp.eq.f32.partialorder %v4314_v22, 8.507059e+37 }
 0x4e9   : > { %v4324_v61 = vadd.f32 %v5835_v46, %v4323_v56  ;;  %vm4330_vm2 = vcmp.eq.f32.partialorder %v4329_v62, 8.507059e+37 }
 0x4ea   : > { %4635 = vrot.lane.b32.xlu2 %v11214_v30, %s6090_s10  ;;  %v4339_v0 = vadd.f32 %v5837_v39, %v4338_v49 }
 0x4eb   : > { %v4328_v4 = vsel %vm4327_vm0, %v5835_v46, %v4324_v61 }
 0x4ec   : > { %4663 = vrot.lane.b32.xlu1 %v9907_v12, %s6090_s10  ;;  %v4343_v46 = vsel %vm4342_vm12, %v5837_v39, %v4339_v0  ;;  %v11217_v0 = vld [vmem:[#allocation69_spill] sm:$0xff] }
 0x4ef   : > { %4649 = vrot.lane.b32.xlu0 %v9704_v58, %s6090_s10  ;;  %v4316_v58 = vand.u32 2147483648, %v10097_v20 }
 0x4f0   : > { %v4421_v5 = vpop.permute.xlu0 %4420 }
 0x4f1   : > { %v4497_v32 = vmul.f32 %v4421_v5, %v9727_v57 }
 0x4f2   : > { %4677 = vrot.lane.b32.xlu2 %v10038_v14, %s6090_s10  ;;  %v4331_v14 = vand.u32 2147483648, %v10100_v25  ;;  %v4346_v25 = vand.u32 2147483648, %v10115_v1 }
 0x4f3   : > { %v4581_v44 = vrot.slane %v4497_v32, 5  ;;  %v4423_v34 = vpop.permute.xlu1 %4422 }
 0x4f4   : > { %v4498_v15 = vmul.f32 %v4423_v34, %v9729_v38  ;;  %4665 = vrot.lane.b32.xlu1 %v9938_v42, %s6090_s10  ;;  %v4313_v42 = vsel %vm4312_vm14, %v5833_v13, %v4309_v35  ;;  %v4332_v20 = vor.u32 1.1754944e-38, %v4331_v14  ;;  %v4347_v52 = vor.u32 1.1754944e-38, %v4346_v25 }
 0x4f5   : > { %v4582_v12 = vsel %vm4549_vm10, %v4581_v44, %v4580_v17  ;;  %v4317_v17 = vor.u32 1.1754944e-38, %v4316_v58  ;;  %vm4561_vm14 = vcmask 1047559  }
 0x4f6   : > { %v4583_v19 = vrot.slane %v4498_v15, 4  ;;  %v4333_v30 = vsel %vm4330_vm2, %v4332_v20, %v4328_v4  ;;  %v4431_v13 = vpop.permute.xlu2 %4430 }
 0x4f7   : > { %4651 = vrot.lane.b32.xlu0 %v9746_v26, %s6090_s10  ;;  %v4318_v51 = vsel %vm4315_vm1, %v4317_v17, %v4313_v42  ;;  %v4344_v26 = vand.u32 2147483647, %v10115_v1  ;;  %v4502_v44 = vmul.f32 %v4431_v13, %v9852_v29 }
 0x4f8   : > { %v4584_v45 = vsel %vm4552_vm11, %v4583_v19, %v4582_v12  ;;  %v11215_v19 = vld [vmem:[#allocation78_spill] sm:$0xff] }
 0x4f9   : > { %v4586_v21 = vsel %vm4555_vm4, %v4585_v54, %v4584_v45  ;;  %vm4345_vm13 = vcmp.eq.f32.partialorder %v4344_v26, 8.507059e+37 }
 0x4fa   : > { %4679 = vrot.lane.b32.xlu2 %v4318_v51, %s6090_s10  ;;  %v4348_v32 = vsel %vm4345_vm13, %v4347_v52, %v4343_v46  ;;  %v11218_v46 = vld [vmem:[#allocation108_spill] sm:$0xff] }
 0x4fb   : > { %v4485_v52 = vmul.f32 %v10036_v18, %v11218_v46 }
 0x4fc   : > { %4681 = vrot.lane.b32.xlu1 %v4333_v30, %s6090_s10 }
 0x4ff   : > { %4667 = vrot.lane.b32.xlu0 %v9958_v24, %s6090_s10 }
 0x502   : > { %v4427_v36 = vpop.permute.xlu0 %4426  ;;  %4683 = vrot.lane.b32.xlu2 %v4348_v32, %s6090_s10 }
 0x503   : > { %v4500_v5 = vmul.f32 %v4427_v36, %v9820_v31 }
 0x504   : > { %4442 = vrot.lane.b32.xlu1 %v4333_v30, %s6089_s21  ;;  %v4437_v1 = vpop.permute.xlu2 %4436  ;;  %v11216_v30 = vld [vmem:[#allocation83_spill] sm:$0xff] }
 0x505   : > { %v4587_v48 = vrot.slane %v4500_v5, 2  ;;  %v4505_v12 = vmul.f32 %v4437_v1, %v9948_v59  ;;  %v4484_v25 = vmul.f32 %v11217_v0, %v11216_v30 }
 0x506   : > { %v10169_v39 = vpop.permute.xlu1 %4428 }
 0x507   : > { %v10165_v41 = vsel %vm4558_vm7, %v4587_v48, %v4586_v21  ;;  %4440 = vrot.lane.b32.xlu0 %v4318_v51, %s6089_s21  ;;  %v4595_v54 = vrot.slane %v4505_v12, 5  ;;  %v4557_v36 = vrot.slane %v4484_v25, 2  ;;  %v4560_v48 = vrot.slane %v4485_v52, 1 }
 0x50a   : > { %4444 = vrot.lane.b32.xlu2 %v4348_v32, %s6089_s21  ;;  %v4559_v32 = vsel %vm4558_vm7, %v4557_v36, %v10023_v2 }
 0x50c   : > { %v4626_v24 = vpop.permute.xlu2 %4625 }
 0x50d   : > { %v4719_v2 = vmul.f32 %v4626_v24, %v11205_v27 }
 0x50f   : > { %v4783_v0 = vrot.slane %v4719_v2, 6 }
 0x513   : > { %v4433_v56 = vpop.permute.xlu0 %4432 }
 0x514   : > { %v4503_v60 = vmul.f32 %v4433_v56, %v9900_v8  ;;  %v4628_v15 = vpop.permute.xlu2 %4627  ;;  %v10195_v56 = vsel %vm4561_vm14, %v4560_v48, %v4559_v32  ;;  %v11222_v32 = vld [vmem:[#allocation95_spill] sm:$0xff] }
 0x516   : > { %v4591_v34 = vrot.slane %v4503_v60, 7  ;;  %v4435_v35 = vpop.permute.xlu1 %4434 }
 0x517   : > { %v4504_v58 = vmul.f32 %v4435_v35, %v11215_v19 }
 0x518   : > { %v4592_v11 = vsel %vm4543_vm5, %v4591_v34, %v4502_v44 }
 0x519   : > { %v4593_v61 = vrot.slane %v4504_v58, 6 }
 0x51b   : > { %v4594_v22 = vsel %vm4546_vm8, %v4593_v61, %v4592_v11  ;;  %v11219_v11 = vld [vmem:[#allocation128_spill] sm:$0xff] }
 0x51c   : > { %v4596_v14 = vsel %vm4549_vm10, %v4595_v54, %v4594_v22  ;;  %v4630_v45 = vpop.permute.xlu2 %4629  ;;  %v11220_v61 = vld [vmem:[#allocation124_spill] sm:$0xff] }
 0x51d   : > { %v4721_v48 = vmul.f32 %v4630_v45, %v11222_v32 }
 0x51e   : > { %v4624_v62 = vpop.permute.xlu1 %4623 }
 0x51f   : > { %v4718_v58 = vmul.f32 %v4624_v62, %v11219_v11 }
 0x521   : > { %v4439_v42 = vpop.permute.xlu0 %4438  ;;  %v4781_v22 = vrot.slane %v4718_v58, 7  ;;  %v4787_v58 = vrot.slane %v4721_v48, 4  ;;  %v11225_v48 = vld [vmem:[#allocation121_spill] sm:$0xff] }
 0x522   : > { %v4506_v49 = vmul.f32 %v4439_v42, %v9973_v7  ;;  %v11221_v42 = vld [vmem:[#allocation21_spill] sm:$0xff] }
 0x524   : > { %v4597_v21 = vrot.slane %v4506_v49, 4  ;;  %v10179_v17 = vpop.permute.xlu2 %4657  ;;  %v4720_v49 = vmul.f32 %v4628_v15, %v11221_v42 }
 0x526   : > { %v4622_v4 = vpop.permute.xlu1 %4621  ;;  %v10182_v20 = vsel %vm4552_vm11, %v4597_v21, %v4596_v14  ;;  %v4785_v11 = vrot.slane %v4720_v49, 5  ;;  %v11224_v49 = vld [vmem:[#allocation110_spill] sm:$0xff] }
 0x527   : > { %v4717_v54 = vmul.f32 %v4622_v4, %v11220_v61 }
 0x529   : > { %v4640_v51 = vpop.permute.xlu0 %4639  ;;  %v4782_v21 = vsel %vm4543_vm5, %v4781_v22, %v4717_v54  ;;  %v11223_v54 = vld [vmem:[#allocation26_spill] sm:$0xff] }
 0x52a   : > { %v4784_v62 = vsel %vm4546_vm8, %v4783_v0, %v4782_v21  ;;  %v4493_v2 = vmul.f32 %v10088_v33, %v11223_v54  ;;  %v4501_v21 = vmul.f32 %v10169_v39, %v11224_v49 }
 0x52b   : > { %v4786_v4 = vsel %vm4549_vm10, %v4785_v11, %v4784_v62  ;;  %v4726_v62 = vmul.f32 %v4640_v51, %v11225_v48 }
 0x52c   : > { %v10188_v26 = vpop.permute.xlu2 %4645  ;;  %v4589_v32 = vrot.slane %v4501_v21, 1 }
 0x52e   : > { %v10186_v13 = vpop.permute.xlu1 %4655  ;;  %v10229_v39 = vsel %vm4561_vm14, %v4589_v32, %v10165_v41 }
 0x531   : > { %v4642_v5 = vpop.permute.xlu0 %4641 }
 0x534   : > { %v4674_v60 = vpop.permute.xlu2 %4673 }
 0x536   : > { %v4644_v1 = vpop.permute.xlu1 %4643 }
 0x537   : > { %v4728_v51 = vmul.f32 %v4644_v1, %v11208_v40 }
 0x539   : > { %v4638_v44 = vpop.permute.xlu0 %4637 }
 0x53c   : > { %v10197_v35 = vpop.permute.xlu2 %4661 }
 0x53e   : > { %v4632_v34 = vpop.permute.xlu1 %4631 }
 0x53f   : > { %v4722_v52 = vmul.f32 %v4632_v34, %v11206_v6  ;;  %v4788_v6 = vsel %vm4552_vm11, %v4787_v58, %v4786_v4  ;;  %v4725_v4 = vmul.f32 %v4638_v44, %v9344_v63  ;;  %v4734_v63 = vmul.f32 %v10186_v13, %v9654_v43 }
 0x540   : > { %v4799_v13 = vrot.slane %v4728_v51, 5 }
 0x541   : > { %v4672_v12 = vpop.permute.xlu0 %4671  ;;  %v4789_v61 = vrot.slane %v4722_v52, 3 }
 0x543   : > { %v4790_v45 = vsel %vm4555_vm4, %v4789_v61, %v4788_v6  ;;  %v4727_v61 = vmul.f32 %v4642_v5, %v9418_v10  ;;  %v4729_v10 = vmul.f32 %v10188_v26, %v9465_v9 }
 0x544   : > { %v4636_v25 = vpop.permute.xlu2 %4635 }
 0x545   : > { %v4724_v27 = vmul.f32 %v4636_v25, %v11218_v46  ;;  %v4575_v25 = vrot.slane %v4493_v2, 1  ;;  %v4743_v2 = vmul.f32 %v4674_v60, %v11215_v19  ;;  %v4797_v41 = vrot.slane %v4727_v61, 6 }
 0x546   : > { %v10200_v18 = vpop.permute.xlu1 %4659  ;;  %v4735_v60 = vmul.f32 %v10179_v17, %v9657_v23 }
 0x547   : > { %v4793_v22 = vrot.slane %v4724_v27, 1  ;;  %v10223_v33 = vsel %vm4561_vm14, %v4575_v25, %v10082_v37  ;;  %v4742_v27 = vmul.f32 %v4672_v12, %v9900_v8  ;;  %v4825_v43 = vrot.slane %v4743_v2, 6 }
 0x548   : > { %v4736_v23 = vmul.f32 %v10200_v18, %v9727_v57 }
 0x549   : > { %v4654_v14 = vpop.permute.xlu0 %4653  ;;  %v4823_v44 = vrot.slane %v4742_v27, 7 }
 0x54a   : > { %v4733_v12 = vmul.f32 %v4654_v14, %v11213_v55  ;;  %v4737_v14 = vmul.f32 %v10197_v35, %v9729_v38  ;;  %v4813_v48 = vrot.slane %v4736_v23, 5 }
 0x54c   : > { %v4678_v0 = vpop.permute.xlu2 %4677 }
 0x54e   : > { %v4648_v36 = vpop.permute.xlu1 %4647 }
 0x54f   : > { %v4730_v8 = vmul.f32 %v4648_v36, %v9537_v53  ;;  %v4745_v53 = vmul.f32 %v4678_v0, %v9973_v7  ;;  %v4801_v36 = vrot.slane %v4729_v10, 4 }
 0x551   : > { %v4634_v24 = vpop.permute.xlu0 %4633  ;;  %v4803_v26 = vrot.slane %v4730_v8, 3  ;;  %v4829_v25 = vrot.slane %v4745_v53, 4 }
 0x552   : > { %v4723_v15 = vmul.f32 %v4634_v24, %v11216_v30  ;;  %v4795_v24 = vrot.slane %v4726_v62, 7 }
 0x554   : > { %v4791_v34 = vrot.slane %v4723_v15, 2  ;;  %v4680_v58 = vpop.permute.xlu2 %4679  ;;  %v4796_v6 = vsel %vm4543_vm5, %v4795_v24, %v4725_v4 }
 0x555   : > { %v4798_v5 = vsel %vm4546_vm8, %v4797_v41, %v4796_v6  ;;  %v4746_v0 = vmul.f32 %v4680_v58, %v10090_v28  ;;  %v4815_v58 = vrot.slane %v4737_v14, 4 }
 0x556   : > { %v4676_v42 = vpop.permute.xlu1 %4675  ;;  %v4792_v46 = vsel %vm4558_vm7, %v4791_v34, %v4790_v45  ;;  %v4809_v34 = vrot.slane %v4734_v63, 7  ;;  %v4800_v9 = vsel %vm4549_vm10, %v4799_v13, %v4798_v5 }
 0x557   : > { %v4794_v52 = vsel %vm4561_vm14, %v4793_v22, %v4792_v46  ;;  %v4802_v7 = vsel %vm4552_vm11, %v4801_v36, %v4800_v9  ;;  %v4831_v27 = vrot.slane %v4746_v0, 3 }
 0x558   : > { %4837 = vrot.lane.b32.xlu0 %v4794_v52, %s6088_s30  ;;  %v4810_v17 = vsel %vm4543_vm5, %v4809_v34, %v4733_v12  ;;  %v4804_v52 = vsel %vm4555_vm4, %v4803_v26, %v4802_v7  ;;  %v5516_v7 = vld [vmem:[#allocation10] ss:$0 sm:$0xff] }
 0x559   : > { %v4670_v30 = vpop.permute.xlu0 %4669 }
 0x55a   : > { %v4741_v15 = vmul.f32 %v4670_v30, %v9852_v29  ;;  %v4744_v29 = vmul.f32 %v4676_v42, %v9948_v59  ;;  %v4811_v42 = vrot.slane %v4735_v60, 6 }
 0x55c   : > { %v4824_v19 = vsel %vm4543_vm5, %v4823_v44, %v4741_v15  ;;  %v4827_v45 = vrot.slane %v4744_v29, 5  ;;  %v4684_v21 = vpop.permute.xlu2 %4683  ;;  %v4812_v18 = vsel %vm4546_vm8, %v4811_v42, %v4810_v17  ;;  %v11228_v17 = vld [vmem:[#allocation34_spill] sm:$0xff] }
 0x55d   : > { %v4826_v59 = vsel %vm4546_vm8, %v4825_v43, %v4824_v19  ;;  %v4748_v32 = vmul.f32 %v4684_v21, %v10107_v50 }
 0x55e   : > { %v4664_v11 = vpop.permute.xlu1 %4663  ;;  %v4828_v46 = vsel %vm4549_vm10, %v4827_v45, %v4826_v59  ;;  %v10305_v45 = vld [vmem:[%s6281_s22 + $0x8] sm:$0xff]  }
 0x55f   : > { %v4738_v30 = vmul.f32 %v4664_v11, %v9779_v16  ;;  %v4830_v4 = vsel %vm4552_vm11, %v4829_v25, %v4828_v46  ;;  %v4814_v16 = vsel %vm4549_vm10, %v4813_v48, %v4812_v18  ;;  %v4835_v15 = vrot.slane %v4748_v32, 1  ;;  %v11229_v25 = vld [vmem:[#allocation41_spill] sm:$0xff] }
 0x560   : > { %v4816_v63 = vsel %vm4552_vm11, %v4815_v58, %v4814_v16 }
 0x561   : > { %v4650_v37 = vpop.permute.xlu0 %4649  ;;  %v4817_v11 = vrot.slane %v4738_v30, 3 }
 0x562   : > { %v4731_v40 = vmul.f32 %v4650_v37, %v9539_v3 }
 0x563   : > { %v4818_v44 = vsel %vm4555_vm4, %v4817_v11, %v4816_v63 }
 0x564   : > { %v4805_v22 = vrot.slane %v4731_v40, 2  ;;  %v4445_v19 = vpop.permute.xlu2 %4444 }
 0x566   : > { %v4666_v1 = vpop.permute.xlu1 %4665 }
 0x567   : > { %v4739_v38 = vmul.f32 %v4666_v1, %v9820_v31  ;;  %v4832_v31 = vsel %vm4555_vm4, %v4831_v27, %v4830_v4  ;;  %v4509_v1 = vmul.f32 %v4445_v19, %v10107_v50  ;;  %v11226_v50 = vld [vmem:[#allocation32_spill] sm:$0xff] }
 0x569   : > { %v4652_v3 = vpop.permute.xlu0 %4651  ;;  %v4819_v37 = vrot.slane %v4739_v38, 2  ;;  %v4603_v12 = vrot.slane %v4509_v1, 1 }
 0x56a   : > { %v4732_v55 = vmul.f32 %v4652_v3, %v11223_v54  ;;  %v4806_v54 = vsel %vm4558_vm7, %v4805_v22, %v4804_v52  ;;  %v4857_v22 = vunpack.c.l.bf16 %v10305_v45 }
 0x56b   : > { %v4820_v8 = vsel %vm4558_vm7, %v4819_v37, %v4818_v44 }
 0x56c   : > { %v4807_v57 = vrot.slane %v4732_v55, 1 }
 0x56e   : > { %v4682_v35 = vpop.permute.xlu1 %4681  ;;  %v4808_v61 = vsel %vm4561_vm14, %v4807_v57, %v4806_v54 }
 0x56f   : > { %v4747_v62 = vmul.f32 %v4682_v35, %v10092_v47  ;;  %4839 = vrot.lane.b32.xlu1 %v4808_v61, %s6088_s30 }
 0x571   : > { %v4833_v24 = vrot.slane %v4747_v62, 2  ;;  %v4668_v2 = vpop.permute.xlu0 %4667 }
 0x572   : > { %v4740_v6 = vmul.f32 %v4668_v2, %v11224_v49 }
 0x573   : > { %v4834_v51 = vsel %vm4558_vm7, %v4833_v24, %v4832_v31 }
 0x574   : > { %v4836_v41 = vsel %vm4561_vm14, %v4835_v15, %v4834_v51  ;;  %v4821_v10 = vrot.slane %v4740_v6, 1 }
 0x575   : > { %4843 = vrot.lane.b32.xlu0 %v4836_v41, %s6088_s30 }
 0x576   : > { %v4443_v5 = vpop.permute.xlu1 %4442  ;;  %v4822_v29 = vsel %vm4561_vm14, %v4821_v10, %v4820_v8 }
 0x577   : > { %4605 = vrot.lane.b32.xlu1 %v10195_v56, %s6088_s30  ;;  %4841 = vrot.lane.b32.xlu2 %v4822_v29, %s6088_s30  ;;  %v4508_v49 = vmul.f32 %v4443_v5, %v10092_v47 }
 0x579   : > { %v4441_v40 = vpop.permute.xlu0 %4440  ;;  %v4601_v13 = vrot.slane %v4508_v49, 2 }
 0x57a   : > { %v4507_v60 = vmul.f32 %v4441_v40, %v10090_v28 }
 0x57c   : > { %v4599_v43 = vrot.slane %v4507_v60, 3 }
 0x57d   : > { %4609 = vrot.lane.b32.xlu0 %v10229_v39, %s6088_s30  ;;  %v10298_v39 = vld [vmem:[%s6281_s22] sm:$0xff]   ;;  %s6016_s22 = scalar_lea.hbm %s6015_s18, 512 }
 0x57e   : > { %v4600_v56 = vsel %vm4555_vm4, %v4599_v43, %v10182_v20  ;;  %v4855_v53 = vunpack.c.l.bf16 %v10298_v39  ;;  %v11227_v20 = vld [vmem:[#allocation36_spill] sm:$0xff]  ;;  %p6017_p1 = scmp.ne.s32.totalorder %s6015_s18, %s6016_s22  ;;  %p6022_p10 = scmp.lt.s32.totalorder %s6020_s15, %s6016_s22 }
 0x57f   : > { %4607 = vrot.lane.b32.xlu2 %v10223_v33, %s6088_s30  ;;  %v4602_v47 = vsel %vm4558_vm7, %v4601_v13, %v4600_v56 }
 0x580   : > { %v4604_v34 = vsel %vm4561_vm14, %v4603_v12, %v4602_v47  ;;  %p6018_p4 = pnand %p6017_p1, %p6219_p7  ;;  %p6023_p11 = por %p6022_p10, %p6021_p2 }
 0x581   : > { %4611 = vrot.lane.b32.xlu1 %v4604_v34, %s6088_s30 }
 0x582   : > { %p6019_p8 = pneg %p6018_p4 }
 0x584   : > { %p6024_p9 = pnand %p6023_p11, %p6019_p8 }
 0x5ca   : > { %v4838_v28 = vpop.permute.xlu0 %4837 }
 0x5cb   : > { %v4849_v9 = vadd.f32 %v4838_v28, %v11226_v50 }
 0x5cd   : > { %5838 = vtanh.f32 %v4849_v9 }
 0x5d1   : > { %v4842_v26 = vpop.permute.xlu2 %4841 }
 0x5d2   : > { %v4851_v59 = vadd.f32 %v4842_v26, %v11227_v20 }
 0x5d3   : > { %v5839_v33 = vpop.eup %5838 }
 0x5d4   : > { %5840 = vtanh.f32 %v4851_v59  ;;  %v4889_v36 = vadd.f32 %v5839_v33, %v4855_v53 }
 0x5d6   : > { %4897 = vrot.lane.b32.xlu2 %v4889_v36, %s6088_s30 }
 0x5d9   : > { %v4608_v23 = vpop.permute.xlu2 %4607 }
 0x5da   : > { %v5841_v3 = vpop.eup %5840  ;;  %v4618_v21 = vadd.f32 %v4608_v23, %v11228_v17 }
 0x5db   : > { %v4891_v42 = vadd.f32 %v5841_v3, %v4857_v22 }
 0x5dc   : > { %v4860_v0 = vmul.f32 0.999995, %v4618_v21 }
 0x5dd   : > { %4901 = vrot.lane.b32.xlu1 %v4891_v42, %s6088_s30 }
 0x5e1   : > { %v4840_v55 = vpop.permute.xlu1 %4839 }
 0x5e2   : > { %v4850_v14 = vadd.f32 %v4840_v55, %v11228_v17 }
 0x5e4   : > { %5842 = vtanh.f32 %v4850_v14 }
 0x5e7   : > { %v4844_v46 = vpop.permute.xlu0 %4843 }
 0x5e8   : > { %v4852_v52 = vadd.f32 %v4844_v46, %v11229_v25 }
 0x5e9   : > { %6027 = shalt.err (!%p6024_p9)
}
 0x5ea   : > { %s6091_s23 = smov 128   ;;  %s6092_s10 = smov 8   ;;  %v4856_v30 = vunpack.c.h.bf16 %v10298_v39  ;;  %v5517_v57 = vld [vmem:[#allocation10 + $0x1] ss:$0 sm:$0xff]  ;;  %v4865_v18 = vmul.f32 %v5516_v7, %v4860_v0  ;;  %5844 = vtanh.f32 %v4852_v52  ;;  %v4606_v32 = vpop.permute.xlu1 %4605  ;;  %v5843_v54 = vpop.eup %5842  ;;  %v4858_v62 = vunpack.c.h.bf16 %v10305_v45 }
 0x5eb   : > { %5438 = dma.vmem_to_hbm [thread:$0]  (%p6219_p7), %s4946_s29, 8192, %s4948_s17, %s4924_s16, %s6091_s23, %s6091_s23, %s6092_s10   ;;  %v4617_v38 = vadd.f32 %v4606_v32, %v11226_v50 }
 0x5ec   : > { %p407_p12 = scmp.lt.s32.totalorder %s5142_s9, 7  ;;  %v4890_v35 = vadd.f32 %v5843_v54, %v4856_v30  ;;  %v4870_v4 = vadd.f32 %v5517_v57, %v4865_v18 }
 0x5ed   : > { %v4859_v48 = vmul.f32 0.999995, %v4617_v38 }
 0x5ee   : > { %s11238_s9 = smov (!%p407_p12, %s5142_s9), 7  ;;  %4899 = vrot.lane.b32.xlu0 %v4890_v35, %s6088_s30  ;;  %v4874_v15 = vmax.f32 %v4870_v4, 0.0 }
 0x5ef   : > { %v4864_v61 = vmul.f32 %v5516_v7, %v4859_v48  ;;  %v4610_v27 = vpop.permute.xlu0 %4609  ;;  %s5143_s20 = sshll.u32 %s11238_s9, 3 }
 0x5f0   : > { %v5845_v16 = vpop.eup %5844  ;;  %v4619_v11 = vadd.f32 %v4610_v27, %v11227_v20  ;;  %s410_s4 = scalar_lea.vmem %s10387_s5, %s5143_s20  ;;  %v4878_v41 = vadd.f32 %v4874_v15, %v4856_v30  ;;  %s416_s11 = scalar_lea.vmem %s10388_s6, %s5143_s20 }
 0x5f1   : > { %v4869_v24 = vadd.f32 %v5517_v57, %v4864_v61  ;;  %v4892_v58 = vadd.f32 %v5845_v16, %v4858_v62 }
 0x5f2   : > { %v4861_v37 = vmul.f32 0.999995, %v4619_v11  ;;  %4882 = vst.msk [vmem:[%s410_s4 + $0x8] sm:$0xff] %vm2063_vm3, %v4878_v41 }
 0x5f3   : > { %v4873_v31 = vmax.f32 %v4869_v24, 0.0  ;;  %4903 = vrot.lane.b32.xlu2 %v4892_v58, %s6088_s30  ;;  %v4612_v51 = vpop.permute.xlu1 %4611 }
 0x5f4   : > { %v4866_v2 = vmul.f32 %v5516_v7, %v4861_v37  ;;  %v4620_v63 = vadd.f32 %v4612_v51, %v11229_v25 }
 0x5f5   : > { %v4877_v6 = vadd.f32 %v4873_v31, %v4855_v53 }
 0x5f6   : > { %v4871_v44 = vadd.f32 %v5517_v57, %v4866_v2  ;;  %v4862_v10 = vmul.f32 0.999995, %v4620_v63 }
 0x5f7   : > { %4881 = vst.msk [vmem:[%s410_s4] sm:$0xff] %vm2063_vm3, %v4877_v6 }
 0x5f8   : > { %v4875_v8 = vmax.f32 %v4871_v44, 0.0  ;;  %v4867_v5 = vmul.f32 %v5516_v7, %v4862_v10 }
 0x5fa   : > { %v4879_v29 = vadd.f32 %v4875_v8, %v4857_v22  ;;  %v4872_v19 = vadd.f32 %v5517_v57, %v4867_v5 }
 0x5fc   : > { %4883 = vst.msk [vmem:[%s410_s4 + $0x10] sm:$0xff] %vm2063_vm3, %v4879_v29  ;;  %v4876_v49 = vmax.f32 %v4872_v19, 0.0 }
 0x5fe   : > { %v4880_v40 = vadd.f32 %v4876_v49, %v4858_v62 }
 0x600   : > { %4884 = vst.msk [vmem:[%s410_s4 + $0x18] sm:$0xff] %vm2063_vm3, %v4880_v40 }
 0x630   : > { %v4898_v1 = vpop.permute.xlu2 %4897 }
 0x631   : > { %4909 = vst.msk [vmem:[%s416_s11] sm:$0xff] %vm2063_vm3, %v4898_v1 }
 0x64d   : > { %v4904_v13 = vpop.permute.xlu2 %4903 }
 0x64e   : > { %4912 = vst.msk [vmem:[%s416_s11 + $0x18] sm:$0xff] %vm2063_vm3, %v4904_v13 }
 0x64f   : > { %v4902_v43 = vpop.permute.xlu1 %4901 }
 0x650   : > { %4911 = vst.msk [vmem:[%s416_s11 + $0x10] sm:$0xff] %vm2063_vm3, %v4902_v43 }
 0x660   : > { %v4900_v60 = vpop.permute.xlu0 %4899 }
 0x661   : > { %4910 = vst.msk [vmem:[%s416_s11 + $0x8] sm:$0xff] %vm2063_vm3, %v4900_v60 }
 0x662 PF: > { %s4978_s2 = sand.u32 1, %s6066_s24   ;;  %p11230_p7 = scmp.ge.s32.totalorder %s6078_s27, 2 }
 0x663   : > { %s4979_s13 = scalar_lea.sflag [#allocation4], %s4978_s2 }
 0x664   : > { %p5458_p13 = pnand %p11230_p7, %p6168_p6 }
 0x666   : > { %p5459_p0 = pneg %p5458_p13 }
 0x668   : > { %6061 = dma.done.wait (%p5459_p0), %s4979_s13, 8192  }
 0x669   : > { %6063 = vsyncadd (%p5459_p0), %s4979_s13, 4294959104  ;;  %s11231_s27 = sld [smem:[#allocation18_spill]]  ;;  %s11234_s24 = smov %s6070_s25 }
 0x66a   : > { %s11232_s26 = sld [smem:[#allocation17_spill]] }
 0x66b   : > { %s11233_s29 = sld [smem:[#allocation19_spill]] }
 0x66f   : > { %p25_p3 = scmp.ge.s32.totalorder %s11231_s27, 4  }
 0x670   : > { %s11235_s25 = smov %s11232_s26 }
 0x671   : > { %s11236_s26 = smov %s11233_s29  ;;  %27 = sbr.rel (!%p25_p3) target bundleno = 12 (0xc), region = 134 }
 0x676   :  { %4985 = vsyncpa [#allocation3], 1 }
 0x677   :  { %4987 = vsyncpa [#allocation3 + $0x1], 1 }
 0x678   :  { %4988 = vsyncpa [#allocation6], 1 }
 0x679   :  { %4990 = vsyncpa [#allocation6 + $0x1], 1 }
 0x67a   :  { %4991 = vsyncpa [#allocation9], 1 }
 0x67b   :  { %4992 = vsyncpa [#allocation4], 1 }
 0x67c   :  { %4994 = vsyncpa [#allocation4 + $0x1], 1 }

</bundles_post_ra>
